<compile_context>
chip_gen: v5e
topology: v5e:2x2
jax: 0.10.0
libtpu: 0.0.40
codegen_flags: <defaults>
</compile_context>

<pallas_src>
import jax
import jax.numpy as jnp
import numpy as np
from jax.experimental import pallas as pl
from jax.experimental.pallas import tpu as pltpu


def inception_aux_kernel(x_ref, cw_ref, cb_ref, w1_ref, b1_ref, w2_ref, b2_ref, out_ref):
    """Fused 1x1-conv + AvgPool(5,3) + ReLU + fc1 + ReLU + fc2 for one batch tile.

    x_ref  : [196, TB, C]   bf16  spatial-major (row p = h*14 + w)
    cw_ref : [C, 128]       bf16  1x1 conv weight as matmul, 1/25 pre-folded
    cb_ref : [1, 128]       f32
    w1_ref : [2048, 1024]   bf16  fc1 weight, rows permuted to feature = s*128 + c
    b1_ref : [1, 1024]      f32
    w2_ref : [1024, N_pad]  bf16  (classes zero-padded to a multiple of 128)
    b2_ref : [1, N_pad]     f32
    out_ref: [TB, N_pad]    f32
    """
    P, TB, C = x_ref.shape                          # P == 196 (14*14)

    # 1x1 conv over ALL spatial positions (conv commutes with the avg pool because it
    # is linear). Each x element is read once; the cast work rides the MXU.
    # TB % 8 == 0 -> both reshapes below are sublane-tile aligned (no data movement).
    x2 = x_ref[...].reshape(P * TB, C)              # [196*TB, C] bf16
    y = jnp.dot(x2, cw_ref[...], preferred_element_type=jnp.float32)   # [196*TB, 128] f32
    y4 = y.reshape(14, 14, TB, 128)                 # [h, w, TB, 128] f32

    cb = cb_ref[...]                                # [1, 128] f32

    # Separable 5x5 / stride-3 window sums in f32 (1/25 divisor already folded into cw).
    wsum = [jnp.sum(y4[:, 3 * ow:3 * ow + 5], axis=1) for ow in range(4)]   # [14, TB, 128]
    blocks = []
    for oh in range(4):                             # feature order s = oh*4 + ow
        for ow in range(4):
            p = jnp.sum(wsum[ow][3 * oh:3 * oh + 5], axis=0)                # [TB, 128] f32
            # BasicConv2d bias + ReLU (bias after pooling == bias before, averaged).
            blocks.append(jnp.maximum(p + cb, 0.0).astype(jnp.bfloat16))

    # Feature order j = s*128 + c (w1 was permuted in the wrapper to match).
    h = jnp.concatenate(blocks, axis=-1)            # [TB, 2048] bf16

    # TODO(synk): dropout(0.5) before fc1/fc2 is identity here (eval mode only).
    h1 = jnp.dot(h, w1_ref[...], preferred_element_type=jnp.float32) + b1_ref[...]
    h1 = jnp.maximum(h1, 0.0).astype(jnp.bfloat16)  # [TB, 1024]

    out = jnp.dot(h1, w2_ref[...], preferred_element_type=jnp.float32) + b2_ref[...]
    out_ref[...] = out.astype(out_ref.dtype)        # [TB, N_pad]


def _round_up(n, m):
    return (n + m - 1) // m * m


def _vmem_capacity_bytes():
    """Physical VMEM per TensorCore (128 MiB on v5e/v6e, 64 MiB on v7x)."""
    try:
        return int(pltpu.get_tpu_info().vmem_capacity_bytes)
    except Exception:
        return 64 * 1024 * 1024   # conservative fallback (v7x per-core size)


def _pick_batch_tile(B, C, n_pad, vmem_limit):
    """Largest batch tile (multiple of 8) that keeps the kernel inside `vmem_limit`,
    capped so the grid has >= 2 steps when the batch allows it (v7x has 2 TCs and the
    "parallel" batch axis can only shard across them if there are >= 2 grid steps)."""
    # VMEM-resident weights/biases (constant index_map, single-buffered).
    resident = (C * 128 + 2048 * 1024 + 1024 * n_pad) * 2 + (128 + 1024 + n_pad) * 4
    # Per-batch-row VMEM inside the kernel (conservative: 3 x-tile copies covers the
    # two pipeline buffers plus headroom for any reshape/relayout copy).
    per_row = (3 * 196 * C * 2            # x tile: double-buffer + headroom (bf16)
               + 196 * 128 * 4            # f32 conv output (largest intermediate)
               + 4 * 14 * 128 * 4         # separable-pool partial sums (f32)
               + 2 * 2048 * 2 + 1024 * 2  # h / h1 activations (bf16)
               + 2 * n_pad * 4            # out tile, double-buffered (f32)
               + 1024 * 4)                # misc slack
    budget = vmem_limit - resident - (4 << 20)      # compiler scratch headroom
    tb = max(8, min(512, (budget // per_row) // 8 * 8))
    b8 = _round_up(B, 8)
    if b8 >= 16:                                    # keep >= 2 grid steps (megacore)
        tb = min(tb, _round_up(-(-b8 // 2), 8))
    return max(8, min(tb, b8))


def _const_spec(shape):
    """BlockSpec for a weight that is identical at every grid step: constant index_map
    keeps it VMEM-resident; single buffering avoids a duplicate resident copy."""
    index_map = lambda i: (0,) * len(shape)
    try:
        return pl.BlockSpec(shape, index_map, pipeline_mode=pl.Buffered(1))
    except Exception:   # older jax without pipeline_mode / Buffered
        return pl.BlockSpec(shape, index_map)


def inception_aux_forward(x_nchw, params, num_classes):
    """Wrapper: PyTorch-convention params + NCHW input -> Pallas kernel call.

    Call under jit so the layout ops on x fuse into one HBM pass. A producer that can
    emit spatial-major bf16 directly could skip the transpose/cast entirely.
    """
    B, C, H, W = x_nchw.shape
    assert H == 14 and W == 14, "fc1 (128*4*4) implies 14x14 spatial input"

    compute_dtype = jnp.bfloat16
    N_pad = _round_up(max(num_classes, 1), 128)
    vmem_limit = min(int(_vmem_capacity_bytes() * 0.75), 100 * 1024 * 1024)
    TB = _pick_batch_tile(B, C, N_pad, vmem_limit)
    B_pad = _round_up(B, TB)

    # x: NCHW -> spatial-major [196, B_pad, C] bf16. Spatial-major keeps the in-kernel
    # reshapes and pooling slices sublane-tile aligned (TB % 8 == 0).
    x = jnp.transpose(x_nchw, (2, 3, 0, 1)).reshape(H * W, B, C).astype(compute_dtype)
    if B_pad != B:
        x = jnp.pad(x, ((0, 0), (0, B_pad - B), (0, 0)))

    # 1x1 conv weight [128, C, 1, 1] -> matmul weight [C, 128]; fold the 1/25 avg-pool
    # divisor in so the kernel can use plain window sums.
    cw = (jnp.transpose(params["conv_w"].reshape(128, C), (1, 0)) * (1.0 / 25.0)
          ).astype(compute_dtype)
    cb = params["conv_b"].reshape(1, 128).astype(jnp.float32)

    # fc1 weight [1024, 2048]; PyTorch flatten order is feature k = c*16 + (h*4+w).
    # The kernel builds features as j = s*128 + c, so permute rows accordingly.
    w1 = jnp.transpose(params["fc1_w"], (1, 0))                            # row = c*16+s
    w1 = w1.reshape(128, 16, 1024).transpose(1, 0, 2).reshape(2048, 1024)  # row = s*128+c
    w1 = w1.astype(compute_dtype)
    b1 = params["fc1_b"].reshape(1, 1024).astype(jnp.float32)

    # fc2: pad the class dim to a lane-aligned multiple of 128 (sliced off afterwards).
    w2 = jnp.transpose(params["fc2_w"], (1, 0)).astype(compute_dtype)      # [1024, nc]
    b2 = params["fc2_b"].reshape(1, num_classes).astype(jnp.float32)
    if N_pad != num_classes:
        w2 = jnp.pad(w2, ((0, 0), (0, N_pad - num_classes)))
        b2 = jnp.pad(b2, ((0, 0), (0, N_pad - num_classes)))

    grid = (B_pad // TB,)
    out = pl.pallas_call(
        inception_aux_kernel,
        out_shape=jax.ShapeDtypeStruct((B_pad, N_pad), jnp.float32),
        grid_spec=pltpu.PrefetchScalarGridSpec(
            num_scalar_prefetch=0,
            grid=grid,
            in_specs=[
                # x: tiled over the batch grid (double-buffered DMA per step).
                pl.BlockSpec((H * W, TB, C), lambda i: (0, i, 0)),
                # Weights/biases: VMEM-resident, single-buffered.
                _const_spec((C, 128)),
                _const_spec((1, 128)),
                _const_spec((2048, 1024)),
                _const_spec((1, 1024)),
                _const_spec((1024, N_pad)),
                _const_spec((1, N_pad)),
            ],
            out_specs=pl.BlockSpec((TB, N_pad), lambda i: (i, 0)),
        ),
        compiler_params=pltpu.CompilerParams(
            dimension_semantics=("parallel",),        # megacore-shardable batch axis
            vmem_limit_bytes=vmem_limit,              # generation-aware (v5e default 16 MiB)
        ),
    )(x, cw, cb, w1, b1, w2, b2)

    return out[:B, :num_classes]


def reference_forward(x_nchw, params, num_classes):
    """Plain-JAX reference with exact PyTorch semantics (eval mode, f32)."""
    B, C, H, W = x_nchw.shape
    # AvgPool2d(kernel=5, stride=3): 14x14 -> 4x4
    pooled = jnp.stack(
        [jnp.stack(
            [jnp.mean(x_nchw[:, :, oh * 3:oh * 3 + 5, ow * 3:ow * 3 + 5], axis=(2, 3))
             for ow in range(4)], axis=-1)
         for oh in range(4)], axis=-2)                           # [B, C, 4, 4]
    # 1x1 conv + ReLU
    cw = params["conv_w"].reshape(128, C)
    y = jnp.einsum("bchw,oc->bohw", pooled, cw) + params["conv_b"][None, :, None, None]
    y = jnp.maximum(y, 0.0)                                      # [B, 128, 4, 4]
    flat = y.reshape(B, -1)                                      # [B, 2048] NCHW flatten
    h1 = jnp.maximum(flat @ params["fc1_w"].T + params["fc1_b"], 0.0)
    out = h1 @ params["fc2_w"].T + params["fc2_b"]
    return out


if __name__ == "__main__":
    B, C_in, num_classes = 2, 4, 10

    key = jax.random.PRNGKey(0)
    ks = jax.random.split(key, 7)
    params = {
        "conv_w": jax.random.normal(ks[0], (128, C_in, 1, 1), jnp.float32) * 0.05,
        "conv_b": jax.random.normal(ks[1], (128,), jnp.float32) * 0.05,
        "fc1_w": jax.random.normal(ks[2], (1024, 128 * 4 * 4), jnp.float32) * 0.02,
        "fc1_b": jax.random.normal(ks[3], (1024,), jnp.float32) * 0.02,
        "fc2_w": jax.random.normal(ks[4], (num_classes, 1024), jnp.float32) * 0.02,
        "fc2_b": jax.random.normal(ks[5], (num_classes,), jnp.float32) * 0.02,
    }
    x = jax.random.normal(ks[6], (B, C_in, 14, 14), jnp.float32)

    fwd = jax.jit(inception_aux_forward, static_argnums=(2,))
    out = jax.block_until_ready(fwd(x, params, num_classes))
    assert out.shape == (B, num_classes)

    ref = jax.block_until_ready(reference_forward(x, params, num_classes))
    # bf16 activations/weights with f32 accumulation -> slightly looser tolerance.
    np.testing.assert_allclose(np.asarray(out), np.asarray(ref), rtol=2e-2, atol=2e-3)

    print("KERNEL_OK")
</pallas_src>

<mosaic_0001>
module attributes {stable_mosaic.version = 11 : i64} {
  func.func @inception_aux_kernel(%arg0: i32, %arg1: memref<196x8x4xbf16, #tpu.memory_space<vmem>>, %arg2: memref<4x128xbf16, #tpu.memory_space<vmem>>, %arg3: memref<1x128xf32, #tpu.memory_space<vmem>>, %arg4: memref<2048x1024xbf16, #tpu.memory_space<vmem>>, %arg5: memref<1x1024xf32, #tpu.memory_space<vmem>>, %arg6: memref<1024x128xbf16, #tpu.memory_space<vmem>>, %arg7: memref<1x128xf32, #tpu.memory_space<vmem>>, %arg8: memref<8x128xf32, #tpu.memory_space<vmem>>) attributes {dimension_semantics = [#tpu.dimension_semantics<parallel>], iteration_bounds = array<i64: 1>, scalar_prefetch = 0 : i64, scratch_operands = 0 : i64, tpu.core_type = #tpu.core_type<tc>, window_params = [{transform_indices = @transform_0, window_bounds = array<i64: 196, 8, 4>}, {pipeline_mode = #tpu.pipeline_mode<synchronous>, transform_indices = @transform_1, window_bounds = array<i64: 4, 128>}, {pipeline_mode = #tpu.pipeline_mode<synchronous>, transform_indices = @transform_2, window_bounds = array<i64: 1, 128>}, {pipeline_mode = #tpu.pipeline_mode<synchronous>, transform_indices = @transform_3, window_bounds = array<i64: 2048, 1024>}, {pipeline_mode = #tpu.pipeline_mode<synchronous>, transform_indices = @transform_4, window_bounds = array<i64: 1, 1024>}, {pipeline_mode = #tpu.pipeline_mode<synchronous>, transform_indices = @transform_5, window_bounds = array<i64: 1024, 128>}, {pipeline_mode = #tpu.pipeline_mode<synchronous>, transform_indices = @transform_6, window_bounds = array<i64: 1, 128>}, {transform_indices = @transform_7, window_bounds = array<i64: 8, 128>}]} {
    %c0 = arith.constant 0 : index
    %c0_0 = arith.constant 0 : index
    %c0_1 = arith.constant 0 : index
    %0 = vector.load %arg1[%c0, %c0_0, %c0_1] : memref<196x8x4xbf16, #tpu.memory_space<vmem>>, vector<196x8x4xbf16>
    %1 = vector.shape_cast %0 : vector<196x8x4xbf16> to vector<1568x4xbf16>
    %c0_2 = arith.constant 0 : index
    %c0_3 = arith.constant 0 : index
    %2 = vector.load %arg2[%c0_2, %c0_3] : memref<4x128xbf16, #tpu.memory_space<vmem>>, vector<4x128xbf16>
    %cst = arith.constant dense<0.000000e+00> : vector<1568x128xf32>
    %3 = tpu.matmul %1, %2, %cst {dimension_numbers = #tpu.dot_dimension_numbers<[1], [0], [0], [1], [0, 0, 1, 1], [], []>} : vector<1568x4xbf16>, vector<4x128xbf16>, vector<1568x128xf32> -> vector<1568x128xf32>
    %4 = vector.shape_cast %3 : vector<1568x128xf32> to vector<14x14x8x128xf32>
    %c0_4 = arith.constant 0 : index
    %c0_5 = arith.constant 0 : index
    %5 = vector.load %arg3[%c0_4, %c0_5] : memref<1x128xf32, #tpu.memory_space<vmem>>, vector<1x128xf32>
    %6 = vector.extract_strided_slice %4 {offsets = [0, 0, 0, 0], sizes = [14, 5, 8, 128], strides = [1, 1, 1, 1]} : vector<14x14x8x128xf32> to vector<14x5x8x128xf32>
    %cst_6 = arith.constant dense<0.000000e+00> : vector<14x8x128xf32>
    %7 = vector.multi_reduction <add>, %6, %cst_6 [1] : vector<14x5x8x128xf32> to vector<14x8x128xf32>
    %8 = vector.extract_strided_slice %4 {offsets = [0, 3, 0, 0], sizes = [14, 5, 8, 128], strides = [1, 1, 1, 1]} : vector<14x14x8x128xf32> to vector<14x5x8x128xf32>
    %cst_7 = arith.constant dense<0.000000e+00> : vector<14x8x128xf32>
    %9 = vector.multi_reduction <add>, %8, %cst_7 [1] : vector<14x5x8x128xf32> to vector<14x8x128xf32>
    %10 = vector.extract_strided_slice %4 {offsets = [0, 6, 0, 0], sizes = [14, 5, 8, 128], strides = [1, 1, 1, 1]} : vector<14x14x8x128xf32> to vector<14x5x8x128xf32>
    %cst_8 = arith.constant dense<0.000000e+00> : vector<14x8x128xf32>
    %11 = vector.multi_reduction <add>, %10, %cst_8 [1] : vector<14x5x8x128xf32> to vector<14x8x128xf32>
    %12 = vector.extract_strided_slice %4 {offsets = [0, 9, 0, 0], sizes = [14, 5, 8, 128], strides = [1, 1, 1, 1]} : vector<14x14x8x128xf32> to vector<14x5x8x128xf32>
    %cst_9 = arith.constant dense<0.000000e+00> : vector<14x8x128xf32>
    %13 = vector.multi_reduction <add>, %12, %cst_9 [1] : vector<14x5x8x128xf32> to vector<14x8x128xf32>
    %14 = vector.extract_strided_slice %7 {offsets = [0, 0, 0], sizes = [5, 8, 128], strides = [1, 1, 1]} : vector<14x8x128xf32> to vector<5x8x128xf32>
    %cst_10 = arith.constant dense<0.000000e+00> : vector<8x128xf32>
    %15 = vector.multi_reduction <add>, %14, %cst_10 [0] : vector<5x8x128xf32> to vector<8x128xf32>
    %16 = vector.broadcast %5 : vector<1x128xf32> to vector<8x128xf32>
    %17 = arith.addf %15, %16 : vector<8x128xf32>
    %cst_11 = arith.constant 0.000000e+00 : f32
    %18 = vector.broadcast %cst_11 : f32 to vector<8x128xf32>
    %19 = arith.maximumf %17, %18 : vector<8x128xf32>
    %20 = arith.truncf %19 : vector<8x128xf32> to vector<8x128xbf16>
    %21 = vector.extract_strided_slice %9 {offsets = [0, 0, 0], sizes = [5, 8, 128], strides = [1, 1, 1]} : vector<14x8x128xf32> to vector<5x8x128xf32>
    %cst_12 = arith.constant dense<0.000000e+00> : vector<8x128xf32>
    %22 = vector.multi_reduction <add>, %21, %cst_12 [0] : vector<5x8x128xf32> to vector<8x128xf32>
    %23 = vector.broadcast %5 : vector<1x128xf32> to vector<8x128xf32>
    %24 = arith.addf %22, %23 : vector<8x128xf32>
    %cst_13 = arith.constant 0.000000e+00 : f32
    %25 = vector.broadcast %cst_13 : f32 to vector<8x128xf32>
    %26 = arith.maximumf %24, %25 : vector<8x128xf32>
    %27 = arith.truncf %26 : vector<8x128xf32> to vector<8x128xbf16>
    %28 = vector.extract_strided_slice %11 {offsets = [0, 0, 0], sizes = [5, 8, 128], strides = [1, 1, 1]} : vector<14x8x128xf32> to vector<5x8x128xf32>
    %cst_14 = arith.constant dense<0.000000e+00> : vector<8x128xf32>
    %29 = vector.multi_reduction <add>, %28, %cst_14 [0] : vector<5x8x128xf32> to vector<8x128xf32>
    %30 = vector.broadcast %5 : vector<1x128xf32> to vector<8x128xf32>
    %31 = arith.addf %29, %30 : vector<8x128xf32>
    %cst_15 = arith.constant 0.000000e+00 : f32
    %32 = vector.broadcast %cst_15 : f32 to vector<8x128xf32>
    %33 = arith.maximumf %31, %32 : vector<8x128xf32>
    %34 = arith.truncf %33 : vector<8x128xf32> to vector<8x128xbf16>
    %35 = vector.extract_strided_slice %13 {offsets = [0, 0, 0], sizes = [5, 8, 128], strides = [1, 1, 1]} : vector<14x8x128xf32> to vector<5x8x128xf32>
    %cst_16 = arith.constant dense<0.000000e+00> : vector<8x128xf32>
    %36 = vector.multi_reduction <add>, %35, %cst_16 [0] : vector<5x8x128xf32> to vector<8x128xf32>
    %37 = vector.broadcast %5 : vector<1x128xf32> to vector<8x128xf32>
    %38 = arith.addf %36, %37 : vector<8x128xf32>
    %cst_17 = arith.constant 0.000000e+00 : f32
    %39 = vector.broadcast %cst_17 : f32 to vector<8x128xf32>
    %40 = arith.maximumf %38, %39 : vector<8x128xf32>
    %41 = arith.truncf %40 : vector<8x128xf32> to vector<8x128xbf16>
    %42 = vector.extract_strided_slice %7 {offsets = [3, 0, 0], sizes = [5, 8, 128], strides = [1, 1, 1]} : vector<14x8x128xf32> to vector<5x8x128xf32>
    %cst_18 = arith.constant dense<0.000000e+00> : vector<8x128xf32>
    %43 = vector.multi_reduction <add>, %42, %cst_18 [0] : vector<5x8x128xf32> to vector<8x128xf32>
    %44 = vector.broadcast %5 : vector<1x128xf32> to vector<8x128xf32>
    %45 = arith.addf %43, %44 : vector<8x128xf32>
    %cst_19 = arith.constant 0.000000e+00 : f32
    %46 = vector.broadcast %cst_19 : f32 to vector<8x128xf32>
    %47 = arith.maximumf %45, %46 : vector<8x128xf32>
    %48 = arith.truncf %47 : vector<8x128xf32> to vector<8x128xbf16>
    %49 = vector.extract_strided_slice %9 {offsets = [3, 0, 0], sizes = [5, 8, 128], strides = [1, 1, 1]} : vector<14x8x128xf32> to vector<5x8x128xf32>
    %cst_20 = arith.constant dense<0.000000e+00> : vector<8x128xf32>
    %50 = vector.multi_reduction <add>, %49, %cst_20 [0] : vector<5x8x128xf32> to vector<8x128xf32>
    %51 = vector.broadcast %5 : vector<1x128xf32> to vector<8x128xf32>
    %52 = arith.addf %50, %51 : vector<8x128xf32>
    %cst_21 = arith.constant 0.000000e+00 : f32
    %53 = vector.broadcast %cst_21 : f32 to vector<8x128xf32>
    %54 = arith.maximumf %52, %53 : vector<8x128xf32>
    %55 = arith.truncf %54 : vector<8x128xf32> to vector<8x128xbf16>
    %56 = vector.extract_strided_slice %11 {offsets = [3, 0, 0], sizes = [5, 8, 128], strides = [1, 1, 1]} : vector<14x8x128xf32> to vector<5x8x128xf32>
    %cst_22 = arith.constant dense<0.000000e+00> : vector<8x128xf32>
    %57 = vector.multi_reduction <add>, %56, %cst_22 [0] : vector<5x8x128xf32> to vector<8x128xf32>
    %58 = vector.broadcast %5 : vector<1x128xf32> to vector<8x128xf32>
    %59 = arith.addf %57, %58 : vector<8x128xf32>
    %cst_23 = arith.constant 0.000000e+00 : f32
    %60 = vector.broadcast %cst_23 : f32 to vector<8x128xf32>
    %61 = arith.maximumf %59, %60 : vector<8x128xf32>
    %62 = arith.truncf %61 : vector<8x128xf32> to vector<8x128xbf16>
    %63 = vector.extract_strided_slice %13 {offsets = [3, 0, 0], sizes = [5, 8, 128], strides = [1, 1, 1]} : vector<14x8x128xf32> to vector<5x8x128xf32>
    %cst_24 = arith.constant dense<0.000000e+00> : vector<8x128xf32>
    %64 = vector.multi_reduction <add>, %63, %cst_24 [0] : vector<5x8x128xf32> to vector<8x128xf32>
    %65 = vector.broadcast %5 : vector<1x128xf32> to vector<8x128xf32>
    %66 = arith.addf %64, %65 : vector<8x128xf32>
    %cst_25 = arith.constant 0.000000e+00 : f32
    %67 = vector.broadcast %cst_25 : f32 to vector<8x128xf32>
    %68 = arith.maximumf %66, %67 : vector<8x128xf32>
    %69 = arith.truncf %68 : vector<8x128xf32> to vector<8x128xbf16>
    %70 = vector.extract_strided_slice %7 {offsets = [6, 0, 0], sizes = [5, 8, 128], strides = [1, 1, 1]} : vector<14x8x128xf32> to vector<5x8x128xf32>
    %cst_26 = arith.constant dense<0.000000e+00> : vector<8x128xf32>
    %71 = vector.multi_reduction <add>, %70, %cst_26 [0] : vector<5x8x128xf32> to vector<8x128xf32>
    %72 = vector.broadcast %5 : vector<1x128xf32> to vector<8x128xf32>
    %73 = arith.addf %71, %72 : vector<8x128xf32>
    %cst_27 = arith.constant 0.000000e+00 : f32
    %74 = vector.broadcast %cst_27 : f32 to vector<8x128xf32>
    %75 = arith.maximumf %73, %74 : vector<8x128xf32>
    %76 = arith.truncf %75 : vector<8x128xf32> to vector<8x128xbf16>
    %77 = vector.extract_strided_slice %9 {offsets = [6, 0, 0], sizes = [5, 8, 128], strides = [1, 1, 1]} : vector<14x8x128xf32> to vector<5x8x128xf32>
    %cst_28 = arith.constant dense<0.000000e+00> : vector<8x128xf32>
    %78 = vector.multi_reduction <add>, %77, %cst_28 [0] : vector<5x8x128xf32> to vector<8x128xf32>
    %79 = vector.broadcast %5 : vector<1x128xf32> to vector<8x128xf32>
    %80 = arith.addf %78, %79 : vector<8x128xf32>
    %cst_29 = arith.constant 0.000000e+00 : f32
    %81 = vector.broadcast %cst_29 : f32 to vector<8x128xf32>
    %82 = arith.maximumf %80, %81 : vector<8x128xf32>
    %83 = arith.truncf %82 : vector<8x128xf32> to vector<8x128xbf16>
    %84 = vector.extract_strided_slice %11 {offsets = [6, 0, 0], sizes = [5, 8, 128], strides = [1, 1, 1]} : vector<14x8x128xf32> to vector<5x8x128xf32>
    %cst_30 = arith.constant dense<0.000000e+00> : vector<8x128xf32>
    %85 = vector.multi_reduction <add>, %84, %cst_30 [0] : vector<5x8x128xf32> to vector<8x128xf32>
    %86 = vector.broadcast %5 : vector<1x128xf32> to vector<8x128xf32>
    %87 = arith.addf %85, %86 : vector<8x128xf32>
    %cst_31 = arith.constant 0.000000e+00 : f32
    %88 = vector.broadcast %cst_31 : f32 to vector<8x128xf32>
    %89 = arith.maximumf %87, %88 : vector<8x128xf32>
    %90 = arith.truncf %89 : vector<8x128xf32> to vector<8x128xbf16>
    %91 = vector.extract_strided_slice %13 {offsets = [6, 0, 0], sizes = [5, 8, 128], strides = [1, 1, 1]} : vector<14x8x128xf32> to vector<5x8x128xf32>
    %cst_32 = arith.constant dense<0.000000e+00> : vector<8x128xf32>
    %92 = vector.multi_reduction <add>, %91, %cst_32 [0] : vector<5x8x128xf32> to vector<8x128xf32>
    %93 = vector.broadcast %5 : vector<1x128xf32> to vector<8x128xf32>
    %94 = arith.addf %92, %93 : vector<8x128xf32>
    %cst_33 = arith.constant 0.000000e+00 : f32
    %95 = vector.broadcast %cst_33 : f32 to vector<8x128xf32>
    %96 = arith.maximumf %94, %95 : vector<8x128xf32>
    %97 = arith.truncf %96 : vector<8x128xf32> to vector<8x128xbf16>
    %98 = vector.extract_strided_slice %7 {offsets = [9, 0, 0], sizes = [5, 8, 128], strides = [1, 1, 1]} : vector<14x8x128xf32> to vector<5x8x128xf32>
    %cst_34 = arith.constant dense<0.000000e+00> : vector<8x128xf32>
    %99 = vector.multi_reduction <add>, %98, %cst_34 [0] : vector<5x8x128xf32> to vector<8x128xf32>
    %100 = vector.broadcast %5 : vector<1x128xf32> to vector<8x128xf32>
    %101 = arith.addf %99, %100 : vector<8x128xf32>
    %cst_35 = arith.constant 0.000000e+00 : f32
    %102 = vector.broadcast %cst_35 : f32 to vector<8x128xf32>
    %103 = arith.maximumf %101, %102 : vector<8x128xf32>
    %104 = arith.truncf %103 : vector<8x128xf32> to vector<8x128xbf16>
    %105 = vector.extract_strided_slice %9 {offsets = [9, 0, 0], sizes = [5, 8, 128], strides = [1, 1, 1]} : vector<14x8x128xf32> to vector<5x8x128xf32>
    %cst_36 = arith.constant dense<0.000000e+00> : vector<8x128xf32>
    %106 = vector.multi_reduction <add>, %105, %cst_36 [0] : vector<5x8x128xf32> to vector<8x128xf32>
    %107 = vector.broadcast %5 : vector<1x128xf32> to vector<8x128xf32>
    %108 = arith.addf %106, %107 : vector<8x128xf32>
    %cst_37 = arith.constant 0.000000e+00 : f32
    %109 = vector.broadcast %cst_37 : f32 to vector<8x128xf32>
    %110 = arith.maximumf %108, %109 : vector<8x128xf32>
    %111 = arith.truncf %110 : vector<8x128xf32> to vector<8x128xbf16>
    %112 = vector.extract_strided_slice %11 {offsets = [9, 0, 0], sizes = [5, 8, 128], strides = [1, 1, 1]} : vector<14x8x128xf32> to vector<5x8x128xf32>
    %cst_38 = arith.constant dense<0.000000e+00> : vector<8x128xf32>
    %113 = vector.multi_reduction <add>, %112, %cst_38 [0] : vector<5x8x128xf32> to vector<8x128xf32>
    %114 = vector.broadcast %5 : vector<1x128xf32> to vector<8x128xf32>
    %115 = arith.addf %113, %114 : vector<8x128xf32>
    %cst_39 = arith.constant 0.000000e+00 : f32
    %116 = vector.broadcast %cst_39 : f32 to vector<8x128xf32>
    %117 = arith.maximumf %115, %116 : vector<8x128xf32>
    %118 = arith.truncf %117 : vector<8x128xf32> to vector<8x128xbf16>
    %119 = vector.extract_strided_slice %13 {offsets = [9, 0, 0], sizes = [5, 8, 128], strides = [1, 1, 1]} : vector<14x8x128xf32> to vector<5x8x128xf32>
    %cst_40 = arith.constant dense<0.000000e+00> : vector<8x128xf32>
    %120 = vector.multi_reduction <add>, %119, %cst_40 [0] : vector<5x8x128xf32> to vector<8x128xf32>
    %121 = vector.broadcast %5 : vector<1x128xf32> to vector<8x128xf32>
    %122 = arith.addf %120, %121 : vector<8x128xf32>
    %cst_41 = arith.constant 0.000000e+00 : f32
    %123 = vector.broadcast %cst_41 : f32 to vector<8x128xf32>
    %124 = arith.maximumf %122, %123 : vector<8x128xf32>
    %125 = arith.truncf %124 : vector<8x128xf32> to vector<8x128xbf16>
    %126 = tpu.concatenate %20, %27, %34, %41, %48, %55, %62, %69, %76, %83, %90, %97, %104, %111, %118, %125 in 1 : vector<8x128xbf16>, vector<8x128xbf16>, vector<8x128xbf16>, vector<8x128xbf16>, vector<8x128xbf16>, vector<8x128xbf16>, vector<8x128xbf16>, vector<8x128xbf16>, vector<8x128xbf16>, vector<8x128xbf16>, vector<8x128xbf16>, vector<8x128xbf16>, vector<8x128xbf16>, vector<8x128xbf16>, vector<8x128xbf16>, vector<8x128xbf16> -> vector<8x2048xbf16>
    %c0_42 = arith.constant 0 : index
    %c0_43 = arith.constant 0 : index
    %127 = vector.load %arg4[%c0_42, %c0_43] : memref<2048x1024xbf16, #tpu.memory_space<vmem>>, vector<2048x1024xbf16>
    %cst_44 = arith.constant dense<0.000000e+00> : vector<8x1024xf32>
    %128 = tpu.matmul %126, %127, %cst_44 {dimension_numbers = #tpu.dot_dimension_numbers<[1], [0], [0], [1], [0, 0, 1, 1], [], []>} : vector<8x2048xbf16>, vector<2048x1024xbf16>, vector<8x1024xf32> -> vector<8x1024xf32>
    %c0_45 = arith.constant 0 : index
    %c0_46 = arith.constant 0 : index
    %129 = vector.load %arg5[%c0_45, %c0_46] : memref<1x1024xf32, #tpu.memory_space<vmem>>, vector<1x1024xf32>
    %130 = vector.broadcast %129 : vector<1x1024xf32> to vector<8x1024xf32>
    %131 = arith.addf %128, %130 : vector<8x1024xf32>
    %cst_47 = arith.constant 0.000000e+00 : f32
    %132 = vector.broadcast %cst_47 : f32 to vector<8x1024xf32>
    %133 = arith.maximumf %131, %132 : vector<8x1024xf32>
    %134 = arith.truncf %133 : vector<8x1024xf32> to vector<8x1024xbf16>
    %c0_48 = arith.constant 0 : index
    %c0_49 = arith.constant 0 : index
    %135 = vector.load %arg6[%c0_48, %c0_49] : memref<1024x128xbf16, #tpu.memory_space<vmem>>, vector<1024x128xbf16>
    %cst_50 = arith.constant dense<0.000000e+00> : vector<8x128xf32>
    %136 = tpu.matmul %134, %135, %cst_50 {dimension_numbers = #tpu.dot_dimension_numbers<[1], [0], [0], [1], [0, 0, 1, 1], [], []>} : vector<8x1024xbf16>, vector<1024x128xbf16>, vector<8x128xf32> -> vector<8x128xf32>
    %c0_51 = arith.constant 0 : index
    %c0_52 = arith.constant 0 : index
    %137 = vector.load %arg7[%c0_51, %c0_52] : memref<1x128xf32, #tpu.memory_space<vmem>>, vector<1x128xf32>
    %138 = vector.broadcast %137 : vector<1x128xf32> to vector<8x128xf32>
    %139 = arith.addf %136, %138 : vector<8x128xf32>
    %c0_53 = arith.constant 0 : index
    %c0_54 = arith.constant 0 : index
    %140 = vector.load %arg8[%c0_53, %c0_54] : memref<8x128xf32, #tpu.memory_space<vmem>>, vector<8x128xf32>
    tpu.vector_store %arg8[%c0_53, %c0_54], %139 {strides = array<i32>} : memref<8x128xf32, #tpu.memory_space<vmem>>, vector<8x128xf32>,
    return
  }
  func.func @transform_0(%arg0: i32) -> (i32, i32, i32) {
    %c0_i32 = arith.constant 0 : i32
    %c0_i32_0 = arith.constant 0 : i32
    %c0_i32_1 = arith.constant 0 : i32
    return %c0_i32, %arg0, %c0_i32_0 : i32, i32, i32
  }
  func.func @transform_1(%arg0: i32) -> (i32, i32) {
    %c0_i32 = arith.constant 0 : i32
    %c0_i32_0 = arith.constant 0 : i32
    %c0_i32_1 = arith.constant 0 : i32
    return %c0_i32, %c0_i32_0 : i32, i32
  }
  func.func @transform_2(%arg0: i32) -> (i32, i32) {
    %c0_i32 = arith.constant 0 : i32
    %c0_i32_0 = arith.constant 0 : i32
    %c0_i32_1 = arith.constant 0 : i32
    return %c0_i32, %c0_i32_0 : i32, i32
  }
  func.func @transform_3(%arg0: i32) -> (i32, i32) {
    %c0_i32 = arith.constant 0 : i32
    %c0_i32_0 = arith.constant 0 : i32
    %c0_i32_1 = arith.constant 0 : i32
    return %c0_i32, %c0_i32_0 : i32, i32
  }
  func.func @transform_4(%arg0: i32) -> (i32, i32) {
    %c0_i32 = arith.constant 0 : i32
    %c0_i32_0 = arith.constant 0 : i32
    %c0_i32_1 = arith.constant 0 : i32
    return %c0_i32, %c0_i32_0 : i32, i32
  }
  func.func @transform_5(%arg0: i32) -> (i32, i32) {
    %c0_i32 = arith.constant 0 : i32
    %c0_i32_0 = arith.constant 0 : i32
    %c0_i32_1 = arith.constant 0 : i32
    return %c0_i32, %c0_i32_0 : i32, i32
  }
  func.func @transform_6(%arg0: i32) -> (i32, i32) {
    %c0_i32 = arith.constant 0 : i32
    %c0_i32_0 = arith.constant 0 : i32
    %c0_i32_1 = arith.constant 0 : i32
    return %c0_i32, %c0_i32_0 : i32, i32
  }
  func.func @transform_7(%arg0: i32) -> (i32, i32) {
    %c0_i32 = arith.constant 0 : i32
    %c0_i32_0 = arith.constant 0 : i32
    return %arg0, %c0_i32 : i32, i32
  }
}

</mosaic_0001>

<bundles_post_ra>
// kernel: inception_aux_forward.1
= control target key start
LH: loop header
LB: loop body
LE: loop exit
PB: predicated region body
PF: predicated region fallthrough
CT: control target
= control target key end

     0   :  { %vm1009_vm0 = vcmask 1041408   ;;  %vm714_vm1 = vcmask 31744   ;;  %s23668_s1 = inlined_call_operand.vmem [shape: bf16[4,128], index: 1, kind: input, shape index: {}]   ;;  %s23669_s0 = inlined_call_operand.vmem [shape: bf16[196,8,4], index: 0, kind: input, shape index: {}]   ;;  %s23670_s2 = inlined_call_operand.vmem [shape: f32[1,128], index: 2, kind: input, shape index: {}]   ;;  %s23671_s3 = inlined_call_operand.vmem [shape: bf16[2048,1024], index: 3, kind: input, shape index: {}]   ;;  %s23672_s4 = inlined_call_operand.vmem [shape: f32[1,1024], index: 4, kind: input, shape index: {}]   ;;  %s23673_s5 = inlined_call_operand.vmem [shape: bf16[1024,128], index: 5, kind: input, shape index: {}]   ;;  %s23674_s6 = inlined_call_operand.vmem [shape: f32[1,128], index: 6, kind: input, shape index: {}]   ;;  %s23675_s7 = inlined_call_operand.vmem [shape: f32[8,128], index: 7, kind: output, shape index: {}]  }
   0x1   :  { %v223_v0 = vld [vmem:[%s23668_s1] sm:$0x3]  ;;  %v15162_v3 = vld [vmem:[%s23669_s0 + $0x8] sm:$0xff]  ;;  %v15163_v4 = vld [vmem:[%s23669_s0 + $0x10] sm:$0xff] }
   0x2   :  { %v1011_v1 = vsel %vm1009_vm0, %v223_v0, 0  ;;  %v15161_v2 = vld [vmem:[%s23669_s0] sm:$0xff]  ;;  %v15164_v5 = vld [vmem:[%s23669_s0 + $0x18] sm:$0xff]  ;;  %v15166_v7 = vld [vmem:[%s23669_s0 + $0x28] sm:$0xff] }
   0x3   :  { %1020 = vmatpush.bf16.msra.mxu0 %v1011_v1  ;;  %16347 = vmatpush.bf16.msra.mxu2 %v1011_v1  ;;  %v15165_v6 = vld [vmem:[%s23669_s0 + $0x20] sm:$0xff]  ;;  %v15167_v8 = vld [vmem:[%s23669_s0 + $0x30] sm:$0xff]  ;;  %v15168_v9 = vld [vmem:[%s23669_s0 + $0x38] sm:$0xff] }
   0x4   :  { %16348 = vmatpush.bf16.msra.mxu3 %v1011_v1  ;;  %v15169_v10 = vld [vmem:[%s23669_s0 + $0x40] sm:$0xff]  ;;  %v15170_v14 = vld [vmem:[%s23669_s0 + $0x48] sm:$0xff]  ;;  %v15171_v19 = vld [vmem:[%s23669_s0 + $0x50] sm:$0xff] }
   0x5   :  { %v15172_v25 = vld [vmem:[%s23669_s0 + $0x58] sm:$0xff]  ;;  %v15173_v31 = vld [vmem:[%s23669_s0 + $0x60] sm:$0xff]  ;;  %v15174_v36 = vld [vmem:[%s23669_s0 + $0x68] sm:$0xff] }
   0x6   :  { %10711 = vmatmul.msk.bf16.vlgmr.msra.gmra.mxu0 %vm714_vm1, %v15161_v2  ;;  %v15175_v42 = vld [vmem:[%s23669_s0 + $0x70] sm:$0xff]  ;;  %v15176_v47 = vld [vmem:[%s23669_s0 + $0x78] sm:$0xff]  ;;  %v15177_v51 = vld [vmem:[%s23669_s0 + $0x80] sm:$0xff] }
   0x7   :  { %v15178_v56 = vld [vmem:[%s23669_s0 + $0x88] sm:$0xff]  ;;  %v15179_v63 = vld [vmem:[%s23669_s0 + $0x90] sm:$0xff] }
  0x16   :  { %10712 = vmatmul.msk.bf16.gmra.mxu0 %vm714_vm1, %v15162_v3 }
  0x26   :  { %10713 = vmatmul.msk.bf16.gmra.mxu0 %vm714_vm1, %v15163_v4 }
  0x36   :  { %10714 = vmatmul.msk.bf16.gmra.mxu0 %vm714_vm1, %v15164_v5 }
  0x46   :  { %10715 = vmatmul.msk.bf16.gmra.mxu0 %vm714_vm1, %v15165_v6  ;;  %v15180_v6 = vld [vmem:[%s23669_s0 + $0x98] sm:$0xff] }
  0x56   :  { %10716 = vmatmul.msk.bf16.gmra.mxu0 %vm714_vm1, %v15166_v7 }
  0x66   :  { %10717 = vmatmul.msk.bf16.gmra.mxu0 %vm714_vm1, %v15167_v8 }
  0x76   :  { %10718 = vmatmul.msk.bf16.gmra.mxu0 %vm714_vm1, %v15168_v9 }
  0x83   :  { %v1022_v11 = vpop.f32.mrf.mxu0 }
  0x86   :  { %10719 = vmatmul.msk.bf16.gmra.mxu0 %vm714_vm1, %v15169_v10 }
  0x8b   :  { %v1024_v12 = vpop.f32.mrf.mxu0 }
  0x8c   :  { %v1513_v13 = vadd.f32 %v1024_v12, %v1022_v11  ;;  %v15181_v11 = vld [vmem:[%s23669_s0 + $0xa0] sm:$0xff] }
  0x93   :  { %v1027_v15 = vpop.f32.mrf.mxu0 }
  0x94   :  { %v1514_v16 = vadd.f32 %v1513_v13, %v1027_v15 }
  0x96   :  { %10720 = vmatmul.msk.bf16.gmra.mxu0 %vm714_vm1, %v15170_v14 }
  0x9b   :  { %v1029_v17 = vpop.f32.mrf.mxu0 }
  0x9c   :  { %v1515_v18 = vadd.f32 %v1514_v16, %v1029_v17 }
  0xa3   :  { %v1032_v20 = vpop.f32.mrf.mxu0 }
  0xa4   :  { %v1516_v21 = vadd.f32 %v1515_v18, %v1032_v20  ;;  %v1569_v22 = vadd.f32 %v1032_v20, %v1029_v17  ;;  %v15182_v18 = vld [vmem:[%s23669_s0 + $0xa8] sm:$0xff] }
  0xa6   :  { %10721 = vmatmul.msk.bf16.gmra.mxu0 %vm714_vm1, %v15171_v19 }
  0xab   :  { %v1034_v23 = vpop.f32.mrf.mxu0 }
  0xac   :  { %v1570_v24 = vadd.f32 %v1569_v22, %v1034_v23 }
  0xb3   :  { %v1037_v26 = vpop.f32.mrf.mxu0 }
  0xb4   :  { %v1571_v27 = vadd.f32 %v1570_v24, %v1037_v26  ;;  %v15183_v24 = vld [vmem:[%s23669_s0 + $0xb0] sm:$0xff] }
  0xb6   :  { %10722 = vmatmul.msk.bf16.gmra.mxu0 %vm714_vm1, %v15172_v25 }
  0xbb   :  { %v1039_v28 = vpop.f32.mrf.mxu0 }
  0xbc   :  { %v1572_v29 = vadd.f32 %v1571_v27, %v1039_v28  ;;  %v1625_v30 = vadd.f32 %v1039_v28, %v1037_v26  ;;  %v15184_v28 = vld [vmem:[%s23669_s0 + $0xb8] sm:$0xff] }
  0xc3   :  { %v1042_v32 = vpop.f32.mrf.mxu0 }
  0xc4   :  { %v1626_v33 = vadd.f32 %v1625_v30, %v1042_v32 }
  0xc6   :  { %10723 = vmatmul.msk.bf16.gmra.mxu0 %vm714_vm1, %v15173_v31 }
  0xcb   :  { %v1044_v34 = vpop.f32.mrf.mxu0 }
  0xcc   :  { %v1627_v35 = vadd.f32 %v1626_v33, %v1044_v34  ;;  %v15185_v33 = vld [vmem:[%s23669_s0 + $0xc0] sm:$0xff] }
  0xd3   :  { %v1047_v37 = vpop.f32.mrf.mxu0 }
  0xd4   :  { %v1628_v38 = vadd.f32 %v1627_v35, %v1047_v37  ;;  %v1681_v39 = vadd.f32 %v1047_v37, %v1044_v34 }
  0xd6   :  { %10724 = vmatmul.msk.bf16.gmra.mxu0 %vm714_vm1, %v15174_v36 }
  0xdb   :  { %v1049_v40 = vpop.f32.mrf.mxu0 }
  0xdc   :  { %v1682_v41 = vadd.f32 %v1681_v39, %v1049_v40  ;;  %v15186_v40 = vld [vmem:[%s23669_s0 + $0xc8] sm:$0xff] }
  0xe3   :  { %v1052_v43 = vpop.f32.mrf.mxu0 }
  0xe4   :  { %v1683_v44 = vadd.f32 %v1682_v41, %v1052_v43 }
  0xe6   :  { %10725 = vmatmul.msk.bf16.gmra.mxu0 %vm714_vm1, %v15175_v42 }
  0xeb   :  { %v1054_v45 = vpop.f32.mrf.mxu0 }
  0xec   :  { %v1684_v46 = vadd.f32 %v1683_v44, %v1054_v45 }
  0xf3   :  { %v1057_v48 = vpop.f32.mrf.mxu0 }
  0xf6   :  { %10726 = vmatmul.msk.bf16.gmra.mxu0 %vm714_vm1, %v15176_v47  ;;  %v15187_v47 = vld [vmem:[%s23669_s0 + $0xd0] sm:$0xff] }
  0xfb   :  { %v1059_v49 = vpop.f32.mrf.mxu0 }
  0xfc   :  { %v1517_v50 = vadd.f32 %v1059_v49, %v1057_v48 }
 0x103   :  { %v1062_v52 = vpop.f32.mrf.mxu0 }
 0x104   :  { %v1518_v53 = vadd.f32 %v1517_v50, %v1062_v52  ;;  %v15188_v52 = vld [vmem:[%s23669_s0 + $0xd8] sm:$0xff] }
 0x106   :  { %10727 = vmatmul.msk.bf16.gmra.mxu0 %vm714_vm1, %v15177_v51 }
 0x10b   :  { %v1064_v54 = vpop.f32.mrf.mxu0 }
 0x10c   :  { %v1519_v55 = vadd.f32 %v1518_v53, %v1064_v54 }
 0x113   :  { %v1067_v57 = vpop.f32.mrf.mxu0 }
 0x114   :  { %v1520_v58 = vadd.f32 %v1519_v55, %v1067_v57  ;;  %v1573_v59 = vadd.f32 %v1067_v57, %v1064_v54 }
 0x116   :  { %v1737_v60 = vadd.f32 %v1520_v58, %v1516_v21  ;;  %10728 = vmatmul.msk.bf16.gmra.mxu0 %vm714_vm1, %v15178_v56 }
 0x11b   :  { %v1069_v61 = vpop.f32.mrf.mxu0 }
 0x11c   :  { %v1574_v62 = vadd.f32 %v1573_v59, %v1069_v61  ;;  %v15189_v59 = vld [vmem:[%s23669_s0 + $0xe0] sm:$0xff] }
 0x123   :  { %v1072_v0 = vpop.f32.mrf.mxu0 }
 0x124   :  { %v1575_v1 = vadd.f32 %v1574_v62, %v1072_v0 }
 0x126   :  { %10729 = vmatmul.msk.bf16.gmra.mxu0 %vm714_vm1, %v15179_v63 }
 0x12b   :  { %v1074_v2 = vpop.f32.mrf.mxu0 }
 0x12c   :  { %v1576_v3 = vadd.f32 %v1575_v1, %v1074_v2  ;;  %v1629_v4 = vadd.f32 %v1074_v2, %v1072_v0  ;;  %v15190_v1 = vld [vmem:[%s23669_s0 + $0xe8] sm:$0xff] }
 0x12e   :  { %v1747_v5 = vadd.f32 %v1576_v3, %v1572_v29 }
 0x133   :  { %v1077_v7 = vpop.f32.mrf.mxu0 }
 0x134   :  { %v1630_v8 = vadd.f32 %v1629_v4, %v1077_v7 }
 0x136   :  { %10730 = vmatmul.msk.bf16.gmra.mxu0 %vm714_vm1, %v15180_v6 }
 0x13b   :  { %v1079_v9 = vpop.f32.mrf.mxu0 }
 0x13c   :  { %v1631_v10 = vadd.f32 %v1630_v8, %v1079_v9 }
 0x143   :  { %v1082_v12 = vpop.f32.mrf.mxu0 }
 0x144   :  { %v1632_v13 = vadd.f32 %v1631_v10, %v1082_v12  ;;  %v1685_v14 = vadd.f32 %v1082_v12, %v1079_v9  ;;  %v15192_v10 = vld [vmem:[%s23669_s0 + $0xf8] sm:$0xff] }
 0x146   :  { %v1754_v15 = vadd.f32 %v1632_v13, %v1628_v38  ;;  %10731 = vmatmul.msk.bf16.gmra.mxu0 %vm714_vm1, %v15181_v11 }
 0x14b   :  { %v1084_v16 = vpop.f32.mrf.mxu0 }
 0x14c   :  { %v1686_v17 = vadd.f32 %v1685_v14, %v1084_v16  ;;  %v15193_v16 = vld [vmem:[%s23669_s0 + $0x100] sm:$0xff] }
 0x153   :  { %v1087_v19 = vpop.f32.mrf.mxu0 }
 0x154   :  { %v1687_v20 = vadd.f32 %v1686_v17, %v1087_v19 }
 0x156   :  { %10732 = vmatmul.msk.bf16.gmra.mxu0 %vm714_vm1, %v15182_v18 }
 0x15b   :  { %v1089_v21 = vpop.f32.mrf.mxu0 }
 0x15c   :  { %v1688_v22 = vadd.f32 %v1687_v20, %v1089_v21 }
 0x15e   :  { %v1761_v23 = vadd.f32 %v1688_v22, %v1684_v46  ;;  %v15194_v22 = vld [vmem:[%s23669_s0 + $0x108] sm:$0xff] }
 0x163   :  { %v1092_v25 = vpop.f32.mrf.mxu0 }
 0x166   :  { %10733 = vmatmul.msk.bf16.gmra.mxu0 %vm714_vm1, %v15183_v24 }
 0x16b   :  { %v1094_v26 = vpop.f32.mrf.mxu0 }
 0x16c   :  { %v1521_v27 = vadd.f32 %v1094_v26, %v1092_v25 }
 0x173   :  { %v1097_v29 = vpop.f32.mrf.mxu0 }
 0x174   :  { %v1522_v30 = vadd.f32 %v1521_v27, %v1097_v29  ;;  %v15195_v27 = vld [vmem:[%s23669_s0 + $0x110] sm:$0xff] }
 0x176   :  { %10734 = vmatmul.msk.bf16.gmra.mxu0 %vm714_vm1, %v15184_v28 }
 0x17b   :  { %v1099_v31 = vpop.f32.mrf.mxu0 }
 0x17c   :  { %v1523_v32 = vadd.f32 %v1522_v30, %v1099_v31 }
 0x183   :  { %v1102_v34 = vpop.f32.mrf.mxu0 }
 0x184   :  { %v1524_v35 = vadd.f32 %v1523_v32, %v1102_v34  ;;  %v1577_v36 = vadd.f32 %v1102_v34, %v1099_v31  ;;  %v15319_v34 = vld [vmem:[%s23671_s3 + $0x1dc] sm:$0xf0] }
 0x186   :  { %v16502_v37 = vadd.f32 %v1737_v60, %v1524_v35  ;;  %10735 = vmatmul.msk.bf16.gmra.mxu0 %vm714_vm1, %v15185_v33  ;;  %v11035_v33 = vld [vmem:[%s23671_s3 + $0x1c0] sm:$0xf] }
 0x187   :  { %v11036_v35 = vor.u32 %v15319_v34, %v11035_v33  ;;  %v11099_v33 = vld [vmem:[%s23671_s3 + $0x240] sm:$0xf] }
 0x188   :  { %v15335_v34 = vld [vmem:[%s23671_s3 + $0x25c] sm:$0xf0] }
 0x189   :  { %8014 = vmatpush.bf16.msra.mxu1 %v11036_v35  ;;  %v11100_v35 = vor.u32 %v15335_v34, %v11099_v33  ;;  %v11739_v34 = vld [vmem:[%s23671_s3 + $0x740] sm:$0xf] }
 0x18b   :  { %v1104_v38 = vpop.f32.mrf.mxu0 }
 0x18c   :  { %v1578_v39 = vadd.f32 %v1577_v36, %v1104_v38  ;;  %v11003_v36 = vld [vmem:[%s23671_s3 + $0x180] sm:$0xf] }
 0x18d   :  { %v15311_v38 = vld [vmem:[%s23671_s3 + $0x19c] sm:$0xf0] }
 0x193   :  { %v1107_v41 = vpop.f32.mrf.mxu0 }
 0x194   :  { %v1579_v42 = vadd.f32 %v1578_v39, %v1107_v41  ;;  %v11004_v39 = vor.u32 %v15311_v38, %v11003_v36  ;;  %v11547_v36 = vld [vmem:[%s23671_s3 + $0x5c0] sm:$0xf] }
 0x195   :  { %v15447_v38 = vld [vmem:[%s23671_s3 + $0x5dc] sm:$0xf0] }
 0x196   :  { %10736 = vmatmul.msk.bf16.gmra.mxu0 %vm714_vm1, %v15186_v40  ;;  %v15196_v40 = vld [vmem:[%s23669_s0 + $0x118] sm:$0xff]  ;;  %8015 = vmatpush.bf16.msra.mxu1 %v11004_v39 }
 0x19b   :  { %v1109_v43 = vpop.f32.mrf.mxu0 }
 0x19c   :  { %v1580_v44 = vadd.f32 %v1579_v42, %v1109_v43  ;;  %v1633_v45 = vadd.f32 %v1109_v43, %v1107_v41  ;;  %v10971_v43 = vld [vmem:[%s23671_s3 + $0x140] sm:$0xf] }
 0x19e   :  { %v16509_v46 = vadd.f32 %v1747_v5, %v1580_v44  ;;  %v15191_v5 = vld [vmem:[%s23669_s0 + $0xf0] sm:$0xff]  ;;  %v15303_v44 = vld [vmem:[%s23671_s3 + $0x15c] sm:$0xf0] }
 0x1a3   :  { %v1112_v48 = vpop.f32.mrf.mxu0 }
 0x1a4   :  { %v1634_v49 = vadd.f32 %v1633_v45, %v1112_v48  ;;  %v10972_v45 = vor.u32 %v15303_v44, %v10971_v43  ;;  %v15295_v48 = vld [vmem:[%s23671_s3 + $0x11c] sm:$0xf0] }
 0x1a5   :  { %v15327_v43 = vld [vmem:[%s23671_s3 + $0x21c] sm:$0xf0] }
 0x1a6   :  { %10737 = vmatmul.msk.bf16.gmra.mxu0 %vm714_vm1, %v15187_v47  ;;  %8016 = vmatpush.bf16.msra.mxu1 %v10972_v45  ;;  %v10939_v47 = vld [vmem:[%s23671_s3 + $0x100] sm:$0xf] }
 0x1a7   :  { %v11515_v44 = vld [vmem:[%s23671_s3 + $0x580] sm:$0xf] }
 0x1ab   :  { %v1114_v50 = vpop.f32.mrf.mxu0 }
 0x1ac   :  { %v1635_v51 = vadd.f32 %v1634_v49, %v1114_v50  ;;  %v10940_v49 = vor.u32 %v15295_v48, %v10939_v47  ;;  %v15439_v47 = vld [vmem:[%s23671_s3 + $0x59c] sm:$0xf0] }
 0x1ae   :  { %8017 = vmatpush.bf16.msra.mxu1 %v10940_v49  ;;  %v15199_v49 = vld [vmem:[%s23669_s0 + $0x130] sm:$0xff] }
 0x1b3   :  { %v1117_v53 = vpop.f32.mrf.mxu0 }
 0x1b4   :  { %v1636_v54 = vadd.f32 %v1635_v51, %v1117_v53  ;;  %v1689_v55 = vadd.f32 %v1117_v53, %v1114_v50  ;;  %v15287_v53 = vld [vmem:[%s23671_s3 + $0xdc] sm:$0xf0] }
 0x1b6   :  { %v16518_v56 = vadd.f32 %v1754_v15, %v1636_v54  ;;  %10738 = vmatmul.msk.bf16.gmra.mxu0 %vm714_vm1, %v15188_v52  ;;  %v10907_v52 = vld [vmem:[%s23671_s3 + $0xc0] sm:$0xf] }
 0x1b7   :  { %v10908_v54 = vor.u32 %v15287_v53, %v10907_v52 }
 0x1b9   :  { %8018 = vmatpush.bf16.msra.mxu1 %v10908_v54 }
 0x1bb   :  { %v1119_v57 = vpop.f32.mrf.mxu0 }
 0x1bc   :  { %v1690_v58 = vadd.f32 %v1689_v55, %v1119_v57  ;;  %v10875_v55 = vld [vmem:[%s23671_s3 + $0x80] sm:$0xf] }
 0x1bd   :  { %v15279_v57 = vld [vmem:[%s23671_s3 + $0x9c] sm:$0xf0] }
 0x1c3   :  { %v1122_v60 = vpop.f32.mrf.mxu0 }
 0x1c4   :  { %v1691_v61 = vadd.f32 %v1690_v58, %v1122_v60  ;;  %v10876_v58 = vor.u32 %v15279_v57, %v10875_v55  ;;  %v16705_v55 = vld [vmem:[%s23670_s2] ss:$0 sm:$0xff] }
 0x1c5   :  { %v11483_v57 = vld [vmem:[%s23671_s3 + $0x540] sm:$0xf] }
 0x1c6   :  { %10739 = vmatmul.msk.bf16.gmra.mxu0 %vm714_vm1, %v15189_v59  ;;  %v15197_v59 = vld [vmem:[%s23669_s0 + $0x120] sm:$0xff]  ;;  %8019 = vmatpush.bf16.msra.mxu1 %v10876_v58 }
 0x1c7   :  { %v15431_v58 = vld [vmem:[%s23671_s3 + $0x55c] sm:$0xf0] }
 0x1cb   :  { %v1124_v62 = vpop.f32.mrf.mxu0 }
 0x1cc   :  { %v1692_v63 = vadd.f32 %v1691_v61, %v1124_v62  ;;  %v15254_v61 = vld [vmem:[%s23669_s0 + $0x2e8] sm:$0xff]  ;;  %v10843_v62 = vld [vmem:[%s23671_s3 + $0x40] sm:$0xf] }
 0x1cd   :  { %10804 = vmatmul.msk.bf16.vlgmr.msra.gmra.mxu2 %vm714_vm1, %v15254_v61  ;;  %v11451_v61 = vld [vmem:[%s23671_s3 + $0x500] sm:$0xf] }
 0x1ce   :  { %v16525_v0 = vadd.f32 %v1761_v23, %v1692_v63  ;;  %v15271_v63 = vld [vmem:[%s23671_s3 + $0x5c] sm:$0xf0] }
 0x1d3   :  { %v1127_v2 = vpop.f32.mrf.mxu0 }
 0x1d6   :  { %10740 = vmatmul.msk.bf16.gmra.mxu0 %vm714_vm1, %v15190_v1  ;;  %v11291_v1 = vld [vmem:[%s23671_s3 + $0x3c0] sm:$0xf] }
 0x1db   :  { %v1129_v3 = vpop.f32.mrf.mxu0 }
 0x1dc   :  { %v1525_v4 = vadd.f32 %v1129_v3, %v1127_v2  ;;  %v15383_v2 = vld [vmem:[%s23671_s3 + $0x3dc] sm:$0xf0]  ;;  %v10844_v3 = vor.u32 %v15271_v63, %v10843_v62 }
 0x1dd   :  { %v15423_v62 = vld [vmem:[%s23671_s3 + $0x51c] sm:$0xf0] }
 0x1de   :  { %8020 = vmatpush.bf16.msra.mxu1 %v10844_v3  ;;  %v11452_v63 = vor.u32 %v15423_v62, %v11451_v61  ;;  %v11579_v62 = vld [vmem:[%s23671_s3 + $0x600] sm:$0xf] }
 0x1e3   :  { %v1132_v6 = vpop.f32.mrf.mxu0 }
 0x1e4   :  { %v1526_v7 = vadd.f32 %v1525_v4, %v1132_v6  ;;  %v11292_v4 = vor.u32 %v15383_v2, %v11291_v1  ;;  %v15263_v6 = vld [vmem:[%s23671_s3 + $0x1c] sm:$0xf0] }
 0x1e6   :  { %10741 = vmatmul.msk.bf16.gmra.mxu0 %vm714_vm1, %v15191_v5  ;;  %8027 = vmatpush.bf16.msrb.mxu2 %v11292_v4  ;;  %v10811_v5 = vld [vmem:[%s23671_s3] sm:$0xf]  ;;  %v15258_v4 = vld [vmem:[%s23669_s0 + $0x308] sm:$0xff] }
 0x1eb   :  { %v1134_v8 = vpop.f32.mrf.mxu0 }
 0x1ec   :  { %v1527_v9 = vadd.f32 %v1526_v7, %v1134_v8  ;;  %v11259_v7 = vld [vmem:[%s23671_s3 + $0x380] sm:$0xf] }
 0x1f3   :  { %v1137_v11 = vpop.f32.mrf.mxu0 }
 0x1f4   :  { %v16538_v12 = vadd.f32 %v1527_v9, %v1137_v11  ;;  %v1581_v13 = vadd.f32 %v1137_v11, %v1134_v8  ;;  %v10812_v8 = vor.u32 %v15263_v6, %v10811_v5  ;;  %v15375_v9 = vld [vmem:[%s23671_s3 + $0x39c] sm:$0xf0] }
 0x1f5   :  { %v11419_v5 = vld [vmem:[%s23671_s3 + $0x4c0] sm:$0xf] }
 0x1f6   :  { %10742 = vmatmul.msk.bf16.gmra.mxu0 %vm714_vm1, %v15192_v10  ;;  %v11260_v10 = vor.u32 %v15375_v9, %v11259_v7  ;;  %8021 = vmatpush.bf16.msra.mxu1 %v10812_v8  ;;  %v1739_v53 = vadd.f32 %v16502_v37, %v16538_v12  ;;  %v15415_v6 = vld [vmem:[%s23671_s3 + $0x4dc] sm:$0xf0] }
 0x1f7   :  { %v11420_v7 = vor.u32 %v15415_v6, %v11419_v5  ;;  %v11387_v8 = vld [vmem:[%s23671_s3 + $0x480] sm:$0xf] }
 0x1f8   :  { %8028 = vmatpush.bf16.msrb.mxu2 %v11260_v10  ;;  %v15407_v9 = vld [vmem:[%s23671_s3 + $0x49c] sm:$0xf0] }
 0x1f9   :  { %v11388_v10 = vor.u32 %v15407_v9, %v11387_v8 }
 0x1fb   :  { %v1139_v14 = vpop.f32.mrf.mxu0 }
 0x1fc   :  { %v1582_v15 = vadd.f32 %v1581_v13, %v1139_v14  ;;  %v15256_v13 = vld [vmem:[%s23669_s0 + $0x2f8] sm:$0xff]  ;;  %v11227_v14 = vld [vmem:[%s23671_s3 + $0x340] sm:$0xf] }
 0x1fd   :  { %10806 = vmatmul.msk.bf16.vlgmr.msra.gmra.mxu3 %vm714_vm1, %v15256_v13 }
 0x203   :  { %v1142_v17 = vpop.f32.mrf.mxu0 }
 0x204   :  { %v1583_v18 = vadd.f32 %v1582_v15, %v1142_v17  ;;  %v15367_v15 = vld [vmem:[%s23671_s3 + $0x35c] sm:$0xf0] }
 0x206   :  { %10743 = vmatmul.msk.bf16.gmra.mxu0 %vm714_vm1, %v15193_v16  ;;  %v11228_v16 = vor.u32 %v15367_v15, %v11227_v14  ;;  %v11355_v14 = vld [vmem:[%s23671_s3 + $0x440] sm:$0xf] }
 0x207   :  { %v15399_v15 = vld [vmem:[%s23671_s3 + $0x45c] sm:$0xf0] }
 0x208   :  { %8029 = vmatpush.bf16.msrb.mxu2 %v11228_v16  ;;  %v11356_v16 = vor.u32 %v15399_v15, %v11355_v14  ;;  %v15203_v14 = vld [vmem:[%s23669_s0 + $0x150] sm:$0xff] }
 0x20b   :  { %v1144_v19 = vpop.f32.mrf.mxu0 }
 0x20c   :  { %v16545_v20 = vadd.f32 %v1583_v18, %v1144_v19  ;;  %v1637_v21 = vadd.f32 %v1144_v19, %v1142_v17  ;;  %v11195_v17 = vld [vmem:[%s23671_s3 + $0x300] sm:$0xf] }
 0x20d   :  { %v15359_v18 = vld [vmem:[%s23671_s3 + $0x31c] sm:$0xf0] }
 0x20e   :  { %v11196_v19 = vor.u32 %v15359_v18, %v11195_v17  ;;  %v11803_v17 = vld [vmem:[%s23671_s3 + $0x7c0] sm:$0xf] }
 0x20f   :  { %v15511_v18 = vld [vmem:[%s23671_s3 + $0x7dc] sm:$0xf0] }
 0x210   :  { %8030 = vmatpush.bf16.msrb.mxu2 %v11196_v19 }
 0x213   :  { %v1147_v23 = vpop.f32.mrf.mxu0 }
 0x214   :  { %v1638_v24 = vadd.f32 %v1637_v21, %v1147_v23  ;;  %v15198_v21 = vld [vmem:[%s23669_s0 + $0x128] sm:$0xff]  ;;  %v15255_v23 = vld [vmem:[%s23669_s0 + $0x2f0] sm:$0xff] }
 0x215   :  { %10805 = vmatmul.msk.bf16.gmra.mxu2 %vm714_vm1, %v15255_v23  ;;  %v11323_v23 = vld [vmem:[%s23671_s3 + $0x400] sm:$0xf] }
 0x216   :  { %10744 = vmatmul.msk.bf16.gmra.mxu0 %vm714_vm1, %v15194_v22 }
 0x21b   :  { %v1149_v25 = vpop.f32.mrf.mxu0 }
 0x21c   :  { %v1639_v26 = vadd.f32 %v1638_v24, %v1149_v25  ;;  %v11163_v24 = vld [vmem:[%s23671_s3 + $0x2c0] sm:$0xf] }
 0x223   :  { %v1152_v28 = vpop.f32.mrf.mxu0 }
 0x224   :  { %v16554_v29 = vadd.f32 %v1639_v26, %v1152_v28  ;;  %v1693_v30 = vadd.f32 %v1152_v28, %v1149_v25  ;;  %v15351_v25 = vld [vmem:[%s23671_s3 + $0x2dc] sm:$0xf0] }
 0x225   :  { %v11164_v26 = vor.u32 %v15351_v25, %v11163_v24  ;;  %v15343_v28 = vld [vmem:[%s23671_s3 + $0x29c] sm:$0xf0] }
 0x226   :  { %10745 = vmatmul.msk.bf16.gmra.mxu0 %vm714_vm1, %v15195_v27  ;;  %v11131_v27 = vld [vmem:[%s23671_s3 + $0x280] sm:$0xf]  ;;  %v1756_v6 = vadd.f32 %v16518_v56, %v16554_v29 }
 0x227   :  { %8031 = vmatpush.bf16.msrb.mxu2 %v11164_v26  ;;  %v15391_v24 = vld [vmem:[%s23671_s3 + $0x41c] sm:$0xf0] }
 0x228   :  { %v11771_v25 = vld [vmem:[%s23671_s3 + $0x780] sm:$0xf]  ;;  %v11324_v26 = vor.u32 %v15391_v24, %v11323_v23 }
 0x22b   :  { %v1154_v31 = vpop.f32.mrf.mxu0 }
 0x22c   :  { %v1694_v32 = vadd.f32 %v1693_v30, %v1154_v31  ;;  %v11132_v30 = vor.u32 %v15343_v28, %v11131_v27  ;;  %v15503_v27 = vld [vmem:[%s23671_s3 + $0x79c] sm:$0xf0] }
 0x22e   :  { %8032 = vmatpush.bf16.msrb.mxu2 %v11132_v30  ;;  %v11772_v30 = vor.u32 %v15503_v27, %v11771_v25  ;;  %v15204_v25 = vld [vmem:[%s23669_s0 + $0x158] sm:$0xff] }
 0x232   :  { %8033 = vmatpush.bf16.msrb.mxu2 %v11100_v35  ;;  %v15495_v35 = vld [vmem:[%s23671_s3 + $0x75c] sm:$0xf0] }
 0x233   :  { %v1157_v41 = vpop.f32.mrf.mxu0 }
 0x234   :  { %v1695_v42 = vadd.f32 %v1694_v32, %v1157_v41  ;;  %v15257_v32 = vld [vmem:[%s23669_s0 + $0x300] sm:$0xff] }
 0x235   :  { %10807 = vmatmul.msk.bf16.gmra.mxu3 %vm714_vm1, %v15257_v32  ;;  %v1749_v32 = vadd.f32 %v16509_v46, %v16545_v20  ;;  %v11707_v46 = vld [vmem:[%s23671_s3 + $0x700] sm:$0xf] }
 0x236   :  { %10746 = vmatmul.msk.bf16.gmra.mxu0 %vm714_vm1, %v15196_v40  ;;  %v11548_v40 = vor.u32 %v15447_v38, %v11547_v36  ;;  %v11740_v36 = vor.u32 %v15495_v35, %v11739_v34 }
 0x238   :  { %8040 = vmatpush.bf16.msrb.mxu3 %v11548_v40  ;;  %v15487_v40 = vld [vmem:[%s23671_s3 + $0x71c] sm:$0xf0] }
 0x23b   :  { %v1159_v50 = vpop.f32.mrf.mxu0 }
 0x23c   :  { %v16585_v51 = vadd.f32 %v1695_v42, %v1159_v50  ;;  %v11067_v42 = vld [vmem:[%s23671_s3 + $0x200] sm:$0xf]  ;;  %v11516_v50 = vor.u32 %v15439_v47, %v11515_v44 }
 0x23d   :  { %v11068_v45 = vor.u32 %v15327_v43, %v11067_v42  ;;  %v15201_v43 = vld [vmem:[%s23669_s0 + $0x140] sm:$0xff] }
 0x23e   :  { %8041 = vmatpush.bf16.msrb.mxu3 %v11516_v50  ;;  %v11675_v47 = vld [vmem:[%s23671_s3 + $0x6c0] sm:$0xf] }
 0x23f   :  { %8034 = vmatpush.bf16.msrb.mxu2 %v11068_v45  ;;  %v11643_v50 = vld [vmem:[%s23671_s3 + $0x680] sm:$0xf] }
 0x243   :  { %v1162_v60 = vpop.f32.mrf.mxu0 }
 0x245   :  { %10808 = vmatmul.msk.bf16.gmra.mxu3 %vm714_vm1, %v15258_v4  ;;  %v15202_v4 = vld [vmem:[%s23669_s0 + $0x148] sm:$0xff] }
 0x246   :  { %10747 = vmatmul.msk.bf16.gmra.mxu0 %vm714_vm1, %v15197_v59  ;;  %v11484_v59 = vor.u32 %v15431_v58, %v11483_v57  ;;  %v11611_v58 = vld [vmem:[%s23671_s3 + $0x640] sm:$0xf] }
 0x248   :  { %8042 = vmatpush.bf16.msrb.mxu3 %v11484_v59  ;;  %v15463_v59 = vld [vmem:[%s23671_s3 + $0x65c] sm:$0xf0] }
 0x24b   :  { %v1164_v11 = vpop.f32.mrf.mxu0 }
 0x24c   :  { %v1529_v39 = vadd.f32 %v1164_v11, %v1162_v60  ;;  %8043 = vmatpush.bf16.msrb.mxu3 %v11452_v63  ;;  %v15200_v11 = vld [vmem:[%s23669_s0 + $0x138] sm:$0xff]  ;;  %v15455_v63 = vld [vmem:[%s23671_s3 + $0x61c] sm:$0xf0] }
 0x250   :  { %8044 = vmatpush.bf16.msrb.mxu3 %v11420_v7  ;;  %v16852_v34 = vpop.f32.mrf.mxu2 }
 0x253   :  { %v1167_v22 = vpop.f32.mrf.mxu0 }
 0x254   :  { %v1530_v41 = vadd.f32 %v1529_v39, %v1167_v22  ;;  %8045 = vmatpush.bf16.msrb.mxu3 %v11388_v10 }
 0x256   :  { %10748 = vmatmul.msk.bf16.gmra.mxu0 %vm714_vm1, %v15198_v21  ;;  %v11804_v21 = vor.u32 %v15511_v18, %v11803_v17 }
 0x258   :  { %8046 = vmatpush.bf16.msrb.mxu3 %v11356_v16  ;;  %8053 = vmatpush.bf16.msrb.mxu1 %v11804_v21 }
 0x25b   :  { %v1169_v31 = vpop.f32.mrf.mxu0 }
 0x25c   :  { %v1531_v48 = vadd.f32 %v1530_v41, %v1169_v31  ;;  %8047 = vmatpush.bf16.msrb.mxu3 %v11324_v26  ;;  %8054 = vmatpush.bf16.msrb.mxu1 %v11772_v30  ;;  %v11708_v41 = vor.u32 %v15487_v40, %v11707_v46  ;;  %v15205_v30 = vld [vmem:[%s23669_s0 + $0x160] sm:$0xff]  ;;  %v15206_v46 = vld [vmem:[%s23669_s0 + $0x168] sm:$0xff] }
 0x260   :  { %8055 = vmatpush.bf16.msrb.mxu1 %v11740_v36 }
 0x263   :  { %v1172_v52 = vpop.f32.mrf.mxu0 }
 0x264   :  { %v16700_v54 = vadd.f32 %v1531_v48, %v1172_v52  ;;  %v1585_v19 = vadd.f32 %v1172_v52, %v1169_v31  ;;  %8056 = vmatpush.bf16.msrb.mxu1 %v11708_v41  ;;  %v15479_v48 = vld [vmem:[%s23671_s3 + $0x6dc] sm:$0xf0] }
 0x265   :  { %v15471_v52 = vld [vmem:[%s23671_s3 + $0x69c] sm:$0xf0] }
 0x266   :  { %v1740_v37 = vadd.f32 %v1739_v53, %v16700_v54  ;;  %10749 = vmatmul.msk.bf16.gmra.mxu0 %vm714_vm1, %v15199_v49  ;;  %v11676_v49 = vor.u32 %v15479_v48, %v11675_v47  ;;  %v11644_v53 = vor.u32 %v15471_v52, %v11643_v50  ;;  %v1768_v41 = vadd.f32 %v16700_v54, %v16538_v12 }
 0x268   :  { %v1744_v60 = vadd.f32 %v16705_v55, %v1740_v37  ;;  %8057 = vmatpush.bf16.msrb.mxu1 %v11676_v49  ;;  %v11612_v37 = vor.u32 %v15463_v59, %v11611_v58 }
 0x26a   :  { %v1745_v1 = vmax.f32 %v1744_v60, 0.0 }
 0x26b   :  { %v1174_v2 = vpop.f32.mrf.mxu0 }
 0x26c   :  { %v16722_v3 = vpack.c.bf16 %v1745_v1, %v1745_v1  ;;  %v1586_v22 = vadd.f32 %v1585_v19, %v1174_v2  ;;  %8058 = vmatpush.bf16.msrb.mxu1 %v11644_v53  ;;  %v11580_v1 = vor.u32 %v15455_v63, %v11579_v62  ;;  %v1763_v19 = vadd.f32 %v16525_v0, %v16585_v51 }
 0x26e   :  { %8022 = vmatmul.bf16.vlgmr.msra.gmra.mxu1 %v16722_v3 }
 0x270   :  { %8059 = vmatpush.bf16.msrb.mxu1 %v11612_v37 }
 0x273   :  { %v1177_v13 = vpop.f32.mrf.mxu0 }
 0x274   :  { %v1587_v28 = vadd.f32 %v1586_v22, %v1177_v13  ;;  %8060 = vmatpush.bf16.msrb.mxu1 %v11580_v1 }
 0x276   :  { %10750 = vmatmul.msk.bf16.gmra.mxu0 %vm714_vm1, %v15200_v11 }
 0x27b   :  { %v1179_v31 = vpop.f32.mrf.mxu0 }
 0x27c   :  { %v16771_v33 = vadd.f32 %v1587_v28, %v1179_v31  ;;  %v1641_v60 = vadd.f32 %v1179_v31, %v1177_v13 }
 0x27e   :  { %v1750_v38 = vadd.f32 %v1749_v32, %v16771_v33 }
 0x280   :  { %v1751_v39 = vadd.f32 %v16705_v55, %v1750_v38  ;;  %v16854_v38 = vpop.f32.mrf.mxu2 }
 0x282   :  { %v1752_v42 = vmax.f32 %v1751_v39, 0.0  ;;  %v1497_v39 = vpop.f32.mrf.mxu3 }
 0x283   :  { %v1182_v44 = vpop.f32.mrf.mxu0 }
 0x284   :  { %v16790_v45 = vpack.c.bf16 %v1752_v42, %v1752_v42  ;;  %v1642_v61 = vadd.f32 %v1641_v60, %v1182_v44 }
 0x286   :  { %10751 = vmatmul.msk.bf16.gmra.mxu0 %vm714_vm1, %v15201_v43  ;;  %8035 = vmatmul.bf16.vlgmr.msrb.gmra.mxu2 %v16790_v45 }
 0x28a   :  { %v1499_v48 = vpop.f32.mrf.mxu3 }
 0x28b   :  { %v1184_v57 = vpop.f32.mrf.mxu0 }
 0x28c   :  { %v1643_v2 = vadd.f32 %v1642_v61, %v1184_v57 }
 0x293   :  { %v1187_v5 = vpop.f32.mrf.mxu0 }
 0x294   :  { %v16823_v7 = vadd.f32 %v1643_v2, %v1187_v5  ;;  %v1697_v15 = vadd.f32 %v1187_v5, %v1184_v57  ;;  %v15207_v57 = vld [vmem:[%s23669_s0 + $0x170] sm:$0xff]  ;;  %v1775_v2 = vadd.f32 %v16771_v33, %v16545_v20  ;;  %v2876_v20 = vld [vmem:[%s23672_s4] sm:$0xff] }
 0x295   :  { %v15209_v33 = vld [vmem:[%s23669_s0 + $0x180] sm:$0xff] }
 0x296   :  { %v1757_v8 = vadd.f32 %v1756_v6, %v16823_v7  ;;  %10752 = vmatmul.msk.bf16.gmra.mxu0 %vm714_vm1, %v15202_v4 }
 0x298   :  { %v1758_v9 = vadd.f32 %v16705_v55, %v1757_v8  ;;  %v16864_v47 = vpop.f32.mrf.mxu2 }
 0x29a   :  { %v1759_v10 = vmax.f32 %v1758_v9, 0.0 }
 0x29b   :  { %v1189_v11 = vpop.f32.mrf.mxu0 }
 0x29c   :  { %v16828_v13 = vpack.c.bf16 %v1759_v10, %v1759_v10  ;;  %v1698_v16 = vadd.f32 %v1697_v15, %v1189_v11  ;;  %v15208_v10 = vld [vmem:[%s23669_s0 + $0x178] sm:$0xff] }
 0x29e   :  { %8048 = vmatmul.bf16.vlgmr.msrb.gmra.mxu3 %v16828_v13 }
 0x2a0   :  { %v16866_v52 = vpop.f32.mrf.mxu2 }
 0x2a1   :  { %v1677_v12 = vadd.f32 %v16866_v52, %v16864_v47 }
 0x2a3   :  { %v1192_v56 = vpop.f32.mrf.mxu0  ;;  %v1678_v59 = vadd.f32 %v1677_v12, %v1497_v39  ;;  %v15212_v12 = vld [vmem:[%s23669_s0 + $0x198] sm:$0xff] }
 0x2a4   :  { %v1699_v17 = vadd.f32 %v1698_v16, %v1192_v56 }
 0x2a5   :  { %v1679_v37 = vadd.f32 %v1678_v59, %v1499_v48 }
 0x2a6   :  { %10753 = vmatmul.msk.bf16.gmra.mxu0 %vm714_vm1, %v15203_v14 }
 0x2ab   :  { %v1194_v18 = vpop.f32.mrf.mxu0 }
 0x2ac   :  { %v16837_v21 = vadd.f32 %v1699_v17, %v1194_v18 }
 0x2ae   :  { %v1764_v22 = vadd.f32 %v1763_v19, %v16837_v21  ;;  %v1782_v19 = vadd.f32 %v16823_v7, %v16554_v29 }
 0x2b0   :  { %v1765_v23 = vadd.f32 %v16705_v55, %v1764_v22  ;;  %v2878_v22 = vperm.slane %v2876_v20, 0 }
 0x2b2   :  { %v1766_v24 = vmax.f32 %v1765_v23, 0.0 }
 0x2b3   :  { %v1197_v26 = vpop.f32.mrf.mxu0 }
 0x2b4   :  { %v16844_v27 = vpack.c.bf16 %v1766_v24, %v1766_v24 }
 0x2b6   :  { %10754 = vmatmul.msk.bf16.gmra.mxu0 %vm714_vm1, %v15204_v25  ;;  %8061 = vmatmul.bf16.vlgmr.msrb.gmra.mxu1 %v16844_v27 }
 0x2b8   :  { %v1502_v53 = vpop.f32.mrf.mxu3 }
 0x2b9   :  { %v16874_v60 = vadd.f32 %v1679_v37, %v1502_v53  ;;  %v1733_v62 = vadd.f32 %v1502_v53, %v1499_v48  ;;  %v15211_v48 = vld [vmem:[%s23669_s0 + $0x190] sm:$0xff] }
 0x2bb   :  { %v1199_v28 = vpop.f32.mrf.mxu0 }
 0x2bc   :  { %v1533_v0 = vadd.f32 %v1199_v28, %v1197_v26 }
 0x2c0   :  { %v1504_v61 = vpop.f32.mrf.mxu3 }
 0x2c1   :  { %v1734_v8 = vadd.f32 %v1733_v62, %v1504_v61  ;;  %v15213_v62 = vld [vmem:[%s23669_s0 + $0x1a0] sm:$0xff] }
 0x2c3   :  { %v1202_v31 = vpop.f32.mrf.mxu0 }
 0x2c4   :  { %v1534_v32 = vadd.f32 %v1533_v0, %v1202_v31 }
 0x2c6   :  { %10755 = vmatmul.msk.bf16.gmra.mxu0 %vm714_vm1, %v15205_v30 }
 0x2c8   :  { %v1507_v9 = vpop.f32.mrf.mxu3 }
 0x2c9   :  { %v16883_v11 = vadd.f32 %v1734_v8, %v1507_v9  ;;  %v15214_v8 = vld [vmem:[%s23669_s0 + $0x1a8] sm:$0xff] }
 0x2cb   :  { %v1204_v35 = vpop.f32.mrf.mxu0 }
 0x2cc   :  { %v1535_v36 = vadd.f32 %v1534_v32, %v1204_v35 }
 0x2d0   :  { %v16901_v29 = vpop.f32.mrf.mxu3 }
 0x2d3   :  { %v1207_v40 = vpop.f32.mrf.mxu0 }
 0x2d4   :  { %v1536_v42 = vadd.f32 %v1535_v36, %v1207_v40  ;;  %v1589_v43 = vadd.f32 %v1207_v40, %v1204_v35  ;;  %v15210_v35 = vld [vmem:[%s23669_s0 + $0x188] sm:$0xff] }
 0x2d6   :  { %v16861_v44 = vadd.f32 %v1768_v41, %v1536_v42  ;;  %10756 = vmatmul.msk.bf16.gmra.mxu0 %vm714_vm1, %v15206_v46  ;;  %v1789_v46 = vadd.f32 %v16837_v21, %v16585_v51 }
 0x2db   :  { %v1209_v49 = vpop.f32.mrf.mxu0 }
 0x2dc   :  { %v1590_v50 = vadd.f32 %v1589_v43, %v1209_v49 }
 0x2e3   :  { %v1212_v54 = vpop.f32.mrf.mxu0 }
 0x2e4   :  { %v1591_v58 = vadd.f32 %v1590_v50, %v1212_v54 }
 0x2e6   :  { %10757 = vmatmul.msk.bf16.gmra.mxu0 %vm714_vm1, %v15207_v57 }
 0x2eb   :  { %v1214_v63 = vpop.f32.mrf.mxu0  ;;  %v8023_v1 = vpop.f32.mrf.mxu1 }
 0x2ec   :  { %v1592_v4 = vadd.f32 %v1591_v58, %v1214_v63  ;;  %v1645_v5 = vadd.f32 %v1214_v63, %v1212_v54  ;;  %v8024_v26 = vadd.f32 %v8023_v1, %v2878_v22 }
 0x2ee   :  { %v16878_v6 = vadd.f32 %v1775_v2, %v1592_v4 }
 0x2f3   :  { %v1217_v14 = vpop.f32.mrf.mxu0  ;;  %v8025_v56 = vpop.f32.mrf.mxu1 }
 0x2f4   :  { %v1646_v15 = vadd.f32 %v1645_v5, %v1217_v14 }
 0x2f6   :  { %10758 = vmatmul.msk.bf16.gmra.mxu0 %vm714_vm1, %v15208_v10 }
 0x2fb   :  { %v1219_v16 = vpop.f32.mrf.mxu0 }
 0x2fc   :  { %v1647_v17 = vadd.f32 %v1646_v15, %v1219_v16 }
 0x303   :  { %v1222_v18 = vpop.f32.mrf.mxu0 }
 0x304   :  { %v1648_v23 = vadd.f32 %v1647_v17, %v1222_v18  ;;  %v1701_v24 = vadd.f32 %v1222_v18, %v1219_v16  ;;  %v15215_v16 = vld [vmem:[%s23669_s0 + $0x1b0] sm:$0xff] }
 0x306   :  { %v16894_v25 = vadd.f32 %v1782_v19, %v1648_v23  ;;  %10759 = vmatmul.msk.bf16.gmra.mxu0 %vm714_vm1, %v15209_v33  ;;  %v15216_v19 = vld [vmem:[%s23669_s0 + $0x1b8] sm:$0xff] }
 0x309   :  { %v8036_v28 = vpop.f32.mrf.mxu2 }
 0x30a   :  { %v8037_v0 = vadd.f32 %v8036_v28, %v8024_v26 }
 0x30b   :  { %v1224_v30 = vpop.f32.mrf.mxu0 }
 0x30c   :  { %v1702_v31 = vadd.f32 %v1701_v24, %v1224_v30  ;;  %v15575_v30 = vld [vmem:[%s23671_s3 + $0x9dc] sm:$0xf0] }
 0x311   :  { %v8038_v32 = vpop.f32.mrf.mxu2 }
 0x312   :  { %v12027_v32 = vld [vmem:[%s23671_s3 + $0x980] sm:$0xf] }
 0x313   :  { %v1227_v36 = vpop.f32.mrf.mxu0 }
 0x314   :  { %v1703_v39 = vadd.f32 %v1702_v31, %v1227_v36 }
 0x316   :  { %10760 = vmatmul.msk.bf16.gmra.mxu0 %vm714_vm1, %v15210_v35  ;;  %v15567_v35 = vld [vmem:[%s23671_s3 + $0x99c] sm:$0xf0] }
 0x317   :  { %v12028_v36 = vor.u32 %v15567_v35, %v12027_v32  ;;  %v15607_v32 = vld [vmem:[%s23671_s3 + $0xadc] sm:$0xf0] }
 0x31b   :  { %v1229_v7 = vpop.f32.mrf.mxu0 }
 0x31c   :  { %v1704_v40 = vadd.f32 %v1703_v39, %v1229_v7  ;;  %v15217_v39 = vld [vmem:[%s23669_s0 + $0x1c0] sm:$0xff] }
 0x31e   :  { %v16905_v41 = vadd.f32 %v1789_v46, %v1704_v40  ;;  %v11995_v40 = vld [vmem:[%s23671_s3 + $0x940] sm:$0xf] }
 0x321   :  { %v8049_v42 = vpop.f32.mrf.mxu3 }
 0x322   :  { %v8050_v43 = vadd.f32 %v8049_v42, %v8037_v0  ;;  %v12059_v0 = vld [vmem:[%s23671_s3 + $0x9c0] sm:$0xf] }
 0x323   :  { %v1232_v49 = vpop.f32.mrf.mxu0  ;;  %v12060_v31 = vor.u32 %v15575_v30, %v12059_v0  ;;  %v15559_v42 = vld [vmem:[%s23671_s3 + $0x95c] sm:$0xf0]  ;;  %v15219_v0 = vld [vmem:[%s23669_s0 + $0x1d0] sm:$0xff] }
 0x325   :  { %8066 = vmatpush.bf16.msra.mxu2 %v12060_v31  ;;  %v12187_v31 = vld [vmem:[%s23671_s3 + $0xac0] sm:$0xf] }
 0x326   :  { %10761 = vmatmul.msk.bf16.gmra.mxu0 %vm714_vm1, %v15211_v48  ;;  %v11963_v48 = vld [vmem:[%s23671_s3 + $0x900] sm:$0xf]  ;;  %v12188_v35 = vor.u32 %v15607_v32, %v12187_v31 }
 0x327   :  { %v12379_v32 = vld [vmem:[%s23671_s3 + $0xc40] sm:$0xf] }
 0x329   :  { %v8051_v50 = vpop.f32.mrf.mxu3  ;;  %8067 = vmatpush.bf16.msra.mxu2 %v12028_v36  ;;  %v12155_v36 = vld [vmem:[%s23671_s3 + $0xa80] sm:$0xf] }
 0x32b   :  { %v1234_v53 = vpop.f32.mrf.mxu0 }
 0x32c   :  { %v1537_v57 = vadd.f32 %v1234_v53, %v1232_v49  ;;  %v15551_v49 = vld [vmem:[%s23671_s3 + $0x91c] sm:$0xf0] }
 0x32d   :  { %v11964_v50 = vor.u32 %v15551_v49, %v11963_v48  ;;  %v15703_v49 = vld [vmem:[%s23671_s3 + $0xddc] sm:$0xf0] }
 0x333   :  { %v1237_v51 = vpop.f32.mrf.mxu0  ;;  %v8062_v21 = vpop.f32.mrf.mxu1 }
 0x334   :  { %v1538_v54 = vadd.f32 %v1537_v57, %v1237_v51  ;;  %v16914_v58 = vadd.f32 %v8062_v21, %v8050_v43  ;;  %v11996_v43 = vor.u32 %v15559_v42, %v11995_v40  ;;  %v15543_v51 = vld [vmem:[%s23671_s3 + $0x8dc] sm:$0xf0] }
 0x335   :  { %v12123_v40 = vld [vmem:[%s23671_s3 + $0xa40] sm:$0xf] }
 0x336   :  { %10762 = vmatmul.msk.bf16.gmra.mxu0 %vm714_vm1, %v15212_v12  ;;  %8068 = vmatpush.bf16.msra.mxu2 %v11996_v43  ;;  %v11931_v12 = vld [vmem:[%s23671_s3 + $0x8c0] sm:$0xf] }
 0x337   :  { %v11932_v21 = vor.u32 %v15543_v51, %v11931_v12  ;;  %v15591_v42 = vld [vmem:[%s23671_s3 + $0xa5c] sm:$0xf0] }
 0x338   :  { %v12571_v43 = vld [vmem:[%s23671_s3 + $0xdc0] sm:$0xf]  ;;  %v12124_v48 = vor.u32 %v15591_v42, %v12123_v40 }
 0x339   :  { %v12091_v51 = vld [vmem:[%s23671_s3 + $0xa00] sm:$0xf] }
 0x33a   :  { %8069 = vmatpush.bf16.msra.mxu2 %v11964_v50 }
 0x33b   :  { %v1239_v59 = vpop.f32.mrf.mxu0  ;;  %v8064_v37 = vpop.f32.mrf.mxu1 }
 0x33c   :  { %v1539_v61 = vadd.f32 %v1538_v54, %v1239_v59  ;;  %v11899_v54 = vld [vmem:[%s23671_s3 + $0x880] sm:$0xf] }
 0x33e   :  { %8070 = vmatpush.bf16.msra.mxu2 %v11932_v21  ;;  %v15583_v21 = vld [vmem:[%s23671_s3 + $0xa1c] sm:$0xf0] }
 0x343   :  { %v1242_v63 = vpop.f32.mrf.mxu0 }
 0x344   :  { %v16920_v1 = vadd.f32 %v1539_v61, %v1242_v63  ;;  %v1593_v2 = vadd.f32 %v1242_v63, %v1239_v59  ;;  %v15535_v59 = vld [vmem:[%s23671_s3 + $0x89c] sm:$0xf0]  ;;  %v15218_v61 = vld [vmem:[%s23669_s0 + $0x1c8] sm:$0xff] }
 0x345   :  { %v11900_v37 = vor.u32 %v15535_v59, %v11899_v54  ;;  %v11867_v63 = vld [vmem:[%s23671_s3 + $0x840] sm:$0xf]  ;;  %v12092_v59 = vor.u32 %v15583_v21, %v12091_v51 }
 0x346   :  { %10763 = vmatmul.msk.bf16.gmra.mxu0 %vm714_vm1, %v15213_v62  ;;  %v12539_v54 = vld [vmem:[%s23671_s3 + $0xd80] sm:$0xf] }
 0x347   :  { %8071 = vmatpush.bf16.msra.mxu2 %v11900_v37  ;;  %v15695_v37 = vld [vmem:[%s23671_s3 + $0xd9c] sm:$0xf0] }
 0x34b   :  { %v1244_v4 = vpop.f32.mrf.mxu0 }
 0x34c   :  { %v1594_v5 = vadd.f32 %v1593_v2, %v1244_v4  ;;  %v15527_v2 = vld [vmem:[%s23671_s3 + $0x85c] sm:$0xf0] }
 0x34d   :  { %v11868_v4 = vor.u32 %v15527_v2, %v11867_v63  ;;  %v12540_v63 = vor.u32 %v15695_v37, %v12539_v54  ;;  %v12763_v37 = vld [vmem:[%s23671_s3 + $0xf40] sm:$0xf] }
 0x34f   :  { %8072 = vmatpush.bf16.msra.mxu2 %v11868_v4  ;;  %v1770_v4 = vadd.f32 %v16861_v44, %v16920_v1  ;;  %v12475_v44 = vld [vmem:[%s23671_s3 + $0xd00] sm:$0xf] }
 0x353   :  { %v1247_v9 = vpop.f32.mrf.mxu0 }
 0x354   :  { %v1595_v10 = vadd.f32 %v1594_v5, %v1247_v9  ;;  %v12315_v5 = vld [vmem:[%s23671_s3 + $0xbc0] sm:$0xf] }
 0x356   :  { %10764 = vmatmul.msk.bf16.gmra.mxu0 %vm714_vm1, %v15214_v8  ;;  %v15639_v8 = vld [vmem:[%s23671_s3 + $0xbdc] sm:$0xf0] }
 0x35b   :  { %v1249_v14 = vpop.f32.mrf.mxu0 }
 0x35c   :  { %v16927_v56 = vadd.f32 %v1595_v10, %v1249_v14  ;;  %v1649_v15 = vadd.f32 %v1249_v14, %v1247_v9  ;;  %v12316_v9 = vor.u32 %v15639_v8, %v12315_v5  ;;  %v11835_v10 = vld [vmem:[%s23671_s3 + $0x800] sm:$0xf] }
 0x35d   :  { %v15519_v14 = vld [vmem:[%s23671_s3 + $0x81c] sm:$0xf0] }
 0x35e   :  { %8079 = vmatpush.bf16.msra.mxu3 %v12316_v9  ;;  %v12507_v8 = vld [vmem:[%s23671_s3 + $0xd40] sm:$0xf]  ;;  %v1777_v54 = vadd.f32 %v16878_v6, %v16927_v56 }
 0x35f   :  { %v15687_v9 = vld [vmem:[%s23671_s3 + $0xd5c] sm:$0xf0] }
 0x360   :  { %v12731_v6 = vld [vmem:[%s23671_s3 + $0xf00] sm:$0xf] }
 0x363   :  { %v1252_v17 = vpop.f32.mrf.mxu0 }
 0x364   :  { %v1650_v20 = vadd.f32 %v1649_v15, %v1252_v17  ;;  %v12283_v15 = vld [vmem:[%s23671_s3 + $0xb80] sm:$0xf] }
 0x365   :  { %v15631_v17 = vld [vmem:[%s23671_s3 + $0xb9c] sm:$0xf0] }
 0x366   :  { %10765 = vmatmul.msk.bf16.gmra.mxu0 %vm714_vm1, %v15215_v16  ;;  %v11836_v16 = vor.u32 %v15519_v14, %v11835_v10  ;;  %v12508_v10 = vor.u32 %v15687_v9, %v12507_v8 }
 0x368   :  { %8073 = vmatpush.bf16.msra.mxu2 %v11836_v16  ;;  %v15679_v16 = vld [vmem:[%s23671_s3 + $0xd1c] sm:$0xf0] }
 0x36b   :  { %v1254_v33 = vpop.f32.mrf.mxu0 }
 0x36c   :  { %v1651_v18 = vadd.f32 %v1650_v20, %v1254_v33  ;;  %v12284_v20 = vor.u32 %v15631_v17, %v12283_v15  ;;  %v12476_v17 = vor.u32 %v15679_v16, %v12475_v44  ;;  %v12699_v44 = vld [vmem:[%s23671_s3 + $0xec0] sm:$0xf] }
 0x36d   :  { %v15735_v16 = vld [vmem:[%s23671_s3 + $0xedc] sm:$0xf0] }
 0x36e   :  { %8080 = vmatpush.bf16.msra.mxu3 %v12284_v20 }
 0x373   :  { %v1257_v22 = vpop.f32.mrf.mxu0 }
 0x374   :  { %v16936_v23 = vadd.f32 %v1651_v18, %v1257_v22  ;;  %v1705_v24 = vadd.f32 %v1257_v22, %v1254_v33  ;;  %v12251_v18 = vld [vmem:[%s23671_s3 + $0xb40] sm:$0xf] }
 0x376   :  { %10766 = vmatmul.msk.bf16.gmra.mxu0 %vm714_vm1, %v15216_v19  ;;  %v15623_v19 = vld [vmem:[%s23671_s3 + $0xb5c] sm:$0xf0] }
 0x377   :  { %v12252_v22 = vor.u32 %v15623_v19, %v12251_v18  ;;  %v12443_v19 = vld [vmem:[%s23671_s3 + $0xcc0] sm:$0xf] }
 0x379   :  { %8081 = vmatpush.bf16.msra.mxu3 %v12252_v22  ;;  %v15671_v22 = vld [vmem:[%s23671_s3 + $0xcdc] sm:$0xf0] }
 0x37b   :  { %v1259_v26 = vpop.f32.mrf.mxu0 }
 0x37c   :  { %v1706_v28 = vadd.f32 %v1705_v24, %v1259_v26  ;;  %v12219_v24 = vld [vmem:[%s23671_s3 + $0xb00] sm:$0xf] }
 0x37d   :  { %v15615_v26 = vld [vmem:[%s23671_s3 + $0xb1c] sm:$0xf0] }
 0x383   :  { %v1262_v7 = vpop.f32.mrf.mxu0 }
 0x384   :  { %v1707_v46 = vadd.f32 %v1706_v28, %v1262_v7  ;;  %v12220_v28 = vor.u32 %v15615_v26, %v12219_v24  ;;  %v12444_v24 = vor.u32 %v15671_v22, %v12443_v19  ;;  %v12411_v26 = vld [vmem:[%s23671_s3 + $0xc80] sm:$0xf] }
 0x386   :  { %10767 = vmatmul.msk.bf16.gmra.mxu0 %vm714_vm1, %v15217_v39  ;;  %8082 = vmatpush.bf16.msra.mxu3 %v12220_v28  ;;  %v15599_v39 = vld [vmem:[%s23671_s3 + $0xa9c] sm:$0xf0] }
 0x387   :  { %v12156_v7 = vor.u32 %v15599_v39, %v12155_v36  ;;  %v15663_v28 = vld [vmem:[%s23671_s3 + $0xc9c] sm:$0xf0] }
 0x388   :  { %v12827_v39 = vld [vmem:[%s23671_s3 + $0xfc0] sm:$0xf] }
 0x38a   :  { %8083 = vmatpush.bf16.msra.mxu3 %v12188_v35  ;;  %v15655_v35 = vld [vmem:[%s23671_s3 + $0xc5c] sm:$0xf0] }
 0x38b   :  { %v1264_v53 = vpop.f32.mrf.mxu0  ;;  %v12380_v36 = vor.u32 %v15655_v35, %v12379_v32  ;;  %v12603_v32 = vld [vmem:[%s23671_s3 + $0xe00] sm:$0xf] }
 0x38c   :  { %v16967_v57 = vadd.f32 %v1707_v46, %v1264_v53  ;;  %v12572_v53 = vor.u32 %v15703_v49, %v12571_v43  ;;  %v15647_v49 = vld [vmem:[%s23671_s3 + $0xc1c] sm:$0xf0] }
 0x38d   :  { %v15711_v35 = vld [vmem:[%s23671_s3 + $0xe1c] sm:$0xf0] }
 0x38e   :  { %8084 = vmatpush.bf16.msra.mxu3 %v12156_v7  ;;  %8092 = vmatpush.bf16.msra.mxu1 %v12572_v53  ;;  %v15767_v7 = vld [vmem:[%s23671_s3 + $0xfdc] sm:$0xf0] }
 0x38f   :  { %v12828_v42 = vor.u32 %v15767_v7, %v12827_v39  ;;  %v15223_v7 = vld [vmem:[%s23669_s0 + $0x1f0] sm:$0xff] }
 0x391   :  { %8105 = vmatpush.bf16.msrb.mxu2 %v12828_v42 }
 0x392   :  { %8085 = vmatpush.bf16.msra.mxu3 %v12124_v48  ;;  %8093 = vmatpush.bf16.msra.mxu1 %v12540_v63  ;;  %v12347_v48 = vld [vmem:[%s23671_s3 + $0xc00] sm:$0xf] }
 0x393   :  { %v1267_v62 = vpop.f32.mrf.mxu0  ;;  %v12348_v53 = vor.u32 %v15647_v49, %v12347_v48 }
 0x396   :  { %10768 = vmatmul.msk.bf16.gmra.mxu0 %vm714_vm1, %v15218_v61  ;;  %8086 = vmatpush.bf16.msra.mxu3 %v12092_v59 }
 0x397   :  { %8094 = vmatpush.bf16.msra.mxu1 %v12508_v10  ;;  %v15222_v10 = vld [vmem:[%s23669_s0 + $0x1e8] sm:$0xff] }
 0x39b   :  { %v1269_v33 = vpop.f32.mrf.mxu0  ;;  %8095 = vmatpush.bf16.msra.mxu1 %v12476_v17  ;;  %v12700_v17 = vor.u32 %v15735_v16, %v12699_v44 }
 0x39c   :  { %v1541_v50 = vadd.f32 %v1269_v33, %v1267_v62  ;;  %v15220_v62 = vld [vmem:[%s23669_s0 + $0x1d8] sm:$0xff] }
 0x39f   :  { %8096 = vmatpush.bf16.msra.mxu1 %v12444_v24  ;;  %v12635_v24 = vld [vmem:[%s23671_s3 + $0xe40] sm:$0xf] }
 0x3a3   :  { %v1272_v30 = vpop.f32.mrf.mxu0 }
 0x3a4   :  { %v1542_v12 = vadd.f32 %v1541_v50, %v1272_v30  ;;  %v15221_v30 = vld [vmem:[%s23669_s0 + $0x1e0] sm:$0xff] }
 0x3a5   :  { %v12795_v50 = vld [vmem:[%s23671_s3 + $0xf80] sm:$0xf] }
 0x3a6   :  { %10769 = vmatmul.msk.bf16.gmra.mxu0 %vm714_vm1, %v15219_v0  ;;  %v12412_v0 = vor.u32 %v15663_v28, %v12411_v26  ;;  %v15719_v26 = vld [vmem:[%s23671_s3 + $0xe5c] sm:$0xf0] }
 0x3a7   :  { %v12636_v28 = vor.u32 %v15719_v26, %v12635_v24 }
 0x3a8   :  { %8097 = vmatpush.bf16.msra.mxu1 %v12412_v0 }
 0x3ab   :  { %v1274_v46 = vpop.f32.mrf.mxu0 }
 0x3ac   :  { %v1543_v61 = vadd.f32 %v1542_v12, %v1274_v46  ;;  %8098 = vmatpush.bf16.msra.mxu1 %v12380_v36  ;;  %v12604_v36 = vor.u32 %v15711_v35, %v12603_v32 }
 0x3b0   :  { %8099 = vmatpush.bf16.msra.mxu1 %v12348_v53 }
 0x3b3   :  { %v1277_v2 = vpop.f32.mrf.mxu0 }
 0x3b4   :  { %v17066_v5 = vadd.f32 %v1543_v61, %v1277_v2  ;;  %v1597_v40 = vadd.f32 %v1277_v2, %v1274_v46  ;;  %v15759_v46 = vld [vmem:[%s23671_s3 + $0xf9c] sm:$0xf0] }
 0x3b5   :  { %v12796_v51 = vor.u32 %v15759_v46, %v12795_v50  ;;  %v15751_v61 = vld [vmem:[%s23671_s3 + $0xf5c] sm:$0xf0]  ;;  %v15224_v46 = vld [vmem:[%s23669_s0 + $0x1f8] sm:$0xff] }
 0x3b6   :  { %v1771_v14 = vadd.f32 %v1770_v4, %v17066_v5  ;;  %10770 = vmatmul.msk.bf16.gmra.mxu0 %vm714_vm1, %v15220_v62  ;;  %v12764_v62 = vor.u32 %v15751_v61, %v12763_v37  ;;  %v15743_v4 = vld [vmem:[%s23671_s3 + $0xf1c] sm:$0xf0]  ;;  %v1791_v37 = vadd.f32 %v16905_v41, %v16967_v57  ;;  %v15226_v41 = vld [vmem:[%s23669_s0 + $0x208] sm:$0xff] }
 0x3b7   :  { %8106 = vmatpush.bf16.msrb.mxu2 %v12796_v51  ;;  %v12732_v8 = vor.u32 %v15743_v4, %v12731_v6  ;;  %v15225_v6 = vld [vmem:[%s23669_s0 + $0x200] sm:$0xff] }
 0x3b8   :  { %v1772_v15 = vadd.f32 %v16705_v55, %v1771_v14 }
 0x3ba   :  { %v1773_v20 = vmax.f32 %v1772_v15, 0.0 }
 0x3bb   :  { %v1279_v33 = vpop.f32.mrf.mxu0  ;;  %8107 = vmatpush.bf16.msrb.mxu2 %v12764_v62 }
 0x3bc   :  { %v17083_v18 = vpack.c.bf16 %v1773_v20, %v1773_v20  ;;  %v1598_v43 = vadd.f32 %v1597_v40, %v1279_v33  ;;  %v12667_v20 = vld [vmem:[%s23671_s3 + $0xe80] sm:$0xf] }
 0x3bd   :  { %v15727_v33 = vld [vmem:[%s23671_s3 + $0xe9c] sm:$0xf0] }
 0x3be   :  { %8074 = vmatmul.bf16.vlgmr.msra.gmra.mxu2 %v17083_v18  ;;  %v12668_v19 = vor.u32 %v15727_v33, %v12667_v20  ;;  %v1796_v33 = vadd.f32 %v17066_v5, %v16920_v1 }
 0x3bf   :  { %8108 = vmatpush.bf16.msrb.mxu2 %v12732_v8 }
 0x3c3   :  { %v1282_v31 = vpop.f32.mrf.mxu0  ;;  %8109 = vmatpush.bf16.msrb.mxu2 %v12700_v17  ;;  %v15227_v17 = vld [vmem:[%s23669_s0 + $0x210] sm:$0xff] }
 0x3c4   :  { %v1599_v12 = vadd.f32 %v1598_v43, %v1282_v31 }
 0x3c6   :  { %10771 = vmatmul.msk.bf16.gmra.mxu0 %vm714_vm1, %v15221_v30 }
 0x3c7   :  { %8110 = vmatpush.bf16.msrb.mxu2 %v12668_v19 }
 0x3cb   :  { %v1284_v21 = vpop.f32.mrf.mxu0  ;;  %8111 = vmatpush.bf16.msrb.mxu2 %v12636_v28 }
 0x3cc   :  { %v17128_v59 = vadd.f32 %v1599_v12, %v1284_v21  ;;  %v1653_v0 = vadd.f32 %v1284_v21, %v1282_v31  ;;  %v1784_v31 = vadd.f32 %v16894_v25, %v16936_v23 }
 0x3ce   :  { %v1778_v63 = vadd.f32 %v1777_v54, %v17128_v59  ;;  %v1803_v1 = vadd.f32 %v17128_v59, %v16927_v56  ;;  %v15230_v56 = vld [vmem:[%s23669_s0 + $0x228] sm:$0xff] }
 0x3cf   :  { %8112 = vmatpush.bf16.msrb.mxu2 %v12604_v36 }
 0x3d0   :  { %v1779_v2 = vadd.f32 %v16705_v55, %v1778_v63 }
 0x3d2   :  { %v1780_v9 = vmax.f32 %v1779_v2, 0.0 }
 0x3d3   :  { %v1287_v14 = vpop.f32.mrf.mxu0 }
 0x3d4   :  { %v17147_v15 = vpack.c.bf16 %v1780_v9, %v1780_v9  ;;  %v1654_v30 = vadd.f32 %v1653_v0, %v1287_v14  ;;  %v15228_v0 = vld [vmem:[%s23669_s0 + $0x218] sm:$0xff] }
 0x3d6   :  { %10772 = vmatmul.msk.bf16.gmra.mxu0 %vm714_vm1, %v15222_v10  ;;  %8087 = vmatmul.bf16.vlgmr.msra.gmra.mxu3 %v17147_v15 }
 0x3db   :  { %v1289_v22 = vpop.f32.mrf.mxu0 }
 0x3dc   :  { %v1655_v39 = vadd.f32 %v1654_v30, %v1289_v22 }
 0x3e3   :  { %v1292_v40 = vpop.f32.mrf.mxu0 }
 0x3e4   :  { %v17180_v42 = vadd.f32 %v1655_v39, %v1292_v40  ;;  %v1709_v12 = vadd.f32 %v1292_v40, %v1289_v22 }
 0x3e6   :  { %v1785_v43 = vadd.f32 %v1784_v31, %v17180_v42  ;;  %10773 = vmatmul.msk.bf16.gmra.mxu0 %vm714_vm1, %v15223_v7  ;;  %v15229_v31 = vld [vmem:[%s23669_s0 + $0x220] sm:$0xff] }
 0x3e8   :  { %v1786_v48 = vadd.f32 %v16705_v55, %v1785_v43 }
 0x3ea   :  { %v1787_v49 = vmax.f32 %v1786_v48, 0.0 }
 0x3eb   :  { %v1294_v50 = vpop.f32.mrf.mxu0 }
 0x3ec   :  { %v17185_v53 = vpack.c.bf16 %v1787_v49, %v1787_v49  ;;  %v1710_v51 = vadd.f32 %v1709_v12, %v1294_v50 }
 0x3ee   :  { %8100 = vmatmul.bf16.vlgmr.msra.gmra.mxu1 %v17185_v53 }
 0x3f3   :  { %v1297_v25 = vpop.f32.mrf.mxu0 }
 0x3f4   :  { %v1711_v21 = vadd.f32 %v1710_v51, %v1297_v25  ;;  %v1810_v25 = vadd.f32 %v17180_v42, %v16936_v23 }
 0x3f6   :  { %10774 = vmatmul.msk.bf16.gmra.mxu0 %vm714_vm1, %v15224_v46 }
 0x3fb   :  { %v1299_v54 = vpop.f32.mrf.mxu0 }
 0x3fc   :  { %v1712_v61 = vadd.f32 %v1711_v21, %v1299_v54 }
 0x3fe   :  { %v1792_v62 = vadd.f32 %v1791_v37, %v1712_v61 }
 0x400   :  { %v1793_v63 = vadd.f32 %v16705_v55, %v1792_v62 }
 0x402   :  { %v1794_v2 = vmax.f32 %v1793_v63, 0.0 }
 0x403   :  { %v1302_v4 = vpop.f32.mrf.mxu0 }
 0x404   :  { %v17198_v8 = vpack.c.bf16 %v1794_v2, %v1794_v2  ;;  %v15231_v2 = vld [vmem:[%s23669_s0 + $0x230] sm:$0xff] }
 0x406   :  { %10775 = vmatmul.msk.bf16.gmra.mxu0 %vm714_vm1, %v15225_v6  ;;  %8113 = vmatmul.bf16.vlgmr.msrb.gmra.mxu2 %v17198_v8 }
 0x40b   :  { %v1304_v9 = vpop.f32.mrf.mxu0 }
 0x40c   :  { %v1545_v10 = vadd.f32 %v1304_v9, %v1302_v4  ;;  %v1817_v9 = vadd.f32 %v1712_v61, %v16967_v57 }
 0x413   :  { %v1307_v14 = vpop.f32.mrf.mxu0 }
 0x414   :  { %v1546_v55 = vadd.f32 %v1545_v10, %v1307_v14 }
 0x416   :  { %10776 = vmatmul.msk.bf16.gmra.mxu0 %vm714_vm1, %v15226_v41 }
 0x41b   :  { %v1309_v44 = vpop.f32.mrf.mxu0 }
 0x41c   :  { %v1547_v16 = vadd.f32 %v1546_v55, %v1309_v44  ;;  %v15232_v55 = vld [vmem:[%s23669_s0 + $0x238] sm:$0xff] }
 0x423   :  { %v1312_v20 = vpop.f32.mrf.mxu0 }
 0x424   :  { %v1548_v19 = vadd.f32 %v1547_v16, %v1312_v20  ;;  %v1601_v22 = vadd.f32 %v1312_v20, %v1309_v44 }
 0x426   :  { %v17211_v24 = vadd.f32 %v1796_v33, %v1548_v19  ;;  %10777 = vmatmul.msk.bf16.gmra.mxu0 %vm714_vm1, %v15227_v17  ;;  %v15233_v33 = vld [vmem:[%s23669_s0 + $0x240] sm:$0xff] }
 0x42b   :  { %v1314_v26 = vpop.f32.mrf.mxu0 }
 0x42c   :  { %v1602_v28 = vadd.f32 %v1601_v22, %v1314_v26 }
 0x433   :  { %v1317_v30 = vpop.f32.mrf.mxu0 }
 0x434   :  { %v1603_v32 = vadd.f32 %v1602_v28, %v1317_v30 }
 0x436   :  { %10778 = vmatmul.msk.bf16.gmra.mxu0 %vm714_vm1, %v15228_v0 }
 0x43b   :  { %v1319_v35 = vpop.f32.mrf.mxu0 }
 0x43c   :  { %v1604_v5 = vadd.f32 %v1603_v32, %v1319_v35  ;;  %v1657_v36 = vadd.f32 %v1319_v35, %v1317_v30  ;;  %v15234_v30 = vld [vmem:[%s23669_s0 + $0x248] sm:$0xff] }
 0x43e   :  { %v17220_v39 = vadd.f32 %v1803_v1, %v1604_v5 }
 0x441   :  { %v8075_v7 = vpop.f32.mrf.mxu2 }
 0x442   :  { %v8076_v40 = vadd.f32 %v8075_v7, %v16914_v58  ;;  %v15235_v7 = vld [vmem:[%s23669_s0 + $0x250] sm:$0xff] }
 0x443   :  { %v1322_v43 = vpop.f32.mrf.mxu0 }
 0x444   :  { %v1658_v48 = vadd.f32 %v1657_v36, %v1322_v43 }
 0x446   :  { %10779 = vmatmul.msk.bf16.gmra.mxu0 %vm714_vm1, %v15229_v31 }
 0x449   :  { %v8077_v49 = vpop.f32.mrf.mxu2 }
 0x44b   :  { %v1324_v50 = vpop.f32.mrf.mxu0 }
 0x44c   :  { %v1659_v46 = vadd.f32 %v1658_v48, %v1324_v50 }
 0x453   :  { %v1327_v59 = vpop.f32.mrf.mxu0 }
 0x454   :  { %v1660_v58 = vadd.f32 %v1659_v46, %v1327_v59  ;;  %v1713_v12 = vadd.f32 %v1327_v59, %v1324_v50  ;;  %v15236_v50 = vld [vmem:[%s23669_s0 + $0x258] sm:$0xff] }
 0x456   :  { %v17232_v51 = vadd.f32 %v1810_v25, %v1660_v58  ;;  %10780 = vmatmul.msk.bf16.gmra.mxu0 %vm714_vm1, %v15230_v56  ;;  %v15237_v58 = vld [vmem:[%s23669_s0 + $0x260] sm:$0xff] }
 0x459   :  { %v8088_v21 = vpop.f32.mrf.mxu3 }
 0x45a   :  { %v8089_v54 = vadd.f32 %v8088_v21, %v8076_v40 }
 0x45b   :  { %v1329_v37 = vpop.f32.mrf.mxu0 }
 0x45c   :  { %v1714_v62 = vadd.f32 %v1713_v12, %v1329_v37 }
 0x461   :  { %v8090_v63 = vpop.f32.mrf.mxu3 }
 0x462   :  { %v13083_v63 = vld [vmem:[%s23671_s3 + $0x11c0] sm:$0xf] }
 0x463   :  { %v1332_v6 = vpop.f32.mrf.mxu0 }
 0x464   :  { %v1715_v4 = vadd.f32 %v1714_v62, %v1332_v6 }
 0x466   :  { %10781 = vmatmul.msk.bf16.gmra.mxu0 %vm714_vm1, %v15231_v2  ;;  %v15831_v2 = vld [vmem:[%s23671_s3 + $0x11dc] sm:$0xf0] }
 0x467   :  { %v13084_v6 = vor.u32 %v15831_v2, %v13083_v63  ;;  %v13243_v63 = vld [vmem:[%s23671_s3 + $0x1300] sm:$0xf] }
 0x468   :  { %v15871_v2 = vld [vmem:[%s23671_s3 + $0x131c] sm:$0xf0] }
 0x469   :  { %8118 = vmatpush.bf16.msrb.mxu3 %v13084_v6  ;;  %v13244_v6 = vor.u32 %v15871_v2, %v13243_v63 }
 0x46b   :  { %v1334_v23 = vpop.f32.mrf.mxu0  ;;  %v8101_v42 = vpop.f32.mrf.mxu1 }
 0x46c   :  { %v1716_v10 = vadd.f32 %v1715_v4, %v1334_v23  ;;  %v8102_v41 = vadd.f32 %v8101_v42, %v8089_v54  ;;  %v13051_v4 = vld [vmem:[%s23671_s3 + $0x1180] sm:$0xf] }
 0x46d   :  { %v15823_v23 = vld [vmem:[%s23671_s3 + $0x119c] sm:$0xf0] }
 0x46e   :  { %v17240_v14 = vadd.f32 %v1817_v9, %v1716_v10  ;;  %v13052_v42 = vor.u32 %v15823_v23, %v13051_v4  ;;  %v15238_v9 = vld [vmem:[%s23669_s0 + $0x268] sm:$0xff]  ;;  %v15240_v4 = vld [vmem:[%s23669_s0 + $0x278] sm:$0xff] }
 0x470   :  { %8119 = vmatpush.bf16.msrb.mxu3 %v13052_v42  ;;  %v13211_v42 = vld [vmem:[%s23671_s3 + $0x12c0] sm:$0xf] }
 0x473   :  { %v1337_v44 = vpop.f32.mrf.mxu0  ;;  %v8103_v16 = vpop.f32.mrf.mxu1 }
 0x476   :  { %10782 = vmatmul.msk.bf16.gmra.mxu0 %vm714_vm1, %v15232_v55  ;;  %v13019_v55 = vld [vmem:[%s23671_s3 + $0x1140] sm:$0xf] }
 0x47b   :  { %v1339_v17 = vpop.f32.mrf.mxu0 }
 0x47c   :  { %v1549_v20 = vadd.f32 %v1339_v17, %v1337_v44  ;;  %v15815_v44 = vld [vmem:[%s23671_s3 + $0x115c] sm:$0xf0] }
 0x47d   :  { %v13020_v16 = vor.u32 %v15815_v44, %v13019_v55  ;;  %v12987_v17 = vld [vmem:[%s23671_s3 + $0x1100] sm:$0xf] }
 0x47e   :  { %v15855_v55 = vld [vmem:[%s23671_s3 + $0x129c] sm:$0xf0] }
 0x47f   :  { %8120 = vmatpush.bf16.msrb.mxu3 %v13020_v16 }
 0x483   :  { %v1342_v19 = vpop.f32.mrf.mxu0 }
 0x484   :  { %v1550_v57 = vadd.f32 %v1549_v20, %v1342_v19  ;;  %v15807_v20 = vld [vmem:[%s23671_s3 + $0x111c] sm:$0xf0] }
 0x486   :  { %10783 = vmatmul.msk.bf16.gmra.mxu0 %vm714_vm1, %v15233_v33  ;;  %v12988_v33 = vor.u32 %v15807_v20, %v12987_v17  ;;  %v13147_v17 = vld [vmem:[%s23671_s3 + $0x1240] sm:$0xf] }
 0x487   :  { %v15847_v20 = vld [vmem:[%s23671_s3 + $0x125c] sm:$0xf0] }
 0x488   :  { %8121 = vmatpush.bf16.msrb.mxu3 %v12988_v33  ;;  %v13595_v33 = vld [vmem:[%s23671_s3 + $0x15c0] sm:$0xf] }
 0x489   :  { %v8114_v61 = vpop.f32.mrf.mxu2 }
 0x48a   :  { %v17250_v22 = vadd.f32 %v8114_v61, %v8102_v41  ;;  %v12955_v61 = vld [vmem:[%s23671_s3 + $0x10c0] sm:$0xf] }
 0x48b   :  { %v1344_v26 = vpop.f32.mrf.mxu0 }
 0x48c   :  { %v1551_v28 = vadd.f32 %v1550_v57, %v1344_v26 }
 0x491   :  { %v8116_v0 = vpop.f32.mrf.mxu2 }
 0x492   :  { %v12923_v0 = vld [vmem:[%s23671_s3 + $0x1080] sm:$0xf] }
 0x493   :  { %v1347_v32 = vpop.f32.mrf.mxu0 }
 0x494   :  { %v17255_v35 = vadd.f32 %v1551_v28, %v1347_v32  ;;  %v1605_v1 = vadd.f32 %v1347_v32, %v1344_v26  ;;  %v15799_v26 = vld [vmem:[%s23671_s3 + $0x10dc] sm:$0xf0] }
 0x495   :  { %v12956_v28 = vor.u32 %v15799_v26, %v12955_v61  ;;  %v15959_v61 = vld [vmem:[%s23671_s3 + $0x15dc] sm:$0xf0] }
 0x496   :  { %10784 = vmatmul.msk.bf16.gmra.mxu0 %vm714_vm1, %v15234_v30  ;;  %v15791_v30 = vld [vmem:[%s23671_s3 + $0x109c] sm:$0xf0] }
 0x497   :  { %8122 = vmatpush.bf16.msrb.mxu3 %v12956_v28  ;;  %v12924_v32 = vor.u32 %v15791_v30, %v12923_v0  ;;  %v13596_v28 = vor.u32 %v15959_v61, %v13595_v33  ;;  %v13115_v30 = vld [vmem:[%s23671_s3 + $0x1200] sm:$0xf] }
 0x498   :  { %v13851_v33 = vld [vmem:[%s23671_s3 + $0x17c0] sm:$0xf] }
 0x499   :  { %8144 = vmatpush.bf16.msra.mxu2 %v13596_v28 }
 0x49b   :  { %v1349_v5 = vpop.f32.mrf.mxu0  ;;  %8123 = vmatpush.bf16.msrb.mxu3 %v12924_v32  ;;  %v15839_v32 = vld [vmem:[%s23671_s3 + $0x121c] sm:$0xf0] }
 0x49c   :  { %v1606_v36 = vadd.f32 %v1605_v1, %v1349_v5  ;;  %v15239_v1 = vld [vmem:[%s23669_s0 + $0x270] sm:$0xff] }
 0x4a3   :  { %v1352_v40 = vpop.f32.mrf.mxu0 }
 0x4a4   :  { %v1607_v31 = vadd.f32 %v1606_v36, %v1352_v40  ;;  %v12891_v36 = vld [vmem:[%s23671_s3 + $0x1040] sm:$0xf] }
 0x4a6   :  { %10785 = vmatmul.msk.bf16.gmra.mxu0 %vm714_vm1, %v15235_v7  ;;  %v15783_v7 = vld [vmem:[%s23671_s3 + $0x105c] sm:$0xf0] }
 0x4ab   :  { %v1354_v43 = vpop.f32.mrf.mxu0 }
 0x4ac   :  { %v17262_v48 = vadd.f32 %v1607_v31, %v1354_v43  ;;  %v1661_v49 = vadd.f32 %v1354_v43, %v1352_v40  ;;  %v12892_v40 = vor.u32 %v15783_v7, %v12891_v36  ;;  %v13339_v31 = vld [vmem:[%s23671_s3 + $0x13c0] sm:$0xf]  ;;  %v13116_v36 = vor.u32 %v15839_v32, %v13115_v30 }
 0x4ad   :  { %v15895_v43 = vld [vmem:[%s23671_s3 + $0x13dc] sm:$0xf0] }
 0x4ae   :  { %8124 = vmatpush.bf16.msrb.mxu3 %v12892_v40  ;;  %v15241_v40 = vld [vmem:[%s23669_s0 + $0x280] sm:$0xff] }
 0x4af   :  { %v15903_v30 = vld [vmem:[%s23671_s3 + $0x141c] sm:$0xf0] }
 0x4b0   :  { %v13819_v32 = vld [vmem:[%s23671_s3 + $0x1780] sm:$0xf] }
 0x4b3   :  { %v1357_v46 = vpop.f32.mrf.mxu0 }
 0x4b4   :  { %v1662_v56 = vadd.f32 %v1661_v49, %v1357_v46  ;;  %v13340_v49 = vor.u32 %v15895_v43, %v13339_v31  ;;  %v15775_v46 = vld [vmem:[%s23671_s3 + $0x101c] sm:$0xf0] }
 0x4b6   :  { %10786 = vmatmul.msk.bf16.gmra.mxu0 %vm714_vm1, %v15236_v50  ;;  %8131 = vmatpush.bf16.msrb.mxu1 %v13340_v49  ;;  %v12859_v50 = vld [vmem:[%s23671_s3 + $0x1000] sm:$0xf]  ;;  %v1798_v49 = vadd.f32 %v17211_v24, %v17255_v35 }
 0x4b7   :  { %v17414_v24 = vld [vmem:[%s23670_s2] ss:$0 sm:$0xff] }
 0x4bb   :  { %v1359_v59 = vpop.f32.mrf.mxu0 }
 0x4bc   :  { %v1663_v25 = vadd.f32 %v1662_v56, %v1359_v59  ;;  %v13307_v56 = vld [vmem:[%s23671_s3 + $0x1380] sm:$0xf] }
 0x4c3   :  { %v1362_v12 = vpop.f32.mrf.mxu0 }
 0x4c4   :  { %v17271_v21 = vadd.f32 %v1663_v25, %v1362_v12  ;;  %v1717_v54 = vadd.f32 %v1362_v12, %v1359_v59  ;;  %v12860_v59 = vor.u32 %v15775_v46, %v12859_v50  ;;  %v15887_v25 = vld [vmem:[%s23671_s3 + $0x139c] sm:$0xf0] }
 0x4c5   :  { %v13531_v46 = vld [vmem:[%s23671_s3 + $0x1540] sm:$0xf] }
 0x4c6   :  { %10787 = vmatmul.msk.bf16.gmra.mxu0 %vm714_vm1, %v15237_v58  ;;  %v13308_v58 = vor.u32 %v15887_v25, %v13307_v56  ;;  %8125 = vmatpush.bf16.msrb.mxu3 %v12860_v59  ;;  %v15943_v56 = vld [vmem:[%s23671_s3 + $0x155c] sm:$0xf0] }
 0x4c7   :  { %v13532_v59 = vor.u32 %v15943_v56, %v13531_v46 }
 0x4c8   :  { %8132 = vmatpush.bf16.msrb.mxu1 %v13308_v58 }
 0x4cb   :  { %v1364_v37 = vpop.f32.mrf.mxu0 }
 0x4cc   :  { %v1718_v62 = vadd.f32 %v1717_v54, %v1364_v37  ;;  %v13275_v54 = vld [vmem:[%s23671_s3 + $0x1340] sm:$0xf] }
 0x4cd   :  { %v15879_v37 = vld [vmem:[%s23671_s3 + $0x135c] sm:$0xf0] }
 0x4d3   :  { %v1367_v10 = vpop.f32.mrf.mxu0 }
 0x4d4   :  { %v1719_v41 = vadd.f32 %v1718_v62, %v1367_v10  ;;  %v13276_v62 = vor.u32 %v15879_v37, %v13275_v54  ;;  %v15935_v54 = vld [vmem:[%s23671_s3 + $0x151c] sm:$0xf0] }
 0x4d6   :  { %10788 = vmatmul.msk.bf16.gmra.mxu0 %vm714_vm1, %v15238_v9  ;;  %8133 = vmatpush.bf16.msrb.mxu1 %v13276_v62  ;;  %v15863_v9 = vld [vmem:[%s23671_s3 + $0x12dc] sm:$0xf0] }
 0x4d7   :  { %v13212_v10 = vor.u32 %v15863_v9, %v13211_v42  ;;  %v13435_v42 = vld [vmem:[%s23671_s3 + $0x1480] sm:$0xf] }
 0x4d8   :  { %v15919_v9 = vld [vmem:[%s23671_s3 + $0x149c] sm:$0xf0] }
 0x4da   :  { %8134 = vmatpush.bf16.msrb.mxu1 %v13244_v6  ;;  %v13467_v6 = vld [vmem:[%s23671_s3 + $0x14c0] sm:$0xf] }
 0x4db   :  { %v1369_v19 = vpop.f32.mrf.mxu0 }
 0x4dc   :  { %v17302_v57 = vadd.f32 %v1719_v41, %v1369_v19  ;;  %v13179_v41 = vld [vmem:[%s23671_s3 + $0x1280] sm:$0xf]  ;;  %v13148_v19 = vor.u32 %v15847_v20, %v13147_v17 }
 0x4dd   :  { %v13180_v44 = vor.u32 %v15855_v55, %v13179_v41  ;;  %v15242_v41 = vld [vmem:[%s23669_s0 + $0x288] sm:$0xff]  ;;  %v15911_v17 = vld [vmem:[%s23671_s3 + $0x145c] sm:$0xf0] }
 0x4de   :  { %8135 = vmatpush.bf16.msrb.mxu1 %v13212_v10  ;;  %v13436_v10 = vor.u32 %v15919_v9, %v13435_v42  ;;  %v15983_v42 = vld [vmem:[%s23671_s3 + $0x169c] sm:$0xf0] }
 0x4e2   :  { %8136 = vmatpush.bf16.msrb.mxu1 %v13180_v44  ;;  %v13403_v44 = vld [vmem:[%s23671_s3 + $0x1440] sm:$0xf] }
 0x4e3   :  { %v1372_v5 = vpop.f32.mrf.mxu0  ;;  %v13404_v20 = vor.u32 %v15911_v17, %v13403_v44  ;;  %v15975_v44 = vld [vmem:[%s23671_s3 + $0x165c] sm:$0xf0] }
 0x4e6   :  { %10789 = vmatmul.msk.bf16.gmra.mxu0 %vm714_vm1, %v15239_v1  ;;  %8137 = vmatpush.bf16.msrb.mxu1 %v13148_v19  ;;  %v13563_v1 = vld [vmem:[%s23671_s3 + $0x1580] sm:$0xf] }
 0x4e7   :  { %v16023_v19 = vld [vmem:[%s23671_s3 + $0x17dc] sm:$0xf0] }
 0x4ea   :  { %8138 = vmatpush.bf16.msrb.mxu1 %v13116_v36 }
 0x4eb   :  { %v1374_v12 = vpop.f32.mrf.mxu0 }
 0x4ec   :  { %v1553_v26 = vadd.f32 %v1374_v12, %v1372_v5  ;;  %v15951_v5 = vld [vmem:[%s23671_s3 + $0x159c] sm:$0xf0] }
 0x4ed   :  { %v13564_v31 = vor.u32 %v15951_v5, %v13563_v1  ;;  %v13499_v12 = vld [vmem:[%s23671_s3 + $0x1500] sm:$0xf] }
 0x4ee   :  { %v13500_v37 = vor.u32 %v15935_v54, %v13499_v12  ;;  %v15243_v54 = vld [vmem:[%s23669_s0 + $0x290] sm:$0xff] }
 0x4ef   :  { %8145 = vmatpush.bf16.msra.mxu2 %v13564_v31 }
 0x4f3   :  { %v1377_v23 = vpop.f32.mrf.mxu0  ;;  %8146 = vmatpush.bf16.msra.mxu2 %v13532_v59 }
 0x4f4   :  { %v1554_v0 = vadd.f32 %v1553_v26, %v1377_v23  ;;  %v13852_v26 = vor.u32 %v16023_v19, %v13851_v33  ;;  %v13627_v19 = vld [vmem:[%s23671_s3 + $0x1600] sm:$0xf] }
 0x4f6   :  { %10790 = vmatmul.msk.bf16.gmra.mxu0 %vm714_vm1, %v15240_v4  ;;  %v15927_v4 = vld [vmem:[%s23671_s3 + $0x14dc] sm:$0xf0]  ;;  %8157 = vmatpush.bf16.msra.mxu3 %v13852_v26 }
 0x4f7   :  { %8147 = vmatpush.bf16.msra.mxu2 %v13500_v37  ;;  %v13468_v23 = vor.u32 %v15927_v4, %v13467_v6  ;;  %v15991_v6 = vld [vmem:[%s23671_s3 + $0x16dc] sm:$0xf0] }
 0x4fb   :  { %v1379_v16 = vpop.f32.mrf.mxu0  ;;  %8148 = vmatpush.bf16.msra.mxu2 %v13468_v23  ;;  %v13691_v23 = vld [vmem:[%s23671_s3 + $0x1680] sm:$0xf] }
 0x4fc   :  { %v1555_v7 = vadd.f32 %v1554_v0, %v1379_v16  ;;  %v13371_v0 = vld [vmem:[%s23671_s3 + $0x1400] sm:$0xf]  ;;  %v13692_v9 = vor.u32 %v15983_v42, %v13691_v23 }
 0x4fd   :  { %v13372_v1 = vor.u32 %v15903_v30, %v13371_v0  ;;  %v15244_v0 = vld [vmem:[%s23669_s0 + $0x298] sm:$0xff] }
 0x4ff   :  { %8149 = vmatpush.bf16.msra.mxu2 %v13436_v10 }
 0x503   :  { %v1382_v43 = vpop.f32.mrf.mxu0  ;;  %8150 = vmatpush.bf16.msra.mxu2 %v13404_v20 }
 0x504   :  { %v17401_v50 = vadd.f32 %v1555_v7, %v1382_v43  ;;  %v1609_v61 = vadd.f32 %v1382_v43, %v1379_v16  ;;  %v16015_v16 = vld [vmem:[%s23671_s3 + $0x179c] sm:$0xf0] }
 0x505   :  { %v13820_v5 = vor.u32 %v16015_v16, %v13819_v32  ;;  %v13787_v43 = vld [vmem:[%s23671_s3 + $0x1740] sm:$0xf] }
 0x506   :  { %v1799_v25 = vadd.f32 %v1798_v49, %v17401_v50  ;;  %10791 = vmatmul.msk.bf16.gmra.mxu0 %vm714_vm1, %v15241_v40  ;;  %v1805_v40 = vadd.f32 %v17220_v39, %v17262_v48  ;;  %v16007_v49 = vld [vmem:[%s23671_s3 + $0x175c] sm:$0xf0] }
 0x507   :  { %8151 = vmatpush.bf16.msra.mxu2 %v13372_v1  ;;  %8158 = vmatpush.bf16.msra.mxu3 %v13820_v5  ;;  %v13788_v46 = vor.u32 %v16007_v49, %v13787_v43  ;;  %v13755_v39 = vld [vmem:[%s23671_s3 + $0x1700] sm:$0xf] }
 0x508   :  { %v1800_v58 = vadd.f32 %v17414_v24, %v1799_v25  ;;  %v15999_v25 = vld [vmem:[%s23671_s3 + $0x171c] sm:$0xf0] }
 0x50a   :  { %v1801_v62 = vmax.f32 %v1800_v58, 0.0  ;;  %v13756_v58 = vor.u32 %v15999_v25, %v13755_v39 }
 0x50b   :  { %v1384_v63 = vpop.f32.mrf.mxu0  ;;  %8159 = vmatpush.bf16.msra.mxu3 %v13788_v46 }
 0x50c   :  { %v17423_v2 = vpack.c.bf16 %v1801_v62, %v1801_v62  ;;  %v1610_v28 = vadd.f32 %v1609_v61, %v1384_v63  ;;  %v13723_v63 = vld [vmem:[%s23671_s3 + $0x16c0] sm:$0xf] }
 0x50d   :  { %v13724_v4 = vor.u32 %v15991_v6, %v13723_v63  ;;  %v15967_v61 = vld [vmem:[%s23671_s3 + $0x161c] sm:$0xf0] }
 0x50e   :  { %8126 = vmatmul.bf16.vlgmr.msrb.gmra.mxu3 %v17423_v2  ;;  %v13628_v26 = vor.u32 %v15967_v61, %v13627_v19 }
 0x50f   :  { %8160 = vmatpush.bf16.msra.mxu3 %v13756_v58 }
 0x513   :  { %v1387_v55 = vpop.f32.mrf.mxu0  ;;  %8161 = vmatpush.bf16.msra.mxu3 %v13724_v4 }
 0x514   :  { %v1611_v36 = vadd.f32 %v1610_v28, %v1387_v55 }
 0x516   :  { %10792 = vmatmul.msk.bf16.gmra.mxu0 %vm714_vm1, %v15242_v41  ;;  %v13659_v41 = vld [vmem:[%s23671_s3 + $0x1640] sm:$0xf] }
 0x517   :  { %8162 = vmatpush.bf16.msra.mxu3 %v13692_v9  ;;  %v13660_v17 = vor.u32 %v15975_v44, %v13659_v41  ;;  %v15248_v41 = vld [vmem:[%s23669_s0 + $0x2b8] sm:$0xff] }
 0x51b   :  { %v1389_v7 = vpop.f32.mrf.mxu0  ;;  %8163 = vmatpush.bf16.msra.mxu3 %v13660_v17  ;;  %v1824_v17 = vadd.f32 %v17401_v50, %v17255_v35 }
 0x51c   :  { %v17468_v31 = vadd.f32 %v1611_v36, %v1389_v7  ;;  %v1665_v20 = vadd.f32 %v1389_v7, %v1387_v55  ;;  %v1812_v55 = vadd.f32 %v17232_v51, %v17271_v21 }
 0x51e   :  { %v1806_v56 = vadd.f32 %v1805_v40, %v17468_v31  ;;  %v15245_v40 = vld [vmem:[%s23669_s0 + $0x2a0] sm:$0xff]  ;;  %v1831_v35 = vadd.f32 %v17468_v31, %v17262_v48  ;;  %v15251_v48 = vld [vmem:[%s23669_s0 + $0x2d0] sm:$0xff] }
 0x51f   :  { %8164 = vmatpush.bf16.msra.mxu3 %v13628_v26 }
 0x520   :  { %v1807_v59 = vadd.f32 %v17414_v24, %v1806_v56 }
 0x522   :  { %v1808_v12 = vmax.f32 %v1807_v59, 0.0  ;;  %v1819_v59 = vadd.f32 %v17240_v14, %v17302_v57  ;;  %v15247_v14 = vld [vmem:[%s23669_s0 + $0x2b0] sm:$0xff] }
 0x523   :  { %v1392_v37 = vpop.f32.mrf.mxu0 }
 0x524   :  { %v17487_v62 = vpack.c.bf16 %v1808_v12, %v1808_v12  ;;  %v1666_v33 = vadd.f32 %v1665_v20, %v1392_v37 }
 0x526   :  { %10793 = vmatmul.msk.bf16.gmra.mxu0 %vm714_vm1, %v15243_v54  ;;  %8139 = vmatmul.bf16.vlgmr.msrb.gmra.mxu1 %v17487_v62  ;;  %v15246_v54 = vld [vmem:[%s23669_s0 + $0x2a8] sm:$0xff] }
 0x52b   :  { %v1394_v10 = vpop.f32.mrf.mxu0 }
 0x52c   :  { %v1667_v28 = vadd.f32 %v1666_v33, %v1394_v10 }
 0x533   :  { %v1397_v30 = vpop.f32.mrf.mxu0 }
 0x534   :  { %v17520_v32 = vadd.f32 %v1667_v28, %v1397_v30  ;;  %v1721_v43 = vadd.f32 %v1397_v30, %v1394_v10  ;;  %v15249_v28 = vld [vmem:[%s23669_s0 + $0x2c0] sm:$0xff] }
 0x536   :  { %v1813_v1 = vadd.f32 %v1812_v55, %v17520_v32  ;;  %10794 = vmatmul.msk.bf16.gmra.mxu0 %vm714_vm1, %v15244_v0 }
 0x538   :  { %v1814_v16 = vadd.f32 %v17414_v24, %v1813_v1 }
 0x53a   :  { %v1815_v36 = vmax.f32 %v1814_v16, 0.0 }
 0x53b   :  { %v1399_v5 = vpop.f32.mrf.mxu0 }
 0x53c   :  { %v17525_v7 = vpack.c.bf16 %v1815_v36, %v1815_v36  ;;  %v1722_v49 = vadd.f32 %v1721_v43, %v1399_v5 }
 0x53e   :  { %8152 = vmatmul.bf16.vlgmr.msra.gmra.mxu2 %v17525_v7 }
 0x543   :  { %v1402_v51 = vpop.f32.mrf.mxu0 }
 0x544   :  { %v1723_v46 = vadd.f32 %v1722_v49, %v1402_v51 }
 0x546   :  { %10795 = vmatmul.msk.bf16.gmra.mxu0 %vm714_vm1, %v15245_v40  ;;  %v15250_v40 = vld [vmem:[%s23669_s0 + $0x2c8] sm:$0xff] }
 0x54b   :  { %v1404_v56 = vpop.f32.mrf.mxu0 }
 0x54c   :  { %v1724_v39 = vadd.f32 %v1723_v46, %v1404_v56 }
 0x54e   :  { %v1820_v25 = vadd.f32 %v1819_v59, %v1724_v39 }
 0x550   :  { %v1821_v58 = vadd.f32 %v17414_v24, %v1820_v25 }
 0x552   :  { %v1822_v12 = vmax.f32 %v1821_v58, 0.0 }
 0x553   :  { %v1407_v37 = vpop.f32.mrf.mxu0 }
 0x554   :  { %v17538_v63 = vpack.c.bf16 %v1822_v12, %v1822_v12 }
 0x556   :  { %10796 = vmatmul.msk.bf16.gmra.mxu0 %vm714_vm1, %v15246_v54  ;;  %8165 = vmatmul.bf16.vlgmr.msra.gmra.mxu3 %v17538_v63 }
 0x55b   :  { %v1409_v6 = vpop.f32.mrf.mxu0 }
 0x55c   :  { %v1557_v4 = vadd.f32 %v1409_v6, %v1407_v37 }
 0x563   :  { %v1412_v23 = vpop.f32.mrf.mxu0 }
 0x564   :  { %v1558_v42 = vadd.f32 %v1557_v4, %v1412_v23 }
 0x566   :  { %10797 = vmatmul.msk.bf16.gmra.mxu0 %vm714_vm1, %v15247_v14  ;;  %v15252_v14 = vld [vmem:[%s23669_s0 + $0x2d8] sm:$0xff] }
 0x56b   :  { %v1414_v9 = vpop.f32.mrf.mxu0 }
 0x56c   :  { %v1559_v10 = vadd.f32 %v1558_v42, %v1414_v9 }
 0x573   :  { %v1417_v44 = vpop.f32.mrf.mxu0 }
 0x574   :  { %v1560_v20 = vadd.f32 %v1559_v10, %v1417_v44  ;;  %v1613_v33 = vadd.f32 %v1417_v44, %v1414_v9 }
 0x576   :  { %v17551_v19 = vadd.f32 %v1824_v17, %v1560_v20  ;;  %10798 = vmatmul.msk.bf16.gmra.mxu0 %vm714_vm1, %v15248_v41  ;;  %v15253_v17 = vld [vmem:[%s23669_s0 + $0x2e0] sm:$0xff] }
 0x57b   :  { %v1419_v61 = vpop.f32.mrf.mxu0 }
 0x57c   :  { %v1614_v26 = vadd.f32 %v1613_v33, %v1419_v61  ;;  %v14619_v33 = vld [vmem:[%s23671_s3 + $0x1dc0] sm:$0xf] }
 0x57d   :  { %v16215_v61 = vld [vmem:[%s23671_s3 + $0x1ddc] sm:$0xf0] }
 0x583   :  { %v1422_v0 = vpop.f32.mrf.mxu0 }
 0x584   :  { %v1615_v30 = vadd.f32 %v1614_v26, %v1422_v0  ;;  %v14620_v26 = vor.u32 %v16215_v61, %v14619_v33  ;;  %v15371_v33 = vld [vmem:[%s23671_s3 + $0x384] sm:$0xf] }
 0x585   :  { %v11261_v61 = vld [vmem:[%s23671_s3 + $0x3a0] sm:$0xf0] }
 0x586   :  { %10799 = vmatmul.msk.bf16.gmra.mxu0 %vm714_vm1, %v15249_v28  ;;  %8196 = vmatpush.bf16.msrb.mxu3 %v14620_v26  ;;  %v11264_v26 = vor.u32 %v15371_v33, %v11261_v61  ;;  %v14331_v33 = vld [vmem:[%s23671_s3 + $0x1b80] sm:$0xf] }
 0x58b   :  { %v1424_v55 = vpop.f32.mrf.mxu0 }
 0x58c   :  { %v1616_v50 = vadd.f32 %v1615_v30, %v1424_v55  ;;  %v1669_v1 = vadd.f32 %v1424_v55, %v1422_v0  ;;  %v14555_v55 = vld [vmem:[%s23671_s3 + $0x1d40] sm:$0xf] }
 0x58e   :  { %v17560_v16 = vadd.f32 %v1831_v35, %v1616_v50  ;;  %v16199_v35 = vld [vmem:[%s23671_s3 + $0x1d5c] sm:$0xf0] }
 0x591   :  { %v8127_v36 = vpop.f32.mrf.mxu3 }
 0x592   :  { %v8128_v5 = vadd.f32 %v8127_v36, %v17250_v22  ;;  %v1838_v22 = vadd.f32 %v17520_v32, %v17271_v21  ;;  %v1845_v21 = vadd.f32 %v1724_v39, %v17302_v57  ;;  %v14587_v57 = vld [vmem:[%s23671_s3 + $0x1d80] sm:$0xf] }
 0x593   :  { %v1427_v51 = vpop.f32.mrf.mxu0  ;;  %v16207_v39 = vld [vmem:[%s23671_s3 + $0x1d9c] sm:$0xf0] }
 0x594   :  { %v1670_v43 = vadd.f32 %v1669_v1, %v1427_v51  ;;  %v14588_v28 = vor.u32 %v16207_v39, %v14587_v57  ;;  %v14556_v1 = vor.u32 %v16199_v35, %v14555_v55  ;;  %v14523_v36 = vld [vmem:[%s23671_s3 + $0x1d00] sm:$0xf]  ;;  %v15363_v39 = vld [vmem:[%s23671_s3 + $0x344] sm:$0xf] }
 0x595   :  { %v15355_v35 = vld [vmem:[%s23671_s3 + $0x304] sm:$0xf] }
 0x596   :  { %10800 = vmatmul.msk.bf16.gmra.mxu0 %vm714_vm1, %v15250_v40  ;;  %8197 = vmatpush.bf16.msrb.mxu3 %v14588_v28  ;;  %v11229_v28 = vld [vmem:[%s23671_s3 + $0x360] sm:$0xf0] }
 0x599   :  { %v8129_v49 = vpop.f32.mrf.mxu3 }
 0x59a   :  { %8198 = vmatpush.bf16.msrb.mxu3 %v14556_v1  ;;  %v16183_v49 = vld [vmem:[%s23671_s3 + $0x1cdc] sm:$0xf0]  ;;  %v15347_v1 = vld [vmem:[%s23671_s3 + $0x2c4] sm:$0xf] }
 0x59b   :  { %v1429_v46 = vpop.f32.mrf.mxu0 }
 0x59c   :  { %v1671_v56 = vadd.f32 %v1670_v43, %v1429_v46  ;;  %v14491_v43 = vld [vmem:[%s23671_s3 + $0x1cc0] sm:$0xf] }
 0x5a3   :  { %v1432_v31 = vpop.f32.mrf.mxu0  ;;  %v8140_v59 = vpop.f32.mrf.mxu1 }
 0x5a4   :  { %v1672_v25 = vadd.f32 %v1671_v56, %v1432_v31  ;;  %v1725_v58 = vadd.f32 %v1432_v31, %v1429_v46  ;;  %v8141_v12 = vadd.f32 %v8140_v59, %v8128_v5  ;;  %v16191_v5 = vld [vmem:[%s23671_s3 + $0x1d1c] sm:$0xf0]  ;;  %v14492_v56 = vor.u32 %v16183_v49, %v14491_v43  ;;  %v15339_v43 = vld [vmem:[%s23671_s3 + $0x284] sm:$0xf] }
 0x5a5   :  { %v14524_v40 = vor.u32 %v16191_v5, %v14523_v36  ;;  %v16175_v31 = vld [vmem:[%s23671_s3 + $0x1c9c] sm:$0xf0]  ;;  %v11165_v36 = vld [vmem:[%s23671_s3 + $0x2e0] sm:$0xf0] }
 0x5a6   :  { %v17572_v54 = vadd.f32 %v1838_v22, %v1672_v25  ;;  %10801 = vmatmul.msk.bf16.gmra.mxu0 %vm714_vm1, %v15251_v48  ;;  %v14459_v48 = vld [vmem:[%s23671_s3 + $0x1c80] sm:$0xf]  ;;  %v11168_v5 = vor.u32 %v15347_v1, %v11165_v36  ;;  %v11133_v49 = vld [vmem:[%s23671_s3 + $0x2a0] sm:$0xf0] }
 0x5a7   :  { %8199 = vmatpush.bf16.msrb.mxu3 %v14524_v40  ;;  %v14460_v59 = vor.u32 %v16175_v31, %v14459_v48  ;;  %v11101_v48 = vld [vmem:[%s23671_s3 + $0x260] sm:$0xf0]  ;;  %v13979_v1 = vld [vmem:[%s23671_s3 + $0x18c0] sm:$0xf] }
 0x5a8   :  { %v16055_v36 = vld [vmem:[%s23671_s3 + $0x18dc] sm:$0xf0] }
 0x5ab   :  { %v1434_v37 = vpop.f32.mrf.mxu0  ;;  %v8142_v6 = vpop.f32.mrf.mxu1  ;;  %8200 = vmatpush.bf16.msrb.mxu3 %v14492_v56  ;;  %v15331_v56 = vld [vmem:[%s23671_s3 + $0x244] sm:$0xf] }
 0x5ac   :  { %v1726_v4 = vadd.f32 %v1725_v58, %v1434_v37  ;;  %v16167_v37 = vld [vmem:[%s23671_s3 + $0x1c5c] sm:$0xf0]  ;;  %v11104_v31 = vor.u32 %v15331_v56, %v11101_v48 }
 0x5ad   :  { %v13947_v48 = vld [vmem:[%s23671_s3 + $0x1880] sm:$0xf] }
 0x5af   :  { %8201 = vmatpush.bf16.msrb.mxu3 %v14460_v59 }
 0x5b3   :  { %v1437_v23 = vpop.f32.mrf.mxu0 }
 0x5b4   :  { %v1727_v42 = vadd.f32 %v1726_v4, %v1437_v23  ;;  %v16159_v23 = vld [vmem:[%s23671_s3 + $0x1c1c] sm:$0xf0] }
 0x5b6   :  { %10802 = vmatmul.msk.bf16.gmra.mxu0 %vm714_vm1, %v15252_v14  ;;  %v14395_v14 = vld [vmem:[%s23671_s3 + $0x1c00] sm:$0xf] }
 0x5bb   :  { %v1439_v9 = vpop.f32.mrf.mxu0 }
 0x5bc   :  { %v1728_v32 = vadd.f32 %v1727_v42, %v1439_v9  ;;  %v14396_v42 = vor.u32 %v16159_v23, %v14395_v14  ;;  %v15379_v9 = vld [vmem:[%s23671_s3 + $0x3c4] sm:$0xf] }
 0x5be   :  { %v17580_v10 = vadd.f32 %v1845_v21, %v1728_v32  ;;  %v11293_v21 = vld [vmem:[%s23671_s3 + $0x3e0] sm:$0xf0] }
 0x5c1   :  { %v8153_v41 = vpop.f32.mrf.mxu2 }
 0x5c2   :  { %v8154_v44 = vadd.f32 %v8153_v41, %v8141_v12  ;;  %v14427_v12 = vld [vmem:[%s23671_s3 + $0x1c40] sm:$0xf]  ;;  %v11296_v41 = vor.u32 %v15379_v9, %v11293_v21 }
 0x5c3   :  { %v1442_v20 = vpop.f32.mrf.mxu0  ;;  %v14428_v4 = vor.u32 %v16167_v37, %v14427_v12  ;;  %v16079_v9 = vld [vmem:[%s23671_s3 + $0x199c] sm:$0xf0] }
 0x5c4   :  { %v14363_v21 = vld [vmem:[%s23671_s3 + $0x1bc0] sm:$0xf] }
 0x5c5   :  { %8202 = vmatpush.bf16.msrb.mxu3 %v14428_v4  ;;  %v11069_v4 = vld [vmem:[%s23671_s3 + $0x220] sm:$0xf0] }
 0x5c6   :  { %10803 = vmatmul.msk.bf16.gmra.mxu0 %vm714_vm1, %v15253_v17 }
 0x5c9   :  { %v8155_v0 = vpop.f32.mrf.mxu2  ;;  %8203 = vmatpush.bf16.msrb.mxu3 %v14396_v42  ;;  %v14075_v42 = vld [vmem:[%s23671_s3 + $0x1980] sm:$0xf] }
 0x5ca   :  { %v11232_v0 = vor.u32 %v15363_v39, %v11229_v28  ;;  %v14011_v28 = vld [vmem:[%s23671_s3 + $0x1900] sm:$0xf] }
 0x5cb   :  { %v1444_v30 = vpop.f32.mrf.mxu0 }
 0x5cc   :  { %v1561_v50 = vadd.f32 %v1444_v30, %v1442_v20 }
 0x5cd   :  { %8235 = vmatpush.bf16.msra.mxu3 %v11296_v41 }
 0x5d1   :  { %8236 = vmatpush.bf16.msra.mxu3 %v11264_v26  ;;  %v16143_v26 = vld [vmem:[%s23671_s3 + $0x1b9c] sm:$0xf0] }
 0x5d2   :  { %v14332_v39 = vor.u32 %v16143_v26, %v14331_v33  ;;  %v14171_v33 = vld [vmem:[%s23671_s3 + $0x1a40] sm:$0xf] }
 0x5d3   :  { %v1447_v51 = vpop.f32.mrf.mxu0  ;;  %v16279_v26 = vld [vmem:[%s23671_s3 + $0x1fdc] sm:$0xf0] }
 0x5d4   :  { %v1562_v46 = vadd.f32 %v1561_v50, %v1447_v51 }
 0x5d5   :  { %8237 = vmatpush.bf16.msra.mxu3 %v11232_v0  ;;  %v16063_v0 = vld [vmem:[%s23671_s3 + $0x191c] sm:$0xf0] }
 0x5d9   :  { %v8166_v22 = vpop.f32.mrf.mxu3 }
 0x5da   :  { %v17622_v25 = vadd.f32 %v8166_v22, %v8154_v44  ;;  %v14107_v22 = vld [vmem:[%s23671_s3 + $0x19c0] sm:$0xf] }
 0x5db   :  { %v1449_v58 = vpop.f32.mrf.mxu0 }
 0x5dc   :  { %v1563_v6 = vadd.f32 %v1562_v46, %v1449_v58  ;;  %v11136_v46 = vor.u32 %v15339_v43, %v11133_v49  ;;  %v16127_v43 = vld [vmem:[%s23671_s3 + $0x1b1c] sm:$0xf0] }
 0x5e1   :  { %v8168_v32 = vpop.f32.mrf.mxu3 }
 0x5e2   :  { %v14076_v32 = vor.u32 %v16079_v9, %v14075_v42  ;;  %v16039_v42 = vld [vmem:[%s23671_s3 + $0x185c] sm:$0xf0] }
 0x5e3   :  { %v1452_v44 = vpop.f32.mrf.mxu0  ;;  %v14203_v9 = vld [vmem:[%s23671_s3 + $0x1a80] sm:$0xf] }
 0x5e4   :  { %v1564_v17 = vadd.f32 %v1563_v6, %v1452_v44  ;;  %v1617_v20 = vadd.f32 %v1452_v44, %v1449_v58  ;;  %v16087_v58 = vld [vmem:[%s23671_s3 + $0x19dc] sm:$0xf0]  ;;  %v15323_v6 = vld [vmem:[%s23671_s3 + $0x204] sm:$0xf] }
 0x5e5   :  { %v14108_v37 = vor.u32 %v16087_v58, %v14107_v22  ;;  %v11072_v14 = vor.u32 %v15323_v6, %v11069_v4  ;;  %v14235_v22 = vld [vmem:[%s23671_s3 + $0x1ac0] sm:$0xf] }
 0x5e6   :  { %v17649_v57 = vadd.f32 %v17551_v19, %v1564_v17  ;;  %v11197_v19 = vld [vmem:[%s23671_s3 + $0x320] sm:$0xf0]  ;;  %v14043_v17 = vld [vmem:[%s23671_s3 + $0x1940] sm:$0xf] }
 0x5e7   :  { %v11200_v50 = vor.u32 %v15355_v35, %v11197_v19  ;;  %8170 = vmatpush.bf16.msra.mxu1 %v14108_v37  ;;  %v16135_v35 = vld [vmem:[%s23671_s3 + $0x1b5c] sm:$0xf0] }
 0x5e9   :  { %8238 = vmatpush.bf16.msra.mxu3 %v11200_v50 }
 0x5eb   :  { %v1454_v30 = vpop.f32.mrf.mxu0  ;;  %8171 = vmatpush.bf16.msra.mxu1 %v14076_v32  ;;  %v16111_v32 = vld [vmem:[%s23671_s3 + $0x1a9c] sm:$0xf0] }
 0x5ec   :  { %v1618_v55 = vadd.f32 %v1617_v20, %v1454_v30  ;;  %v16071_v20 = vld [vmem:[%s23671_s3 + $0x195c] sm:$0xf0] }
 0x5ed   :  { %8239 = vmatpush.bf16.msra.mxu3 %v11168_v5  ;;  %v14044_v61 = vor.u32 %v16071_v20, %v14043_v17  ;;  %v14299_v30 = vld [vmem:[%s23671_s3 + $0x1b40] sm:$0xf] }
 0x5ee   :  { %v14300_v19 = vor.u32 %v16135_v35, %v14299_v30  ;;  %v14267_v5 = vld [vmem:[%s23671_s3 + $0x1b00] sm:$0xf] }
 0x5ef   :  { %8172 = vmatpush.bf16.msra.mxu1 %v14044_v61  ;;  %v13883_v17 = vld [vmem:[%s23671_s3 + $0x1800] sm:$0xf] }
 0x5f0   :  { %v16031_v20 = vld [vmem:[%s23671_s3 + $0x181c] sm:$0xf0] }
 0x5f1   :  { %8240 = vmatpush.bf16.msra.mxu3 %v11136_v46  ;;  %v14268_v46 = vor.u32 %v16127_v43, %v14267_v5  ;;  %v13884_v61 = vor.u32 %v16031_v20, %v13883_v17  ;;  %v16271_v43 = vld [vmem:[%s23671_s3 + $0x1f9c] sm:$0xf0]  ;;  %v15299_v17 = vld [vmem:[%s23671_s3 + $0x144] sm:$0xf] }
 0x5f2   :  { %v15547_v20 = vld [vmem:[%s23671_s3 + $0x904] sm:$0xf] }
 0x5f3   :  { %v1457_v40 = vpop.f32.mrf.mxu0 }
 0x5f4   :  { %v1619_v51 = vadd.f32 %v1618_v55, %v1457_v40  ;;  %v14012_v55 = vor.u32 %v16063_v0, %v14011_v28  ;;  %v15571_v28 = vld [vmem:[%s23671_s3 + $0x9c4] sm:$0xf] }
 0x5f5   :  { %8241 = vmatpush.bf16.msra.mxu3 %v11104_v31  ;;  %v16047_v31 = vld [vmem:[%s23671_s3 + $0x189c] sm:$0xf0]  ;;  %v12061_v0 = vld [vmem:[%s23671_s3 + $0x9e0] sm:$0xf0] }
 0x5f6   :  { %8173 = vmatpush.bf16.msra.mxu1 %v14012_v55  ;;  %v13948_v58 = vor.u32 %v16047_v31, %v13947_v48  ;;  %v12029_v48 = vld [vmem:[%s23671_s3 + $0x9a0] sm:$0xf0] }
 0x5f9   :  { %8242 = vmatpush.bf16.msra.mxu3 %v11072_v14  ;;  %v13915_v14 = vld [vmem:[%s23671_s3 + $0x1840] sm:$0xf] }
 0x5fb   :  { %v1459_v59 = vpop.f32.mrf.mxu0 }
 0x5fc   :  { %v1620_v12 = vadd.f32 %v1619_v51, %v1459_v59  ;;  %v13980_v51 = vor.u32 %v16055_v36, %v13979_v1  ;;  %v1673_v49 = vadd.f32 %v1459_v59, %v1457_v40  ;;  %v16119_v40 = vld [vmem:[%s23671_s3 + $0x1adc] sm:$0xf0]  ;;  %v12064_v36 = vor.u32 %v15571_v28, %v12061_v0 }
 0x5fd   :  { %v16095_v1 = vld [vmem:[%s23671_s3 + $0x1a1c] sm:$0xf0] }
 0x5fe   :  { %v17694_v23 = vadd.f32 %v17560_v16, %v1620_v12  ;;  %v16151_v16 = vld [vmem:[%s23671_s3 + $0x1bdc] sm:$0xf0]  ;;  %8174 = vmatpush.bf16.msra.mxu1 %v13980_v51  ;;  %v14236_v12 = vor.u32 %v16119_v40, %v14235_v22  ;;  %v11037_v22 = vld [vmem:[%s23671_s3 + $0x1e0] sm:$0xf0] }
 0x5ff   :  { %v14364_v41 = vor.u32 %v16151_v16, %v14363_v21  ;;  %v13916_v21 = vor.u32 %v16039_v42, %v13915_v14  ;;  %v14843_v51 = vld [vmem:[%s23671_s3 + $0x1f80] sm:$0xf]  ;;  %v11997_v14 = vld [vmem:[%s23671_s3 + $0x960] sm:$0xf0] }
 0x600   :  { %v14844_v31 = vor.u32 %v16271_v43, %v14843_v51  ;;  %v14747_v28 = vld [vmem:[%s23671_s3 + $0x1ec0] sm:$0xf] }
 0x601   :  { %8183 = vmatpush.bf16.msrb.mxu2 %v14364_v41  ;;  %v14204_v41 = vor.u32 %v16111_v32, %v14203_v9  ;;  %v11005_v9 = vld [vmem:[%s23671_s3 + $0x1a0] sm:$0xf0]  ;;  %v16247_v0 = vld [vmem:[%s23671_s3 + $0x1edc] sm:$0xf0] }
 0x602   :  { %8175 = vmatpush.bf16.msra.mxu1 %v13948_v58 }
 0x603   :  { %v1462_v44 = vpop.f32.mrf.mxu0 }
 0x604   :  { %v1674_v56 = vadd.f32 %v1673_v49, %v1462_v44  ;;  %v15315_v49 = vld [vmem:[%s23671_s3 + $0x1c4] sm:$0xf] }
 0x605   :  { %8184 = vmatpush.bf16.msrb.mxu2 %v14332_v39  ;;  %v11040_v58 = vor.u32 %v15315_v49, %v11037_v22  ;;  %v14715_v49 = vld [vmem:[%s23671_s3 + $0x1e80] sm:$0xf] }
 0x606   :  { %8176 = vmatpush.bf16.msra.mxu1 %v13916_v21 }
 0x609   :  { %8185 = vmatpush.bf16.msrb.mxu2 %v14300_v19 }
 0x60a   :  { %8177 = vmatpush.bf16.msra.mxu1 %v13884_v61 }
 0x60b   :  { %v1464_v50 = vpop.f32.mrf.mxu0 }
 0x60c   :  { %v1675_v59 = vadd.f32 %v1674_v56, %v1464_v50  ;;  %v15563_v56 = vld [vmem:[%s23671_s3 + $0x984] sm:$0xf] }
 0x60d   :  { %8186 = vmatpush.bf16.msrb.mxu2 %v14268_v46  ;;  %v12032_v40 = vor.u32 %v15563_v56, %v12029_v48  ;;  %v16239_v56 = vld [vmem:[%s23671_s3 + $0x1e9c] sm:$0xf0]  ;;  %v15283_v48 = vld [vmem:[%s23671_s3 + $0xc4] sm:$0xf] }
 0x60e   :  { %v14716_v22 = vor.u32 %v16239_v56, %v14715_v49  ;;  %v15739_v56 = vld [vmem:[%s23671_s3 + $0xf04] sm:$0xf] }
 0x611   :  { %8187 = vmatpush.bf16.msrb.mxu2 %v14236_v12  ;;  %v16263_v12 = vld [vmem:[%s23671_s3 + $0x1f5c] sm:$0xf0] }
 0x613   :  { %v1467_v37 = vpop.f32.mrf.mxu0 }
 0x614   :  { %v1676_v6 = vadd.f32 %v1675_v59, %v1467_v37  ;;  %v17756_v4 = vadd.f32 %v1467_v37, %v1464_v50  ;;  %v14139_v50 = vld [vmem:[%s23671_s3 + $0x1a00] sm:$0xf]  ;;  %v15307_v37 = vld [vmem:[%s23671_s3 + $0x184] sm:$0xf] }
 0x615   :  { %8188 = vmatpush.bf16.msrb.mxu2 %v14204_v41  ;;  %v14140_v5 = vor.u32 %v16095_v1, %v14139_v50  ;;  %v14811_v59 = vld [vmem:[%s23671_s3 + $0x1f40] sm:$0xf]  ;;  %v11008_v32 = vor.u32 %v15307_v37, %v11005_v9  ;;  %v10941_v50 = vld [vmem:[%s23671_s3 + $0x120] sm:$0xf0] }
 0x616   :  { %v1840_v16 = vadd.f32 %v17572_v54, %v1676_v6  ;;  %v16103_v54 = vld [vmem:[%s23671_s3 + $0x1a5c] sm:$0xf0]  ;;  %v15555_v6 = vld [vmem:[%s23671_s3 + $0x944] sm:$0xf]  ;;  %v14812_v42 = vor.u32 %v16263_v12, %v14811_v59 }
 0x617   :  { %v14172_v30 = vor.u32 %v16103_v54, %v14171_v33  ;;  %v14779_v41 = vld [vmem:[%s23671_s3 + $0x1f00] sm:$0xf]  ;;  %v11965_v33 = vld [vmem:[%s23671_s3 + $0x920] sm:$0xf0] }
 0x618   :  { %v1841_v44 = vadd.f32 %v1840_v16, %v16874_v60  ;;  %v14875_v60 = vld [vmem:[%s23671_s3 + $0x1fc0] sm:$0xf]  ;;  %v12000_v16 = vor.u32 %v15555_v6, %v11997_v14  ;;  %v10973_v54 = vld [vmem:[%s23671_s3 + $0x160] sm:$0xf0] }
 0x619   :  { %v14876_v55 = vor.u32 %v16279_v26, %v14875_v60  ;;  %8189 = vmatpush.bf16.msrb.mxu2 %v14172_v30  ;;  %v10976_v60 = vor.u32 %v15299_v17, %v10973_v54  ;;  %v15291_v30 = vld [vmem:[%s23671_s3 + $0x104] sm:$0xf]  ;;  %v14683_v12 = vld [vmem:[%s23671_s3 + $0x1e40] sm:$0xf] }
 0x61a   :  { %v1842_v39 = vadd.f32 %v17414_v24, %v1841_v44  ;;  %v16255_v44 = vld [vmem:[%s23671_s3 + $0x1f1c] sm:$0xf0]  ;;  %v15275_v6 = vld [vmem:[%s23671_s3 + $0x84] sm:$0xf] }
 0x61b   :  { %v1469_v35 = vpop.f32.mrf.mxu0  ;;  %8209 = vmatpush.bf16.msrb.mxu1 %v14876_v55  ;;  %v14780_v61 = vor.u32 %v16255_v44, %v14779_v41  ;;  %v16231_v37 = vld [vmem:[%s23671_s3 + $0x1e5c] sm:$0xf0]  ;;  %v15523_v14 = vld [vmem:[%s23671_s3 + $0x844] sm:$0xf] }
 0x61c   :  { %v1843_v19 = vmax.f32 %v1842_v39, 0.0  ;;  %v1730_v26 = vadd.f32 %v17756_v4, %v1469_v35  ;;  %v11968_v39 = vor.u32 %v15547_v20, %v11965_v33  ;;  %v15539_v4 = vld [vmem:[%s23671_s3 + $0x8c4] sm:$0xf]  ;;  %v14684_v9 = vor.u32 %v16231_v37, %v14683_v12  ;;  %v14651_v44 = vld [vmem:[%s23671_s3 + $0x1e00] sm:$0xf] }
 0x61d   :  { %8190 = vmatpush.bf16.msrb.mxu2 %v14140_v5  ;;  %v11933_v35 = vld [vmem:[%s23671_s3 + $0x8e0] sm:$0xf0]  ;;  %v1736_v5 = vadd.f32 %v16883_v11, %v16901_v29  ;;  %v16223_v17 = vld [vmem:[%s23671_s3 + $0x1e1c] sm:$0xf0] }
 0x61e   :  { %v17812_v46 = vpack.c.bf16 %v1843_v19, %v1843_v19  ;;  %v14748_v19 = vor.u32 %v16247_v0, %v14747_v28  ;;  %v11936_v43 = vor.u32 %v15539_v4, %v11933_v35  ;;  %v15531_v11 = vld [vmem:[%s23671_s3 + $0x884] sm:$0xf]  ;;  %v14652_v54 = vor.u32 %v16223_v17, %v14651_v44 }
 0x61f   :  { %8210 = vmatpush.bf16.msrb.mxu1 %v14844_v31  ;;  %v11901_v29 = vld [vmem:[%s23671_s3 + $0x8a0] sm:$0xf0] }
 0x620   :  { %8204 = vmatmul.bf16.vlgmr.msrb.gmra.mxu3 %v17812_v46  ;;  %v15267_v20 = vld [vmem:[%s23671_s3 + $0x44] sm:$0xf] }
 0x621   :  { %8274 = vmatpush.bf16.msrb.mxu3 %v12064_v36  ;;  %8222 = vmatpush.bf16.msra.mxu2 %v11040_v58  ;;  %v10944_v36 = vor.u32 %v15291_v30, %v10941_v50  ;;  %v10909_v58 = vld [vmem:[%s23671_s3 + $0xe0] sm:$0xf0] }
 0x622   :  { %v15515_v33 = vld [vmem:[%s23671_s3 + $0x804] sm:$0xf] }
 0x623   :  { %v1472_v21 = vpop.f32.mrf.mxu0  ;;  %8211 = vmatpush.bf16.msrb.mxu1 %v14812_v42  ;;  %v11869_v42 = vld [vmem:[%s23671_s3 + $0x860] sm:$0xf0] }
 0x624   :  { %v1731_v55 = vadd.f32 %v1730_v26, %v1472_v21  ;;  %v10877_v21 = vld [vmem:[%s23671_s3 + $0xa0] sm:$0xf0]  ;;  %v11872_v41 = vor.u32 %v15523_v14, %v11869_v42 }
 0x625   :  { %8275 = vmatpush.bf16.msrb.mxu3 %v12032_v40  ;;  %8223 = vmatpush.bf16.msra.mxu2 %v11008_v32  ;;  %v10912_v40 = vor.u32 %v15283_v48, %v10909_v58  ;;  %v15763_v26 = vld [vmem:[%s23671_s3 + $0xfc4] sm:$0xf] }
 0x626   :  { %v15259_v30 = vld [vmem:[%s23671_s3 + $0x4] sm:$0xf] }
 0x627   :  { %8212 = vmatpush.bf16.msrb.mxu1 %v14780_v61  ;;  %v11837_v61 = vld [vmem:[%s23671_s3 + $0x820] sm:$0xf0] }
 0x628   :  { %v11840_v0 = vor.u32 %v15515_v33, %v11837_v61  ;;  %v15755_v50 = vld [vmem:[%s23671_s3 + $0xf84] sm:$0xf] }
 0x629   :  { %8276 = vmatpush.bf16.msrb.mxu3 %v12000_v16  ;;  %8224 = vmatpush.bf16.msra.mxu2 %v10976_v60  ;;  %v10880_v16 = vor.u32 %v15275_v6, %v10877_v21  ;;  %v10845_v60 = vld [vmem:[%s23671_s3 + $0x60] sm:$0xf0] }
 0x62a   :  { %v10848_v28 = vor.u32 %v15267_v20, %v10845_v60  ;;  %v12733_v48 = vld [vmem:[%s23671_s3 + $0xf20] sm:$0xf0] }
 0x62b   :  { %v1474_v1 = vpop.f32.mrf.mxu0  ;;  %8213 = vmatpush.bf16.msrb.mxu1 %v14748_v19  ;;  %v15723_v12 = vld [vmem:[%s23671_s3 + $0xe84] sm:$0xf] }
 0x62c   :  { %v1732_v51 = vadd.f32 %v1731_v55, %v1474_v1  ;;  %v10813_v55 = vld [vmem:[%s23671_s3 + $0x20] sm:$0xf0] }
 0x62d   :  { %8277 = vmatpush.bf16.msrb.mxu3 %v11968_v39  ;;  %8225 = vmatpush.bf16.msra.mxu2 %v10944_v36  ;;  %v12829_v39 = vld [vmem:[%s23671_s3 + $0xfe0] sm:$0xf0]  ;;  %v10816_v35 = vor.u32 %v15259_v30, %v10813_v55 }
 0x62e   :  { %v1847_v31 = vadd.f32 %v17580_v10, %v1732_v51  ;;  %v11904_v10 = vor.u32 %v15531_v11, %v11901_v29  ;;  %v12832_v4 = vor.u32 %v15763_v26, %v12829_v39  ;;  %v12797_v1 = vld [vmem:[%s23671_s3 + $0xfa0] sm:$0xf0] }
 0x62f   :  { %8214 = vmatpush.bf16.msrb.mxu1 %v14716_v22  ;;  %v12800_v36 = vor.u32 %v15755_v50, %v12797_v1  ;;  %v12765_v51 = vld [vmem:[%s23671_s3 + $0xf60] sm:$0xf0] }
 0x630   :  { %v17900_v59 = vadd.f32 %v1847_v31, %v1736_v5  ;;  %8243 = vmatmul.bf16.vlgmr.msra.gmra.mxu3 %v16790_v45  ;;  %v15747_v5 = vld [vmem:[%s23671_s3 + $0xf44] sm:$0xf]  ;;  %v12736_v31 = vor.u32 %v15739_v56, %v12733_v48 }
 0x631   :  { %8278 = vmatpush.bf16.msrb.mxu3 %v11936_v43  ;;  %8226 = vmatpush.bf16.msra.mxu2 %v10912_v40  ;;  %v12768_v43 = vor.u32 %v15747_v5, %v12765_v51  ;;  %v15731_v11 = vld [vmem:[%s23671_s3 + $0xec4] sm:$0xf] }
 0x632   :  { %v12701_v29 = vld [vmem:[%s23671_s3 + $0xee0] sm:$0xf0] }
 0x633   :  { %v1477_v32 = vpop.f32.mrf.mxu0  ;;  %8215 = vmatpush.bf16.msrb.mxu1 %v14684_v9  ;;  %v12704_v40 = vor.u32 %v15731_v11, %v12701_v29  ;;  %v12669_v37 = vld [vmem:[%s23671_s3 + $0xea0] sm:$0xf0]  ;;  %v16352_v29 = vld [vmem:[%s23670_s2] ss:$0 sm:$0xff] }
 0x634   :  { %v12672_v21 = vor.u32 %v15723_v12, %v12669_v37  ;;  %v15443_v20 = vld [vmem:[%s23671_s3 + $0x5c4] sm:$0xf] }
 0x635   :  { %8279 = vmatpush.bf16.msrb.mxu3 %v11904_v10  ;;  %8227 = vmatpush.bf16.msra.mxu2 %v10880_v16  ;;  %v12637_v16 = vld [vmem:[%s23671_s3 + $0xe60] sm:$0xf0] }
 0x636   :  { %v11549_v33 = vld [vmem:[%s23671_s3 + $0x5e0] sm:$0xf0] }
 0x637   :  { %8216 = vmatpush.bf16.msrb.mxu1 %v14652_v54  ;;  %v15955_v54 = vld [vmem:[%s23671_s3 + $0x15c4] sm:$0xf]  ;;  %v11552_v26 = vor.u32 %v15443_v20, %v11549_v33 }
 0x638   :  { %v13597_v60 = vld [vmem:[%s23671_s3 + $0x15e0] sm:$0xf0] }
 0x639   :  { %8280 = vmatpush.bf16.msrb.mxu3 %v11872_v41  ;;  %8228 = vmatpush.bf16.msra.mxu2 %v10848_v28  ;;  %v15435_v39 = vld [vmem:[%s23671_s3 + $0x584] sm:$0xf] }
 0x63a   :  { %v15507_v55 = vld [vmem:[%s23671_s3 + $0x7c4] sm:$0xf] }
 0x63b   :  { %v1479_v19 = vpop.f32.mrf.mxu0  ;;  %v13565_v50 = vld [vmem:[%s23671_s3 + $0x15a0] sm:$0xf0] }
 0x63c   :  { %v1565_v22 = vadd.f32 %v1479_v19, %v1477_v32  ;;  %v15715_v32 = vld [vmem:[%s23671_s3 + $0xe44] sm:$0xf] }
 0x63d   :  { %8281 = vmatpush.bf16.msrb.mxu3 %v11840_v0  ;;  %8229 = vmatpush.bf16.msra.mxu2 %v10816_v35  ;;  %v13600_v35 = vor.u32 %v15955_v54, %v13597_v60  ;;  %v15427_v5 = vld [vmem:[%s23671_s3 + $0x544] sm:$0xf] }
 0x63e   :  { %v11773_v56 = vld [vmem:[%s23671_s3 + $0x7a0] sm:$0xf0] }
 0x63f   :  { %v13533_v11 = vld [vmem:[%s23671_s3 + $0x1560] sm:$0xf0] }
 0x640   :  { %8282 = vmatmul.bf16.vlgmr.msrb.gmra.mxu3 %v17083_v18  ;;  %v11453_v12 = vld [vmem:[%s23671_s3 + $0x520] sm:$0xf0] }
 0x641   :  { %8313 = vmatpush.bf16.msra.mxu3 %v12832_v4  ;;  %v11805_v4 = vld [vmem:[%s23671_s3 + $0x7e0] sm:$0xf0] }
 0x642   :  { %v15491_v37 = vld [vmem:[%s23671_s3 + $0x744] sm:$0xf] }
 0x643   :  { %v1482_v49 = vpop.f32.mrf.mxu0  ;;  %v13469_v20 = vld [vmem:[%s23671_s3 + $0x14e0] sm:$0xf0] }
 0x644   :  { %v1566_v58 = vadd.f32 %v1565_v22, %v1482_v49  ;;  %v15499_v49 = vld [vmem:[%s23671_s3 + $0x784] sm:$0xf]  ;;  %v1849_v22 = vadd.f32 %v16352_v29, %v17900_v59 }
 0x645   :  { %8314 = vmatpush.bf16.msra.mxu3 %v12800_v36  ;;  %v11808_v36 = vor.u32 %v15507_v55, %v11805_v4  ;;  %v11741_v59 = vld [vmem:[%s23671_s3 + $0x760] sm:$0xf0] }
 0x646   :  { %v15475_v54 = vld [vmem:[%s23671_s3 + $0x6c4] sm:$0xf] }
 0x647   :  { %v11677_v60 = vld [vmem:[%s23671_s3 + $0x6e0] sm:$0xf0] }
 0x648   :  { %v15395_v55 = vld [vmem:[%s23671_s3 + $0x444] sm:$0xf] }
 0x649   :  { %8315 = vmatpush.bf16.msra.mxu3 %v12768_v43  ;;  %v11485_v43 = vld [vmem:[%s23671_s3 + $0x560] sm:$0xf0] }
 0x64a   :  { %v11357_v4 = vld [vmem:[%s23671_s3 + $0x460] sm:$0xf0] }
 0x64b   :  { %v1484_v10 = vpop.f32.mrf.mxu0  ;;  %v12317_v29 = vld [vmem:[%s23671_s3 + $0xbe0] sm:$0xf0] }
 0x64c   :  { %v1567_v6 = vadd.f32 %v1566_v58, %v1484_v10  ;;  %v1621_v14 = vadd.f32 %v16852_v34, %v1484_v10  ;;  %v11488_v58 = vor.u32 %v15427_v5, %v11485_v43  ;;  %v15419_v10 = vld [vmem:[%s23671_s3 + $0x504] sm:$0xf] }
 0x64d   :  { %8316 = vmatpush.bf16.msra.mxu3 %v12736_v31  ;;  %v15939_v31 = vld [vmem:[%s23671_s3 + $0x1544] sm:$0xf] }
 0x64e   :  { %v1568_v42 = vadd.f32 %v1567_v6, %v16852_v34  ;;  %v1622_v9 = vadd.f32 %v1621_v14, %v16854_v38  ;;  %v12640_v38 = vor.u32 %v15715_v32, %v12637_v16  ;;  %v13536_v6 = vor.u32 %v15939_v31, %v13533_v11  ;;  %v15931_v14 = vld [vmem:[%s23671_s3 + $0x1504] sm:$0xf] }
 0x64f   :  { %v11744_v32 = vor.u32 %v15491_v37, %v11741_v59  ;;  %v15411_v16 = vld [vmem:[%s23671_s3 + $0x4c4] sm:$0xf] }
 0x650   :  { %v1623_v41 = vadd.f32 %v1622_v9, %v16864_v47  ;;  %v1827_v44 = vadd.f32 %v17649_v57, %v1568_v42  ;;  %v15707_v47 = vld [vmem:[%s23671_s3 + $0xe04] sm:$0xf]  ;;  %v1850_v9 = vmax.f32 %v1849_v22, 0.0 }
 0x651   :  { %8317 = vmatpush.bf16.msra.mxu3 %v12704_v40  ;;  %v11776_v40 = vor.u32 %v15499_v49, %v11773_v56  ;;  %v13501_v42 = vld [vmem:[%s23671_s3 + $0x1520] sm:$0xf0] }
 0x652   :  { %v1624_v17 = vadd.f32 %v1623_v41, %v16866_v52  ;;  %v1828_v34 = vadd.f32 %v17414_v24, %v1827_v44  ;;  %v12605_v52 = vld [vmem:[%s23671_s3 + $0xe20] sm:$0xf0] }
 0x653   :  { %v12608_v30 = vor.u32 %v15707_v47, %v12605_v52  ;;  %v11421_v41 = vld [vmem:[%s23671_s3 + $0x4e0] sm:$0xf0] }
 0x654   :  { %v1829_v57 = vmax.f32 %v1828_v34, 0.0  ;;  %v1834_v61 = vadd.f32 %v17694_v23, %v1624_v17  ;;  %v11517_v23 = vld [vmem:[%s23671_s3 + $0x5a0] sm:$0xf0]  ;;  %v13504_v34 = vor.u32 %v15931_v14, %v13501_v42  ;;  %v11424_v33 = vor.u32 %v15411_v16, %v11421_v41 }
 0x655   :  { %8318 = vmatpush.bf16.msra.mxu3 %v12672_v21  ;;  %v11520_v1 = vor.u32 %v15435_v39, %v11517_v23  ;;  %v11456_v21 = vor.u32 %v15419_v10, %v11453_v12  ;;  %v15483_v44 = vld [vmem:[%s23671_s3 + $0x704] sm:$0xf]  ;;  %v11680_v23 = vor.u32 %v15475_v54, %v11677_v60 }
 0x656   :  { %v18017_v28 = vpack.c.bf16 %v1829_v57, %v1829_v57  ;;  %v1835_v0 = vadd.f32 %v17414_v24, %v1834_v61  ;;  %v15947_v24 = vld [vmem:[%s23671_s3 + $0x1584] sm:$0xf]  ;;  %v18101_v57 = vpack.c.bf16 %v1850_v9, %v1850_v9 }
 0x657   :  { %v13568_v48 = vor.u32 %v15947_v24, %v13565_v50  ;;  %v11709_v17 = vld [vmem:[%s23671_s3 + $0x720] sm:$0xf0] }
 0x658   :  { %v1836_v19 = vmax.f32 %v1835_v0, 0.0  ;;  %8178 = vmatmul.bf16.vlgmr.msra.gmra.mxu1 %v18017_v28  ;;  %v11712_v47 = vor.u32 %v15483_v44, %v11709_v17  ;;  %v15403_v52 = vld [vmem:[%s23671_s3 + $0x484] sm:$0xf] }
 0x659   :  { %8319 = vmatpush.bf16.msra.mxu3 %v12640_v38  ;;  %8248 = vmatpush.bf16.msra.mxu1 %v11552_v26  ;;  %v15923_v38 = vld [vmem:[%s23671_s3 + $0x14c4] sm:$0xf] }
 0x65a   :  { %v18039_v51 = vpack.c.bf16 %v1836_v19, %v1836_v19  ;;  %v11389_v61 = vld [vmem:[%s23671_s3 + $0x4a0] sm:$0xf0]  ;;  %v13472_v26 = vor.u32 %v15923_v38, %v13469_v20 }
 0x65b   :  { %v15915_v39 = vld [vmem:[%s23671_s3 + $0x1484] sm:$0xf] }
 0x65c   :  { %8191 = vmatmul.bf16.vlgmr.msrb.gmra.mxu2 %v18039_v51  ;;  %v13437_v0 = vld [vmem:[%s23671_s3 + $0x14a0] sm:$0xf0] }
 0x65d   :  { %8320 = vmatpush.bf16.msra.mxu3 %v12608_v30  ;;  %8249 = vmatpush.bf16.msra.mxu1 %v11520_v1  ;;  %v11392_v30 = vor.u32 %v15403_v52, %v11389_v61  ;;  %v11645_v19 = vld [vmem:[%s23671_s3 + $0x6a0] sm:$0xf0]  ;;  %v13440_v24 = vor.u32 %v15915_v39, %v13437_v0 }
 0x65e   :  { %8261 = vmatpush.bf16.msrb.mxu2 %v11808_v36  ;;  %v15907_v50 = vld [vmem:[%s23671_s3 + $0x1444] sm:$0xf]  ;;  %v11360_v36 = vor.u32 %v15395_v55, %v11357_v4 }
 0x65f   :  { %v13405_v1 = vld [vmem:[%s23671_s3 + $0x1460] sm:$0xf0] }
 0x660   :  { %8321 = vmatmul.bf16.vlgmr.msra.gmra.mxu3 %v17198_v8  ;;  %v15387_v43 = vld [vmem:[%s23671_s3 + $0x404] sm:$0xf]  ;;  %v13408_v31 = vor.u32 %v15907_v50, %v13405_v1 }
 0x661   :  { %8352 = vmatpush.bf16.msrb.mxu3 %v13600_v35  ;;  %8250 = vmatpush.bf16.msra.mxu1 %v11488_v58  ;;  %v15467_v35 = vld [vmem:[%s23671_s3 + $0x684] sm:$0xf] }
 0x662   :  { %8262 = vmatpush.bf16.msrb.mxu2 %v11776_v40  ;;  %v11648_v5 = vor.u32 %v15467_v35, %v11645_v19  ;;  %v11325_v49 = vld [vmem:[%s23671_s3 + $0x420] sm:$0xf0] }
 0x663   :  { %v15459_v56 = vld [vmem:[%s23671_s3 + $0x644] sm:$0xf]  ;;  %v11328_v40 = vor.u32 %v15387_v43, %v11325_v49 }
 0x664   :  { %v15635_v11 = vld [vmem:[%s23671_s3 + $0xbc4] sm:$0xf] }
 0x665   :  { %8353 = vmatpush.bf16.msrb.mxu3 %v13568_v48  ;;  %8251 = vmatpush.bf16.msra.mxu1 %v11456_v21  ;;  %v11613_v48 = vld [vmem:[%s23671_s3 + $0x660] sm:$0xf0]  ;;  %v12320_v59 = vor.u32 %v15635_v11, %v12317_v29 }
 0x666   :  { %8263 = vmatpush.bf16.msrb.mxu2 %v11744_v32  ;;  %v15899_v22 = vld [vmem:[%s23671_s3 + $0x1404] sm:$0xf]  ;;  %v11616_v10 = vor.u32 %v15459_v56, %v11613_v48 }
 0x667   :  { %v13373_v58 = vld [vmem:[%s23671_s3 + $0x1420] sm:$0xf0] }
 0x668   :  { %8217 = vmatmul.bf16.vlgmr.msrb.gmra.mxu1 %v18101_v57  ;;  %v16147_v12 = vld [vmem:[%s23671_s3 + $0x1bc4] sm:$0xf]  ;;  %v13376_v9 = vor.u32 %v15899_v22, %v13373_v58 }
 0x669   :  { %8354 = vmatpush.bf16.msrb.mxu3 %v13536_v6  ;;  %8252 = vmatpush.bf16.msra.mxu1 %v11424_v33  ;;  %v14365_v37 = vld [vmem:[%s23671_s3 + $0x1be0] sm:$0xf0] }
 0x66a   :  { %8264 = vmatpush.bf16.msrb.mxu2 %v11712_v47  ;;  %v15451_v6 = vld [vmem:[%s23671_s3 + $0x604] sm:$0xf]  ;;  %v14368_v41 = vor.u32 %v16147_v12, %v14365_v37 }
 0x66b   :  { %v11581_v14 = vld [vmem:[%s23671_s3 + $0x620] sm:$0xf0] }
 0x66c   :  { %8230 = vmatmul.bf16.vlgmr.msra.gmra.mxu2 %v16722_v3  ;;  %v15627_v42 = vld [vmem:[%s23671_s3 + $0xb84] sm:$0xf]  ;;  %v11584_v44 = vor.u32 %v15451_v6, %v11581_v14 }
 0x66d   :  { %8355 = vmatpush.bf16.msrb.mxu3 %v13504_v34  ;;  %8253 = vmatpush.bf16.msra.mxu1 %v11392_v30  ;;  %v12285_v21 = vld [vmem:[%s23671_s3 + $0xba0] sm:$0xf0] }
 0x66e   :  { %8265 = vmatpush.bf16.msrb.mxu2 %v11680_v23  ;;  %v15699_v32 = vld [vmem:[%s23671_s3 + $0xdc4] sm:$0xf]  ;;  %v12288_v38 = vor.u32 %v15627_v42, %v12285_v21 }
 0x66f   :  { %v12573_v16 = vld [vmem:[%s23671_s3 + $0xde0] sm:$0xf0] }
 0x670   :  { %v16139_v17 = vld [vmem:[%s23671_s3 + $0x1b84] sm:$0xf]  ;;  %v12576_v20 = vor.u32 %v15699_v32, %v12573_v16 }
 0x671   :  { %8356 = vmatpush.bf16.msrb.mxu3 %v13472_v26  ;;  %8254 = vmatpush.bf16.msra.mxu1 %v11360_v36  ;;  %v14333_v34 = vld [vmem:[%s23671_s3 + $0x1ba0] sm:$0xf0] }
 0x672   :  { %8266 = vmatpush.bf16.msrb.mxu2 %v11648_v5  ;;  %v15619_v33 = vld [vmem:[%s23671_s3 + $0xb44] sm:$0xf]  ;;  %v14336_v54 = vor.u32 %v16139_v17, %v14333_v34 }
 0x673   :  { %v12253_v47 = vld [vmem:[%s23671_s3 + $0xb60] sm:$0xf0] }
 0x674   :  { %v15691_v52 = vld [vmem:[%s23671_s3 + $0xd84] sm:$0xf]  ;;  %v12256_v39 = vor.u32 %v15619_v33, %v12253_v47 }
 0x675   :  { %8357 = vmatpush.bf16.msrb.mxu3 %v13440_v24  ;;  %8255 = vmatpush.bf16.msra.mxu1 %v11328_v40  ;;  %v12541_v61 = vld [vmem:[%s23671_s3 + $0xda0] sm:$0xf0] }
 0x676   :  { %8267 = vmatpush.bf16.msrb.mxu2 %v11616_v10  ;;  %v16131_v60 = vld [vmem:[%s23671_s3 + $0x1b44] sm:$0xf]  ;;  %v12544_v0 = vor.u32 %v15691_v52, %v12541_v61 }
 0x677   :  { %v14301_v26 = vld [vmem:[%s23671_s3 + $0x1b60] sm:$0xf0] }
 0x678   :  { %8256 = vmatmul.bf16.vlgmr.msra.gmra.mxu1 %v16828_v13  ;;  %v15611_v30 = vld [vmem:[%s23671_s3 + $0xb04] sm:$0xf]  ;;  %v14304_v35 = vor.u32 %v16131_v60, %v14301_v26 }
 0x679   :  { %8358 = vmatpush.bf16.msrb.mxu3 %v13408_v31  ;;  %8287 = vmatpush.bf16.msrb.mxu1 %v12320_v59  ;;  %v12221_v23 = vld [vmem:[%s23671_s3 + $0xb20] sm:$0xf0] }
 0x67a   :  { %8268 = vmatpush.bf16.msrb.mxu2 %v11584_v44  ;;  %v15683_v55 = vld [vmem:[%s23671_s3 + $0xd44] sm:$0xf]  ;;  %v12224_v50 = vor.u32 %v15611_v30, %v12221_v23  ;;  %v11043_v30 = vld [vmem:[%s23671_s3 + $0x1c8] sm:$0xf] }
 0x67b   :  { %v12509_v4 = vld [vmem:[%s23671_s3 + $0xd60] sm:$0xf0]  ;;  %v15320_v23 = vld [vmem:[%s23671_s3 + $0x1e4] sm:$0xf0] }
 0x67c   :  { %v16123_v19 = vld [vmem:[%s23671_s3 + $0x1b04] sm:$0xf]  ;;  %v12512_v1 = vor.u32 %v15683_v55, %v12509_v4 }
 0x67d   :  { %8359 = vmatpush.bf16.msrb.mxu3 %v13376_v9  ;;  %8288 = vmatpush.bf16.msrb.mxu1 %v12288_v38  ;;  %v14269_v24 = vld [vmem:[%s23671_s3 + $0x1b20] sm:$0xf0] }
 0x67e   :  { %8300 = vmatpush.bf16.msra.mxu2 %v12576_v20  ;;  %v15603_v36 = vld [vmem:[%s23671_s3 + $0xac4] sm:$0xf]  ;;  %v14272_v56 = vor.u32 %v16123_v19, %v14269_v24 }
 0x67f   :  { %8269 = vmatmul.bf16.vlgmr.msrb.gmra.mxu2 %v16844_v27  ;;  %v12189_v5 = vld [vmem:[%s23671_s3 + $0xae0] sm:$0xf0] }
 0x680   :  { %8360 = vmatmul.bf16.vlgmr.msrb.gmra.mxu3 %v17525_v7  ;;  %v15675_v43 = vld [vmem:[%s23671_s3 + $0xd04] sm:$0xf]  ;;  %v12192_v11 = vor.u32 %v15603_v36, %v12189_v5  ;;  %v11044_v5 = vor.u32 %v15320_v23, %v11043_v30  ;;  %v10883_v23 = vld [vmem:[%s23671_s3 + $0x88] sm:$0xf] }
 0x681   :  { %8391 = vmatpush.bf16.msra.mxu3 %v14368_v41  ;;  %8289 = vmatpush.bf16.msrb.mxu1 %v12256_v39  ;;  %v12477_v49 = vld [vmem:[%s23671_s3 + $0xd20] sm:$0xf0] }
 0x682   :  { %8301 = vmatpush.bf16.msra.mxu2 %v12544_v0  ;;  %v16115_v48 = vld [vmem:[%s23671_s3 + $0x1ac4] sm:$0xf]  ;;  %v12480_v29 = vor.u32 %v15675_v43, %v12477_v49  ;;  %v11011_v49 = vld [vmem:[%s23671_s3 + $0x188] sm:$0xf] }
 0x683   :  { %v14237_v31 = vld [vmem:[%s23671_s3 + $0x1ae0] sm:$0xf0] }
 0x684   :  { %v15595_v22 = vld [vmem:[%s23671_s3 + $0xa84] sm:$0xf]  ;;  %v14240_v12 = vor.u32 %v16115_v48, %v14237_v31 }
 0x685   :  { %8392 = vmatpush.bf16.msra.mxu3 %v14336_v54  ;;  %8290 = vmatpush.bf16.msrb.mxu1 %v12224_v50  ;;  %v12157_v58 = vld [vmem:[%s23671_s3 + $0xaa0] sm:$0xf0] }
 0x686   :  { %8302 = vmatpush.bf16.msra.mxu2 %v12512_v1  ;;  %v15667_v40 = vld [vmem:[%s23671_s3 + $0xcc4] sm:$0xf]  ;;  %v12160_v6 = vor.u32 %v15595_v22, %v12157_v58 }
 0x687   :  { %v12445_v10 = vld [vmem:[%s23671_s3 + $0xce0] sm:$0xf0] }
 0x688   :  { %v16107_v37 = vld [vmem:[%s23671_s3 + $0x1a84] sm:$0xf]  ;;  %v12448_v14 = vor.u32 %v15667_v40, %v12445_v10  ;;  %v10979_v10 = vld [vmem:[%s23671_s3 + $0x148] sm:$0xf] }
 0x689   :  { %8393 = vmatpush.bf16.msra.mxu3 %v14304_v35  ;;  %v14205_v59 = vld [vmem:[%s23671_s3 + $0x1aa0] sm:$0xf0]  ;;  %8291 = vmatpush.bf16.msrb.mxu1 %v12192_v11 }
 0x68a   :  { %8303 = vmatpush.bf16.msra.mxu2 %v12480_v29  ;;  %v15587_v42 = vld [vmem:[%s23671_s3 + $0xa44] sm:$0xf]  ;;  %v14208_v16 = vor.u32 %v16107_v37, %v14205_v59 }
 0x68b   :  { %v12125_v9 = vld [vmem:[%s23671_s3 + $0xa60] sm:$0xf0] }
 0x68c   :  { %v15659_v21 = vld [vmem:[%s23671_s3 + $0xc84] sm:$0xf]  ;;  %v12128_v17 = vor.u32 %v15587_v42, %v12125_v9 }
 0x68d   :  { %8394 = vmatpush.bf16.msra.mxu3 %v14272_v56  ;;  %v12413_v32 = vld [vmem:[%s23671_s3 + $0xca0] sm:$0xf0]  ;;  %8292 = vmatpush.bf16.msrb.mxu1 %v12160_v6  ;;  %v15312_v56 = vld [vmem:[%s23671_s3 + $0x1a4] sm:$0xf0] }
 0x68e   :  { %v16099_v41 = vld [vmem:[%s23671_s3 + $0x1a44] sm:$0xf]  ;;  %8304 = vmatpush.bf16.msra.mxu2 %v12448_v14  ;;  %v12416_v34 = vor.u32 %v15659_v21, %v12413_v32  ;;  %v11012_v40 = vor.u32 %v15312_v56, %v11011_v49  ;;  %v10947_v32 = vld [vmem:[%s23671_s3 + $0x108] sm:$0xf] }
 0x68f   :  { %v14173_v44 = vld [vmem:[%s23671_s3 + $0x1a60] sm:$0xf0]  ;;  %v15272_v49 = vld [vmem:[%s23671_s3 + $0x64] sm:$0xf0] }
 0x690   :  { %v15579_v38 = vld [vmem:[%s23671_s3 + $0xa04] sm:$0xf]  ;;  %v14176_v52 = vor.u32 %v16099_v41, %v14173_v44 }
 0x691   :  { %8395 = vmatpush.bf16.msra.mxu3 %v14240_v12  ;;  %v12093_v20 = vld [vmem:[%s23671_s3 + $0xa20] sm:$0xf0]  ;;  %8293 = vmatpush.bf16.msrb.mxu1 %v12128_v17  ;;  %v15304_v12 = vld [vmem:[%s23671_s3 + $0x164] sm:$0xf0] }
 0x692   :  { %v15651_v33 = vld [vmem:[%s23671_s3 + $0xc44] sm:$0xf]  ;;  %8305 = vmatpush.bf16.msra.mxu2 %v12416_v34  ;;  %v12096_v39 = vor.u32 %v15579_v38, %v12093_v20  ;;  %v10980_v21 = vor.u32 %v15304_v12, %v10979_v10  ;;  %v10819_v12 = vld [vmem:[%s23671_s3 + $0x8] sm:$0xf] }
 0x693   :  { %v12381_v47 = vld [vmem:[%s23671_s3 + $0xc60] sm:$0xf0] }
 0x694   :  { %v15827_v61 = vld [vmem:[%s23671_s3 + $0x11c4] sm:$0xf]  ;;  %v12384_v0 = vor.u32 %v15651_v33, %v12381_v47  ;;  %v10915_v47 = vld [vmem:[%s23671_s3 + $0xc8] sm:$0xf] }
 0x695   :  { %8396 = vmatpush.bf16.msra.mxu3 %v14208_v16  ;;  %v13085_v54 = vld [vmem:[%s23671_s3 + $0x11e0] sm:$0xf0]  ;;  %8294 = vmatpush.bf16.msrb.mxu1 %v12096_v39  ;;  %v15296_v16 = vld [vmem:[%s23671_s3 + $0x124] sm:$0xf0] }
 0x696   :  { %v16091_v60 = vld [vmem:[%s23671_s3 + $0x1a04] sm:$0xf]  ;;  %v13088_v55 = vor.u32 %v15827_v61, %v13085_v54  ;;  %8306 = vmatpush.bf16.msra.mxu2 %v12384_v0  ;;  %v10948_v33 = vor.u32 %v15296_v16, %v10947_v32 }
 0x697   :  { %v14141_v26 = vld [vmem:[%s23671_s3 + $0x1a20] sm:$0xf0] }
 0x698   :  { %v15643_v4 = vld [vmem:[%s23671_s3 + $0xc04] sm:$0xf]  ;;  %v14144_v24 = vor.u32 %v16091_v60, %v14141_v26  ;;  %8295 = vmatmul.bf16.vlgmr.msrb.gmra.mxu1 %v17147_v15 }
 0x699   :  { %v12349_v35 = vld [vmem:[%s23671_s3 + $0xc20] sm:$0xf0]  ;;  %8397 = vmatpush.bf16.msra.mxu3 %v14176_v52  ;;  %8326 = vmatpush.bf16.msra.mxu1 %v13088_v55  ;;  %v15288_v52 = vld [vmem:[%s23671_s3 + $0xe4] sm:$0xf0] }
 0x69a   :  { %v15819_v19 = vld [vmem:[%s23671_s3 + $0x1184] sm:$0xf]  ;;  %v12352_v43 = vor.u32 %v15643_v4, %v12349_v35  ;;  %v10916_v30 = vor.u32 %v15288_v52, %v10915_v47  ;;  %v15280_v55 = vld [vmem:[%s23671_s3 + $0xa4] sm:$0xf0] }
 0x69b   :  { %v13053_v50 = vld [vmem:[%s23671_s3 + $0x11a0] sm:$0xf0]  ;;  %v11779_v47 = vld [vmem:[%s23671_s3 + $0x788] sm:$0xf] }
 0x69c   :  { %v15891_v1 = vld [vmem:[%s23671_s3 + $0x13c4] sm:$0xf]  ;;  %v13056_v48 = vor.u32 %v15819_v19, %v13053_v50  ;;  %8307 = vmatpush.bf16.msra.mxu2 %v12352_v43  ;;  %v10851_v43 = vld [vmem:[%s23671_s3 + $0x48] sm:$0xf] }
 0x69d   :  { %v13341_v36 = vld [vmem:[%s23671_s3 + $0x13e0] sm:$0xf0]  ;;  %8398 = vmatpush.bf16.msra.mxu3 %v14144_v24  ;;  %v15504_v52 = vld [vmem:[%s23671_s3 + $0x7a4] sm:$0xf0] }
 0x69e   :  { %v13344_v31 = vor.u32 %v15891_v1, %v13341_v36  ;;  %v15811_v11 = vld [vmem:[%s23671_s3 + $0x1144] sm:$0xf]  ;;  %8327 = vmatpush.bf16.msra.mxu1 %v13056_v48 }
 0x69f   :  { %v13021_v29 = vld [vmem:[%s23671_s3 + $0x1160] sm:$0xf0]  ;;  %8308 = vmatmul.bf16.vlgmr.msra.gmra.mxu2 %v17185_v53 }
 0x6a0   :  { %v15883_v22 = vld [vmem:[%s23671_s3 + $0x1384] sm:$0xf]  ;;  %8339 = vmatpush.bf16.msrb.mxu2 %v13344_v31  ;;  %v13024_v37 = vor.u32 %v15811_v11, %v13021_v29  ;;  %8399 = vmatmul.bf16.vlgmr.msra.gmra.mxu3 %v18039_v51 }
 0x6a1   :  { %v13309_v58 = vld [vmem:[%s23671_s3 + $0x13a0] sm:$0xf0]  ;;  %8430 = vmatpush.bf16.msrb.mxu3 %v11044_v5  ;;  %v10884_v5 = vor.u32 %v15280_v55, %v10883_v23  ;;  %v11747_v55 = vld [vmem:[%s23671_s3 + $0x748] sm:$0xf] }
 0x6a2   :  { %v13312_v59 = vor.u32 %v15883_v22, %v13309_v58  ;;  %v15803_v6 = vld [vmem:[%s23671_s3 + $0x1104] sm:$0xf]  ;;  %8328 = vmatpush.bf16.msra.mxu1 %v13024_v37  ;;  %v10852_v58 = vor.u32 %v15272_v49, %v10851_v43  ;;  %v15264_v37 = vld [vmem:[%s23671_s3 + $0x24] sm:$0xf0] }
 0x6a3   :  { %v12989_v14 = vld [vmem:[%s23671_s3 + $0x1120] sm:$0xf0]  ;;  %v18414_v4 = vpop.f32.mrf.mxu3  ;;  %v11715_v49 = vld [vmem:[%s23671_s3 + $0x708] sm:$0xf] }
 0x6a4   :  { %v15875_v42 = vld [vmem:[%s23671_s3 + $0x1344] sm:$0xf]  ;;  %8340 = vmatpush.bf16.msrb.mxu2 %v13312_v59  ;;  %v12992_v41 = vor.u32 %v15803_v6, %v12989_v14 }
 0x6a5   :  { %v13277_v9 = vld [vmem:[%s23671_s3 + $0x1360] sm:$0xf0]  ;;  %8431 = vmatpush.bf16.msrb.mxu3 %v11012_v40 }
 0x6a6   :  { %v13280_v44 = vor.u32 %v15875_v42, %v13277_v9  ;;  %v15795_v17 = vld [vmem:[%s23671_s3 + $0x10c4] sm:$0xf]  ;;  %8329 = vmatpush.bf16.msra.mxu1 %v12992_v41  ;;  %v11811_v42 = vld [vmem:[%s23671_s3 + $0x7c8] sm:$0xf] }
 0x6a7   :  { %v12957_v34 = vld [vmem:[%s23671_s3 + $0x10e0] sm:$0xf0]  ;;  %v15512_v9 = vld [vmem:[%s23671_s3 + $0x7e4] sm:$0xf0] }
 0x6a8   :  { %v15867_v38 = vld [vmem:[%s23671_s3 + $0x1304] sm:$0xf]  ;;  %8341 = vmatpush.bf16.msrb.mxu2 %v13280_v44  ;;  %v12960_v61 = vor.u32 %v15795_v17, %v12957_v34  ;;  %v10820_v44 = vor.u32 %v15264_v37, %v10819_v12  ;;  %v11683_v12 = vld [vmem:[%s23671_s3 + $0x6c8] sm:$0xf] }
 0x6a9   :  { %v13245_v20 = vld [vmem:[%s23671_s3 + $0x1320] sm:$0xf0]  ;;  %8432 = vmatpush.bf16.msrb.mxu3 %v10980_v21  ;;  %v15480_v37 = vld [vmem:[%s23671_s3 + $0x6e4] sm:$0xf0] }
 0x6aa   :  { %v13248_v54 = vor.u32 %v15867_v38, %v13245_v20  ;;  %v15787_v60 = vld [vmem:[%s23671_s3 + $0x1084] sm:$0xf]  ;;  %8330 = vmatpush.bf16.msra.mxu1 %v12960_v61  ;;  %v11812_v20 = vor.u32 %v15512_v9, %v11811_v42 }
 0x6ab   :  { %v12925_v26 = vld [vmem:[%s23671_s3 + $0x10a0] sm:$0xf0]  ;;  %v8207_v59 = vpop.f32.mrf.mxu3 }
 0x6ac   :  { %v15859_v39 = vld [vmem:[%s23671_s3 + $0x12c4] sm:$0xf]  ;;  %8342 = vmatpush.bf16.msrb.mxu2 %v13248_v54  ;;  %v12928_v35 = vor.u32 %v15787_v60, %v12925_v26 }
 0x6ad   :  { %v13213_v0 = vld [vmem:[%s23671_s3 + $0x12e0] sm:$0xf0]  ;;  %8433 = vmatpush.bf16.msrb.mxu3 %v10948_v33 }
 0x6ae   :  { %v13216_v19 = vor.u32 %v15859_v39, %v13213_v0  ;;  %v15779_v24 = vld [vmem:[%s23671_s3 + $0x1044] sm:$0xf]  ;;  %8331 = vmatpush.bf16.msra.mxu1 %v12928_v35  ;;  %v15496_v35 = vld [vmem:[%s23671_s3 + $0x764] sm:$0xf0] }
 0x6af   :  { %v12893_v50 = vld [vmem:[%s23671_s3 + $0x1060] sm:$0xf0]  ;;  %v11748_v43 = vor.u32 %v15496_v35, %v11747_v55 }
 0x6b0   :  { %v15851_v1 = vld [vmem:[%s23671_s3 + $0x1284] sm:$0xf]  ;;  %8343 = vmatpush.bf16.msrb.mxu2 %v13216_v19  ;;  %v12896_v56 = vor.u32 %v15779_v24, %v12893_v50 }
 0x6b1   :  { %v13181_v36 = vld [vmem:[%s23671_s3 + $0x12a0] sm:$0xf0]  ;;  %8434 = vmatpush.bf16.msrb.mxu3 %v10916_v30  ;;  %v11780_v30 = vor.u32 %v15504_v52, %v11779_v47 }
 0x6b2   :  { %v13184_v48 = vor.u32 %v15851_v1, %v13181_v36  ;;  %v15771_v31 = vld [vmem:[%s23671_s3 + $0x1004] sm:$0xf]  ;;  %8332 = vmatpush.bf16.msra.mxu1 %v12896_v56  ;;  %v15488_v56 = vld [vmem:[%s23671_s3 + $0x724] sm:$0xf0] }
 0x6b3   :  { %v12861_v11 = vld [vmem:[%s23671_s3 + $0x1020] sm:$0xf0]  ;;  %v18501_v23 = vpop.f32.mrf.mxu3 }
 0x6b4   :  { %v15843_v29 = vld [vmem:[%s23671_s3 + $0x1244] sm:$0xf]  ;;  %8344 = vmatpush.bf16.msrb.mxu2 %v13184_v48  ;;  %v12864_v6 = vor.u32 %v15771_v31, %v12861_v11 }
 0x6b5   :  { %v13149_v22 = vld [vmem:[%s23671_s3 + $0x1260] sm:$0xf0]  ;;  %8435 = vmatpush.bf16.msrb.mxu3 %v10884_v5 }
 0x6b6   :  { %v16019_v40 = vld [vmem:[%s23671_s3 + $0x17c4] sm:$0xf]  ;;  %v13152_v14 = vor.u32 %v15843_v29, %v13149_v22  ;;  %8333 = vmatpush.bf16.msra.mxu1 %v12864_v6 }
 0x6b7   :  { %v13853_v10 = vld [vmem:[%s23671_s3 + $0x17e0] sm:$0xf0] }
 0x6b8   :  { %v13856_v21 = vor.u32 %v16019_v40, %v13853_v10  ;;  %v15835_v32 = vld [vmem:[%s23671_s3 + $0x1204] sm:$0xf]  ;;  %8345 = vmatpush.bf16.msrb.mxu2 %v13152_v14  ;;  %v11716_v40 = vor.u32 %v15488_v56, %v11715_v49  ;;  %v15704_v49 = vld [vmem:[%s23671_s3 + $0xde4] sm:$0xf0] }
 0x6b9   :  { %v13117_v16 = vld [vmem:[%s23671_s3 + $0x1220] sm:$0xf0]  ;;  %8436 = vmatpush.bf16.msrb.mxu3 %v10852_v58  ;;  %8334 = vmatmul.bf16.vlgmr.msra.gmra.mxu1 %v17423_v2 }
 0x6ba   :  { %v16011_v41 = vld [vmem:[%s23671_s3 + $0x1784] sm:$0xf]  ;;  %v13120_v33 = vor.u32 %v15835_v32, %v13117_v16  ;;  %8365 = vmatpush.bf16.msrb.mxu1 %v13856_v21  ;;  %v11684_v32 = vor.u32 %v15480_v37, %v11683_v12  ;;  %v11651_v16 = vld [vmem:[%s23671_s3 + $0x688] sm:$0xf] }
 0x6bb   :  { %v13821_v17 = vld [vmem:[%s23671_s3 + $0x17a0] sm:$0xf0]  ;;  %v8246_v10 = vpop.f32.mrf.mxu3 }
 0x6bc   :  { %v16083_v34 = vld [vmem:[%s23671_s3 + $0x19c4] sm:$0xf]  ;;  %v13824_v61 = vor.u32 %v16011_v41, %v13821_v17  ;;  %8346 = vmatpush.bf16.msrb.mxu2 %v13120_v33  ;;  %v15472_v41 = vld [vmem:[%s23671_s3 + $0x6a4] sm:$0xf0] }
 0x6bd   :  { %v14109_v38 = vld [vmem:[%s23671_s3 + $0x19e0] sm:$0xf0]  ;;  %8437 = vmatpush.bf16.msrb.mxu3 %v10820_v44  ;;  %v11652_v47 = vor.u32 %v15472_v41, %v11651_v16 }
 0x6be   :  { %v14112_v54 = vor.u32 %v16083_v34, %v14109_v38  ;;  %v16003_v60 = vld [vmem:[%s23671_s3 + $0x1744] sm:$0xf]  ;;  %8366 = vmatpush.bf16.msrb.mxu1 %v13824_v61  ;;  %v11619_v61 = vld [vmem:[%s23671_s3 + $0x648] sm:$0xf] }
 0x6bf   :  { %v13789_v26 = vld [vmem:[%s23671_s3 + $0x1760] sm:$0xf0]  ;;  %8347 = vmatmul.bf16.vlgmr.msrb.gmra.mxu2 %v17487_v62 }
 0x6c0   :  { %v16075_v39 = vld [vmem:[%s23671_s3 + $0x1984] sm:$0xf]  ;;  %8378 = vmatpush.bf16.msra.mxu2 %v14112_v54  ;;  %v13792_v19 = vor.u32 %v16003_v60, %v13789_v26  ;;  %8438 = vmatmul.bf16.vlgmr.msrb.gmra.mxu3 %v16722_v3  ;;  %v15464_v54 = vld [vmem:[%s23671_s3 + $0x664] sm:$0xf0] }
 0x6c1   :  { %v14077_v0 = vld [vmem:[%s23671_s3 + $0x19a0] sm:$0xf0]  ;;  %8469 = vmatpush.bf16.msra.mxu3 %v11812_v20  ;;  %v11620_v35 = vor.u32 %v15464_v54, %v11619_v61 }
 0x6c2   :  { %v14080_v24 = vor.u32 %v16075_v39, %v14077_v0  ;;  %v15995_v50 = vld [vmem:[%s23671_s3 + $0x1704] sm:$0xf]  ;;  %8367 = vmatpush.bf16.msrb.mxu1 %v13792_v19 }
 0x6c3   :  { %v13757_v1 = vld [vmem:[%s23671_s3 + $0x1720] sm:$0xf0]  ;;  %v18577_v52 = vpop.f32.mrf.mxu3 }
 0x6c4   :  { %v16067_v36 = vld [vmem:[%s23671_s3 + $0x1944] sm:$0xf]  ;;  %8379 = vmatpush.bf16.msra.mxu2 %v14080_v24  ;;  %v13760_v48 = vor.u32 %v15995_v50, %v13757_v1  ;;  %v11587_v50 = vld [vmem:[%s23671_s3 + $0x608] sm:$0xf] }
 0x6c5   :  { %v14045_v5 = vld [vmem:[%s23671_s3 + $0x1960] sm:$0xf0]  ;;  %8470 = vmatpush.bf16.msra.mxu3 %v11780_v30  ;;  %v15456_v1 = vld [vmem:[%s23671_s3 + $0x624] sm:$0xf0] }
 0x6c6   :  { %v14048_v31 = vor.u32 %v16067_v36, %v14045_v5  ;;  %v15987_v11 = vld [vmem:[%s23671_s3 + $0x16c4] sm:$0xf]  ;;  %8368 = vmatpush.bf16.msrb.mxu1 %v13760_v48 }
 0x6c7   :  { %v13725_v29 = vld [vmem:[%s23671_s3 + $0x16e0] sm:$0xf0] }
 0x6c8   :  { %v16059_v22 = vld [vmem:[%s23671_s3 + $0x1904] sm:$0xf]  ;;  %8380 = vmatpush.bf16.msra.mxu2 %v14048_v31  ;;  %v13728_v59 = vor.u32 %v15987_v11, %v13725_v29  ;;  %v11588_v29 = vor.u32 %v15456_v1, %v11587_v50 }
 0x6c9   :  { %v14013_v58 = vld [vmem:[%s23671_s3 + $0x1920] sm:$0xf0]  ;;  %8471 = vmatpush.bf16.msra.mxu3 %v11748_v43  ;;  %v12579_v43 = vld [vmem:[%s23671_s3 + $0xdc8] sm:$0xf] }
 0x6ca   :  { %v14016_v6 = vor.u32 %v16059_v22, %v14013_v58  ;;  %v15979_v14 = vld [vmem:[%s23671_s3 + $0x1684] sm:$0xf]  ;;  %8369 = vmatpush.bf16.msrb.mxu1 %v13728_v59  ;;  %v12580_v12 = vor.u32 %v15704_v49, %v12579_v43  ;;  %v12547_v59 = vld [vmem:[%s23671_s3 + $0xd88] sm:$0xf] }
 0x6cb   :  { %v13693_v42 = vld [vmem:[%s23671_s3 + $0x16a0] sm:$0xf0]  ;;  %v8285_v10 = vpop.f32.mrf.mxu3 }
 0x6cc   :  { %v16051_v9 = vld [vmem:[%s23671_s3 + $0x18c4] sm:$0xf]  ;;  %8381 = vmatpush.bf16.msra.mxu2 %v14016_v6  ;;  %v13696_v44 = vor.u32 %v15979_v14, %v13693_v42  ;;  %v15696_v6 = vld [vmem:[%s23671_s3 + $0xda4] sm:$0xf0] }
 0x6cd   :  { %v13981_v21 = vld [vmem:[%s23671_s3 + $0x18e0] sm:$0xf0]  ;;  %8472 = vmatpush.bf16.msra.mxu3 %v11716_v40  ;;  %v12548_v41 = vor.u32 %v15696_v6, %v12547_v59 }
 0x6ce   :  { %v13984_v17 = vor.u32 %v16051_v9, %v13981_v21  ;;  %v15971_v34 = vld [vmem:[%s23671_s3 + $0x1644] sm:$0xf]  ;;  %8370 = vmatpush.bf16.msrb.mxu1 %v13696_v44  ;;  %v12515_v44 = vld [vmem:[%s23671_s3 + $0xd48] sm:$0xf] }
 0x6cf   :  { %v13661_v38 = vld [vmem:[%s23671_s3 + $0x1660] sm:$0xf0] }
 0x6d0   :  { %v16043_v20 = vld [vmem:[%s23671_s3 + $0x1884] sm:$0xf]  ;;  %8382 = vmatpush.bf16.msra.mxu2 %v13984_v17  ;;  %v13664_v60 = vor.u32 %v15971_v34, %v13661_v38  ;;  %v15688_v17 = vld [vmem:[%s23671_s3 + $0xd64] sm:$0xf0] }
 0x6d1   :  { %v13949_v33 = vld [vmem:[%s23671_s3 + $0x18a0] sm:$0xf0]  ;;  %8473 = vmatpush.bf16.msra.mxu3 %v11684_v32  ;;  %v12516_v54 = vor.u32 %v15688_v17, %v12515_v44 }
 0x6d2   :  { %v13952_v26 = vor.u32 %v16043_v20, %v13949_v33  ;;  %v15963_v39 = vld [vmem:[%s23671_s3 + $0x1604] sm:$0xf]  ;;  %8371 = vmatpush.bf16.msrb.mxu1 %v13664_v60  ;;  %v12483_v60 = vld [vmem:[%s23671_s3 + $0xd08] sm:$0xf] }
 0x6d3   :  { %v13629_v0 = vld [vmem:[%s23671_s3 + $0x1620] sm:$0xf0] }
 0x6d4   :  { %v16035_v30 = vld [vmem:[%s23671_s3 + $0x1844] sm:$0xf]  ;;  %8383 = vmatpush.bf16.msra.mxu2 %v13952_v26  ;;  %v13632_v36 = vor.u32 %v15963_v39, %v13629_v0  ;;  %v15680_v26 = vld [vmem:[%s23671_s3 + $0xd24] sm:$0xf0] }
 0x6d5   :  { %v13917_v55 = vld [vmem:[%s23671_s3 + $0x1860] sm:$0xf0]  ;;  %8474 = vmatpush.bf16.msra.mxu3 %v11652_v47  ;;  %v8179_v39 = vpop.f32.mrf.mxu1  ;;  %v12484_v1 = vor.u32 %v15680_v26, %v12483_v60  ;;  %v15648_v60 = vld [vmem:[%s23671_s3 + $0xc24] sm:$0xf0] }
 0x6d6   :  { %v16211_v19 = vld [vmem:[%s23671_s3 + $0x1dc4] sm:$0xf]  ;;  %v13920_v5 = vor.u32 %v16035_v30, %v13917_v55  ;;  %8372 = vmatpush.bf16.msrb.mxu1 %v13632_v36  ;;  %v12451_v36 = vld [vmem:[%s23671_s3 + $0xcc8] sm:$0xf] }
 0x6d7   :  { %v14621_v24 = vld [vmem:[%s23671_s3 + $0x1de0] sm:$0xf0] }
 0x6d8   :  { %v14624_v56 = vor.u32 %v16211_v19, %v14621_v24  ;;  %v16027_v48 = vld [vmem:[%s23671_s3 + $0x1804] sm:$0xf]  ;;  %8384 = vmatpush.bf16.msra.mxu2 %v13920_v5 }
 0x6d9   :  { %v13885_v31 = vld [vmem:[%s23671_s3 + $0x1820] sm:$0xf0]  ;;  %8475 = vmatpush.bf16.msra.mxu3 %v11620_v35  ;;  %8373 = vmatmul.bf16.vlgmr.msrb.gmra.mxu1 %v17538_v63  ;;  %v8180_v35 = vadd.f32 %v8179_v39, %v17622_v25  ;;  %v15672_v25 = vld [vmem:[%s23671_s3 + $0xce4] sm:$0xf0] }
 0x6da   :  { %v16203_v11 = vld [vmem:[%s23671_s3 + $0x1d84] sm:$0xf]  ;;  %v13888_v37 = vor.u32 %v16027_v48, %v13885_v31  ;;  %8404 = vmatpush.bf16.msra.mxu1 %v14624_v56 }
 0x6db   :  { %v14589_v22 = vld [vmem:[%s23671_s3 + $0x1da0] sm:$0xf0] }
 0x6dc   :  { %v16275_v58 = vld [vmem:[%s23671_s3 + $0x1fc4] sm:$0xf]  ;;  %v14592_v14 = vor.u32 %v16203_v11, %v14589_v22  ;;  %8385 = vmatpush.bf16.msra.mxu2 %v13888_v37  ;;  %v12452_v11 = vor.u32 %v15672_v25, %v12451_v36  ;;  %v15664_v22 = vld [vmem:[%s23671_s3 + $0xca4] sm:$0xf0] }
 0x6dd   :  { %v14877_v40 = vld [vmem:[%s23671_s3 + $0x1fe0] sm:$0xf0]  ;;  %8476 = vmatpush.bf16.msra.mxu3 %v11588_v29  ;;  %v12419_v29 = vld [vmem:[%s23671_s3 + $0xc88] sm:$0xf] }
 0x6de   :  { %v14880_v42 = vor.u32 %v16275_v58, %v14877_v40  ;;  %v16195_v9 = vld [vmem:[%s23671_s3 + $0x1d44] sm:$0xf]  ;;  %8405 = vmatpush.bf16.msra.mxu1 %v14592_v14  ;;  %v8181_v58 = vpop.f32.mrf.mxu1 }
 0x6df   :  { %v14557_v21 = vld [vmem:[%s23671_s3 + $0x1d60] sm:$0xf0]  ;;  %8386 = vmatmul.bf16.vlgmr.msra.gmra.mxu2 %v18017_v28  ;;  %v8192_v14 = vpop.f32.mrf.mxu2 }
 0x6e0   :  { %v16267_v32 = vld [vmem:[%s23671_s3 + $0x1f84] sm:$0xf]  ;;  %8417 = vmatpush.bf16.msrb.mxu2 %v14880_v42  ;;  %v14560_v34 = vor.u32 %v16195_v9, %v14557_v21  ;;  %8477 = vmatmul.bf16.vlgmr.msra.gmra.mxu3 %v16844_v27  ;;  %v12420_v42 = vor.u32 %v15664_v22, %v12419_v29  ;;  %v8193_v9 = vadd.f32 %v8192_v14, %v8180_v35  ;;  %v12387_v21 = vld [vmem:[%s23671_s3 + $0xc48] sm:$0xf] }
 0x6e1   :  { %v14845_v16 = vld [vmem:[%s23671_s3 + $0x1fa0] sm:$0xf0]  ;;  %8508 = vmatpush.bf16.msrb.mxu3 %v12580_v12  ;;  %v15888_v29 = vld [vmem:[%s23671_s3 + $0x13a4] sm:$0xf0] }
 0x6e2   :  { %v14848_v38 = vor.u32 %v16267_v32, %v14845_v16  ;;  %v16187_v20 = vld [vmem:[%s23671_s3 + $0x1d04] sm:$0xf]  ;;  %8406 = vmatpush.bf16.msra.mxu1 %v14560_v34  ;;  %v15656_v32 = vld [vmem:[%s23671_s3 + $0xc64] sm:$0xf0]  ;;  %v8206_v34 = vadd.f32 %v18414_v4, %v8193_v9 }
 0x6e3   :  { %v14525_v33 = vld [vmem:[%s23671_s3 + $0x1d20] sm:$0xf0]  ;;  %v18733_v16 = vpop.f32.mrf.mxu3  ;;  %v15384_v4 = vld [vmem:[%s23671_s3 + $0x3e4] sm:$0xf0] }
 0x6e4   :  { %v16259_v47 = vld [vmem:[%s23671_s3 + $0x1f44] sm:$0xf]  ;;  %8418 = vmatpush.bf16.msrb.mxu2 %v14848_v38  ;;  %v14528_v0 = vor.u32 %v16187_v20, %v14525_v33  ;;  %v13283_v9 = vld [vmem:[%s23671_s3 + $0x1348] sm:$0xf] }
 0x6e5   :  { %v14813_v61 = vld [vmem:[%s23671_s3 + $0x1f60] sm:$0xf0]  ;;  %8509 = vmatpush.bf16.msrb.mxu3 %v12548_v41 }
 0x6e6   :  { %v14816_v30 = vor.u32 %v16259_v47, %v14813_v61  ;;  %v16179_v55 = vld [vmem:[%s23671_s3 + $0x1cc4] sm:$0xf]  ;;  %8407 = vmatpush.bf16.msra.mxu1 %v14528_v0  ;;  %v12388_v47 = vor.u32 %v15656_v32, %v12387_v21  ;;  %v11299_v61 = vld [vmem:[%s23671_s3 + $0x3c8] sm:$0xf]  ;;  %v8218_v26 = vpop.f32.mrf.mxu1 }
 0x6e7   :  { %v14493_v19 = vld [vmem:[%s23671_s3 + $0x1ce0] sm:$0xf0]  ;;  %v18766_v35 = vadd.f32 %v8218_v26, %v8206_v34  ;;  %v8194_v36 = vpop.f32.mrf.mxu2  ;;  %v15880_v21 = vld [vmem:[%s23671_s3 + $0x1364] sm:$0xf0] }
 0x6e8   :  { %v16251_v24 = vld [vmem:[%s23671_s3 + $0x1f04] sm:$0xf]  ;;  %8419 = vmatpush.bf16.msrb.mxu2 %v14816_v30  ;;  %v14496_v5 = vor.u32 %v16179_v55, %v14493_v19  ;;  %v13347_v30 = vld [vmem:[%s23671_s3 + $0x13c8] sm:$0xf]  ;;  %v11300_v19 = vor.u32 %v15384_v4, %v11299_v61 }
 0x6e9   :  { %v14781_v50 = vld [vmem:[%s23671_s3 + $0x1f20] sm:$0xf0]  ;;  %8510 = vmatpush.bf16.msrb.mxu3 %v12516_v54  ;;  %v12355_v54 = vld [vmem:[%s23671_s3 + $0xc08] sm:$0xf] }
 0x6ea   :  { %v14784_v43 = vor.u32 %v16251_v24, %v14781_v50  ;;  %v16171_v49 = vld [vmem:[%s23671_s3 + $0x1c84] sm:$0xf]  ;;  %8408 = vmatpush.bf16.msra.mxu1 %v14496_v5  ;;  %v15896_v55 = vld [vmem:[%s23671_s3 + $0x13e4] sm:$0xf0]  ;;  %v12356_v25 = vor.u32 %v15648_v60, %v12355_v54 }
 0x6eb   :  { %v14461_v56 = vld [vmem:[%s23671_s3 + $0x1ca0] sm:$0xf0]  ;;  %v15376_v5 = vld [vmem:[%s23671_s3 + $0x3a4] sm:$0xf0] }
 0x6ec   :  { %v16243_v48 = vld [vmem:[%s23671_s3 + $0x1ec4] sm:$0xf]  ;;  %8420 = vmatpush.bf16.msrb.mxu2 %v14784_v43  ;;  %v14464_v40 = vor.u32 %v16171_v49, %v14461_v56  ;;  %v11555_v43 = vld [vmem:[%s23671_s3 + $0x5c8] sm:$0xf]  ;;  %v13348_v56 = vor.u32 %v15896_v55, %v13347_v30 }
 0x6ed   :  { %v14749_v31 = vld [vmem:[%s23671_s3 + $0x1ee0] sm:$0xf0]  ;;  %8511 = vmatpush.bf16.msrb.mxu3 %v12484_v1  ;;  %v11267_v1 = vld [vmem:[%s23671_s3 + $0x388] sm:$0xf] }
 0x6ee   :  { %v14752_v10 = vor.u32 %v16243_v48, %v14749_v31  ;;  %v16163_v12 = vld [vmem:[%s23671_s3 + $0x1c44] sm:$0xf]  ;;  %8409 = vmatpush.bf16.msra.mxu1 %v14464_v40  ;;  %v15448_v49 = vld [vmem:[%s23671_s3 + $0x5e4] sm:$0xf0]  ;;  %v8324_v48 = vpop.f32.mrf.mxu3  ;;  %v11268_v22 = vor.u32 %v15376_v5, %v11267_v1 }
 0x6ef   :  { %v14429_v37 = vld [vmem:[%s23671_s3 + $0x1c60] sm:$0xf0]  ;;  %v11556_v58 = vor.u32 %v15448_v49, %v11555_v43  ;;  %v11235_v40 = vld [vmem:[%s23671_s3 + $0x348] sm:$0xf] }
 0x6f0   :  { %v16235_v59 = vld [vmem:[%s23671_s3 + $0x1e84] sm:$0xf]  ;;  %8421 = vmatpush.bf16.msrb.mxu2 %v14752_v10  ;;  %v14432_v41 = vor.u32 %v16163_v12, %v14429_v37  ;;  %v15368_v10 = vld [vmem:[%s23671_s3 + $0x364] sm:$0xf0] }
 0x6f1   :  { %v14717_v6 = vld [vmem:[%s23671_s3 + $0x1ea0] sm:$0xf0]  ;;  %8512 = vmatpush.bf16.msrb.mxu3 %v12452_v11  ;;  %v13315_v11 = vld [vmem:[%s23671_s3 + $0x1388] sm:$0xf]  ;;  %v11236_v32 = vor.u32 %v15368_v10, %v11235_v40 }
 0x6f2   :  { %v14720_v44 = vor.u32 %v16235_v59, %v14717_v6  ;;  %v16155_v17 = vld [vmem:[%s23671_s3 + $0x1c04] sm:$0xf]  ;;  %8410 = vmatpush.bf16.msra.mxu1 %v14432_v41  ;;  %v11523_v12 = vld [vmem:[%s23671_s3 + $0x588] sm:$0xf]  ;;  %v13316_v14 = vor.u32 %v15888_v29, %v13315_v11 }
 0x6f3   :  { %v14397_v38 = vld [vmem:[%s23671_s3 + $0x1c20] sm:$0xf0]  ;;  %v15440_v37 = vld [vmem:[%s23671_s3 + $0x5a4] sm:$0xf0] }
 0x6f4   :  { %v16227_v20 = vld [vmem:[%s23671_s3 + $0x1e44] sm:$0xf]  ;;  %8422 = vmatpush.bf16.msrb.mxu2 %v14720_v44  ;;  %v14400_v39 = vor.u32 %v16155_v17, %v14397_v38  ;;  %v11524_v41 = vor.u32 %v15440_v37, %v11523_v12  ;;  %v11203_v44 = vld [vmem:[%s23671_s3 + $0x308] sm:$0xf]  ;;  %v8231_v17 = vpop.f32.mrf.mxu2 }
 0x6f5   :  { %v14685_v33 = vld [vmem:[%s23671_s3 + $0x1e60] sm:$0xf0]  ;;  %8513 = vmatpush.bf16.msrb.mxu3 %v12420_v42  ;;  %v8220_v42 = vpop.f32.mrf.mxu1  ;;  %v15360_v34 = vld [vmem:[%s23671_s3 + $0x324] sm:$0xf0] }
 0x6f6   :  { %v14688_v0 = vor.u32 %v16227_v20, %v14685_v33  ;;  %v16219_v24 = vld [vmem:[%s23671_s3 + $0x1e04] sm:$0xf]  ;;  %8411 = vmatpush.bf16.msra.mxu1 %v14400_v39  ;;  %v11491_v38 = vld [vmem:[%s23671_s3 + $0x548] sm:$0xf]  ;;  %v11204_v60 = vor.u32 %v15360_v34, %v11203_v44 }
 0x6f7   :  { %v14653_v50 = vld [vmem:[%s23671_s3 + $0x1e20] sm:$0xf0]  ;;  %v15432_v20 = vld [vmem:[%s23671_s3 + $0x564] sm:$0xf0] }
 0x6f8   :  { %8423 = vmatpush.bf16.msrb.mxu2 %v14688_v0  ;;  %v14656_v31 = vor.u32 %v16219_v24, %v14653_v50  ;;  %v16353_v59 = vld [vmem:[%s23672_s4] sm:$0xff]  ;;  %v13251_v61 = vld [vmem:[%s23671_s3 + $0x1308] sm:$0xf]  ;;  %v11492_v26 = vor.u32 %v15432_v20, %v11491_v38 }
 0x6f9   :  { %8514 = vmatpush.bf16.msrb.mxu3 %v12388_v47  ;;  %8412 = vmatmul.bf16.vlgmr.msra.gmra.mxu1 %v17812_v46  ;;  %v2879_v6 = vperm.slane %v16353_v59, 1  ;;  %v13284_v47 = vor.u32 %v15880_v21, %v13283_v9  ;;  %v15872_v4 = vld [vmem:[%s23671_s3 + $0x1324] sm:$0xf0] }
 0x6fa   :  { %8443 = vmatpush.bf16.msrb.mxu1 %v11300_v19  ;;  %v11171_v39 = vld [vmem:[%s23671_s3 + $0x2c8] sm:$0xf] }
 0x6fb   :  { %v8232_v33 = vadd.f32 %v8231_v17, %v2879_v6  ;;  %v15352_v0 = vld [vmem:[%s23671_s3 + $0x2e4] sm:$0xf0] }
 0x6fc   :  { %8424 = vmatpush.bf16.msrb.mxu2 %v14656_v31  ;;  %v11459_v30 = vld [vmem:[%s23671_s3 + $0x508] sm:$0xf]  ;;  %v11172_v36 = vor.u32 %v15352_v0, %v11171_v39  ;;  %v8233_v43 = vpop.f32.mrf.mxu2 }
 0x6fd   :  { %8515 = vmatpush.bf16.msrb.mxu3 %v12356_v25  ;;  %v8245_v54 = vadd.f32 %v18501_v23, %v8232_v33  ;;  %v15424_v55 = vld [vmem:[%s23671_s3 + $0x524] sm:$0xf0]  ;;  %v13252_v23 = vor.u32 %v15872_v4, %v13251_v61  ;;  %v8257_v19 = vpop.f32.mrf.mxu1 }
 0x6fe   :  { %8444 = vmatpush.bf16.msrb.mxu1 %v11268_v22  ;;  %v13219_v24 = vld [vmem:[%s23671_s3 + $0x12c8] sm:$0xf]  ;;  %v11460_v25 = vor.u32 %v15424_v55, %v11459_v30 }
 0x6ff   :  { %8425 = vmatmul.bf16.vlgmr.msrb.gmra.mxu2 %v18101_v57  ;;  %v15864_v50 = vld [vmem:[%s23671_s3 + $0x12e4] sm:$0xf0]  ;;  %v8258_v1 = vadd.f32 %v8257_v19, %v8245_v54 }
 0x700   :  { %8456 = vmatpush.bf16.msra.mxu2 %v11556_v58  ;;  %8516 = vmatmul.bf16.vlgmr.msrb.gmra.mxu3 %v17185_v53  ;;  %v11139_v5 = vld [vmem:[%s23671_s3 + $0x288] sm:$0xf]  ;;  %v13220_v31 = vor.u32 %v15864_v50, %v13219_v24 }
 0x701   :  { %8547 = vmatpush.bf16.msra.mxu3 %v13348_v56  ;;  %v15344_v49 = vld [vmem:[%s23671_s3 + $0x2a4] sm:$0xf0] }
 0x702   :  { %8445 = vmatpush.bf16.msrb.mxu1 %v11236_v32  ;;  %v11427_v56 = vld [vmem:[%s23671_s3 + $0x4c8] sm:$0xf]  ;;  %v11140_v22 = vor.u32 %v15344_v49, %v11139_v5 }
 0x703   :  { %v15416_v48 = vld [vmem:[%s23671_s3 + $0x4e4] sm:$0xf0]  ;;  %v18889_v9 = vpop.f32.mrf.mxu3 }
 0x704   :  { %8457 = vmatpush.bf16.msra.mxu2 %v11524_v41  ;;  %v13187_v11 = vld [vmem:[%s23671_s3 + $0x1288] sm:$0xf]  ;;  %v11428_v58 = vor.u32 %v15416_v48, %v11427_v56  ;;  %v8270_v44 = vpop.f32.mrf.mxu2 }
 0x705   :  { %8548 = vmatpush.bf16.msra.mxu3 %v13316_v14  ;;  %v15856_v29 = vld [vmem:[%s23671_s3 + $0x12a4] sm:$0xf0]  ;;  %v8259_v6 = vpop.f32.mrf.mxu1  ;;  %v8271_v20 = vadd.f32 %v8270_v44, %v8258_v1 }
 0x706   :  { %8446 = vmatpush.bf16.msrb.mxu1 %v11204_v60  ;;  %v11107_v40 = vld [vmem:[%s23671_s3 + $0x248] sm:$0xf]  ;;  %v13188_v59 = vor.u32 %v15856_v29, %v13187_v11 }
 0x707   :  { %v15336_v10 = vld [vmem:[%s23671_s3 + $0x264] sm:$0xf0]  ;;  %v8284_v30 = vadd.f32 %v18577_v52, %v8271_v20 }
 0x708   :  { %8458 = vmatpush.bf16.msra.mxu2 %v11492_v26  ;;  %v11395_v12 = vld [vmem:[%s23671_s3 + $0x488] sm:$0xf]  ;;  %v11108_v21 = vor.u32 %v15336_v10, %v11107_v40 }
 0x709   :  { %8549 = vmatpush.bf16.msra.mxu3 %v13284_v47  ;;  %v15408_v37 = vld [vmem:[%s23671_s3 + $0x4a4] sm:$0xf0] }
 0x70a   :  { %8447 = vmatpush.bf16.msrb.mxu1 %v11172_v36  ;;  %v13155_v14 = vld [vmem:[%s23671_s3 + $0x1248] sm:$0xf]  ;;  %v11396_v32 = vor.u32 %v15408_v37, %v11395_v12 }
 0x70b   :  { %v15848_v42 = vld [vmem:[%s23671_s3 + $0x1264] sm:$0xf0]  ;;  %v8363_v5 = vpop.f32.mrf.mxu3 }
 0x70c   :  { %8459 = vmatpush.bf16.msra.mxu2 %v11460_v25  ;;  %v11075_v41 = vld [vmem:[%s23671_s3 + $0x208] sm:$0xf]  ;;  %v13156_v33 = vor.u32 %v15848_v42, %v13155_v14  ;;  %v8272_v48 = vpop.f32.mrf.mxu2 }
 0x70d   :  { %8550 = vmatpush.bf16.msra.mxu3 %v13252_v23  ;;  %v15328_v17 = vld [vmem:[%s23671_s3 + $0x224] sm:$0xf0] }
 0x70e   :  { %8448 = vmatpush.bf16.msrb.mxu1 %v11140_v22  ;;  %v11363_v34 = vld [vmem:[%s23671_s3 + $0x448] sm:$0xf]  ;;  %v11076_v60 = vor.u32 %v15328_v17, %v11075_v41 }
 0x70f   :  { %v15400_v38 = vld [vmem:[%s23671_s3 + $0x464] sm:$0xf0] }
 0x710   :  { %8460 = vmatpush.bf16.msra.mxu2 %v11428_v58  ;;  %v12067_v47 = vld [vmem:[%s23671_s3 + $0x9c8] sm:$0xf]  ;;  %v11364_v26 = vor.u32 %v15400_v38, %v11363_v34 }
 0x711   :  { %8551 = vmatpush.bf16.msra.mxu3 %v13220_v31  ;;  %v15576_v61 = vld [vmem:[%s23671_s3 + $0x9e4] sm:$0xf0] }
 0x712   :  { %v13123_v4 = vld [vmem:[%s23671_s3 + $0x1208] sm:$0xf]  ;;  %8449 = vmatpush.bf16.msrb.mxu1 %v11108_v21  ;;  %v12068_v55 = vor.u32 %v15576_v61, %v12067_v47 }
 0x713   :  { %v15840_v54 = vld [vmem:[%s23671_s3 + $0x1224] sm:$0xf0] }
 0x714   :  { %8461 = vmatpush.bf16.msra.mxu2 %v11396_v32  ;;  %v14115_v39 = vld [vmem:[%s23671_s3 + $0x19c8] sm:$0xf]  ;;  %v13124_v50 = vor.u32 %v15840_v54, %v13123_v4 }
 0x715   :  { %8552 = vmatpush.bf16.msra.mxu3 %v13188_v59  ;;  %v16088_v0 = vld [vmem:[%s23671_s3 + $0x19e4] sm:$0xf0]  ;;  %v8296_v54 = vpop.f32.mrf.mxu1 }
 0x716   :  { %v11331_v23 = vld [vmem:[%s23671_s3 + $0x408] sm:$0xf]  ;;  %v14116_v25 = vor.u32 %v16088_v0, %v14115_v39  ;;  %8450 = vmatpush.bf16.msrb.mxu1 %v11076_v60  ;;  %v8297_v39 = vadd.f32 %v8296_v54, %v8284_v30 }
 0x717   :  { %v15392_v19 = vld [vmem:[%s23671_s3 + $0x424] sm:$0xf0] }
 0x718   :  { %v12035_v24 = vld [vmem:[%s23671_s3 + $0x988] sm:$0xf]  ;;  %8462 = vmatpush.bf16.msra.mxu2 %v11364_v26  ;;  %v11332_v43 = vor.u32 %v15392_v19, %v11331_v23 }
 0x719   :  { %8553 = vmatpush.bf16.msra.mxu3 %v13156_v33  ;;  %v15568_v1 = vld [vmem:[%s23671_s3 + $0x9a4] sm:$0xf0]  ;;  %8451 = vmatmul.bf16.vlgmr.msrb.gmra.mxu1 %v16790_v45 }
 0x71a   :  { %v12323_v52 = vld [vmem:[%s23671_s3 + $0xbc8] sm:$0xf]  ;;  %8482 = vmatpush.bf16.msra.mxu1 %v12068_v55  ;;  %v12036_v31 = vor.u32 %v15568_v1, %v12035_v24 }
 0x71b   :  { %v15640_v36 = vld [vmem:[%s23671_s3 + $0xbe4] sm:$0xf0] }
 0x71c   :  { %v14083_v49 = vld [vmem:[%s23671_s3 + $0x1988] sm:$0xf]  ;;  %v12324_v11 = vor.u32 %v15640_v36, %v12323_v52  ;;  %8463 = vmatpush.bf16.msra.mxu2 %v11332_v43 }
 0x71d   :  { %v16080_v56 = vld [vmem:[%s23671_s3 + $0x19a4] sm:$0xf0]  ;;  %8554 = vmatpush.bf16.msra.mxu3 %v13124_v50 }
 0x71e   :  { %v12003_v29 = vld [vmem:[%s23671_s3 + $0x948] sm:$0xf]  ;;  %v14084_v10 = vor.u32 %v16080_v56, %v14083_v49  ;;  %8483 = vmatpush.bf16.msra.mxu1 %v12036_v31  ;;  %v8298_v31 = vpop.f32.mrf.mxu1 }
 0x71f   :  { %v15560_v22 = vld [vmem:[%s23671_s3 + $0x964] sm:$0xf0]  ;;  %8464 = vmatmul.bf16.vlgmr.msra.gmra.mxu2 %v16828_v13 }
 0x720   :  { %v12291_v58 = vld [vmem:[%s23671_s3 + $0xb88] sm:$0xf]  ;;  %8495 = vmatpush.bf16.msrb.mxu2 %v12324_v11  ;;  %v12004_v59 = vor.u32 %v15560_v22, %v12003_v29  ;;  %8555 = vmatmul.bf16.vlgmr.msra.gmra.mxu3 %v17487_v62 }
 0x721   :  { %v15632_v40 = vld [vmem:[%s23671_s3 + $0xba4] sm:$0xf0]  ;;  %8586 = vmatpush.bf16.msrb.mxu3 %v14116_v25 }
 0x722   :  { %v14051_v12 = vld [vmem:[%s23671_s3 + $0x1948] sm:$0xf]  ;;  %v12292_v6 = vor.u32 %v15632_v40, %v12291_v58  ;;  %8484 = vmatpush.bf16.msra.mxu1 %v12004_v59 }
 0x723   :  { %v16072_v37 = vld [vmem:[%s23671_s3 + $0x1964] sm:$0xf0]  ;;  %v19039_v22 = vpop.f32.mrf.mxu3 }
 0x724   :  { %v11971_v14 = vld [vmem:[%s23671_s3 + $0x908] sm:$0xf]  ;;  %v14052_v41 = vor.u32 %v16072_v37, %v14051_v12  ;;  %8496 = vmatpush.bf16.msrb.mxu2 %v12292_v6  ;;  %v8309_v12 = vpop.f32.mrf.mxu2 }
 0x725   :  { %v15552_v42 = vld [vmem:[%s23671_s3 + $0x924] sm:$0xf0]  ;;  %8587 = vmatpush.bf16.msrb.mxu3 %v14084_v10 }
 0x726   :  { %v12259_v21 = vld [vmem:[%s23671_s3 + $0xb48] sm:$0xf]  ;;  %v11972_v34 = vor.u32 %v15552_v42, %v11971_v14  ;;  %v8310_v14 = vadd.f32 %v8309_v12, %v8297_v39 }
 0x727   :  { %v15624_v32 = vld [vmem:[%s23671_s3 + $0xb64] sm:$0xf0] }
 0x728   :  { %v14019_v44 = vld [vmem:[%s23671_s3 + $0x1908] sm:$0xf]  ;;  %v12260_v38 = vor.u32 %v15624_v32, %v12259_v21  ;;  %8485 = vmatpush.bf16.msra.mxu1 %v11972_v34 }
 0x729   :  { %v16064_v17 = vld [vmem:[%s23671_s3 + $0x1924] sm:$0xf0]  ;;  %8588 = vmatpush.bf16.msrb.mxu3 %v14052_v41 }
 0x72a   :  { %v11939_v20 = vld [vmem:[%s23671_s3 + $0x8c8] sm:$0xf]  ;;  %v14020_v4 = vor.u32 %v16064_v17, %v14019_v44  ;;  %8497 = vmatpush.bf16.msrb.mxu2 %v12260_v38 }
 0x72b   :  { %v15544_v33 = vld [vmem:[%s23671_s3 + $0x8e4] sm:$0xf0] }
 0x72c   :  { %v12227_v47 = vld [vmem:[%s23671_s3 + $0xb08] sm:$0xf]  ;;  %v11940_v0 = vor.u32 %v15544_v33, %v11939_v20  ;;  %v8323_v33 = vadd.f32 %v18733_v16, %v8310_v14 }
 0x72d   :  { %v15616_v61 = vld [vmem:[%s23671_s3 + $0xb24] sm:$0xf0]  ;;  %8589 = vmatpush.bf16.msrb.mxu3 %v14020_v4 }
 0x72e   :  { %v13987_v60 = vld [vmem:[%s23671_s3 + $0x18c8] sm:$0xf]  ;;  %v12228_v55 = vor.u32 %v15616_v61, %v12227_v47  ;;  %8486 = vmatpush.bf16.msra.mxu1 %v11940_v0 }
 0x72f   :  { %v16056_v26 = vld [vmem:[%s23671_s3 + $0x18e4] sm:$0xf0] }
 0x730   :  { %v11907_v23 = vld [vmem:[%s23671_s3 + $0x888] sm:$0xf]  ;;  %v13988_v50 = vor.u32 %v16056_v26, %v13987_v60  ;;  %8498 = vmatpush.bf16.msrb.mxu2 %v12228_v55  ;;  %v8402_v55 = vpop.f32.mrf.mxu3 }
 0x731   :  { %v15536_v19 = vld [vmem:[%s23671_s3 + $0x8a4] sm:$0xf0] }
 0x732   :  { %v12195_v24 = vld [vmem:[%s23671_s3 + $0xac8] sm:$0xf]  ;;  %v11908_v36 = vor.u32 %v15536_v19, %v11907_v23  ;;  %8590 = vmatpush.bf16.msrb.mxu3 %v13988_v50 }
 0x733   :  { %v15608_v30 = vld [vmem:[%s23671_s3 + $0xae4] sm:$0xf0] }
 0x734   :  { %v13955_v1 = vld [vmem:[%s23671_s3 + $0x1888] sm:$0xf]  ;;  %v12196_v25 = vor.u32 %v15608_v30, %v12195_v24  ;;  %8487 = vmatpush.bf16.msra.mxu1 %v11908_v36  ;;  %v8311_v30 = vpop.f32.mrf.mxu2 }
 0x735   :  { %v16048_v52 = vld [vmem:[%s23671_s3 + $0x18a4] sm:$0xf0] }
 0x736   :  { %v11875_v5 = vld [vmem:[%s23671_s3 + $0x848] sm:$0xf]  ;;  %v13956_v48 = vor.u32 %v16048_v52, %v13955_v1  ;;  %8499 = vmatpush.bf16.msrb.mxu2 %v12196_v25 }
 0x737   :  { %v15528_v43 = vld [vmem:[%s23671_s3 + $0x864] sm:$0xf0] }
 0x738   :  { %v12163_v49 = vld [vmem:[%s23671_s3 + $0xa88] sm:$0xf]  ;;  %v11876_v58 = vor.u32 %v15528_v43, %v11875_v5  ;;  %8591 = vmatpush.bf16.msrb.mxu3 %v13956_v48 }
 0x739   :  { %v15600_v56 = vld [vmem:[%s23671_s3 + $0xaa4] sm:$0xf0] }
 0x73a   :  { %v13923_v11 = vld [vmem:[%s23671_s3 + $0x1848] sm:$0xf]  ;;  %v12164_v40 = vor.u32 %v15600_v56, %v12163_v49  ;;  %8488 = vmatpush.bf16.msra.mxu1 %v11876_v58 }
 0x73b   :  { %v16040_v29 = vld [vmem:[%s23671_s3 + $0x1864] sm:$0xf0] }
 0x73c   :  { %v11843_v10 = vld [vmem:[%s23671_s3 + $0x808] sm:$0xf]  ;;  %v13924_v42 = vor.u32 %v16040_v29, %v13923_v11  ;;  %8500 = vmatpush.bf16.msrb.mxu2 %v12164_v40 }
 0x73d   :  { %v15520_v37 = vld [vmem:[%s23671_s3 + $0x824] sm:$0xf0] }
 0x73e   :  { %v12131_v59 = vld [vmem:[%s23671_s3 + $0xa48] sm:$0xf]  ;;  %v11844_v17 = vor.u32 %v15520_v37, %v11843_v10  ;;  %8592 = vmatpush.bf16.msrb.mxu3 %v13924_v42 }
 0x73f   :  { %v15592_v6 = vld [vmem:[%s23671_s3 + $0xa64] sm:$0xf0] }
 0x740   :  { %v12835_v21 = vld [vmem:[%s23671_s3 + $0xfc8] sm:$0xf]  ;;  %v12132_v34 = vor.u32 %v15592_v6, %v12131_v59  ;;  %8489 = vmatpush.bf16.msra.mxu1 %v11844_v17 }
 0x741   :  { %v15768_v32 = vld [vmem:[%s23671_s3 + $0xfe4] sm:$0xf0] }
 0x742   :  { %v13891_v41 = vld [vmem:[%s23671_s3 + $0x1808] sm:$0xf]  ;;  %v12836_v47 = vor.u32 %v15768_v32, %v12835_v21  ;;  %8501 = vmatpush.bf16.msrb.mxu2 %v12132_v34 }
 0x743   :  { %v16032_v44 = vld [vmem:[%s23671_s3 + $0x1824] sm:$0xf0]  ;;  %8490 = vmatmul.bf16.vlgmr.msra.gmra.mxu1 %v17083_v18 }
 0x744   :  { %v14883_v38 = vld [vmem:[%s23671_s3 + $0x1fc8] sm:$0xf]  ;;  %v13892_v60 = vor.u32 %v16032_v44, %v13891_v41  ;;  %8521 = vmatpush.bf16.msrb.mxu1 %v12836_v47  ;;  %v8335_v44 = vpop.f32.mrf.mxu1 }
 0x745   :  { %v16280_v20 = vld [vmem:[%s23671_s3 + $0x1fe4] sm:$0xf0] }
 0x746   :  { %v12099_v61 = vld [vmem:[%s23671_s3 + $0xa08] sm:$0xf]  ;;  %v14884_v0 = vor.u32 %v16280_v20, %v14883_v38  ;;  %8593 = vmatpush.bf16.msrb.mxu3 %v13892_v60  ;;  %v8336_v38 = vadd.f32 %v8335_v44, %v8323_v33 }
 0x747   :  { %v15584_v4 = vld [vmem:[%s23671_s3 + $0xa24] sm:$0xf0] }
 0x748   :  { %v12803_v54 = vld [vmem:[%s23671_s3 + $0xf88] sm:$0xf]  ;;  %v12100_v23 = vor.u32 %v15584_v4, %v12099_v61 }
 0x749   :  { %v15760_v26 = vld [vmem:[%s23671_s3 + $0xfa4] sm:$0xf0]  ;;  %8594 = vmatmul.bf16.vlgmr.msrb.gmra.mxu3 %v18017_v28 }
 0x74a   :  { %v13091_v16 = vld [vmem:[%s23671_s3 + $0x11c8] sm:$0xf]  ;;  %v12804_v50 = vor.u32 %v15760_v26, %v12803_v54  ;;  %8625 = vmatpush.bf16.msra.mxu3 %v14884_v0  ;;  %8502 = vmatpush.bf16.msrb.mxu2 %v12100_v23 }
 0x74b   :  { %v15832_v39 = vld [vmem:[%s23671_s3 + $0x11e4] sm:$0xf0] }
 0x74c   :  { %v14851_v19 = vld [vmem:[%s23671_s3 + $0x1f88] sm:$0xf]  ;;  %v13092_v1 = vor.u32 %v15832_v39, %v13091_v16  ;;  %8522 = vmatpush.bf16.msrb.mxu1 %v12804_v50  ;;  %v8337_v50 = vpop.f32.mrf.mxu1 }
 0x74d   :  { %v16272_v24 = vld [vmem:[%s23671_s3 + $0x1fa4] sm:$0xf0]  ;;  %8503 = vmatmul.bf16.vlgmr.msrb.gmra.mxu2 %v17147_v15 }
 0x74e   :  { %v12771_v52 = vld [vmem:[%s23671_s3 + $0xf48] sm:$0xf]  ;;  %v14852_v43 = vor.u32 %v16272_v24, %v14851_v19  ;;  %8534 = vmatpush.bf16.msra.mxu2 %v13092_v1 }
 0x74f   :  { %v15752_v36 = vld [vmem:[%s23671_s3 + $0xf64] sm:$0xf0] }
 0x750   :  { %v13059_v25 = vld [vmem:[%s23671_s3 + $0x1188] sm:$0xf]  ;;  %v12772_v48 = vor.u32 %v15752_v36, %v12771_v52  ;;  %8626 = vmatpush.bf16.msra.mxu3 %v14852_v43  ;;  %v19189_v36 = vpop.f32.mrf.mxu3 }
 0x751   :  { %v15824_v5 = vld [vmem:[%s23671_s3 + $0x11a4] sm:$0xf0] }
 0x752   :  { %v14819_v49 = vld [vmem:[%s23671_s3 + $0x1f48] sm:$0xf]  ;;  %v13060_v31 = vor.u32 %v15824_v5, %v13059_v25  ;;  %8523 = vmatpush.bf16.msrb.mxu1 %v12772_v48 }
 0x753   :  { %v16264_v56 = vld [vmem:[%s23671_s3 + $0x1f64] sm:$0xf0] }
 0x754   :  { %v12739_v11 = vld [vmem:[%s23671_s3 + $0xf08] sm:$0xf]  ;;  %v14820_v10 = vor.u32 %v16264_v56, %v14819_v49  ;;  %8535 = vmatpush.bf16.msra.mxu2 %v13060_v31  ;;  %v8348_v49 = vpop.f32.mrf.mxu2 }
 0x755   :  { %v15744_v29 = vld [vmem:[%s23671_s3 + $0xf24] sm:$0xf0] }
 0x756   :  { %v13027_v58 = vld [vmem:[%s23671_s3 + $0x1148] sm:$0xf]  ;;  %v12740_v59 = vor.u32 %v15744_v29, %v12739_v11  ;;  %8627 = vmatpush.bf16.msra.mxu3 %v14820_v10  ;;  %v8349_v11 = vadd.f32 %v8348_v49, %v8336_v38  ;;  %v15420_v49 = vld [vmem:[%s23671_s3 + $0x50c] sm:$0xf] }
 0x757   :  { %v15816_v40 = vld [vmem:[%s23671_s3 + $0x1164] sm:$0xf0] }
 0x758   :  { %v14787_v12 = vld [vmem:[%s23671_s3 + $0x1f08] sm:$0xf]  ;;  %v13028_v6 = vor.u32 %v15816_v40, %v13027_v58  ;;  %8524 = vmatpush.bf16.msrb.mxu1 %v12740_v59 }
 0x759   :  { %v16256_v37 = vld [vmem:[%s23671_s3 + $0x1f24] sm:$0xf0] }
 0x75a   :  { %v12707_v14 = vld [vmem:[%s23671_s3 + $0xec8] sm:$0xf]  ;;  %v14788_v41 = vor.u32 %v16256_v37, %v14787_v12  ;;  %8536 = vmatpush.bf16.msra.mxu2 %v13028_v6  ;;  %v15444_v6 = vld [vmem:[%s23671_s3 + $0x5cc] sm:$0xf] }
 0x75b   :  { %v15736_v42 = vld [vmem:[%s23671_s3 + $0xee4] sm:$0xf0] }
 0x75c   :  { %v12995_v21 = vld [vmem:[%s23671_s3 + $0x1108] sm:$0xf]  ;;  %v12708_v20 = vor.u32 %v15736_v42, %v12707_v14  ;;  %8628 = vmatpush.bf16.msra.mxu3 %v14788_v41  ;;  %v11557_v14 = vld [vmem:[%s23671_s3 + $0x5e8] sm:$0xf0]  ;;  %v8362_v42 = vadd.f32 %v18889_v9, %v8349_v11 }
 0x75d   :  { %v15808_v32 = vld [vmem:[%s23671_s3 + $0x1124] sm:$0xf0] }
 0x75e   :  { %v14755_v17 = vld [vmem:[%s23671_s3 + $0x1ec8] sm:$0xf]  ;;  %v12996_v47 = vor.u32 %v15808_v32, %v12995_v21  ;;  %8525 = vmatpush.bf16.msrb.mxu1 %v12708_v20  ;;  %v11560_v20 = vor.u32 %v15444_v6, %v11557_v14 }
 0x75f   :  { %v16248_v34 = vld [vmem:[%s23671_s3 + $0x1ee4] sm:$0xf0] }
 0x760   :  { %v12675_v61 = vld [vmem:[%s23671_s3 + $0xe88] sm:$0xf]  ;;  %v14756_v60 = vor.u32 %v16248_v34, %v14755_v17  ;;  %8537 = vmatpush.bf16.msra.mxu2 %v12996_v47  ;;  %v8441_v47 = vpop.f32.mrf.mxu3 }
 0x761   :  { %v15728_v4 = vld [vmem:[%s23671_s3 + $0xea4] sm:$0xf0] }
 0x762   :  { %v12963_v54 = vld [vmem:[%s23671_s3 + $0x10c8] sm:$0xf]  ;;  %v12676_v39 = vor.u32 %v15728_v4, %v12675_v61  ;;  %8629 = vmatpush.bf16.msra.mxu3 %v14756_v60  ;;  %v15436_v4 = vld [vmem:[%s23671_s3 + $0x58c] sm:$0xf] }
 0x763   :  { %v15800_v33 = vld [vmem:[%s23671_s3 + $0x10e4] sm:$0xf0] }
 0x764   :  { %v14723_v26 = vld [vmem:[%s23671_s3 + $0x1e88] sm:$0xf]  ;;  %v12964_v0 = vor.u32 %v15800_v33, %v12963_v54  ;;  %8526 = vmatpush.bf16.msrb.mxu1 %v12676_v39  ;;  %v11525_v54 = vld [vmem:[%s23671_s3 + $0x5a8] sm:$0xf0]  ;;  %v8350_v33 = vpop.f32.mrf.mxu2 }
 0x765   :  { %v16240_v16 = vld [vmem:[%s23671_s3 + $0x1ea4] sm:$0xf0] }
 0x766   :  { %v12643_v55 = vld [vmem:[%s23671_s3 + $0xe48] sm:$0xf]  ;;  %v14724_v30 = vor.u32 %v16240_v16, %v14723_v26  ;;  %8538 = vmatpush.bf16.msra.mxu2 %v12964_v0 }
 0x767   :  { %v15720_v23 = vld [vmem:[%s23671_s3 + $0xe64] sm:$0xf0] }
 0x768   :  { %v12931_v19 = vld [vmem:[%s23671_s3 + $0x1088] sm:$0xf]  ;;  %v12644_v25 = vor.u32 %v15720_v23, %v12643_v55  ;;  %8630 = vmatpush.bf16.msra.mxu3 %v14724_v30  ;;  %v11528_v23 = vor.u32 %v15436_v4, %v11525_v54 }
 0x769   :  { %v15792_v24 = vld [vmem:[%s23671_s3 + $0x10a4] sm:$0xf0] }
 0x76a   :  { %v14691_v1 = vld [vmem:[%s23671_s3 + $0x1e48] sm:$0xf]  ;;  %v12932_v5 = vor.u32 %v15792_v24, %v12931_v19  ;;  %8527 = vmatpush.bf16.msrb.mxu1 %v12644_v25  ;;  %v15428_v19 = vld [vmem:[%s23671_s3 + $0x54c] sm:$0xf] }
 0x76b   :  { %v16232_v52 = vld [vmem:[%s23671_s3 + $0x1e64] sm:$0xf0]  ;;  %v11493_v24 = vld [vmem:[%s23671_s3 + $0x568] sm:$0xf0] }
 0x76c   :  { %v12611_v43 = vld [vmem:[%s23671_s3 + $0xe08] sm:$0xf]  ;;  %v14692_v29 = vor.u32 %v16232_v52, %v14691_v1  ;;  %8539 = vmatpush.bf16.msra.mxu2 %v12932_v5 }
 0x76d   :  { %v15712_v56 = vld [vmem:[%s23671_s3 + $0xe24] sm:$0xf0] }
 0x76e   :  { %v12899_v48 = vld [vmem:[%s23671_s3 + $0x1048] sm:$0xf]  ;;  %v12612_v37 = vor.u32 %v15712_v56, %v12611_v43  ;;  %8631 = vmatpush.bf16.msra.mxu3 %v14692_v29  ;;  %v11496_v43 = vor.u32 %v15428_v19, %v11493_v24  ;;  %v11461_v56 = vld [vmem:[%s23671_s3 + $0x528] sm:$0xf0]  ;;  %v8387_v19 = vpop.f32.mrf.mxu2 }
 0x76f   :  { %v15784_v31 = vld [vmem:[%s23671_s3 + $0x1064] sm:$0xf0] }
 0x770   :  { %v13603_v58 = vld [vmem:[%s23671_s3 + $0x15c8] sm:$0xf]  ;;  %v12900_v59 = vor.u32 %v15784_v31, %v12899_v48  ;;  %8528 = vmatpush.bf16.msrb.mxu1 %v12612_v37  ;;  %v15412_v37 = vld [vmem:[%s23671_s3 + $0x4cc] sm:$0xf] }
 0x771   :  { %v15960_v40 = vld [vmem:[%s23671_s3 + $0x15e4] sm:$0xf0] }
 0x772   :  { %v14659_v10 = vld [vmem:[%s23671_s3 + $0x1e08] sm:$0xf]  ;;  %v13604_v21 = vor.u32 %v15960_v40, %v13603_v58  ;;  %8540 = vmatpush.bf16.msra.mxu2 %v12900_v59  ;;  %v11429_v59 = vld [vmem:[%s23671_s3 + $0x4e8] sm:$0xf0] }
 0x773   :  { %v16224_v12 = vld [vmem:[%s23671_s3 + $0x1e24] sm:$0xf0]  ;;  %8529 = vmatmul.bf16.vlgmr.msrb.gmra.mxu1 %v17198_v8 }
 0x774   :  { %v12867_v32 = vld [vmem:[%s23671_s3 + $0x1008] sm:$0xf]  ;;  %v14660_v17 = vor.u32 %v16224_v12, %v14659_v10  ;;  %8560 = vmatpush.bf16.msra.mxu1 %v13604_v21  ;;  %v11464_v10 = vor.u32 %v15420_v49, %v11461_v56  ;;  %v8374_v12 = vpop.f32.mrf.mxu1  ;;  %v11333_v49 = vld [vmem:[%s23671_s3 + $0x428] sm:$0xf0] }
 0x775   :  { %v15776_v41 = vld [vmem:[%s23671_s3 + $0x1024] sm:$0xf0]  ;;  %v8375_v6 = vadd.f32 %v8374_v12, %v8362_v42 }
 0x776   :  { %v13571_v44 = vld [vmem:[%s23671_s3 + $0x1588] sm:$0xf]  ;;  %v12868_v61 = vor.u32 %v15776_v41, %v12867_v32  ;;  %8632 = vmatpush.bf16.msra.mxu3 %v14660_v17  ;;  %v11432_v17 = vor.u32 %v15412_v37, %v11429_v59 }
 0x777   :  { %v15952_v34 = vld [vmem:[%s23671_s3 + $0x15a4] sm:$0xf0] }
 0x778   :  { %v13859_v9 = vld [vmem:[%s23671_s3 + $0x17c8] sm:$0xf]  ;;  %v13572_v60 = vor.u32 %v15952_v34, %v13571_v44  ;;  %8541 = vmatpush.bf16.msra.mxu2 %v12868_v61  ;;  %v15404_v34 = vld [vmem:[%s23671_s3 + $0x48c] sm:$0xf] }
 0x779   :  { %v16024_v38 = vld [vmem:[%s23671_s3 + $0x17e4] sm:$0xf0]  ;;  %8633 = vmatmul.bf16.vlgmr.msra.gmra.mxu3 %v18101_v57 }
 0x77a   :  { %v13860_v26 = vor.u32 %v16024_v38, %v13859_v9  ;;  %v13539_v16 = vld [vmem:[%s23671_s3 + $0x1548] sm:$0xf]  ;;  %8664 = vmatpush.bf16.msrb.mxu3 %v11560_v20  ;;  %8561 = vmatpush.bf16.msra.mxu1 %v13572_v60  ;;  %v11397_v9 = vld [vmem:[%s23671_s3 + $0x4a8] sm:$0xf0] }
 0x77b   :  { %v15944_v39 = vld [vmem:[%s23671_s3 + $0x1564] sm:$0xf0]  ;;  %8542 = vmatmul.bf16.vlgmr.msra.gmra.mxu2 %v17423_v2  ;;  %v11400_v33 = vor.u32 %v15404_v34, %v11397_v9 }
 0x77c   :  { %v13827_v0 = vld [vmem:[%s23671_s3 + $0x1788] sm:$0xf]  ;;  %8573 = vmatpush.bf16.msrb.mxu2 %v13860_v26  ;;  %v13540_v30 = vor.u32 %v15944_v39, %v13539_v16  ;;  %v8376_v60 = vpop.f32.mrf.mxu1  ;;  %v15396_v26 = vld [vmem:[%s23671_s3 + $0x44c] sm:$0xf]  ;;  %v19339_v39 = vpop.f32.mrf.mxu3 }
 0x77d   :  { %v16016_v55 = vld [vmem:[%s23671_s3 + $0x17a4] sm:$0xf0]  ;;  %v11365_v16 = vld [vmem:[%s23671_s3 + $0x468] sm:$0xf0] }
 0x77e   :  { %v13828_v50 = vor.u32 %v16016_v55, %v13827_v0  ;;  %v13507_v1 = vld [vmem:[%s23671_s3 + $0x1508] sm:$0xf]  ;;  %8665 = vmatpush.bf16.msrb.mxu3 %v11528_v23  ;;  %8562 = vmatpush.bf16.msra.mxu1 %v13540_v30 }
 0x77f   :  { %v15936_v52 = vld [vmem:[%s23671_s3 + $0x1524] sm:$0xf0] }
 0x780   :  { %v13795_v25 = vld [vmem:[%s23671_s3 + $0x1748] sm:$0xf]  ;;  %8574 = vmatpush.bf16.msrb.mxu2 %v13828_v50  ;;  %v13508_v48 = vor.u32 %v15936_v52, %v13507_v1  ;;  %v8388_v1 = vadd.f32 %v8387_v19, %v8375_v6  ;;  %v11368_v52 = vor.u32 %v15396_v26, %v11365_v16  ;;  %v15612_v19 = vld [vmem:[%s23671_s3 + $0xb0c] sm:$0xf] }
 0x781   :  { %v16008_v5 = vld [vmem:[%s23671_s3 + $0x1764] sm:$0xf0] }
 0x782   :  { %v13796_v31 = vor.u32 %v16008_v5, %v13795_v25  ;;  %v13475_v11 = vld [vmem:[%s23671_s3 + $0x14c8] sm:$0xf]  ;;  %8666 = vmatpush.bf16.msrb.mxu3 %v11496_v43  ;;  %8563 = vmatpush.bf16.msra.mxu1 %v13508_v48  ;;  %v15388_v43 = vld [vmem:[%s23671_s3 + $0x40c] sm:$0xf] }
 0x783   :  { %v15928_v29 = vld [vmem:[%s23671_s3 + $0x14e4] sm:$0xf0]  ;;  %v11336_v37 = vor.u32 %v15388_v43, %v11333_v49 }
 0x784   :  { %v13763_v58 = vld [vmem:[%s23671_s3 + $0x1708] sm:$0xf]  ;;  %8575 = vmatpush.bf16.msrb.mxu2 %v13796_v31  ;;  %v13476_v14 = vor.u32 %v15928_v29, %v13475_v11  ;;  %v15636_v31 = vld [vmem:[%s23671_s3 + $0xbcc] sm:$0xf]  ;;  %v8401_v29 = vadd.f32 %v19039_v22, %v8388_v1  ;;  %v8413_v49 = vpop.f32.mrf.mxu1 }
 0x785   :  { %v16000_v40 = vld [vmem:[%s23671_s3 + $0x1724] sm:$0xf0]  ;;  %v12325_v11 = vld [vmem:[%s23671_s3 + $0xbe8] sm:$0xf0] }
 0x786   :  { %v13764_v21 = vor.u32 %v16000_v40, %v13763_v58  ;;  %v13443_v32 = vld [vmem:[%s23671_s3 + $0x1488] sm:$0xf]  ;;  %8667 = vmatpush.bf16.msrb.mxu3 %v11464_v10  ;;  %8564 = vmatpush.bf16.msra.mxu1 %v13476_v14  ;;  %v12328_v14 = vor.u32 %v15636_v31, %v12325_v11  ;;  %v8414_v31 = vadd.f32 %v8413_v49, %v8401_v29 }
 0x787   :  { %v15920_v41 = vld [vmem:[%s23671_s3 + $0x14a4] sm:$0xf0] }
 0x788   :  { %v13731_v44 = vld [vmem:[%s23671_s3 + $0x16c8] sm:$0xf]  ;;  %8576 = vmatpush.bf16.msrb.mxu2 %v13764_v21  ;;  %v13444_v38 = vor.u32 %v15920_v41, %v13443_v32  ;;  %v8480_v21 = vpop.f32.mrf.mxu3  ;;  %v15628_v41 = vld [vmem:[%s23671_s3 + $0xb8c] sm:$0xf] }
 0x789   :  { %v15992_v42 = vld [vmem:[%s23671_s3 + $0x16e4] sm:$0xf0] }
 0x78a   :  { %v13732_v20 = vor.u32 %v15992_v42, %v13731_v44  ;;  %v13411_v47 = vld [vmem:[%s23671_s3 + $0x1448] sm:$0xf]  ;;  %8668 = vmatpush.bf16.msrb.mxu3 %v11432_v17  ;;  %8565 = vmatpush.bf16.msra.mxu1 %v13444_v38  ;;  %v12293_v44 = vld [vmem:[%s23671_s3 + $0xba8] sm:$0xf0]  ;;  %v8389_v42 = vpop.f32.mrf.mxu2 }
 0x78b   :  { %v15912_v61 = vld [vmem:[%s23671_s3 + $0x1464] sm:$0xf0] }
 0x78c   :  { %v13699_v4 = vld [vmem:[%s23671_s3 + $0x1688] sm:$0xf]  ;;  %8577 = vmatpush.bf16.msrb.mxu2 %v13732_v20  ;;  %v13412_v0 = vor.u32 %v15912_v61, %v13411_v47  ;;  %v12296_v61 = vor.u32 %v15628_v41, %v12293_v44 }
 0x78d   :  { %v15984_v54 = vld [vmem:[%s23671_s3 + $0x16a4] sm:$0xf0] }
 0x78e   :  { %v13700_v55 = vor.u32 %v15984_v54, %v13699_v4  ;;  %v13379_v23 = vld [vmem:[%s23671_s3 + $0x1408] sm:$0xf]  ;;  %8669 = vmatpush.bf16.msrb.mxu3 %v11400_v33  ;;  %8566 = vmatpush.bf16.msra.mxu1 %v13412_v0  ;;  %v15620_v4 = vld [vmem:[%s23671_s3 + $0xb4c] sm:$0xf] }
 0x78f   :  { %v15904_v24 = vld [vmem:[%s23671_s3 + $0x1424] sm:$0xf0]  ;;  %v12261_v54 = vld [vmem:[%s23671_s3 + $0xb68] sm:$0xf0] }
 0x790   :  { %v13667_v30 = vld [vmem:[%s23671_s3 + $0x1648] sm:$0xf]  ;;  %8578 = vmatpush.bf16.msrb.mxu2 %v13700_v55  ;;  %v13380_v56 = vor.u32 %v15904_v24, %v13379_v23  ;;  %v12264_v23 = vor.u32 %v15620_v4, %v12261_v54  ;;  %v12229_v24 = vld [vmem:[%s23671_s3 + $0xb28] sm:$0xf0] }
 0x791   :  { %v15976_v50 = vld [vmem:[%s23671_s3 + $0x1664] sm:$0xf0]  ;;  %v12232_v43 = vor.u32 %v15612_v19, %v12229_v24  ;;  %v12101_v19 = vld [vmem:[%s23671_s3 + $0xa28] sm:$0xf0] }
 0x792   :  { %v14371_v25 = vld [vmem:[%s23671_s3 + $0x1bc8] sm:$0xf]  ;;  %v13668_v48 = vor.u32 %v15976_v50, %v13667_v30  ;;  %8670 = vmatpush.bf16.msrb.mxu3 %v11368_v52  ;;  %8567 = vmatpush.bf16.msra.mxu1 %v13380_v56  ;;  %v15604_v56 = vld [vmem:[%s23671_s3 + $0xacc] sm:$0xf]  ;;  %v8426_v4 = vpop.f32.mrf.mxu2 }
 0x793   :  { %v16152_v5 = vld [vmem:[%s23671_s3 + $0x1be4] sm:$0xf0] }
 0x794   :  { %v14372_v58 = vor.u32 %v16152_v5, %v14371_v25  ;;  %v13635_v40 = vld [vmem:[%s23671_s3 + $0x1608] sm:$0xf]  ;;  %8579 = vmatpush.bf16.msrb.mxu2 %v13668_v48  ;;  %v12197_v48 = vld [vmem:[%s23671_s3 + $0xae8] sm:$0xf0] }
 0x795   :  { %v15968_v10 = vld [vmem:[%s23671_s3 + $0x1624] sm:$0xf0]  ;;  %8568 = vmatmul.bf16.vlgmr.msra.gmra.mxu1 %v17525_v7 }
 0x796   :  { %v14339_v12 = vld [vmem:[%s23671_s3 + $0x1b88] sm:$0xf]  ;;  %v13636_v32 = vor.u32 %v15968_v10, %v13635_v40  ;;  %8599 = vmatpush.bf16.msrb.mxu1 %v14372_v58  ;;  %8671 = vmatpush.bf16.msrb.mxu3 %v11336_v37  ;;  %v12200_v37 = vor.u32 %v15604_v56, %v12197_v48  ;;  %v11013_v56 = vld [vmem:[%s23671_s3 + $0x1a8] sm:$0xf0] }
 0x797   :  { %v16144_v59 = vld [vmem:[%s23671_s3 + $0x1ba4] sm:$0xf0]  ;;  %v15380_v48 = vld [vmem:[%s23671_s3 + $0x3cc] sm:$0xf] }
 0x798   :  { %v14627_v22 = vld [vmem:[%s23671_s3 + $0x1dc8] sm:$0xf]  ;;  %v14340_v17 = vor.u32 %v16144_v59, %v14339_v12  ;;  %8580 = vmatpush.bf16.msrb.mxu2 %v13636_v32  ;;  %v15596_v59 = vld [vmem:[%s23671_s3 + $0xa8c] sm:$0xf] }
 0x799   :  { %v16216_v6 = vld [vmem:[%s23671_s3 + $0x1de4] sm:$0xf0]  ;;  %8672 = vmatmul.bf16.vlgmr.msrb.gmra.mxu3 %v16828_v13 }
 0x79a   :  { %v14628_v34 = vor.u32 %v16216_v6, %v14627_v22  ;;  %v14307_v9 = vld [vmem:[%s23671_s3 + $0x1b48] sm:$0xf]  ;;  %8703 = vmatpush.bf16.msra.mxu3 %v12328_v14  ;;  %8600 = vmatpush.bf16.msrb.mxu1 %v14340_v17  ;;  %v12165_v22 = vld [vmem:[%s23671_s3 + $0xaa8] sm:$0xf0]  ;;  %v8415_v17 = vpop.f32.mrf.mxu1 }
 0x79b   :  { %v16136_v38 = vld [vmem:[%s23671_s3 + $0x1b64] sm:$0xf0]  ;;  %8581 = vmatmul.bf16.vlgmr.msrb.gmra.mxu2 %v17538_v63  ;;  %v12168_v42 = vor.u32 %v15596_v59, %v12165_v22  ;;  %v15300_v22 = vld [vmem:[%s23671_s3 + $0x14c] sm:$0xf] }
 0x79c   :  { %v14595_v20 = vld [vmem:[%s23671_s3 + $0x1d88] sm:$0xf]  ;;  %8612 = vmatpush.bf16.msra.mxu2 %v14628_v34  ;;  %v14308_v33 = vor.u32 %v16136_v38, %v14307_v9  ;;  %v15588_v34 = vld [vmem:[%s23671_s3 + $0xa4c] sm:$0xf]  ;;  %v19489_v38 = vpop.f32.mrf.mxu3 }
 0x79d   :  { %v16208_v47 = vld [vmem:[%s23671_s3 + $0x1da4] sm:$0xf0]  ;;  %v12133_v9 = vld [vmem:[%s23671_s3 + $0xa68] sm:$0xf0] }
 0x79e   :  { %v14596_v60 = vor.u32 %v16208_v47, %v14595_v20  ;;  %v14275_v26 = vld [vmem:[%s23671_s3 + $0x1b08] sm:$0xf]  ;;  %8704 = vmatpush.bf16.msra.mxu3 %v12296_v61  ;;  %8601 = vmatpush.bf16.msrb.mxu1 %v14308_v33 }
 0x79f   :  { %v16128_v16 = vld [vmem:[%s23671_s3 + $0x1b24] sm:$0xf0] }
 0x7a0   :  { %v14563_v0 = vld [vmem:[%s23671_s3 + $0x1d48] sm:$0xf]  ;;  %8613 = vmatpush.bf16.msra.mxu2 %v14596_v60  ;;  %v14276_v30 = vor.u32 %v16128_v16, %v14275_v26  ;;  %v19503_v26 = vadd.f32 %v8426_v4, %v8414_v31  ;;  %v12136_v16 = vor.u32 %v15588_v34, %v12133_v9  ;;  %v11301_v31 = vld [vmem:[%s23671_s3 + $0x3e8] sm:$0xf0] }
 0x7a1   :  { %v16200_v55 = vld [vmem:[%s23671_s3 + $0x1d64] sm:$0xf0]  ;;  %v11304_v59 = vor.u32 %v15380_v48, %v11301_v31  ;;  %v15292_v34 = vld [vmem:[%s23671_s3 + $0x10c] sm:$0xf] }
 0x7a2   :  { %v14564_v50 = vor.u32 %v16200_v55, %v14563_v0  ;;  %v14243_v1 = vld [vmem:[%s23671_s3 + $0x1ac8] sm:$0xf]  ;;  %8705 = vmatpush.bf16.msra.mxu3 %v12264_v23  ;;  %8602 = vmatpush.bf16.msrb.mxu1 %v14276_v30  ;;  %v15316_v0 = vld [vmem:[%s23671_s3 + $0x1cc] sm:$0xf] }
 0x7a3   :  { %v16120_v52 = vld [vmem:[%s23671_s3 + $0x1ae4] sm:$0xf0]  ;;  %v11045_v55 = vld [vmem:[%s23671_s3 + $0x1e8] sm:$0xf0] }
 0x7a4   :  { %v14531_v25 = vld [vmem:[%s23671_s3 + $0x1d08] sm:$0xf]  ;;  %8614 = vmatpush.bf16.msra.mxu2 %v14564_v50  ;;  %v14244_v11 = vor.u32 %v16120_v52, %v14243_v1  ;;  %v15580_v23 = vld [vmem:[%s23671_s3 + $0xa0c] sm:$0xf]  ;;  %v11048_v52 = vor.u32 %v15316_v0, %v11045_v55 }
 0x7a5   :  { %v16192_v5 = vld [vmem:[%s23671_s3 + $0x1d24] sm:$0xf0]  ;;  %v15828_v50 = vld [vmem:[%s23671_s3 + $0x11cc] sm:$0xf]  ;;  %v12104_v49 = vor.u32 %v15580_v23, %v12101_v19 }
 0x7a6   :  { %v14532_v58 = vor.u32 %v16192_v5, %v14531_v25  ;;  %v14211_v40 = vld [vmem:[%s23671_s3 + $0x1a88] sm:$0xf]  ;;  %8706 = vmatpush.bf16.msra.mxu3 %v12232_v43  ;;  %8603 = vmatpush.bf16.msrb.mxu1 %v14244_v11  ;;  %v13093_v1 = vld [vmem:[%s23671_s3 + $0x11e8] sm:$0xf0] }
 0x7a7   :  { %v16112_v10 = vld [vmem:[%s23671_s3 + $0x1aa4] sm:$0xf0]  ;;  %v15308_v43 = vld [vmem:[%s23671_s3 + $0x18c] sm:$0xf]  ;;  %v13096_v11 = vor.u32 %v15828_v50, %v13093_v1  ;;  %v8452_v1 = vpop.f32.mrf.mxu1 }
 0x7a8   :  { %v14499_v12 = vld [vmem:[%s23671_s3 + $0x1cc8] sm:$0xf]  ;;  %8615 = vmatpush.bf16.msra.mxu2 %v14532_v58  ;;  %v14212_v6 = vor.u32 %v16112_v10, %v14211_v40  ;;  %v8519_v58 = vpop.f32.mrf.mxu3  ;;  %v15820_v10 = vld [vmem:[%s23671_s3 + $0x118c] sm:$0xf] }
 0x7a9   :  { %v16184_v29 = vld [vmem:[%s23671_s3 + $0x1ce4] sm:$0xf0]  ;;  %v10949_v9 = vld [vmem:[%s23671_s3 + $0x128] sm:$0xf0] }
 0x7aa   :  { %v14500_v14 = vor.u32 %v16184_v29, %v14499_v12  ;;  %v14179_v21 = vld [vmem:[%s23671_s3 + $0x1a48] sm:$0xf]  ;;  %8707 = vmatpush.bf16.msra.mxu3 %v12200_v37  ;;  %8604 = vmatpush.bf16.msrb.mxu1 %v14212_v6  ;;  %v13061_v12 = vld [vmem:[%s23671_s3 + $0x11a8] sm:$0xf0]  ;;  %v8428_v29 = vpop.f32.mrf.mxu2  ;;  %v11016_v37 = vor.u32 %v15308_v43, %v11013_v56 }
 0x7ab   :  { %v16104_v32 = vld [vmem:[%s23671_s3 + $0x1a64] sm:$0xf0]  ;;  %v10981_v6 = vld [vmem:[%s23671_s3 + $0x168] sm:$0xf0] }
 0x7ac   :  { %v14467_v41 = vld [vmem:[%s23671_s3 + $0x1c88] sm:$0xf]  ;;  %8616 = vmatpush.bf16.msra.mxu2 %v14500_v14  ;;  %v14180_v20 = vor.u32 %v16104_v32, %v14179_v21  ;;  %v15372_v14 = vld [vmem:[%s23671_s3 + $0x38c] sm:$0xf]  ;;  %v13064_v32 = vor.u32 %v15820_v10, %v13061_v12 }
 0x7ad   :  { %v16176_v44 = vld [vmem:[%s23671_s3 + $0x1ca4] sm:$0xf0]  ;;  %v11269_v21 = vld [vmem:[%s23671_s3 + $0x3a8] sm:$0xf0] }
 0x7ae   :  { %v14468_v47 = vor.u32 %v16176_v44, %v14467_v41  ;;  %v14147_v61 = vld [vmem:[%s23671_s3 + $0x1a08] sm:$0xf]  ;;  %8708 = vmatpush.bf16.msra.mxu3 %v12168_v42  ;;  %8605 = vmatpush.bf16.msrb.mxu1 %v14180_v20  ;;  %v15812_v41 = vld [vmem:[%s23671_s3 + $0x114c] sm:$0xf]  ;;  %v10984_v42 = vor.u32 %v15300_v22, %v10981_v6  ;;  %v11272_v17 = vor.u32 %v15372_v14, %v11269_v21 }
 0x7af   :  { %v16096_v54 = vld [vmem:[%s23671_s3 + $0x1a24] sm:$0xf0]  ;;  %v13029_v44 = vld [vmem:[%s23671_s3 + $0x1168] sm:$0xf0]  ;;  %v8454_v14 = vpop.f32.mrf.mxu1 }
 0x7b0   :  { %v14435_v33 = vld [vmem:[%s23671_s3 + $0x1c48] sm:$0xf]  ;;  %8617 = vmatpush.bf16.msra.mxu2 %v14468_v47  ;;  %v14148_v24 = vor.u32 %v16096_v54, %v14147_v61  ;;  %v15364_v20 = vld [vmem:[%s23671_s3 + $0x34c] sm:$0xf]  ;;  %v16354_v61 = vld [vmem:[%s23672_s4] sm:$0xff]  ;;  %v13032_v54 = vor.u32 %v15812_v41, %v13029_v44  ;;  %v19644_v41 = vpop.f32.mrf.mxu3 }
 0x7b1   :  { %v16168_v60 = vld [vmem:[%s23671_s3 + $0x1c64] sm:$0xf0]  ;;  %v11237_v47 = vld [vmem:[%s23671_s3 + $0x368] sm:$0xf0]  ;;  %v2880_v4 = vperm.slane %v16354_v61, 2 }
 0x7b2   :  { %v14436_v30 = vor.u32 %v16168_v60, %v14435_v33  ;;  %v14403_v25 = vld [vmem:[%s23671_s3 + $0x1c08] sm:$0xf]  ;;  %8709 = vmatpush.bf16.msra.mxu3 %v12136_v16  ;;  %8606 = vmatpush.bf16.msrb.mxu1 %v14148_v24  ;;  %v15804_v33 = vld [vmem:[%s23671_s3 + $0x110c] sm:$0xf]  ;;  %v10952_v16 = vor.u32 %v15292_v34, %v10949_v9  ;;  %v11240_v0 = vor.u32 %v15364_v20, %v11237_v47  ;;  %v8465_v34 = vpop.f32.mrf.mxu2 }
 0x7b3   :  { %v16160_v5 = vld [vmem:[%s23671_s3 + $0x1c24] sm:$0xf0]  ;;  %v12997_v60 = vld [vmem:[%s23671_s3 + $0x1128] sm:$0xf0] }
 0x7b4   :  { %8618 = vmatpush.bf16.msra.mxu2 %v14436_v30  ;;  %v14404_v40 = vor.u32 %v16160_v5, %v14403_v25  ;;  %v15284_v55 = vld [vmem:[%s23671_s3 + $0xcc] sm:$0xf]  ;;  %v8440_v30 = vadd.f32 %v19189_v36, %v2880_v4  ;;  %v13000_v50 = vor.u32 %v15804_v33, %v12997_v60 }
 0x7b5   :  { %8607 = vmatmul.bf16.vlgmr.msrb.gmra.mxu1 %v18039_v51  ;;  %v10917_v23 = vld [vmem:[%s23671_s3 + $0xe8] sm:$0xf0] }
 0x7b6   :  { %8638 = vmatpush.bf16.msra.mxu1 %v11048_v52  ;;  %8710 = vmatpush.bf16.msra.mxu3 %v12104_v49  ;;  %v15356_v19 = vld [vmem:[%s23671_s3 + $0x30c] sm:$0xf]  ;;  %v8453_v5 = vadd.f32 %v8452_v1, %v8440_v30  ;;  %v10920_v43 = vor.u32 %v15284_v55, %v10917_v23 }
 0x7b7   :  { %v11205_v24 = vld [vmem:[%s23671_s3 + $0x328] sm:$0xf0] }
 0x7b8   :  { %8619 = vmatpush.bf16.msra.mxu2 %v14404_v40  ;;  %v15796_v52 = vld [vmem:[%s23671_s3 + $0x10cc] sm:$0xf]  ;;  %v11208_v49 = vor.u32 %v15356_v19, %v11205_v24  ;;  %v8466_v61 = vadd.f32 %v8465_v34, %v8453_v5 }
 0x7b9   :  { %8711 = vmatmul.bf16.vlgmr.msra.gmra.mxu3 %v17147_v15  ;;  %v12965_v25 = vld [vmem:[%s23671_s3 + $0x10e8] sm:$0xf0] }
 0x7ba   :  { %8742 = vmatpush.bf16.msrb.mxu3 %v13096_v11  ;;  %8639 = vmatpush.bf16.msra.mxu1 %v11016_v37  ;;  %v15276_v36 = vld [vmem:[%s23671_s3 + $0x8c] sm:$0xf]  ;;  %v12968_v11 = vor.u32 %v15796_v52, %v12965_v25  ;;  %v8479_v24 = vadd.f32 %v19339_v39, %v8466_v61 }
 0x7bb   :  { %8620 = vmatmul.bf16.vlgmr.msra.gmra.mxu2 %v17812_v46  ;;  %v10885_v56 = vld [vmem:[%s23671_s3 + $0xa8] sm:$0xf0] }
 0x7bc   :  { %8651 = vmatpush.bf16.msrb.mxu2 %v11304_v59  ;;  %v15348_v48 = vld [vmem:[%s23671_s3 + $0x2cc] sm:$0xf]  ;;  %v10888_v10 = vor.u32 %v15276_v36, %v10885_v56  ;;  %v8558_v36 = vpop.f32.mrf.mxu3 }
 0x7bd   :  { %v11173_v31 = vld [vmem:[%s23671_s3 + $0x2e8] sm:$0xf0] }
 0x7be   :  { %8743 = vmatpush.bf16.msrb.mxu3 %v13064_v32  ;;  %8640 = vmatpush.bf16.msra.mxu1 %v10984_v42  ;;  %v15788_v58 = vld [vmem:[%s23671_s3 + $0x108c] sm:$0xf]  ;;  %v11176_v12 = vor.u32 %v15348_v48, %v11173_v31 }
 0x7bf   :  { %v12933_v40 = vld [vmem:[%s23671_s3 + $0x10a8] sm:$0xf0] }
 0x7c0   :  { %8652 = vmatpush.bf16.msrb.mxu2 %v11272_v17  ;;  %v15268_v29 = vld [vmem:[%s23671_s3 + $0x4c] sm:$0xf]  ;;  %v12936_v6 = vor.u32 %v15788_v58, %v12933_v40 }
 0x7c1   :  { %v10853_v37 = vld [vmem:[%s23671_s3 + $0x68] sm:$0xf0] }
 0x7c2   :  { %8744 = vmatpush.bf16.msrb.mxu3 %v13032_v54  ;;  %8641 = vmatpush.bf16.msra.mxu1 %v10952_v16  ;;  %v15340_v59 = vld [vmem:[%s23671_s3 + $0x28c] sm:$0xf]  ;;  %v10856_v44 = vor.u32 %v15268_v29, %v10853_v37 }
 0x7c3   :  { %v11141_v22 = vld [vmem:[%s23671_s3 + $0x2a8] sm:$0xf0] }
 0x7c4   :  { %8653 = vmatpush.bf16.msrb.mxu2 %v11240_v0  ;;  %v15780_v21 = vld [vmem:[%s23671_s3 + $0x104c] sm:$0xf]  ;;  %v11144_v42 = vor.u32 %v15340_v59, %v11141_v22 }
 0x7c5   :  { %v12901_v32 = vld [vmem:[%s23671_s3 + $0x1068] sm:$0xf0] }
 0x7c6   :  { %8745 = vmatpush.bf16.msrb.mxu3 %v13000_v50  ;;  %8642 = vmatpush.bf16.msra.mxu1 %v10920_v43  ;;  %v15260_v17 = vld [vmem:[%s23671_s3 + $0xc] sm:$0xf]  ;;  %v12904_v4 = vor.u32 %v15780_v21, %v12901_v32 }
 0x7c7   :  { %v10821_v9 = vld [vmem:[%s23671_s3 + $0x28] sm:$0xf0] }
 0x7c8   :  { %8654 = vmatpush.bf16.msrb.mxu2 %v11208_v49  ;;  %v15332_v20 = vld [vmem:[%s23671_s3 + $0x24c] sm:$0xf]  ;;  %v10824_v0 = vor.u32 %v15260_v17, %v10821_v9 }
 0x7c9   :  { %v11109_v47 = vld [vmem:[%s23671_s3 + $0x268] sm:$0xf0] }
 0x7ca   :  { %8746 = vmatpush.bf16.msrb.mxu3 %v12968_v11  ;;  %8643 = vmatpush.bf16.msra.mxu1 %v10888_v10  ;;  %v15508_v54 = vld [vmem:[%s23671_s3 + $0x7cc] sm:$0xf]  ;;  %v11112_v55 = vor.u32 %v15332_v20, %v11109_v47  ;;  %v8467_v11 = vpop.f32.mrf.mxu2 }
 0x7cb   :  { %v11813_v33 = vld [vmem:[%s23671_s3 + $0x7e8] sm:$0xf0] }
 0x7cc   :  { %8655 = vmatpush.bf16.msrb.mxu2 %v11176_v12  ;;  %v15772_v60 = vld [vmem:[%s23671_s3 + $0x100c] sm:$0xf]  ;;  %v11816_v30 = vor.u32 %v15508_v54, %v11813_v33 }
 0x7cd   :  { %v12869_v16 = vld [vmem:[%s23671_s3 + $0x1028] sm:$0xf0] }
 0x7ce   :  { %8747 = vmatpush.bf16.msrb.mxu3 %v12936_v6  ;;  %8644 = vmatpush.bf16.msra.mxu1 %v10856_v44  ;;  %v16020_v23 = vld [vmem:[%s23671_s3 + $0x17cc] sm:$0xf]  ;;  %v12872_v25 = vor.u32 %v15772_v60, %v12869_v16 }
 0x7cf   :  { %v13861_v19 = vld [vmem:[%s23671_s3 + $0x17e8] sm:$0xf0] }
 0x7d0   :  { %8656 = vmatpush.bf16.msrb.mxu2 %v11144_v42  ;;  %v15324_v50 = vld [vmem:[%s23671_s3 + $0x20c] sm:$0xf]  ;;  %v13864_v49 = vor.u32 %v16020_v23, %v13861_v19 }
 0x7d1   :  { %v11077_v1 = vld [vmem:[%s23671_s3 + $0x228] sm:$0xf0] }
 0x7d2   :  { %v15500_v52 = vld [vmem:[%s23671_s3 + $0x78c] sm:$0xf]  ;;  %8748 = vmatpush.bf16.msrb.mxu3 %v12904_v4  ;;  %8645 = vmatpush.bf16.msra.mxu1 %v10824_v0  ;;  %v11080_v56 = vor.u32 %v15324_v50, %v11077_v1  ;;  %v8491_v0 = vpop.f32.mrf.mxu1 }
 0x7d3   :  { %v11781_v5 = vld [vmem:[%s23671_s3 + $0x7a8] sm:$0xf0]  ;;  %v8492_v19 = vadd.f32 %v8491_v0, %v8479_v24 }
 0x7d4   :  { %v15572_v39 = vld [vmem:[%s23671_s3 + $0x9cc] sm:$0xf]  ;;  %8657 = vmatpush.bf16.msrb.mxu2 %v11112_v55  ;;  %v11784_v58 = vor.u32 %v15500_v52, %v11781_v5 }
 0x7d5   :  { %v12069_v43 = vld [vmem:[%s23671_s3 + $0x9e8] sm:$0xf0]  ;;  %8646 = vmatmul.bf16.vlgmr.msra.gmra.mxu1 %v16722_v3 }
 0x7d6   :  { %v16012_v48 = vld [vmem:[%s23671_s3 + $0x178c] sm:$0xf]  ;;  %8677 = vmatpush.bf16.msrb.mxu1 %v11816_v30  ;;  %v12072_v40 = vor.u32 %v15572_v39, %v12069_v43  ;;  %8749 = vmatpush.bf16.msrb.mxu3 %v12872_v25 }
 0x7d7   :  { %v13829_v31 = vld [vmem:[%s23671_s3 + $0x17a8] sm:$0xf0] }
 0x7d8   :  { %v15492_v10 = vld [vmem:[%s23671_s3 + $0x74c] sm:$0xf]  ;;  %v13832_v59 = vor.u32 %v16012_v48, %v13829_v31  ;;  %8658 = vmatpush.bf16.msrb.mxu2 %v11080_v56 }
 0x7d9   :  { %v11749_v12 = vld [vmem:[%s23671_s3 + $0x768] sm:$0xf0]  ;;  %8750 = vmatmul.bf16.vlgmr.msrb.gmra.mxu3 %v17423_v2 }
 0x7da   :  { %v15564_v29 = vld [vmem:[%s23671_s3 + $0x98c] sm:$0xf]  ;;  %8781 = vmatpush.bf16.msra.mxu3 %v13864_v49  ;;  %8678 = vmatpush.bf16.msrb.mxu1 %v11784_v58  ;;  %v11752_v14 = vor.u32 %v15492_v10, %v11749_v12 }
 0x7db   :  { %v12037_v37 = vld [vmem:[%s23671_s3 + $0x9a8] sm:$0xf0]  ;;  %8659 = vmatmul.bf16.vlgmr.msrb.gmra.mxu2 %v16790_v45 }
 0x7dc   :  { %v16004_v22 = vld [vmem:[%s23671_s3 + $0x174c] sm:$0xf]  ;;  %8690 = vmatpush.bf16.msra.mxu2 %v12072_v40  ;;  %v12040_v21 = vor.u32 %v15564_v29, %v12037_v37  ;;  %v8493_v40 = vpop.f32.mrf.mxu1  ;;  %v19794_v29 = vpop.f32.mrf.mxu3 }
 0x7dd   :  { %v13797_v6 = vld [vmem:[%s23671_s3 + $0x1768] sm:$0xf0] }
 0x7de   :  { %v15484_v32 = vld [vmem:[%s23671_s3 + $0x70c] sm:$0xf]  ;;  %8782 = vmatpush.bf16.msra.mxu3 %v13832_v59  ;;  %v13800_v34 = vor.u32 %v16004_v22, %v13797_v6  ;;  %8679 = vmatpush.bf16.msrb.mxu1 %v11752_v14  ;;  %v8504_v6 = vpop.f32.mrf.mxu2 }
 0x7df   :  { %v11717_v44 = vld [vmem:[%s23671_s3 + $0x728] sm:$0xf0] }
 0x7e0   :  { %v15556_v42 = vld [vmem:[%s23671_s3 + $0x94c] sm:$0xf]  ;;  %8691 = vmatpush.bf16.msra.mxu2 %v12040_v21  ;;  %v11720_v47 = vor.u32 %v15484_v32, %v11717_v44  ;;  %v8505_v44 = vadd.f32 %v8504_v6, %v8492_v19 }
 0x7e1   :  { %v12005_v17 = vld [vmem:[%s23671_s3 + $0x968] sm:$0xf0] }
 0x7e2   :  { %v15996_v9 = vld [vmem:[%s23671_s3 + $0x170c] sm:$0xf]  ;;  %v12008_v61 = vor.u32 %v15556_v42, %v12005_v17  ;;  %8783 = vmatpush.bf16.msra.mxu3 %v13800_v34  ;;  %8680 = vmatpush.bf16.msrb.mxu1 %v11720_v47 }
 0x7e3   :  { %v13765_v20 = vld [vmem:[%s23671_s3 + $0x1728] sm:$0xf0] }
 0x7e4   :  { %v15476_v4 = vld [vmem:[%s23671_s3 + $0x6cc] sm:$0xf]  ;;  %v13768_v16 = vor.u32 %v15996_v9, %v13765_v20  ;;  %8692 = vmatpush.bf16.msra.mxu2 %v12008_v61 }
 0x7e5   :  { %v11685_v54 = vld [vmem:[%s23671_s3 + $0x6e8] sm:$0xf0] }
 0x7e6   :  { %v15548_v33 = vld [vmem:[%s23671_s3 + $0x90c] sm:$0xf]  ;;  %v11688_v30 = vor.u32 %v15476_v4, %v11685_v54  ;;  %8784 = vmatpush.bf16.msra.mxu3 %v13768_v16 }
 0x7e7   :  { %v11973_v60 = vld [vmem:[%s23671_s3 + $0x928] sm:$0xf0] }
 0x7e8   :  { %v15988_v55 = vld [vmem:[%s23671_s3 + $0x16cc] sm:$0xf]  ;;  %v11976_v50 = vor.u32 %v15548_v33, %v11973_v60  ;;  %8681 = vmatpush.bf16.msrb.mxu1 %v11688_v30  ;;  %v8518_v33 = vadd.f32 %v19489_v38, %v8505_v44 }
 0x7e9   :  { %v13733_v23 = vld [vmem:[%s23671_s3 + $0x16e8] sm:$0xf0] }
 0x7ea   :  { %v15468_v1 = vld [vmem:[%s23671_s3 + $0x68c] sm:$0xf]  ;;  %v13736_v5 = vor.u32 %v15988_v55, %v13733_v23  ;;  %8693 = vmatpush.bf16.msra.mxu2 %v11976_v50 }
 0x7eb   :  { %v11653_v52 = vld [vmem:[%s23671_s3 + $0x6a8] sm:$0xf0] }
 0x7ec   :  { %v15540_v25 = vld [vmem:[%s23671_s3 + $0x8cc] sm:$0xf]  ;;  %v11656_v49 = vor.u32 %v15468_v1, %v11653_v52  ;;  %8785 = vmatpush.bf16.msra.mxu3 %v13736_v5  ;;  %v8597_v1 = vpop.f32.mrf.mxu3  ;;  %v8506_v5 = vpop.f32.mrf.mxu2 }
 0x7ed   :  { %v11941_v24 = vld [vmem:[%s23671_s3 + $0x8e8] sm:$0xf0] }
 0x7ee   :  { %v15980_v39 = vld [vmem:[%s23671_s3 + $0x168c] sm:$0xf]  ;;  %v11944_v36 = vor.u32 %v15540_v25, %v11941_v24  ;;  %8682 = vmatpush.bf16.msrb.mxu1 %v11656_v49 }
 0x7ef   :  { %v13701_v43 = vld [vmem:[%s23671_s3 + $0x16a8] sm:$0xf0] }
 0x7f0   :  { %v15460_v56 = vld [vmem:[%s23671_s3 + $0x64c] sm:$0xf]  ;;  %v13704_v58 = vor.u32 %v15980_v39, %v13701_v43  ;;  %8694 = vmatpush.bf16.msra.mxu2 %v11944_v36 }
 0x7f1   :  { %v11621_v48 = vld [vmem:[%s23671_s3 + $0x668] sm:$0xf0] }
 0x7f2   :  { %v15532_v31 = vld [vmem:[%s23671_s3 + $0x88c] sm:$0xf]  ;;  %v11624_v37 = vor.u32 %v15460_v56, %v11621_v48  ;;  %8786 = vmatpush.bf16.msra.mxu3 %v13704_v58 }
 0x7f3   :  { %v11909_v11 = vld [vmem:[%s23671_s3 + $0x8a8] sm:$0xf0] }
 0x7f4   :  { %v15972_v10 = vld [vmem:[%s23671_s3 + $0x164c] sm:$0xf]  ;;  %v11912_v59 = vor.u32 %v15532_v31, %v11909_v11  ;;  %8683 = vmatpush.bf16.msrb.mxu1 %v11624_v37 }
 0x7f5   :  { %v13669_v12 = vld [vmem:[%s23671_s3 + $0x1668] sm:$0xf0] }
 0x7f6   :  { %v15452_v22 = vld [vmem:[%s23671_s3 + $0x60c] sm:$0xf]  ;;  %v13672_v42 = vor.u32 %v15972_v10, %v13669_v12  ;;  %8695 = vmatpush.bf16.msra.mxu2 %v11912_v59 }
 0x7f7   :  { %v11589_v14 = vld [vmem:[%s23671_s3 + $0x628] sm:$0xf0] }
 0x7f8   :  { %v15524_v21 = vld [vmem:[%s23671_s3 + $0x84c] sm:$0xf]  ;;  %v11592_v47 = vor.u32 %v15452_v22, %v11589_v14  ;;  %8787 = vmatpush.bf16.msra.mxu3 %v13672_v42 }
 0x7f9   :  { %v11877_v32 = vld [vmem:[%s23671_s3 + $0x868] sm:$0xf0] }
 0x7fa   :  { %v15700_v17 = vld [vmem:[%s23671_s3 + $0xdcc] sm:$0xf]  ;;  %v11880_v61 = vor.u32 %v15524_v21, %v11877_v32  ;;  %8684 = vmatpush.bf16.msrb.mxu1 %v11592_v47  ;;  %v8530_v47 = vpop.f32.mrf.mxu1 }
 0x7fb   :  { %v12581_v34 = vld [vmem:[%s23671_s3 + $0xde8] sm:$0xf0] }
 0x7fc   :  { %v15964_v9 = vld [vmem:[%s23671_s3 + $0x160c] sm:$0xf]  ;;  %v12584_v60 = vor.u32 %v15700_v17, %v12581_v34  ;;  %8696 = vmatpush.bf16.msra.mxu2 %v11880_v61 }
 0x7fd   :  { %v13637_v20 = vld [vmem:[%s23671_s3 + $0x1628] sm:$0xf0]  ;;  %8685 = vmatmul.bf16.vlgmr.msrb.gmra.mxu1 %v16844_v27 }
 0x7fe   :  { %v16212_v4 = vld [vmem:[%s23671_s3 + $0x1dcc] sm:$0xf]  ;;  %v13640_v23 = vor.u32 %v15964_v9, %v13637_v20  ;;  %8716 = vmatpush.bf16.msra.mxu1 %v12584_v60 }
 0x7ff   :  { %v14629_v54 = vld [vmem:[%s23671_s3 + $0x1de8] sm:$0xf0] }
 0x800   :  { %v15516_v16 = vld [vmem:[%s23671_s3 + $0x80c] sm:$0xf]  ;;  %v14632_v50 = vor.u32 %v16212_v4, %v14629_v54  ;;  %8788 = vmatpush.bf16.msra.mxu3 %v13640_v23  ;;  %v8531_v54 = vadd.f32 %v8530_v47, %v8518_v33 }
 0x801   :  { %v11845_v0 = vld [vmem:[%s23671_s3 + $0x828] sm:$0xf0] }
 0x802   :  { %v15692_v55 = vld [vmem:[%s23671_s3 + $0xd8c] sm:$0xf]  ;;  %v11848_v52 = vor.u32 %v15516_v16, %v11845_v0 }
 0x803   :  { %v12549_v19 = vld [vmem:[%s23671_s3 + $0xda8] sm:$0xf0]  ;;  %8789 = vmatmul.bf16.vlgmr.msra.gmra.mxu3 %v17538_v63 }
 0x804   :  { %v15764_v38 = vld [vmem:[%s23671_s3 + $0xfcc] sm:$0xf]  ;;  %v12552_v39 = vor.u32 %v15692_v55, %v12549_v19  ;;  %8820 = vmatpush.bf16.msrb.mxu3 %v14632_v50  ;;  %8697 = vmatpush.bf16.msra.mxu2 %v11848_v52 }
 0x805   :  { %v12837_v30 = vld [vmem:[%s23671_s3 + $0xfe8] sm:$0xf0] }
 0x806   :  { %v16204_v25 = vld [vmem:[%s23671_s3 + $0x1d8c] sm:$0xf]  ;;  %v12840_v43 = vor.u32 %v15764_v38, %v12837_v30  ;;  %8717 = vmatpush.bf16.msra.mxu1 %v12552_v39 }
 0x807   :  { %v14597_v24 = vld [vmem:[%s23671_s3 + $0x1da8] sm:$0xf0]  ;;  %8698 = vmatmul.bf16.vlgmr.msra.gmra.mxu2 %v17083_v18 }
 0x808   :  { %v15684_v49 = vld [vmem:[%s23671_s3 + $0xd4c] sm:$0xf]  ;;  %v14600_v31 = vor.u32 %v16204_v25, %v14597_v24  ;;  %8729 = vmatpush.bf16.msrb.mxu2 %v12840_v43  ;;  %v8532_v43 = vpop.f32.mrf.mxu1 }
 0x809   :  { %v12517_v36 = vld [vmem:[%s23671_s3 + $0xd68] sm:$0xf0] }
 0x80a   :  { %v15756_v56 = vld [vmem:[%s23671_s3 + $0xf8c] sm:$0xf]  ;;  %v12520_v40 = vor.u32 %v15684_v49, %v12517_v36  ;;  %8821 = vmatpush.bf16.msrb.mxu3 %v14600_v31 }
 0x80b   :  { %v12805_v48 = vld [vmem:[%s23671_s3 + $0xfa8] sm:$0xf0] }
 0x80c   :  { %v16196_v11 = vld [vmem:[%s23671_s3 + $0x1d4c] sm:$0xf]  ;;  %v12808_v10 = vor.u32 %v15756_v56, %v12805_v48  ;;  %8718 = vmatpush.bf16.msra.mxu1 %v12520_v40  ;;  %v19944_v56 = vpop.f32.mrf.mxu3 }
 0x80d   :  { %v14565_v58 = vld [vmem:[%s23671_s3 + $0x1d68] sm:$0xf0] }
 0x80e   :  { %v15676_v12 = vld [vmem:[%s23671_s3 + $0xd0c] sm:$0xf]  ;;  %v14568_v6 = vor.u32 %v16196_v11, %v14565_v58  ;;  %8730 = vmatpush.bf16.msrb.mxu2 %v12808_v10  ;;  %v8543_v58 = vpop.f32.mrf.mxu2 }
 0x80f   :  { %v12485_v37 = vld [vmem:[%s23671_s3 + $0xd28] sm:$0xf0] }
 0x810   :  { %v15748_v59 = vld [vmem:[%s23671_s3 + $0xf4c] sm:$0xf]  ;;  %v12488_v32 = vor.u32 %v15676_v12, %v12485_v37  ;;  %8822 = vmatpush.bf16.msrb.mxu3 %v14568_v6  ;;  %v8544_v37 = vadd.f32 %v8543_v58, %v8531_v54 }
 0x811   :  { %v12773_v22 = vld [vmem:[%s23671_s3 + $0xf68] sm:$0xf0] }
 0x812   :  { %v16188_v14 = vld [vmem:[%s23671_s3 + $0x1d0c] sm:$0xf]  ;;  %v12776_v44 = vor.u32 %v15748_v59, %v12773_v22  ;;  %8719 = vmatpush.bf16.msra.mxu1 %v12488_v32 }
 0x813   :  { %v14533_v21 = vld [vmem:[%s23671_s3 + $0x1d28] sm:$0xf0] }
 0x814   :  { %v15668_v42 = vld [vmem:[%s23671_s3 + $0xccc] sm:$0xf]  ;;  %v14536_v20 = vor.u32 %v16188_v14, %v14533_v21  ;;  %8731 = vmatpush.bf16.msrb.mxu2 %v12776_v44 }
 0x815   :  { %v12453_v17 = vld [vmem:[%s23671_s3 + $0xce8] sm:$0xf0] }
 0x816   :  { %v15740_v34 = vld [vmem:[%s23671_s3 + $0xf0c] sm:$0xf]  ;;  %v12456_v60 = vor.u32 %v15668_v42, %v12453_v17  ;;  %8823 = vmatpush.bf16.msrb.mxu3 %v14536_v20  ;;  %v11307_v42 = vld [vmem:[%s23671_s3 + $0x3d0] sm:$0xf] }
 0x817   :  { %v12741_v9 = vld [vmem:[%s23671_s3 + $0xf28] sm:$0xf0]  ;;  %v15385_v17 = vld [vmem:[%s23671_s3 + $0x3ec] sm:$0xf0] }
 0x818   :  { %v16180_v61 = vld [vmem:[%s23671_s3 + $0x1ccc] sm:$0xf]  ;;  %v12744_v16 = vor.u32 %v15740_v34, %v12741_v9  ;;  %8720 = vmatpush.bf16.msra.mxu1 %v12456_v60  ;;  %v8557_v34 = vadd.f32 %v19644_v41, %v8544_v37 }
 0x819   :  { %v14501_v4 = vld [vmem:[%s23671_s3 + $0x1ce8] sm:$0xf0] }
 0x81a   :  { %v15660_v0 = vld [vmem:[%s23671_s3 + $0xc8c] sm:$0xf]  ;;  %v14504_v19 = vor.u32 %v16180_v61, %v14501_v4  ;;  %8732 = vmatpush.bf16.msrb.mxu2 %v12744_v16  ;;  %v11308_v16 = vor.u32 %v15385_v17, %v11307_v42  ;;  %v15353_v42 = vld [vmem:[%s23671_s3 + $0x2ec] sm:$0xf0] }
 0x81b   :  { %v12421_v55 = vld [vmem:[%s23671_s3 + $0xca8] sm:$0xf0] }
 0x81c   :  { %v15732_v23 = vld [vmem:[%s23671_s3 + $0xecc] sm:$0xf]  ;;  %v12424_v50 = vor.u32 %v15660_v0, %v12421_v55  ;;  %8824 = vmatpush.bf16.msrb.mxu3 %v14504_v19  ;;  %v8636_v0 = vpop.f32.mrf.mxu3  ;;  %v8545_v19 = vpop.f32.mrf.mxu2 }
 0x81d   :  { %v12709_v33 = vld [vmem:[%s23671_s3 + $0xee8] sm:$0xf0] }
 0x81e   :  { %v16172_v38 = vld [vmem:[%s23671_s3 + $0x1c8c] sm:$0xf]  ;;  %v12712_v1 = vor.u32 %v15732_v23, %v12709_v33  ;;  %8721 = vmatpush.bf16.msra.mxu1 %v12424_v50  ;;  %v11275_v23 = vld [vmem:[%s23671_s3 + $0x390] sm:$0xf] }
 0x81f   :  { %v14469_v30 = vld [vmem:[%s23671_s3 + $0x1ca8] sm:$0xf0]  ;;  %v15377_v33 = vld [vmem:[%s23671_s3 + $0x3ac] sm:$0xf0] }
 0x820   :  { %v15652_v52 = vld [vmem:[%s23671_s3 + $0xc4c] sm:$0xf]  ;;  %v14472_v39 = vor.u32 %v16172_v38, %v14469_v30  ;;  %8733 = vmatpush.bf16.msrb.mxu2 %v12712_v1 }
 0x821   :  { %v12389_v25 = vld [vmem:[%s23671_s3 + $0xc68] sm:$0xf0] }
 0x822   :  { %v15724_v24 = vld [vmem:[%s23671_s3 + $0xe8c] sm:$0xf]  ;;  %v12392_v48 = vor.u32 %v15652_v52, %v12389_v25  ;;  %8825 = vmatpush.bf16.msrb.mxu3 %v14472_v39  ;;  %v15369_v39 = vld [vmem:[%s23671_s3 + $0x36c] sm:$0xf0] }
 0x823   :  { %v12677_v5 = vld [vmem:[%s23671_s3 + $0xea8] sm:$0xf0] }
 0x824   :  { %v16164_v49 = vld [vmem:[%s23671_s3 + $0x1c4c] sm:$0xf]  ;;  %v12680_v31 = vor.u32 %v15724_v24, %v12677_v5  ;;  %8722 = vmatpush.bf16.msra.mxu1 %v12392_v48  ;;  %v11276_v24 = vor.u32 %v15377_v33, %v11275_v23  ;;  %v11243_v5 = vld [vmem:[%s23671_s3 + $0x350] sm:$0xf] }
 0x825   :  { %v14437_v36 = vld [vmem:[%s23671_s3 + $0x1c68] sm:$0xf0]  ;;  %v11244_v58 = vor.u32 %v15369_v39, %v11243_v5  ;;  %v8582_v39 = vpop.f32.mrf.mxu2 }
 0x826   :  { %v15644_v11 = vld [vmem:[%s23671_s3 + $0xc0c] sm:$0xf]  ;;  %v14440_v59 = vor.u32 %v16164_v49, %v14437_v36  ;;  %8734 = vmatpush.bf16.msrb.mxu2 %v12680_v31 }
 0x827   :  { %v12357_v40 = vld [vmem:[%s23671_s3 + $0xc28] sm:$0xf0] }
 0x828   :  { %v15716_v10 = vld [vmem:[%s23671_s3 + $0xe4c] sm:$0xf]  ;;  %v12360_v32 = vor.u32 %v15644_v11, %v12357_v40  ;;  %8826 = vmatpush.bf16.msrb.mxu3 %v14440_v59  ;;  %v11211_v40 = vld [vmem:[%s23671_s3 + $0x310] sm:$0xf] }
 0x829   :  { %v12645_v12 = vld [vmem:[%s23671_s3 + $0xe68] sm:$0xf0] }
 0x82a   :  { %v15892_v22 = vld [vmem:[%s23671_s3 + $0x13cc] sm:$0xf]  ;;  %v12648_v44 = vor.u32 %v15716_v10, %v12645_v12  ;;  %8723 = vmatpush.bf16.msra.mxu1 %v12360_v32  ;;  %v15361_v10 = vld [vmem:[%s23671_s3 + $0x32c] sm:$0xf0]  ;;  %v8569_v32 = vpop.f32.mrf.mxu1 }
 0x82b   :  { %v13349_v6 = vld [vmem:[%s23671_s3 + $0x13e8] sm:$0xf0]  ;;  %v8570_v17 = vadd.f32 %v8569_v32, %v8557_v34 }
 0x82c   :  { %v16156_v14 = vld [vmem:[%s23671_s3 + $0x1c0c] sm:$0xf]  ;;  %v13352_v9 = vor.u32 %v15892_v22, %v13349_v6  ;;  %8735 = vmatpush.bf16.msrb.mxu2 %v12648_v44  ;;  %v11179_v44 = vld [vmem:[%s23671_s3 + $0x2d0] sm:$0xf] }
 0x82d   :  { %v14405_v21 = vld [vmem:[%s23671_s3 + $0x1c28] sm:$0xf0]  ;;  %8724 = vmatmul.bf16.vlgmr.msra.gmra.mxu1 %v17185_v53 }
 0x82e   :  { %v15708_v20 = vld [vmem:[%s23671_s3 + $0xe0c] sm:$0xf]  ;;  %v14408_v4 = vor.u32 %v16156_v14, %v14405_v21  ;;  %8755 = vmatpush.bf16.msrb.mxu1 %v13352_v9  ;;  %v11212_v21 = vor.u32 %v15361_v10, %v11211_v40  ;;  %v11083_v40 = vld [vmem:[%s23671_s3 + $0x210] sm:$0xf] }
 0x82f   :  { %v12613_v47 = vld [vmem:[%s23671_s3 + $0xe28] sm:$0xf0]  ;;  %v15329_v10 = vld [vmem:[%s23671_s3 + $0x22c] sm:$0xf0] }
 0x830   :  { %v15884_v61 = vld [vmem:[%s23671_s3 + $0x138c] sm:$0xf]  ;;  %v12616_v55 = vor.u32 %v15708_v20, %v12613_v47  ;;  %8827 = vmatpush.bf16.msrb.mxu3 %v14408_v4 }
 0x831   :  { %v13317_v54 = vld [vmem:[%s23671_s3 + $0x13a8] sm:$0xf0] }
 0x832   :  { %v15956_v41 = vld [vmem:[%s23671_s3 + $0x15cc] sm:$0xf]  ;;  %v13320_v38 = vor.u32 %v15884_v61, %v13317_v54  ;;  %8736 = vmatpush.bf16.msrb.mxu2 %v12616_v55  ;;  %v11180_v54 = vor.u32 %v15353_v42, %v11179_v44  ;;  %v11084_v42 = vor.u32 %v15329_v10, %v11083_v40 }
 0x833   :  { %v13605_v60 = vld [vmem:[%s23671_s3 + $0x15e8] sm:$0xf0]  ;;  %8828 = vmatmul.bf16.vlgmr.msrb.gmra.mxu3 %v17812_v46 }
 0x834   :  { %v13608_v30 = vor.u32 %v15956_v41, %v13605_v60  ;;  %v15876_v50 = vld [vmem:[%s23671_s3 + $0x134c] sm:$0xf]  ;;  %8859 = vmatpush.bf16.msra.mxu3 %v11308_v16  ;;  %8756 = vmatpush.bf16.msrb.mxu1 %v13320_v38  ;;  %v11147_v41 = vld [vmem:[%s23671_s3 + $0x290] sm:$0xf] }
 0x835   :  { %v13285_v1 = vld [vmem:[%s23671_s3 + $0x1368] sm:$0xf0]  ;;  %8737 = vmatmul.bf16.vlgmr.msrb.gmra.mxu2 %v17198_v8  ;;  %v15345_v60 = vld [vmem:[%s23671_s3 + $0x2ac] sm:$0xf0] }
 0x836   :  { %v15948_v52 = vld [vmem:[%s23671_s3 + $0x158c] sm:$0xf]  ;;  %8768 = vmatpush.bf16.msra.mxu2 %v13608_v30  ;;  %v13288_v43 = vor.u32 %v15876_v50, %v13285_v1  ;;  %v11148_v38 = vor.u32 %v15345_v60, %v11147_v41  ;;  %v8571_v30 = vpop.f32.mrf.mxu1  ;;  %v11115_v50 = vld [vmem:[%s23671_s3 + $0x250] sm:$0xf] }
 0x837   :  { %v13573_v25 = vld [vmem:[%s23671_s3 + $0x15a8] sm:$0xf0]  ;;  %v15337_v1 = vld [vmem:[%s23671_s3 + $0x26c] sm:$0xf0] }
 0x838   :  { %v13576_v49 = vor.u32 %v15948_v52, %v13573_v25  ;;  %v15868_v36 = vld [vmem:[%s23671_s3 + $0x130c] sm:$0xf]  ;;  %8860 = vmatpush.bf16.msra.mxu3 %v11276_v24  ;;  %8757 = vmatpush.bf16.msrb.mxu1 %v13288_v43  ;;  %v20094_v52 = vpop.f32.mrf.mxu3 }
 0x839   :  { %v13253_v48 = vld [vmem:[%s23671_s3 + $0x1328] sm:$0xf0] }
 0x83a   :  { %v15940_v31 = vld [vmem:[%s23671_s3 + $0x154c] sm:$0xf]  ;;  %8769 = vmatpush.bf16.msra.mxu2 %v13576_v49  ;;  %v13256_v12 = vor.u32 %v15868_v36, %v13253_v48  ;;  %v8583_v48 = vadd.f32 %v8582_v39, %v8570_v17 }
 0x83b   :  { %v13541_v11 = vld [vmem:[%s23671_s3 + $0x1568] sm:$0xf0] }
 0x83c   :  { %v13544_v37 = vor.u32 %v15940_v31, %v13541_v11  ;;  %v15860_v59 = vld [vmem:[%s23671_s3 + $0x12cc] sm:$0xf]  ;;  %8861 = vmatpush.bf16.msra.mxu3 %v11244_v58  ;;  %8758 = vmatpush.bf16.msrb.mxu1 %v13256_v12  ;;  %v11116_v31 = vor.u32 %v15337_v1, %v11115_v50 }
 0x83d   :  { %v13221_v22 = vld [vmem:[%s23671_s3 + $0x12e8] sm:$0xf0] }
 0x83e   :  { %v15932_v6 = vld [vmem:[%s23671_s3 + $0x150c] sm:$0xf]  ;;  %8770 = vmatpush.bf16.msra.mxu2 %v13544_v37  ;;  %v13224_v9 = vor.u32 %v15860_v59, %v13221_v22  ;;  %v12075_v59 = vld [vmem:[%s23671_s3 + $0x9d0] sm:$0xf] }
 0x83f   :  { %v13509_v14 = vld [vmem:[%s23671_s3 + $0x1528] sm:$0xf0]  ;;  %v15577_v22 = vld [vmem:[%s23671_s3 + $0x9ec] sm:$0xf0] }
 0x840   :  { %v13512_v20 = vor.u32 %v15932_v6, %v13509_v14  ;;  %v15852_v47 = vld [vmem:[%s23671_s3 + $0x128c] sm:$0xf]  ;;  %8862 = vmatpush.bf16.msra.mxu3 %v11212_v21  ;;  %8759 = vmatpush.bf16.msrb.mxu1 %v13224_v9  ;;  %v8596_v6 = vadd.f32 %v19794_v29, %v8583_v48 }
 0x841   :  { %v13189_v61 = vld [vmem:[%s23671_s3 + $0x12a8] sm:$0xf0] }
 0x842   :  { %v15924_v4 = vld [vmem:[%s23671_s3 + $0x14cc] sm:$0xf]  ;;  %8771 = vmatpush.bf16.msra.mxu2 %v13512_v20  ;;  %v13192_v16 = vor.u32 %v15852_v47, %v13189_v61  ;;  %v12076_v20 = vor.u32 %v15577_v22, %v12075_v59  ;;  %v8675_v47 = vpop.f32.mrf.mxu3  ;;  %v15545_v59 = vld [vmem:[%s23671_s3 + $0x8ec] sm:$0xf0] }
 0x843   :  { %v13477_v34 = vld [vmem:[%s23671_s3 + $0x14e8] sm:$0xf0] }
 0x844   :  { %v13480_v0 = vor.u32 %v15924_v4, %v13477_v34  ;;  %v15844_v55 = vld [vmem:[%s23671_s3 + $0x124c] sm:$0xf]  ;;  %8863 = vmatpush.bf16.msra.mxu3 %v11180_v54  ;;  %8760 = vmatpush.bf16.msrb.mxu1 %v13192_v16  ;;  %v12043_v4 = vld [vmem:[%s23671_s3 + $0x990] sm:$0xf]  ;;  %v8584_v54 = vpop.f32.mrf.mxu2 }
 0x845   :  { %v13157_v23 = vld [vmem:[%s23671_s3 + $0x1268] sm:$0xf0]  ;;  %v15569_v34 = vld [vmem:[%s23671_s3 + $0x9ac] sm:$0xf0] }
 0x846   :  { %v15916_v33 = vld [vmem:[%s23671_s3 + $0x148c] sm:$0xf]  ;;  %8772 = vmatpush.bf16.msra.mxu2 %v13480_v0  ;;  %v13160_v25 = vor.u32 %v15844_v55, %v13157_v23 }
 0x847   :  { %v13445_v19 = vld [vmem:[%s23671_s3 + $0x14a8] sm:$0xf0] }
 0x848   :  { %v13448_v24 = vor.u32 %v15916_v33, %v13445_v19  ;;  %v15836_v5 = vld [vmem:[%s23671_s3 + $0x120c] sm:$0xf]  ;;  %8864 = vmatpush.bf16.msra.mxu3 %v11148_v38  ;;  %8761 = vmatpush.bf16.msrb.mxu1 %v13160_v25  ;;  %v12044_v33 = vor.u32 %v15569_v34, %v12043_v4  ;;  %v12011_v19 = vld [vmem:[%s23671_s3 + $0x950] sm:$0xf] }
 0x849   :  { %v13125_v43 = vld [vmem:[%s23671_s3 + $0x1228] sm:$0xf0]  ;;  %v15561_v38 = vld [vmem:[%s23671_s3 + $0x96c] sm:$0xf0] }
 0x84a   :  { %v15908_v49 = vld [vmem:[%s23671_s3 + $0x144c] sm:$0xf]  ;;  %8773 = vmatpush.bf16.msra.mxu2 %v13448_v24  ;;  %v13128_v12 = vor.u32 %v15836_v5, %v13125_v43  ;;  %v12012_v39 = vor.u32 %v15561_v38, %v12011_v19  ;;  %v11979_v43 = vld [vmem:[%s23671_s3 + $0x910] sm:$0xf] }
 0x84b   :  { %v13413_v36 = vld [vmem:[%s23671_s3 + $0x1468] sm:$0xf0] }
 0x84c   :  { %v16084_v11 = vld [vmem:[%s23671_s3 + $0x19cc] sm:$0xf]  ;;  %v13416_v37 = vor.u32 %v15908_v49, %v13413_v36  ;;  %8865 = vmatpush.bf16.msra.mxu3 %v11116_v31  ;;  %8762 = vmatpush.bf16.msrb.mxu1 %v13128_v12  ;;  %v15553_v49 = vld [vmem:[%s23671_s3 + $0x92c] sm:$0xf0]  ;;  %v8608_v12 = vpop.f32.mrf.mxu1  ;;  %v8621_v38 = vpop.f32.mrf.mxu2 }
 0x84d   :  { %v14117_v58 = vld [vmem:[%s23671_s3 + $0x19e8] sm:$0xf0]  ;;  %v11980_v10 = vor.u32 %v15553_v49, %v11979_v43  ;;  %v8609_v22 = vadd.f32 %v8608_v12, %v8596_v6  ;;  %v11851_v43 = vld [vmem:[%s23671_s3 + $0x810] sm:$0xf] }
 0x84e   :  { %v14120_v14 = vor.u32 %v16084_v11, %v14117_v58  ;;  %v15900_v21 = vld [vmem:[%s23671_s3 + $0x140c] sm:$0xf]  ;;  %8774 = vmatpush.bf16.msra.mxu2 %v13416_v37  ;;  %v11947_v37 = vld [vmem:[%s23671_s3 + $0x8d0] sm:$0xf] }
 0x84f   :  { %v13381_v32 = vld [vmem:[%s23671_s3 + $0x1428] sm:$0xf0]  ;;  %8763 = vmatmul.bf16.vlgmr.msrb.gmra.mxu1 %v17487_v62  ;;  %v15521_v49 = vld [vmem:[%s23671_s3 + $0x82c] sm:$0xf0] }
 0x850   :  { %v16076_v44 = vld [vmem:[%s23671_s3 + $0x198c] sm:$0xf]  ;;  %v13384_v61 = vor.u32 %v15900_v21, %v13381_v32  ;;  %8794 = vmatpush.bf16.msra.mxu1 %v14120_v14  ;;  %8866 = vmatpush.bf16.msra.mxu3 %v11084_v42 }
 0x851   :  { %v14085_v17 = vld [vmem:[%s23671_s3 + $0x19a8] sm:$0xf0] }
 0x852   :  { %v16148_v29 = vld [vmem:[%s23671_s3 + $0x1bcc] sm:$0xf]  ;;  %v14088_v41 = vor.u32 %v16076_v44, %v14085_v17  ;;  %8775 = vmatpush.bf16.msra.mxu2 %v13384_v61  ;;  %v11948_v17 = vor.u32 %v15545_v59, %v11947_v37  ;;  %v11852_v37 = vor.u32 %v15521_v49, %v11851_v43  ;;  %v15297_v43 = vld [vmem:[%s23671_s3 + $0x12c] sm:$0xf0] }
 0x853   :  { %v14373_v9 = vld [vmem:[%s23671_s3 + $0x1be8] sm:$0xf0]  ;;  %8867 = vmatmul.bf16.vlgmr.msra.gmra.mxu3 %v16790_v45 }
 0x854   :  { %v14376_v60 = vor.u32 %v16148_v29, %v14373_v9  ;;  %v16068_v16 = vld [vmem:[%s23671_s3 + $0x194c] sm:$0xf]  ;;  %8898 = vmatpush.bf16.msrb.mxu3 %v12076_v20  ;;  %8795 = vmatpush.bf16.msra.mxu1 %v14088_v41  ;;  %v11915_v29 = vld [vmem:[%s23671_s3 + $0x890] sm:$0xf] }
 0x855   :  { %v14053_v0 = vld [vmem:[%s23671_s3 + $0x1968] sm:$0xf0]  ;;  %8776 = vmatmul.bf16.vlgmr.msra.gmra.mxu2 %v17525_v7  ;;  %v15537_v9 = vld [vmem:[%s23671_s3 + $0x8ac] sm:$0xf0] }
 0x856   :  { %v16140_v55 = vld [vmem:[%s23671_s3 + $0x1b8c] sm:$0xf]  ;;  %8807 = vmatpush.bf16.msrb.mxu2 %v14376_v60  ;;  %v14056_v30 = vor.u32 %v16068_v16, %v14053_v0  ;;  %v11916_v41 = vor.u32 %v15537_v9, %v11915_v29  ;;  %v8610_v60 = vpop.f32.mrf.mxu1  ;;  %v11883_v16 = vld [vmem:[%s23671_s3 + $0x850] sm:$0xf] }
 0x857   :  { %v14341_v23 = vld [vmem:[%s23671_s3 + $0x1ba8] sm:$0xf0]  ;;  %v15529_v0 = vld [vmem:[%s23671_s3 + $0x86c] sm:$0xf0] }
 0x858   :  { %v14344_v50 = vor.u32 %v16140_v55, %v14341_v23  ;;  %v16060_v1 = vld [vmem:[%s23671_s3 + $0x190c] sm:$0xf]  ;;  %8899 = vmatpush.bf16.msrb.mxu3 %v12044_v33  ;;  %8796 = vmatpush.bf16.msra.mxu1 %v14056_v30  ;;  %v20244_v55 = vpop.f32.mrf.mxu3 }
 0x859   :  { %v14021_v25 = vld [vmem:[%s23671_s3 + $0x1928] sm:$0xf0] }
 0x85a   :  { %v16132_v24 = vld [vmem:[%s23671_s3 + $0x1b4c] sm:$0xf]  ;;  %8808 = vmatpush.bf16.msrb.mxu2 %v14344_v50  ;;  %v14024_v36 = vor.u32 %v16060_v1, %v14021_v25  ;;  %v8622_v25 = vadd.f32 %v8621_v38, %v8609_v22  ;;  %v11051_v22 = vld [vmem:[%s23671_s3 + $0x1d0] sm:$0xf] }
 0x85b   :  { %v14309_v5 = vld [vmem:[%s23671_s3 + $0x1b68] sm:$0xf0] }
 0x85c   :  { %v14312_v48 = vor.u32 %v16132_v24, %v14309_v5  ;;  %v16052_v31 = vld [vmem:[%s23671_s3 + $0x18cc] sm:$0xf]  ;;  %8900 = vmatpush.bf16.msrb.mxu3 %v12012_v39  ;;  %8797 = vmatpush.bf16.msra.mxu1 %v14024_v36  ;;  %v11884_v24 = vor.u32 %v15529_v0, %v11883_v16  ;;  %v20271_v36 = vadd.f32 %v19944_v56, %v8622_v25 }
 0x85d   :  { %v13989_v11 = vld [vmem:[%s23671_s3 + $0x18e8] sm:$0xf0] }
 0x85e   :  { %v16124_v58 = vld [vmem:[%s23671_s3 + $0x1b0c] sm:$0xf]  ;;  %8809 = vmatpush.bf16.msrb.mxu2 %v14312_v48  ;;  %v13992_v14 = vor.u32 %v16052_v31, %v13989_v11  ;;  %v12843_v11 = vld [vmem:[%s23671_s3 + $0xfd0] sm:$0xf] }
 0x85f   :  { %v14277_v40 = vld [vmem:[%s23671_s3 + $0x1b28] sm:$0xf0] }
 0x860   :  { %v14280_v21 = vor.u32 %v16124_v58, %v14277_v40  ;;  %v16044_v32 = vld [vmem:[%s23671_s3 + $0x188c] sm:$0xf]  ;;  %8901 = vmatpush.bf16.msrb.mxu3 %v11980_v10  ;;  %8798 = vmatpush.bf16.msra.mxu1 %v13992_v14  ;;  %v15769_v58 = vld [vmem:[%s23671_s3 + $0xfec] sm:$0xf0] }
 0x861   :  { %v13957_v44 = vld [vmem:[%s23671_s3 + $0x18a8] sm:$0xf0]  ;;  %v15321_v14 = vld [vmem:[%s23671_s3 + $0x1ec] sm:$0xf0] }
 0x862   :  { %v16116_v42 = vld [vmem:[%s23671_s3 + $0x1acc] sm:$0xf]  ;;  %8810 = vmatpush.bf16.msrb.mxu2 %v14280_v21  ;;  %v13960_v20 = vor.u32 %v16044_v32, %v13957_v44  ;;  %v12844_v21 = vor.u32 %v15769_v58, %v12843_v11  ;;  %v8714_v32 = vpop.f32.mrf.mxu3  ;;  %v11052_v9 = vor.u32 %v15321_v14, %v11051_v22  ;;  %v15737_v11 = vld [vmem:[%s23671_s3 + $0xeec] sm:$0xf0] }
 0x863   :  { %v14245_v6 = vld [vmem:[%s23671_s3 + $0x1ae8] sm:$0xf0]  ;;  %v12683_v22 = vld [vmem:[%s23671_s3 + $0xe90] sm:$0xf] }
 0x864   :  { %v14248_v47 = vor.u32 %v16116_v42, %v14245_v6  ;;  %v16036_v61 = vld [vmem:[%s23671_s3 + $0x184c] sm:$0xf]  ;;  %8902 = vmatpush.bf16.msrb.mxu3 %v11948_v17  ;;  %8799 = vmatpush.bf16.msra.mxu1 %v13960_v20  ;;  %v12811_v42 = vld [vmem:[%s23671_s3 + $0xf90] sm:$0xf]  ;;  %v8623_v17 = vpop.f32.mrf.mxu2 }
 0x865   :  { %v13925_v4 = vld [vmem:[%s23671_s3 + $0x1868] sm:$0xf0]  ;;  %v15761_v6 = vld [vmem:[%s23671_s3 + $0xfac] sm:$0xf0] }
 0x866   :  { %v16108_v34 = vld [vmem:[%s23671_s3 + $0x1a8c] sm:$0xf]  ;;  %8811 = vmatpush.bf16.msrb.mxu2 %v14248_v47  ;;  %v13928_v23 = vor.u32 %v16036_v61, %v13925_v4  ;;  %v11019_v61 = vld [vmem:[%s23671_s3 + $0x190] sm:$0xf] }
 0x867   :  { %v14213_v54 = vld [vmem:[%s23671_s3 + $0x1aa8] sm:$0xf0]  ;;  %v15313_v4 = vld [vmem:[%s23671_s3 + $0x1ac] sm:$0xf0] }
 0x868   :  { %v14216_v33 = vor.u32 %v16108_v34, %v14213_v54  ;;  %v16028_v19 = vld [vmem:[%s23671_s3 + $0x180c] sm:$0xf]  ;;  %8903 = vmatpush.bf16.msrb.mxu3 %v11916_v41  ;;  %8800 = vmatpush.bf16.msra.mxu1 %v13928_v23  ;;  %v12812_v34 = vor.u32 %v15761_v6, %v12811_v42  ;;  %v12779_v54 = vld [vmem:[%s23671_s3 + $0xf50] sm:$0xf]  ;;  %v11020_v16 = vor.u32 %v15313_v4, %v11019_v61 }
 0x869   :  { %v13893_v30 = vld [vmem:[%s23671_s3 + $0x1828] sm:$0xf0]  ;;  %v15753_v41 = vld [vmem:[%s23671_s3 + $0xf6c] sm:$0xf0] }
 0x86a   :  { %v16100_v50 = vld [vmem:[%s23671_s3 + $0x1a4c] sm:$0xf]  ;;  %8812 = vmatpush.bf16.msrb.mxu2 %v14216_v33  ;;  %v13896_v48 = vor.u32 %v16028_v19, %v13893_v30  ;;  %v10987_v33 = vld [vmem:[%s23671_s3 + $0x150] sm:$0xf]  ;;  %v12780_v38 = vor.u32 %v15753_v41, %v12779_v54  ;;  %v20399_v54 = vpop.f32.mrf.mxu3 }
 0x86b   :  { %v14181_v1 = vld [vmem:[%s23671_s3 + $0x1a68] sm:$0xf0]  ;;  %v15305_v19 = vld [vmem:[%s23671_s3 + $0x16c] sm:$0xf0] }
 0x86c   :  { %v16276_v5 = vld [vmem:[%s23671_s3 + $0x1fcc] sm:$0xf]  ;;  %v14184_v31 = vor.u32 %v16100_v50, %v14181_v1  ;;  %8904 = vmatpush.bf16.msrb.mxu3 %v11884_v24  ;;  %8801 = vmatpush.bf16.msra.mxu1 %v13896_v48  ;;  %v12747_v30 = vld [vmem:[%s23671_s3 + $0xf10] sm:$0xf]  ;;  %v10988_v25 = vor.u32 %v15305_v19, %v10987_v33  ;;  %v8647_v48 = vpop.f32.mrf.mxu1 }
 0x86d   :  { %v14885_v39 = vld [vmem:[%s23671_s3 + $0x1fe8] sm:$0xf0]  ;;  %v15745_v50 = vld [vmem:[%s23671_s3 + $0xf2c] sm:$0xf0] }
 0x86e   :  { %v14888_v40 = vor.u32 %v16276_v5, %v14885_v39  ;;  %v16092_v10 = vld [vmem:[%s23671_s3 + $0x1a0c] sm:$0xf]  ;;  %8813 = vmatpush.bf16.msrb.mxu2 %v14184_v31  ;;  %v10955_v39 = vld [vmem:[%s23671_s3 + $0x110] sm:$0xf]  ;;  %v12748_v49 = vor.u32 %v15745_v50, %v12747_v30 }
 0x86f   :  { %v14149_v56 = vld [vmem:[%s23671_s3 + $0x1a28] sm:$0xf0]  ;;  %8802 = vmatmul.bf16.vlgmr.msra.gmra.mxu1 %v18017_v28  ;;  %v12715_v31 = vld [vmem:[%s23671_s3 + $0xed0] sm:$0xf] }
 0x870   :  { %v16268_v12 = vld [vmem:[%s23671_s3 + $0x1f8c] sm:$0xf]  ;;  %v14152_v44 = vor.u32 %v16092_v10, %v14149_v56  ;;  %8833 = vmatpush.bf16.msrb.mxu1 %v14888_v40  ;;  %8905 = vmatpush.bf16.msrb.mxu3 %v11852_v37  ;;  %v10956_v40 = vor.u32 %v15297_v43, %v10955_v39  ;;  %v15289_v37 = vld [vmem:[%s23671_s3 + $0xec] sm:$0xf0] }
 0x871   :  { %v14853_v59 = vld [vmem:[%s23671_s3 + $0x1fa8] sm:$0xf0]  ;;  %v15729_v14 = vld [vmem:[%s23671_s3 + $0xeac] sm:$0xf0] }
 0x872   :  { %v14856_v29 = vor.u32 %v16268_v12, %v14853_v59  ;;  %v16260_v20 = vld [vmem:[%s23671_s3 + $0x1f4c] sm:$0xf]  ;;  %8814 = vmatpush.bf16.msrb.mxu2 %v14152_v44  ;;  %v10923_v12 = vld [vmem:[%s23671_s3 + $0xd0] sm:$0xf]  ;;  %v12716_v59 = vor.u32 %v15737_v11, %v12715_v31 }
 0x873   :  { %v14821_v47 = vld [vmem:[%s23671_s3 + $0x1f68] sm:$0xf0]  ;;  %8906 = vmatmul.bf16.vlgmr.msrb.gmra.mxu3 %v17083_v18  ;;  %v10924_v42 = vor.u32 %v15289_v37, %v10923_v12  ;;  %v12651_v61 = vld [vmem:[%s23671_s3 + $0xe50] sm:$0xf] }
 0x874   :  { %8937 = vmatpush.bf16.msra.mxu3 %v12844_v21  ;;  %8834 = vmatpush.bf16.msrb.mxu1 %v14856_v29  ;;  %v14824_v60 = vor.u32 %v16260_v20, %v14821_v47  ;;  %v16252_v0 = vld [vmem:[%s23671_s3 + $0x1f0c] sm:$0xf]  ;;  %v16355_v21 = vld [vmem:[%s23672_s4] sm:$0xff]  ;;  %v10891_v29 = vld [vmem:[%s23671_s3 + $0x90] sm:$0xf]  ;;  %v12684_v20 = vor.u32 %v15729_v14, %v12683_v22  ;;  %v8649_v47 = vpop.f32.mrf.mxu1 }
 0x875   :  { %v14789_v23 = vld [vmem:[%s23671_s3 + $0x1f28] sm:$0xf0]  ;;  %8815 = vmatmul.bf16.vlgmr.msrb.gmra.mxu2 %v18039_v51  ;;  %v2881_v32 = vperm.slane %v16355_v21, 3  ;;  %v15721_v4 = vld [vmem:[%s23671_s3 + $0xe6c] sm:$0xf0] }
 0x876   :  { %8846 = vmatpush.bf16.msra.mxu2 %v11052_v9  ;;  %v14792_v1 = vor.u32 %v16252_v0, %v14789_v23  ;;  %v16244_v24 = vld [vmem:[%s23671_s3 + $0x1ecc] sm:$0xf]  ;;  %v15281_v9 = vld [vmem:[%s23671_s3 + $0xac] sm:$0xf0]  ;;  %v8660_v0 = vpop.f32.mrf.mxu2  ;;  %v12652_v30 = vor.u32 %v15721_v4, %v12651_v61 }
 0x877   :  { %v14757_v5 = vld [vmem:[%s23671_s3 + $0x1ee8] sm:$0xf0]  ;;  %v10859_v33 = vld [vmem:[%s23671_s3 + $0x50] sm:$0xf] }
 0x878   :  { %8938 = vmatpush.bf16.msra.mxu3 %v12812_v34  ;;  %8835 = vmatpush.bf16.msrb.mxu1 %v14824_v60  ;;  %v14760_v58 = vor.u32 %v16244_v24, %v14757_v5  ;;  %v16236_v10 = vld [vmem:[%s23671_s3 + $0x1e8c] sm:$0xf]  ;;  %v8648_v34 = vadd.f32 %v8647_v48, %v2881_v32  ;;  %v10892_v60 = vor.u32 %v15281_v9, %v10891_v29  ;;  %v15273_v19 = vld [vmem:[%s23671_s3 + $0x6c] sm:$0xf0] }
 0x879   :  { %v14725_v56 = vld [vmem:[%s23671_s3 + $0x1ea8] sm:$0xf0]  ;;  %v11563_v50 = vld [vmem:[%s23671_s3 + $0x5d0] sm:$0xf]  ;;  %v10860_v39 = vor.u32 %v15273_v19, %v10859_v33 }
 0x87a   :  { %8847 = vmatpush.bf16.msra.mxu2 %v11020_v16  ;;  %v14728_v44 = vor.u32 %v16236_v10, %v14725_v56  ;;  %v16228_v6 = vld [vmem:[%s23671_s3 + $0x1e4c] sm:$0xf]  ;;  %v15713_v24 = vld [vmem:[%s23671_s3 + $0xe2c] sm:$0xf0] }
 0x87b   :  { %v14693_v17 = vld [vmem:[%s23671_s3 + $0x1e68] sm:$0xf0]  ;;  %v13611_v43 = vld [vmem:[%s23671_s3 + $0x15d0] sm:$0xf] }
 0x87c   :  { %8939 = vmatpush.bf16.msra.mxu3 %v12780_v38  ;;  %8836 = vmatpush.bf16.msrb.mxu1 %v14792_v1  ;;  %v14696_v41 = vor.u32 %v16228_v6, %v14693_v17  ;;  %v16220_v16 = vld [vmem:[%s23671_s3 + $0x1e0c] sm:$0xf]  ;;  %v8661_v38 = vadd.f32 %v8660_v0, %v8648_v34  ;;  %v15449_v1 = vld [vmem:[%s23671_s3 + $0x5ec] sm:$0xf0] }
 0x87d   :  { %v14661_v23 = vld [vmem:[%s23671_s3 + $0x1e28] sm:$0xf0]  ;;  %v11564_v31 = vor.u32 %v15449_v1, %v11563_v50  ;;  %v10827_v11 = vld [vmem:[%s23671_s3 + $0x10] sm:$0xf] }
 0x87e   :  { %8848 = vmatpush.bf16.msra.mxu2 %v10988_v25  ;;  %v12619_v25 = vld [vmem:[%s23671_s3 + $0xe10] sm:$0xf]  ;;  %v14664_v5 = vor.u32 %v16220_v16, %v14661_v23  ;;  %v8674_v48 = vadd.f32 %v20094_v52, %v8661_v38  ;;  %v8662_v32 = vpop.f32.mrf.mxu2 }
 0x87f   :  { %v12620_v10 = vor.u32 %v15713_v24, %v12619_v25  ;;  %v15441_v56 = vld [vmem:[%s23671_s3 + $0x5ac] sm:$0xf0] }
 0x880   :  { %8940 = vmatpush.bf16.msra.mxu3 %v12748_v49  ;;  %8837 = vmatpush.bf16.msrb.mxu1 %v14760_v58  ;;  %v15961_v49 = vld [vmem:[%s23671_s3 + $0x15ec] sm:$0xf0] }
 0x881   :  { %v15265_v58 = vld [vmem:[%s23671_s3 + $0x2c] sm:$0xf0]  ;;  %v13612_v37 = vor.u32 %v15961_v49, %v13611_v43 }
 0x882   :  { %8849 = vmatpush.bf16.msra.mxu2 %v10956_v40  ;;  %v11531_v40 = vld [vmem:[%s23671_s3 + $0x590] sm:$0xf]  ;;  %v10828_v22 = vor.u32 %v15265_v58, %v10827_v11 }
 0x883   :  { %v11819_v52 = vld [vmem:[%s23671_s3 + $0x7d0] sm:$0xf] }
 0x884   :  { %8941 = vmatpush.bf16.msra.mxu3 %v12716_v59  ;;  %8838 = vmatpush.bf16.msrb.mxu1 %v14728_v44  ;;  %v15513_v12 = vld [vmem:[%s23671_s3 + $0x7ec] sm:$0xf0]  ;;  %v8753_v59 = vpop.f32.mrf.mxu3  ;;  %v11532_v44 = vor.u32 %v15441_v56, %v11531_v40 }
 0x885   :  { %v13579_v14 = vld [vmem:[%s23671_s3 + $0x1590] sm:$0xf] }
 0x886   :  { %8850 = vmatpush.bf16.msra.mxu2 %v10924_v42  ;;  %v15953_v21 = vld [vmem:[%s23671_s3 + $0x15ac] sm:$0xf0]  ;;  %v11820_v42 = vor.u32 %v15513_v12, %v11819_v52 }
 0x887   :  { %v11499_v6 = vld [vmem:[%s23671_s3 + $0x550] sm:$0xf] }
 0x888   :  { %8942 = vmatpush.bf16.msra.mxu3 %v12684_v20  ;;  %8839 = vmatpush.bf16.msrb.mxu1 %v14696_v41  ;;  %v15433_v17 = vld [vmem:[%s23671_s3 + $0x56c] sm:$0xf0]  ;;  %v13580_v20 = vor.u32 %v15953_v21, %v13579_v14 }
 0x889   :  { %v11787_v29 = vld [vmem:[%s23671_s3 + $0x790] sm:$0xf]  ;;  %v11500_v4 = vor.u32 %v15433_v17, %v11499_v6 }
 0x88a   :  { %8851 = vmatpush.bf16.msra.mxu2 %v10892_v60  ;;  %v15505_v9 = vld [vmem:[%s23671_s3 + $0x7ac] sm:$0xf0] }
 0x88b   :  { %v13547_v47 = vld [vmem:[%s23671_s3 + $0x1550] sm:$0xf]  ;;  %v11788_v34 = vor.u32 %v15505_v9, %v11787_v29 }
 0x88c   :  { %8943 = vmatpush.bf16.msra.mxu3 %v12652_v30  ;;  %8840 = vmatpush.bf16.msrb.mxu1 %v14664_v5  ;;  %v15945_v61 = vld [vmem:[%s23671_s3 + $0x156c] sm:$0xf0]  ;;  %v20549_v9 = vpop.f32.mrf.mxu3 }
 0x88d   :  { %v11467_v41 = vld [vmem:[%s23671_s3 + $0x510] sm:$0xf]  ;;  %v13548_v23 = vor.u32 %v15945_v61, %v13547_v47 }
 0x88e   :  { %8852 = vmatpush.bf16.msra.mxu2 %v10860_v39  ;;  %v15425_v60 = vld [vmem:[%s23671_s3 + $0x52c] sm:$0xf0]  ;;  %v8686_v39 = vpop.f32.mrf.mxu1 }
 0x88f   :  { %8841 = vmatmul.bf16.vlgmr.msrb.gmra.mxu1 %v18101_v57  ;;  %v11755_v16 = vld [vmem:[%s23671_s3 + $0x750] sm:$0xf]  ;;  %v11468_v38 = vor.u32 %v15425_v60, %v11467_v41 }
 0x890   :  { %8872 = vmatpush.bf16.msra.mxu1 %v11564_v31  ;;  %8944 = vmatpush.bf16.msra.mxu3 %v12620_v10  ;;  %v15497_v0 = vld [vmem:[%s23671_s3 + $0x76c] sm:$0xf0]  ;;  %v8687_v31 = vadd.f32 %v8686_v39, %v8674_v48 }
 0x891   :  { %v13515_v33 = vld [vmem:[%s23671_s3 + $0x1510] sm:$0xf]  ;;  %v11756_v30 = vor.u32 %v15497_v0, %v11755_v16 }
 0x892   :  { %8853 = vmatpush.bf16.msra.mxu2 %v10828_v22  ;;  %v15937_v19 = vld [vmem:[%s23671_s3 + $0x152c] sm:$0xf0] }
 0x893   :  { %8945 = vmatmul.bf16.vlgmr.msra.gmra.mxu3 %v17198_v8  ;;  %v11435_v50 = vld [vmem:[%s23671_s3 + $0x4d0] sm:$0xf]  ;;  %v13516_v5 = vor.u32 %v15937_v19, %v13515_v33 }
 0x894   :  { %8976 = vmatpush.bf16.msrb.mxu3 %v13612_v37  ;;  %8873 = vmatpush.bf16.msra.mxu1 %v11532_v44  ;;  %v15417_v1 = vld [vmem:[%s23671_s3 + $0x4ec] sm:$0xf0] }
 0x895   :  { %8854 = vmatmul.bf16.vlgmr.msra.gmra.mxu2 %v16722_v3  ;;  %v11723_v25 = vld [vmem:[%s23671_s3 + $0x710] sm:$0xf]  ;;  %v11436_v11 = vor.u32 %v15417_v1, %v11435_v50 }
 0x896   :  { %8885 = vmatpush.bf16.msrb.mxu2 %v11820_v42  ;;  %v15489_v24 = vld [vmem:[%s23671_s3 + $0x72c] sm:$0xf0]  ;;  %v8688_v6 = vpop.f32.mrf.mxu1 }
 0x897   :  { %v13483_v43 = vld [vmem:[%s23671_s3 + $0x14d0] sm:$0xf]  ;;  %v11724_v58 = vor.u32 %v15489_v24, %v11723_v25 }
 0x898   :  { %8977 = vmatpush.bf16.msrb.mxu3 %v13580_v20  ;;  %8874 = vmatpush.bf16.msra.mxu1 %v11500_v4  ;;  %v15929_v49 = vld [vmem:[%s23671_s3 + $0x14ec] sm:$0xf0]  ;;  %v8699_v4 = vpop.f32.mrf.mxu2 }
 0x899   :  { %v11403_v40 = vld [vmem:[%s23671_s3 + $0x490] sm:$0xf]  ;;  %v13484_v52 = vor.u32 %v15929_v49, %v13483_v43  ;;  %v8700_v16 = vadd.f32 %v8699_v4, %v8687_v31 }
 0x89a   :  { %8886 = vmatpush.bf16.msrb.mxu2 %v11788_v34  ;;  %v15409_v10 = vld [vmem:[%s23671_s3 + $0x4ac] sm:$0xf0] }
 0x89b   :  { %v11691_v56 = vld [vmem:[%s23671_s3 + $0x6d0] sm:$0xf]  ;;  %v11404_v59 = vor.u32 %v15409_v10, %v11403_v40  ;;  %v8713_v24 = vadd.f32 %v20244_v55, %v8700_v16  ;;  %v8792_v10 = vpop.f32.mrf.mxu3 }
 0x89c   :  { %8978 = vmatpush.bf16.msrb.mxu3 %v13548_v23  ;;  %8875 = vmatpush.bf16.msra.mxu1 %v11468_v38  ;;  %v15481_v48 = vld [vmem:[%s23671_s3 + $0x6ec] sm:$0xf0] }
 0x89d   :  { %v13451_v12 = vld [vmem:[%s23671_s3 + $0x1490] sm:$0xf]  ;;  %v11692_v22 = vor.u32 %v15481_v48, %v11691_v56 }
 0x89e   :  { %8887 = vmatpush.bf16.msrb.mxu2 %v11756_v30  ;;  %v15921_v37 = vld [vmem:[%s23671_s3 + $0x14ac] sm:$0xf0] }
 0x89f   :  { %v11371_v14 = vld [vmem:[%s23671_s3 + $0x450] sm:$0xf]  ;;  %v13452_v42 = vor.u32 %v15921_v37, %v13451_v12 }
 0x8a0   :  { %8979 = vmatpush.bf16.msrb.mxu3 %v13516_v5  ;;  %8876 = vmatpush.bf16.msra.mxu1 %v11436_v11  ;;  %v15401_v21 = vld [vmem:[%s23671_s3 + $0x46c] sm:$0xf0]  ;;  %v8701_v12 = vpop.f32.mrf.mxu2 }
 0x8a1   :  { %v11659_v32 = vld [vmem:[%s23671_s3 + $0x690] sm:$0xf]  ;;  %v11372_v20 = vor.u32 %v15401_v21, %v11371_v14 }
 0x8a2   :  { %8888 = vmatpush.bf16.msrb.mxu2 %v11724_v58  ;;  %v15473_v44 = vld [vmem:[%s23671_s3 + $0x6ac] sm:$0xf0] }
 0x8a3   :  { %v13419_v17 = vld [vmem:[%s23671_s3 + $0x1450] sm:$0xf]  ;;  %v11660_v47 = vor.u32 %v15473_v44, %v11659_v32 }
 0x8a4   :  { %8980 = vmatpush.bf16.msrb.mxu3 %v13484_v52  ;;  %v15913_v29 = vld [vmem:[%s23671_s3 + $0x146c] sm:$0xf0]  ;;  %8877 = vmatpush.bf16.msra.mxu1 %v11404_v59 }
 0x8a5   :  { %v11339_v61 = vld [vmem:[%s23671_s3 + $0x410] sm:$0xf]  ;;  %v13420_v0 = vor.u32 %v15913_v29, %v13419_v17 }
 0x8a6   :  { %8889 = vmatpush.bf16.msrb.mxu2 %v11692_v22  ;;  %v15393_v34 = vld [vmem:[%s23671_s3 + $0x42c] sm:$0xf0] }
 0x8a7   :  { %v11627_v41 = vld [vmem:[%s23671_s3 + $0x650] sm:$0xf]  ;;  %v11340_v30 = vor.u32 %v15393_v34, %v11339_v61 }
 0x8a8   :  { %v15465_v60 = vld [vmem:[%s23671_s3 + $0x66c] sm:$0xf0]  ;;  %8981 = vmatpush.bf16.msrb.mxu3 %v13452_v42  ;;  %8878 = vmatpush.bf16.msra.mxu1 %v11372_v20 }
 0x8a9   :  { %v12331_v23 = vld [vmem:[%s23671_s3 + $0xbd0] sm:$0xf]  ;;  %v11628_v50 = vor.u32 %v15465_v60, %v11627_v41 }
 0x8aa   :  { %v15641_v33 = vld [vmem:[%s23671_s3 + $0xbec] sm:$0xf0]  ;;  %8890 = vmatpush.bf16.msrb.mxu2 %v11660_v47 }
 0x8ab   :  { %v13387_v19 = vld [vmem:[%s23671_s3 + $0x1410] sm:$0xf]  ;;  %v12332_v5 = vor.u32 %v15641_v33, %v12331_v23 }
 0x8ac   :  { %v15905_v38 = vld [vmem:[%s23671_s3 + $0x142c] sm:$0xf0]  ;;  %8982 = vmatpush.bf16.msrb.mxu3 %v13420_v0  ;;  %8879 = vmatpush.bf16.msra.mxu1 %v11340_v30 }
 0x8ad   :  { %v14379_v1 = vld [vmem:[%s23671_s3 + $0x1bd0] sm:$0xf]  ;;  %v13388_v31 = vor.u32 %v15905_v38, %v13387_v19 }
 0x8ae   :  { %v16153_v25 = vld [vmem:[%s23671_s3 + $0x1bec] sm:$0xf0]  ;;  %8891 = vmatpush.bf16.msrb.mxu2 %v11628_v50  ;;  %v8725_v50 = vpop.f32.mrf.mxu1 }
 0x8af   :  { %v11595_v39 = vld [vmem:[%s23671_s3 + $0x610] sm:$0xf]  ;;  %v14380_v40 = vor.u32 %v16153_v25, %v14379_v1  ;;  %8880 = vmatmul.bf16.vlgmr.msra.gmra.mxu1 %v16828_v13 }
 0x8b0   :  { %v15457_v43 = vld [vmem:[%s23671_s3 + $0x62c] sm:$0xf0]  ;;  %8911 = vmatpush.bf16.msrb.mxu1 %v12332_v5  ;;  %8983 = vmatpush.bf16.msrb.mxu3 %v13388_v31  ;;  %v8726_v5 = vadd.f32 %v8725_v50, %v8713_v24 }
 0x8b1   :  { %v12299_v49 = vld [vmem:[%s23671_s3 + $0xb90] sm:$0xf]  ;;  %v11596_v56 = vor.u32 %v15457_v43, %v11595_v39 }
 0x8b2   :  { %v15633_v11 = vld [vmem:[%s23671_s3 + $0xbac] sm:$0xf0] }
 0x8b3   :  { %v12587_v55 = vld [vmem:[%s23671_s3 + $0xdd0] sm:$0xf]  ;;  %v12300_v37 = vor.u32 %v15633_v11, %v12299_v49  ;;  %8892 = vmatpush.bf16.msrb.mxu2 %v11596_v56  ;;  %8984 = vmatmul.bf16.vlgmr.msrb.gmra.mxu3 %v17525_v7 }
 0x8b4   :  { %v15705_v58 = vld [vmem:[%s23671_s3 + $0xdec] sm:$0xf0]  ;;  %9015 = vmatpush.bf16.msra.mxu3 %v14380_v40 }
 0x8b5   :  { %v14347_v48 = vld [vmem:[%s23671_s3 + $0x1b90] sm:$0xf]  ;;  %v12588_v59 = vor.u32 %v15705_v58, %v12587_v55  ;;  %8912 = vmatpush.bf16.msrb.mxu1 %v12300_v37 }
 0x8b6   :  { %v16145_v52 = vld [vmem:[%s23671_s3 + $0x1bac] sm:$0xf0]  ;;  %8893 = vmatmul.bf16.vlgmr.msrb.gmra.mxu2 %v16844_v27 }
 0x8b7   :  { %v12267_v22 = vld [vmem:[%s23671_s3 + $0xb50] sm:$0xf]  ;;  %v14348_v44 = vor.u32 %v16145_v52, %v14347_v48  ;;  %8924 = vmatpush.bf16.msra.mxu2 %v12588_v59 }
 0x8b8   :  { %v15625_v14 = vld [vmem:[%s23671_s3 + $0xb6c] sm:$0xf0] }
 0x8b9   :  { %v12555_v21 = vld [vmem:[%s23671_s3 + $0xd90] sm:$0xf]  ;;  %v12268_v17 = vor.u32 %v15625_v14, %v12267_v22  ;;  %9016 = vmatpush.bf16.msra.mxu3 %v14348_v44  ;;  %v8727_v22 = vpop.f32.mrf.mxu1 }
 0x8ba   :  { %v15697_v32 = vld [vmem:[%s23671_s3 + $0xdac] sm:$0xf0]  ;;  %v10989_v22 = vld [vmem:[%s23671_s3 + $0x170] sm:$0xf0] }
 0x8bb   :  { %v14315_v42 = vld [vmem:[%s23671_s3 + $0x1b50] sm:$0xf]  ;;  %v12556_v29 = vor.u32 %v15697_v32, %v12555_v21  ;;  %8913 = vmatpush.bf16.msrb.mxu1 %v12268_v17  ;;  %v20699_v32 = vpop.f32.mrf.mxu3  ;;  %v8738_v17 = vpop.f32.mrf.mxu2 }
 0x8bc   :  { %v16137_v6 = vld [vmem:[%s23671_s3 + $0x1b6c] sm:$0xf0] }
 0x8bd   :  { %v12235_v20 = vld [vmem:[%s23671_s3 + $0xb10] sm:$0xf]  ;;  %v14316_v34 = vor.u32 %v16137_v6, %v14315_v42  ;;  %8925 = vmatpush.bf16.msra.mxu2 %v12556_v29 }
 0x8be   :  { %v15617_v47 = vld [vmem:[%s23671_s3 + $0xb2c] sm:$0xf0] }
 0x8bf   :  { %v12523_v61 = vld [vmem:[%s23671_s3 + $0xd50] sm:$0xf]  ;;  %v12236_v16 = vor.u32 %v15617_v47, %v12235_v20  ;;  %9017 = vmatpush.bf16.msra.mxu3 %v14316_v34 }
 0x8c0   :  { %v15689_v4 = vld [vmem:[%s23671_s3 + $0xd6c] sm:$0xf0] }
 0x8c1   :  { %v14283_v41 = vld [vmem:[%s23671_s3 + $0x1b10] sm:$0xf]  ;;  %v12524_v0 = vor.u32 %v15689_v4, %v12523_v61  ;;  %8914 = vmatpush.bf16.msrb.mxu1 %v12236_v16  ;;  %v8739_v61 = vadd.f32 %v8738_v17, %v8726_v5 }
 0x8c2   :  { %v16129_v60 = vld [vmem:[%s23671_s3 + $0x1b2c] sm:$0xf0] }
 0x8c3   :  { %v12203_v23 = vld [vmem:[%s23671_s3 + $0xad0] sm:$0xf]  ;;  %v14284_v30 = vor.u32 %v16129_v60, %v14283_v41  ;;  %8926 = vmatpush.bf16.msra.mxu2 %v12524_v0 }
 0x8c4   :  { %v15609_v33 = vld [vmem:[%s23671_s3 + $0xaec] sm:$0xf0] }
 0x8c5   :  { %v12491_v19 = vld [vmem:[%s23671_s3 + $0xd10] sm:$0xf]  ;;  %v12204_v39 = vor.u32 %v15609_v33, %v12203_v23  ;;  %9018 = vmatpush.bf16.msra.mxu3 %v14284_v30  ;;  %v15317_v33 = vld [vmem:[%s23671_s3 + $0x1d4] sm:$0xf] }
 0x8c6   :  { %v15681_v38 = vld [vmem:[%s23671_s3 + $0xd2c] sm:$0xf0] }
 0x8c7   :  { %v14251_v1 = vld [vmem:[%s23671_s3 + $0x1ad0] sm:$0xf]  ;;  %v12492_v43 = vor.u32 %v15681_v38, %v12491_v19  ;;  %8915 = vmatpush.bf16.msrb.mxu1 %v12204_v39  ;;  %v11053_v19 = vld [vmem:[%s23671_s3 + $0x1f0] sm:$0xf0]  ;;  %v8752_v38 = vadd.f32 %v20399_v54, %v8739_v61 }
 0x8c8   :  { %v16121_v25 = vld [vmem:[%s23671_s3 + $0x1aec] sm:$0xf0] }
 0x8c9   :  { %v12171_v49 = vld [vmem:[%s23671_s3 + $0xa90] sm:$0xf]  ;;  %v14252_v55 = vor.u32 %v16121_v25, %v14251_v1  ;;  %8927 = vmatpush.bf16.msra.mxu2 %v12492_v43 }
 0x8ca   :  { %v15601_v31 = vld [vmem:[%s23671_s3 + $0xaac] sm:$0xf0] }
 0x8cb   :  { %v12459_v11 = vld [vmem:[%s23671_s3 + $0xcd0] sm:$0xf]  ;;  %v12172_v10 = vor.u32 %v15601_v31, %v12171_v49  ;;  %9019 = vmatpush.bf16.msra.mxu3 %v14252_v55  ;;  %v11056_v49 = vor.u32 %v15317_v33, %v11053_v19  ;;  %v8831_v31 = vpop.f32.mrf.mxu3  ;;  %v11021_v55 = vld [vmem:[%s23671_s3 + $0x1b0] sm:$0xf0] }
 0x8cc   :  { %v15673_v24 = vld [vmem:[%s23671_s3 + $0xcec] sm:$0xf0]  ;;  %v15285_v33 = vld [vmem:[%s23671_s3 + $0xd4] sm:$0xf] }
 0x8cd   :  { %v14219_v58 = vld [vmem:[%s23671_s3 + $0x1a90] sm:$0xf]  ;;  %v12460_v56 = vor.u32 %v15673_v24, %v12459_v11  ;;  %8916 = vmatpush.bf16.msrb.mxu1 %v12172_v10  ;;  %v15309_v24 = vld [vmem:[%s23671_s3 + $0x194] sm:$0xf] }
 0x8ce   :  { %v16113_v40 = vld [vmem:[%s23671_s3 + $0x1aac] sm:$0xf0]  ;;  %v10925_v19 = vld [vmem:[%s23671_s3 + $0xf0] sm:$0xf0] }
 0x8cf   :  { %v12139_v48 = vld [vmem:[%s23671_s3 + $0xa50] sm:$0xf]  ;;  %v14220_v59 = vor.u32 %v16113_v40, %v14219_v58  ;;  %8928 = vmatpush.bf16.msra.mxu2 %v12460_v56  ;;  %v8740_v58 = vpop.f32.mrf.mxu2 }
 0x8d0   :  { %v15593_v52 = vld [vmem:[%s23671_s3 + $0xa6c] sm:$0xf0] }
 0x8d1   :  { %v12427_v12 = vld [vmem:[%s23671_s3 + $0xc90] sm:$0xf]  ;;  %v12140_v44 = vor.u32 %v15593_v52, %v12139_v48  ;;  %9020 = vmatpush.bf16.msra.mxu3 %v14220_v59  ;;  %v15301_v59 = vld [vmem:[%s23671_s3 + $0x154] sm:$0xf] }
 0x8d2   :  { %v15665_v37 = vld [vmem:[%s23671_s3 + $0xcac] sm:$0xf0] }
 0x8d3   :  { %v14187_v14 = vld [vmem:[%s23671_s3 + $0x1a50] sm:$0xf]  ;;  %v12428_v42 = vor.u32 %v15665_v37, %v12427_v12  ;;  %8917 = vmatpush.bf16.msrb.mxu1 %v12140_v44  ;;  %v11024_v37 = vor.u32 %v15309_v24, %v11021_v55 }
 0x8d4   :  { %v16105_v21 = vld [vmem:[%s23671_s3 + $0x1a6c] sm:$0xf0] }
 0x8d5   :  { %v12107_v6 = vld [vmem:[%s23671_s3 + $0xa10] sm:$0xf]  ;;  %v14188_v4 = vor.u32 %v16105_v21, %v14187_v14  ;;  %8929 = vmatpush.bf16.msra.mxu2 %v12428_v42 }
 0x8d6   :  { %v15585_v29 = vld [vmem:[%s23671_s3 + $0xa2c] sm:$0xf0] }
 0x8d7   :  { %v12395_v20 = vld [vmem:[%s23671_s3 + $0xc50] sm:$0xf]  ;;  %v12108_v0 = vor.u32 %v15585_v29, %v12107_v6  ;;  %9021 = vmatpush.bf16.msra.mxu3 %v14188_v4  ;;  %v10992_v29 = vor.u32 %v15301_v59, %v10989_v22 }
 0x8d8   :  { %v15657_v47 = vld [vmem:[%s23671_s3 + $0xc6c] sm:$0xf0] }
 0x8d9   :  { %v13099_v34 = vld [vmem:[%s23671_s3 + $0x11d0] sm:$0xf]  ;;  %v12396_v23 = vor.u32 %v15657_v47, %v12395_v20  ;;  %8918 = vmatpush.bf16.msrb.mxu1 %v12108_v0  ;;  %v15293_v20 = vld [vmem:[%s23671_s3 + $0x114] sm:$0xf] }
 0x8da   :  { %v15833_v41 = vld [vmem:[%s23671_s3 + $0x11ec] sm:$0xf0]  ;;  %v10957_v47 = vld [vmem:[%s23671_s3 + $0x130] sm:$0xf0] }
 0x8db   :  { %v14155_v60 = vld [vmem:[%s23671_s3 + $0x1a10] sm:$0xf]  ;;  %v13100_v30 = vor.u32 %v15833_v41, %v13099_v34  ;;  %8930 = vmatpush.bf16.msra.mxu2 %v12396_v23  ;;  %v10960_v0 = vor.u32 %v15293_v20, %v10957_v47  ;;  %v8764_v23 = vpop.f32.mrf.mxu1  ;;  %v15261_v47 = vld [vmem:[%s23671_s3 + $0x14] sm:$0xf] }
 0x8dc   :  { %v16097_v16 = vld [vmem:[%s23671_s3 + $0x1a2c] sm:$0xf0]  ;;  %8919 = vmatmul.bf16.vlgmr.msrb.gmra.mxu1 %v17147_v15 }
 0x8dd   :  { %v12363_v50 = vld [vmem:[%s23671_s3 + $0xc10] sm:$0xf]  ;;  %v14156_v5 = vor.u32 %v16097_v16, %v14155_v60  ;;  %8950 = vmatpush.bf16.msra.mxu1 %v13100_v30  ;;  %v8765_v30 = vadd.f32 %v8764_v23, %v8752_v38 }
 0x8de   :  { %v15649_v1 = vld [vmem:[%s23671_s3 + $0xc2c] sm:$0xf0] }
 0x8df   :  { %v13067_v25 = vld [vmem:[%s23671_s3 + $0x1190] sm:$0xf]  ;;  %v12364_v11 = vor.u32 %v15649_v1, %v12363_v50  ;;  %9022 = vmatpush.bf16.msra.mxu3 %v14156_v5 }
 0x8e0   :  { %v15825_v39 = vld [vmem:[%s23671_s3 + $0x11ac] sm:$0xf0] }
 0x8e1   :  { %v13355_v54 = vld [vmem:[%s23671_s3 + $0x13d0] sm:$0xf]  ;;  %v13068_v40 = vor.u32 %v15825_v39, %v13067_v25  ;;  %8931 = vmatpush.bf16.msra.mxu2 %v12364_v11 }
 0x8e2   :  { %v15897_v43 = vld [vmem:[%s23671_s3 + $0x13ec] sm:$0xf0]  ;;  %9023 = vmatmul.bf16.vlgmr.msra.gmra.mxu3 %v18039_v51 }
 0x8e3   :  { %v13356_v10 = vor.u32 %v15897_v43, %v13355_v54  ;;  %v13035_v56 = vld [vmem:[%s23671_s3 + $0x1150] sm:$0xf]  ;;  %9054 = vmatpush.bf16.msrb.mxu3 %v11056_v49  ;;  %8951 = vmatpush.bf16.msra.mxu1 %v13068_v40  ;;  %v10928_v54 = vor.u32 %v15285_v33, %v10925_v19  ;;  %v15277_v43 = vld [vmem:[%s23671_s3 + $0x94] sm:$0xf] }
 0x8e4   :  { %v15817_v48 = vld [vmem:[%s23671_s3 + $0x116c] sm:$0xf0]  ;;  %8932 = vmatmul.bf16.vlgmr.msra.gmra.mxu2 %v17185_v53  ;;  %v10893_v49 = vld [vmem:[%s23671_s3 + $0xb0] sm:$0xf0] }
 0x8e5   :  { %v13323_v52 = vld [vmem:[%s23671_s3 + $0x1390] sm:$0xf]  ;;  %8963 = vmatpush.bf16.msrb.mxu2 %v13356_v10  ;;  %v13036_v14 = vor.u32 %v15817_v48, %v13035_v56  ;;  %v10896_v10 = vor.u32 %v15277_v43, %v10893_v49  ;;  %v8766_v56 = vpop.f32.mrf.mxu1  ;;  %v15269_v48 = vld [vmem:[%s23671_s3 + $0x54] sm:$0xf] }
 0x8e6   :  { %v15889_v12 = vld [vmem:[%s23671_s3 + $0x13ac] sm:$0xf0]  ;;  %v11757_v56 = vld [vmem:[%s23671_s3 + $0x770] sm:$0xf0] }
 0x8e7   :  { %v13324_v21 = vor.u32 %v15889_v12, %v13323_v52  ;;  %v13003_v44 = vld [vmem:[%s23671_s3 + $0x1110] sm:$0xf]  ;;  %9055 = vmatpush.bf16.msrb.mxu3 %v11024_v37  ;;  %8952 = vmatpush.bf16.msra.mxu1 %v13036_v14  ;;  %v10861_v52 = vld [vmem:[%s23671_s3 + $0x70] sm:$0xf0]  ;;  %v20849_v12 = vpop.f32.mrf.mxu3  ;;  %v8777_v14 = vpop.f32.mrf.mxu2 }
 0x8e8   :  { %v15809_v42 = vld [vmem:[%s23671_s3 + $0x112c] sm:$0xf0] }
 0x8e9   :  { %v13291_v6 = vld [vmem:[%s23671_s3 + $0x1350] sm:$0xf]  ;;  %8964 = vmatpush.bf16.msrb.mxu2 %v13324_v21  ;;  %v13004_v61 = vor.u32 %v15809_v42, %v13003_v44 }
 0x8ea   :  { %v15881_v17 = vld [vmem:[%s23671_s3 + $0x136c] sm:$0xf0] }
 0x8eb   :  { %v13292_v4 = vor.u32 %v15881_v17, %v13291_v6  ;;  %v12971_v34 = vld [vmem:[%s23671_s3 + $0x10d0] sm:$0xf]  ;;  %9056 = vmatpush.bf16.msrb.mxu3 %v10992_v29  ;;  %8953 = vmatpush.bf16.msra.mxu1 %v13004_v61  ;;  %v8778_v6 = vadd.f32 %v8777_v14, %v8765_v30  ;;  %v10864_v17 = vor.u32 %v15269_v48, %v10861_v52  ;;  %v10829_v61 = vld [vmem:[%s23671_s3 + $0x30] sm:$0xf0] }
 0x8ec   :  { %v15801_v41 = vld [vmem:[%s23671_s3 + $0x10ec] sm:$0xf0]  ;;  %v10832_v30 = vor.u32 %v15261_v47, %v10829_v61 }
 0x8ed   :  { %v13259_v60 = vld [vmem:[%s23671_s3 + $0x1310] sm:$0xf]  ;;  %8965 = vmatpush.bf16.msrb.mxu2 %v13292_v4  ;;  %v12972_v50 = vor.u32 %v15801_v41, %v12971_v34  ;;  %v15509_v41 = vld [vmem:[%s23671_s3 + $0x7d4] sm:$0xf] }
 0x8ee   :  { %v15873_v16 = vld [vmem:[%s23671_s3 + $0x132c] sm:$0xf0] }
 0x8ef   :  { %v13260_v1 = vor.u32 %v15873_v16, %v13259_v60  ;;  %v12939_v25 = vld [vmem:[%s23671_s3 + $0x1090] sm:$0xf]  ;;  %9057 = vmatpush.bf16.msrb.mxu3 %v10960_v0  ;;  %8954 = vmatpush.bf16.msra.mxu1 %v12972_v50  ;;  %v11821_v60 = vld [vmem:[%s23671_s3 + $0x7f0] sm:$0xf0]  ;;  %v8791_v16 = vadd.f32 %v20549_v9, %v8778_v6  ;;  %v8779_v43 = vpop.f32.mrf.mxu2 }
 0x8f0   :  { %v15793_v5 = vld [vmem:[%s23671_s3 + $0x10ac] sm:$0xf0] }
 0x8f1   :  { %v13227_v39 = vld [vmem:[%s23671_s3 + $0x12d0] sm:$0xf]  ;;  %8966 = vmatpush.bf16.msrb.mxu2 %v13260_v1  ;;  %v12940_v31 = vor.u32 %v15793_v5, %v12939_v25  ;;  %v11824_v25 = vor.u32 %v15509_v41, %v11821_v60  ;;  %v8870_v5 = vpop.f32.mrf.mxu3  ;;  %v15477_v41 = vld [vmem:[%s23671_s3 + $0x6d4] sm:$0xf] }
 0x8f2   :  { %v15865_v38 = vld [vmem:[%s23671_s3 + $0x12ec] sm:$0xf0]  ;;  %v11693_v60 = vld [vmem:[%s23671_s3 + $0x6f0] sm:$0xf0] }
 0x8f3   :  { %v13228_v11 = vor.u32 %v15865_v38, %v13227_v39  ;;  %v12907_v24 = vld [vmem:[%s23671_s3 + $0x1050] sm:$0xf]  ;;  %9058 = vmatpush.bf16.msrb.mxu3 %v10928_v54  ;;  %8955 = vmatpush.bf16.msra.mxu1 %v12940_v31  ;;  %v15501_v38 = vld [vmem:[%s23671_s3 + $0x794] sm:$0xf] }
 0x8f4   :  { %v15785_v55 = vld [vmem:[%s23671_s3 + $0x106c] sm:$0xf0]  ;;  %v11789_v54 = vld [vmem:[%s23671_s3 + $0x7b0] sm:$0xf0] }
 0x8f5   :  { %v13195_v58 = vld [vmem:[%s23671_s3 + $0x1290] sm:$0xf]  ;;  %8967 = vmatpush.bf16.msrb.mxu2 %v13228_v11  ;;  %v12908_v37 = vor.u32 %v15785_v55, %v12907_v24 }
 0x8f6   :  { %v15857_v40 = vld [vmem:[%s23671_s3 + $0x12ac] sm:$0xf0] }
 0x8f7   :  { %v13196_v59 = vor.u32 %v15857_v40, %v13195_v58  ;;  %v12875_v22 = vld [vmem:[%s23671_s3 + $0x1010] sm:$0xf]  ;;  %9059 = vmatpush.bf16.msrb.mxu3 %v10896_v10  ;;  %8956 = vmatpush.bf16.msra.mxu1 %v12908_v37  ;;  %v11792_v40 = vor.u32 %v15501_v38, %v11789_v54  ;;  %v15493_v10 = vld [vmem:[%s23671_s3 + $0x754] sm:$0xf] }
 0x8f8   :  { %v15777_v21 = vld [vmem:[%s23671_s3 + $0x102c] sm:$0xf0] }
 0x8f9   :  { %v13163_v44 = vld [vmem:[%s23671_s3 + $0x1250] sm:$0xf]  ;;  %8968 = vmatpush.bf16.msrb.mxu2 %v13196_v59  ;;  %v12876_v4 = vor.u32 %v15777_v21, %v12875_v22  ;;  %v11760_v21 = vor.u32 %v15493_v10, %v11757_v56 }
 0x8fa   :  { %v15849_v42 = vld [vmem:[%s23671_s3 + $0x126c] sm:$0xf0] }
 0x8fb   :  { %v13867_v29 = vld [vmem:[%s23671_s3 + $0x17d0] sm:$0xf]  ;;  %v13164_v34 = vor.u32 %v15849_v42, %v13163_v44  ;;  %9060 = vmatpush.bf16.msrb.mxu3 %v10864_v17  ;;  %8957 = vmatpush.bf16.msra.mxu1 %v12876_v4  ;;  %v15485_v44 = vld [vmem:[%s23671_s3 + $0x714] sm:$0xf] }
 0x8fc   :  { %v16025_v20 = vld [vmem:[%s23671_s3 + $0x17ec] sm:$0xf0]  ;;  %v11725_v42 = vld [vmem:[%s23671_s3 + $0x730] sm:$0xf0] }
 0x8fd   :  { %v13868_v0 = vor.u32 %v16025_v20, %v13867_v29  ;;  %v13131_v23 = vld [vmem:[%s23671_s3 + $0x1210] sm:$0xf]  ;;  %8969 = vmatpush.bf16.msrb.mxu2 %v13164_v34  ;;  %v11728_v4 = vor.u32 %v15485_v44, %v11725_v42  ;;  %v8803_v34 = vpop.f32.mrf.mxu1  ;;  %v15453_v42 = vld [vmem:[%s23671_s3 + $0x614] sm:$0xf] }
 0x8fe   :  { %v15841_v33 = vld [vmem:[%s23671_s3 + $0x122c] sm:$0xf0]  ;;  %8958 = vmatmul.bf16.vlgmr.msra.gmra.mxu1 %v17423_v2 }
 0x8ff   :  { %v13835_v19 = vld [vmem:[%s23671_s3 + $0x1790] sm:$0xf]  ;;  %v13132_v39 = vor.u32 %v15841_v33, %v13131_v23  ;;  %8989 = vmatpush.bf16.msrb.mxu1 %v13868_v0  ;;  %9061 = vmatpush.bf16.msrb.mxu3 %v10832_v30  ;;  %v8804_v0 = vadd.f32 %v8803_v34, %v8791_v16 }
 0x900   :  { %v16017_v50 = vld [vmem:[%s23671_s3 + $0x17ac] sm:$0xf0] }
 0x901   :  { %v14123_v9 = vld [vmem:[%s23671_s3 + $0x19d0] sm:$0xf]  ;;  %v13836_v49 = vor.u32 %v16017_v50, %v13835_v19  ;;  %8970 = vmatpush.bf16.msrb.mxu2 %v13132_v39 }
 0x902   :  { %v16089_v1 = vld [vmem:[%s23671_s3 + $0x19ec] sm:$0xf0]  ;;  %9062 = vmatmul.bf16.vlgmr.msrb.gmra.mxu3 %v16722_v3 }
 0x903   :  { %v14124_v31 = vor.u32 %v16089_v1, %v14123_v9  ;;  %v13803_v11 = vld [vmem:[%s23671_s3 + $0x1750] sm:$0xf]  ;;  %9093 = vmatpush.bf16.msra.mxu3 %v11824_v25  ;;  %8990 = vmatpush.bf16.msrb.mxu1 %v13836_v49  ;;  %v11696_v9 = vor.u32 %v15477_v41, %v11693_v60  ;;  %v15469_v1 = vld [vmem:[%s23671_s3 + $0x694] sm:$0xf] }
 0x904   :  { %v16009_v24 = vld [vmem:[%s23671_s3 + $0x176c] sm:$0xf0]  ;;  %8971 = vmatmul.bf16.vlgmr.msrb.gmra.mxu2 %v17487_v62  ;;  %v11661_v25 = vld [vmem:[%s23671_s3 + $0x6b0] sm:$0xf0] }
 0x905   :  { %v14091_v55 = vld [vmem:[%s23671_s3 + $0x1990] sm:$0xf]  ;;  %9002 = vmatpush.bf16.msra.mxu2 %v14124_v31  ;;  %v13804_v48 = vor.u32 %v16009_v24, %v13803_v11  ;;  %v11664_v31 = vor.u32 %v15469_v1, %v11661_v25  ;;  %v8805_v11 = vpop.f32.mrf.mxu1  ;;  %v15461_v24 = vld [vmem:[%s23671_s3 + $0x654] sm:$0xf] }
 0x906   :  { %v16081_v58 = vld [vmem:[%s23671_s3 + $0x19ac] sm:$0xf0]  ;;  %v12525_v11 = vld [vmem:[%s23671_s3 + $0xd70] sm:$0xf0] }
 0x907   :  { %v14092_v52 = vor.u32 %v16081_v58, %v14091_v55  ;;  %v13771_v37 = vld [vmem:[%s23671_s3 + $0x1710] sm:$0xf]  ;;  %9094 = vmatpush.bf16.msra.mxu3 %v11792_v40  ;;  %8991 = vmatpush.bf16.msrb.mxu1 %v13804_v48  ;;  %v11629_v55 = vld [vmem:[%s23671_s3 + $0x670] sm:$0xf0]  ;;  %v20999_v58 = vpop.f32.mrf.mxu3  ;;  %v8816_v48 = vpop.f32.mrf.mxu2 }
 0x908   :  { %v16001_v59 = vld [vmem:[%s23671_s3 + $0x172c] sm:$0xf0] }
 0x909   :  { %v14059_v22 = vld [vmem:[%s23671_s3 + $0x1950] sm:$0xf]  ;;  %9003 = vmatpush.bf16.msra.mxu2 %v14092_v52  ;;  %v13772_v6 = vor.u32 %v16001_v59, %v13771_v37 }
 0x90a   :  { %v16073_v14 = vld [vmem:[%s23671_s3 + $0x196c] sm:$0xf0] }
 0x90b   :  { %v14060_v17 = vor.u32 %v16073_v14, %v14059_v22  ;;  %v13739_v29 = vld [vmem:[%s23671_s3 + $0x16d0] sm:$0xf]  ;;  %9095 = vmatpush.bf16.msra.mxu3 %v11760_v21  ;;  %8992 = vmatpush.bf16.msrb.mxu1 %v13772_v6  ;;  %v8817_v22 = vadd.f32 %v8816_v48, %v8804_v0  ;;  %v11632_v14 = vor.u32 %v15461_v24, %v11629_v55  ;;  %v11597_v6 = vld [vmem:[%s23671_s3 + $0x630] sm:$0xf0] }
 0x90c   :  { %v15993_v20 = vld [vmem:[%s23671_s3 + $0x16ec] sm:$0xf0]  ;;  %v11600_v0 = vor.u32 %v15453_v42, %v11597_v6 }
 0x90d   :  { %v14027_v47 = vld [vmem:[%s23671_s3 + $0x1910] sm:$0xf]  ;;  %9004 = vmatpush.bf16.msra.mxu2 %v14060_v17  ;;  %v13740_v23 = vor.u32 %v15993_v20, %v13739_v29  ;;  %v15701_v20 = vld [vmem:[%s23671_s3 + $0xdd4] sm:$0xf] }
 0x90e   :  { %v16065_v61 = vld [vmem:[%s23671_s3 + $0x192c] sm:$0xf0] }
 0x90f   :  { %v14028_v33 = vor.u32 %v16065_v61, %v14027_v47  ;;  %v13707_v19 = vld [vmem:[%s23671_s3 + $0x1690] sm:$0xf]  ;;  %9096 = vmatpush.bf16.msra.mxu3 %v11728_v4  ;;  %8993 = vmatpush.bf16.msrb.mxu1 %v13740_v23  ;;  %v12589_v47 = vld [vmem:[%s23671_s3 + $0xdf0] sm:$0xf0]  ;;  %v8830_v61 = vadd.f32 %v20699_v32, %v8817_v22  ;;  %v8818_v1 = vpop.f32.mrf.mxu2 }
 0x910   :  { %v15985_v30 = vld [vmem:[%s23671_s3 + $0x16ac] sm:$0xf0] }
 0x911   :  { %v13995_v50 = vld [vmem:[%s23671_s3 + $0x18d0] sm:$0xf]  ;;  %9005 = vmatpush.bf16.msra.mxu2 %v14028_v33  ;;  %v13708_v5 = vor.u32 %v15985_v30, %v13707_v19  ;;  %v12592_v19 = vor.u32 %v15701_v20, %v12589_v47  ;;  %v8909_v30 = vpop.f32.mrf.mxu3  ;;  %v15669_v20 = vld [vmem:[%s23671_s3 + $0xcd4] sm:$0xf] }
 0x912   :  { %v16057_v16 = vld [vmem:[%s23671_s3 + $0x18ec] sm:$0xf0]  ;;  %v12461_v47 = vld [vmem:[%s23671_s3 + $0xcf0] sm:$0xf0] }
 0x913   :  { %v13996_v39 = vor.u32 %v16057_v16, %v13995_v50  ;;  %v13675_v38 = vld [vmem:[%s23671_s3 + $0x1650] sm:$0xf]  ;;  %9097 = vmatpush.bf16.msra.mxu3 %v11696_v9  ;;  %8994 = vmatpush.bf16.msrb.mxu1 %v13708_v5  ;;  %v15693_v16 = vld [vmem:[%s23671_s3 + $0xd94] sm:$0xf] }
 0x914   :  { %v15977_v54 = vld [vmem:[%s23671_s3 + $0x166c] sm:$0xf0]  ;;  %v12557_v9 = vld [vmem:[%s23671_s3 + $0xdb0] sm:$0xf0] }
 0x915   :  { %v13963_v43 = vld [vmem:[%s23671_s3 + $0x1890] sm:$0xf]  ;;  %9006 = vmatpush.bf16.msra.mxu2 %v13996_v39  ;;  %v13676_v40 = vor.u32 %v15977_v54, %v13675_v38 }
 0x916   :  { %v16049_v49 = vld [vmem:[%s23671_s3 + $0x18ac] sm:$0xf0] }
 0x917   :  { %v13964_v10 = vor.u32 %v16049_v49, %v13963_v43  ;;  %v13643_v56 = vld [vmem:[%s23671_s3 + $0x1610] sm:$0xf]  ;;  %9098 = vmatpush.bf16.msra.mxu3 %v11664_v31  ;;  %8995 = vmatpush.bf16.msrb.mxu1 %v13676_v40  ;;  %v12560_v49 = vor.u32 %v15693_v16, %v12557_v9  ;;  %v15685_v31 = vld [vmem:[%s23671_s3 + $0xd54] sm:$0xf] }
 0x918   :  { %v15969_v52 = vld [vmem:[%s23671_s3 + $0x162c] sm:$0xf0] }
 0x919   :  { %v13931_v37 = vld [vmem:[%s23671_s3 + $0x1850] sm:$0xf]  ;;  %9007 = vmatpush.bf16.msra.mxu2 %v13964_v10  ;;  %v13644_v17 = vor.u32 %v15969_v52, %v13643_v56  ;;  %v12528_v52 = vor.u32 %v15685_v31, %v12525_v11  ;;  %v21154_v31 = vpop.f32.mrf.mxu3 }
 0x91a   :  { %v16041_v59 = vld [vmem:[%s23671_s3 + $0x186c] sm:$0xf0] }
 0x91b   :  { %v14635_v21 = vld [vmem:[%s23671_s3 + $0x1dd0] sm:$0xf]  ;;  %v13932_v29 = vor.u32 %v16041_v59, %v13931_v37  ;;  %9099 = vmatpush.bf16.msra.mxu3 %v11632_v14  ;;  %8996 = vmatpush.bf16.msrb.mxu1 %v13644_v17  ;;  %v15677_v37 = vld [vmem:[%s23671_s3 + $0xd14] sm:$0xf] }
 0x91c   :  { %v16217_v44 = vld [vmem:[%s23671_s3 + $0x1dec] sm:$0xf0]  ;;  %v12493_v59 = vld [vmem:[%s23671_s3 + $0xd30] sm:$0xf0] }
 0x91d   :  { %v14636_v4 = vor.u32 %v16217_v44, %v14635_v21  ;;  %v13899_v34 = vld [vmem:[%s23671_s3 + $0x1810] sm:$0xf]  ;;  %9008 = vmatpush.bf16.msra.mxu2 %v13932_v29  ;;  %v12496_v17 = vor.u32 %v15677_v37, %v12493_v59  ;;  %v8842_v29 = vpop.f32.mrf.mxu1  ;;  %v15381_v59 = vld [vmem:[%s23671_s3 + $0x3d4] sm:$0xf] }
 0x91e   :  { %v16033_v41 = vld [vmem:[%s23671_s3 + $0x182c] sm:$0xf0]  ;;  %8997 = vmatmul.bf16.vlgmr.msrb.gmra.mxu1 %v17538_v63 }
 0x91f   :  { %v14603_v60 = vld [vmem:[%s23671_s3 + $0x1d90] sm:$0xf]  ;;  %v13900_v50 = vor.u32 %v16033_v41, %v13899_v34  ;;  %9028 = vmatpush.bf16.msra.mxu1 %v14636_v4  ;;  %9100 = vmatpush.bf16.msra.mxu3 %v11600_v0  ;;  %v21113_v4 = vadd.f32 %v8842_v29, %v8830_v61 }
 0x920   :  { %v16209_v23 = vld [vmem:[%s23671_s3 + $0x1dac] sm:$0xf0] }
 0x921   :  { %v14891_v32 = vld [vmem:[%s23671_s3 + $0x1fd0] sm:$0xf]  ;;  %v14604_v25 = vor.u32 %v16209_v23, %v14603_v60  ;;  %9009 = vmatpush.bf16.msra.mxu2 %v13900_v50 }
 0x922   :  { %v16281_v33 = vld [vmem:[%s23671_s3 + $0x1fec] sm:$0xf0]  ;;  %9101 = vmatmul.bf16.vlgmr.msra.gmra.mxu3 %v16844_v27 }
 0x923   :  { %v14892_v5 = vor.u32 %v16281_v33, %v14891_v32  ;;  %v14571_v39 = vld [vmem:[%s23671_s3 + $0x1d50] sm:$0xf]  ;;  %9132 = vmatpush.bf16.msrb.mxu3 %v12592_v19  ;;  %9029 = vmatpush.bf16.msra.mxu1 %v14604_v25  ;;  %v12464_v32 = vor.u32 %v15669_v20, %v12461_v47  ;;  %v15661_v33 = vld [vmem:[%s23671_s3 + $0xc94] sm:$0xf] }
 0x924   :  { %v16201_v38 = vld [vmem:[%s23671_s3 + $0x1d6c] sm:$0xf0]  ;;  %9010 = vmatmul.bf16.vlgmr.msra.gmra.mxu2 %v18017_v28  ;;  %v12429_v19 = vld [vmem:[%s23671_s3 + $0xcb0] sm:$0xf0] }
 0x925   :  { %v14859_v54 = vld [vmem:[%s23671_s3 + $0x1f90] sm:$0xf]  ;;  %9041 = vmatpush.bf16.msrb.mxu2 %v14892_v5  ;;  %v14572_v24 = vor.u32 %v16201_v38, %v14571_v39  ;;  %v16356_v5 = vld [vmem:[%s23672_s4] sm:$0xff]  ;;  %v12432_v38 = vor.u32 %v15661_v33, %v12429_v19  ;;  %v15885_v19 = vld [vmem:[%s23671_s3 + $0x1394] sm:$0xf] }
 0x926   :  { %v16273_v43 = vld [vmem:[%s23671_s3 + $0x1fac] sm:$0xf0]  ;;  %v2882_v39 = vperm.slane %v16356_v5, 4  ;;  %v15437_v5 = vld [vmem:[%s23671_s3 + $0x594] sm:$0xf] }
 0x927   :  { %v14860_v55 = vor.u32 %v16273_v43, %v14859_v54  ;;  %v14539_v40 = vld [vmem:[%s23671_s3 + $0x1d10] sm:$0xf]  ;;  %9133 = vmatpush.bf16.msrb.mxu3 %v12560_v49  ;;  %9030 = vmatpush.bf16.msra.mxu1 %v14572_v24  ;;  %v8844_v54 = vpop.f32.mrf.mxu1  ;;  %v15653_v43 = vld [vmem:[%s23671_s3 + $0xc54] sm:$0xf] }
 0x928   :  { %v16193_v10 = vld [vmem:[%s23671_s3 + $0x1d2c] sm:$0xf0]  ;;  %v12397_v49 = vld [vmem:[%s23671_s3 + $0xc70] sm:$0xf0] }
 0x929   :  { %v14827_v56 = vld [vmem:[%s23671_s3 + $0x1f50] sm:$0xf]  ;;  %9042 = vmatpush.bf16.msrb.mxu2 %v14860_v55  ;;  %v14540_v22 = vor.u32 %v16193_v10, %v14539_v40  ;;  %v8855_v40 = vpop.f32.mrf.mxu2  ;;  %v12400_v37 = vor.u32 %v15653_v43, %v12397_v49  ;;  %v15877_v54 = vld [vmem:[%s23671_s3 + $0x1354] sm:$0xf] }
 0x92a   :  { %v16265_v48 = vld [vmem:[%s23671_s3 + $0x1f6c] sm:$0xf0]  ;;  %v13293_v43 = vld [vmem:[%s23671_s3 + $0x1370] sm:$0xf0] }
 0x92b   :  { %v14828_v14 = vor.u32 %v16265_v48, %v14827_v56  ;;  %v14507_v21 = vld [vmem:[%s23671_s3 + $0x1cd0] sm:$0xf]  ;;  %9134 = vmatpush.bf16.msrb.mxu3 %v12528_v52  ;;  %9031 = vmatpush.bf16.msra.mxu1 %v14540_v22  ;;  %v8856_v52 = vadd.f32 %v8855_v40, %v2882_v39  ;;  %v11309_v22 = vld [vmem:[%s23671_s3 + $0x3f0] sm:$0xf0] }
 0x92c   :  { %v16185_v44 = vld [vmem:[%s23671_s3 + $0x1cec] sm:$0xf0]  ;;  %v11312_v20 = vor.u32 %v15381_v59, %v11309_v22  ;;  %v11533_v39 = vld [vmem:[%s23671_s3 + $0x5b0] sm:$0xf0] }
 0x92d   :  { %v14795_v42 = vld [vmem:[%s23671_s3 + $0x1f10] sm:$0xf]  ;;  %9043 = vmatpush.bf16.msrb.mxu2 %v14828_v14  ;;  %v14508_v34 = vor.u32 %v16185_v44, %v14507_v21  ;;  %v15645_v14 = vld [vmem:[%s23671_s3 + $0xc14] sm:$0xf]  ;;  %v8869_v29 = vadd.f32 %v20849_v12, %v8856_v52 }
 0x92e   :  { %v16257_v6 = vld [vmem:[%s23671_s3 + $0x1f2c] sm:$0xf0]  ;;  %v12365_v21 = vld [vmem:[%s23671_s3 + $0xc30] sm:$0xf0] }
 0x92f   :  { %v14796_v41 = vor.u32 %v16257_v6, %v14795_v42  ;;  %v14475_v60 = vld [vmem:[%s23671_s3 + $0x1c90] sm:$0xf]  ;;  %9135 = vmatpush.bf16.msrb.mxu3 %v12496_v17  ;;  %9032 = vmatpush.bf16.msra.mxu1 %v14508_v34  ;;  %v15893_v6 = vld [vmem:[%s23671_s3 + $0x13d4] sm:$0xf] }
 0x930   :  { %v16177_v0 = vld [vmem:[%s23671_s3 + $0x1cac] sm:$0xf0]  ;;  %v13357_v17 = vld [vmem:[%s23671_s3 + $0x13f0] sm:$0xf0] }
 0x931   :  { %v14763_v23 = vld [vmem:[%s23671_s3 + $0x1ed0] sm:$0xf]  ;;  %9044 = vmatpush.bf16.msrb.mxu2 %v14796_v41  ;;  %v14476_v30 = vor.u32 %v16177_v0, %v14475_v60  ;;  %v15373_v41 = vld [vmem:[%s23671_s3 + $0x394] sm:$0xf]  ;;  %v12368_v60 = vor.u32 %v15645_v14, %v12365_v21 }
 0x932   :  { %v16249_v61 = vld [vmem:[%s23671_s3 + $0x1eec] sm:$0xf0]  ;;  %v11277_v0 = vld [vmem:[%s23671_s3 + $0x3b0] sm:$0xf0] }
 0x933   :  { %v14764_v50 = vor.u32 %v16249_v61, %v14763_v23  ;;  %v14443_v16 = vld [vmem:[%s23671_s3 + $0x1c50] sm:$0xf]  ;;  %9136 = vmatpush.bf16.msrb.mxu3 %v12464_v32  ;;  %9033 = vmatpush.bf16.msra.mxu1 %v14476_v30  ;;  %v15445_v12 = vld [vmem:[%s23671_s3 + $0x5d4] sm:$0xf]  ;;  %v13360_v61 = vor.u32 %v15893_v6, %v13357_v17  ;;  %v8948_v32 = vpop.f32.mrf.mxu3  ;;  %v8881_v6 = vpop.f32.mrf.mxu1 }
 0x934   :  { %v16169_v9 = vld [vmem:[%s23671_s3 + $0x1c6c] sm:$0xf0]  ;;  %v11565_v23 = vld [vmem:[%s23671_s3 + $0x5f0] sm:$0xf0] }
 0x935   :  { %v14731_v1 = vld [vmem:[%s23671_s3 + $0x1e90] sm:$0xf]  ;;  %9045 = vmatpush.bf16.msrb.mxu2 %v14764_v50  ;;  %v14444_v11 = vor.u32 %v16169_v9, %v14443_v16  ;;  %v13325_v30 = vld [vmem:[%s23671_s3 + $0x13b0] sm:$0xf0]  ;;  %v8857_v50 = vpop.f32.mrf.mxu2  ;;  %v11280_v16 = vor.u32 %v15373_v41, %v11277_v0  ;;  %v11568_v9 = vor.u32 %v15445_v12, %v11565_v23 }
 0x936   :  { %v16241_v25 = vld [vmem:[%s23671_s3 + $0x1eac] sm:$0xf0]  ;;  %v15429_v40 = vld [vmem:[%s23671_s3 + $0x554] sm:$0xf] }
 0x937   :  { %v14732_v24 = vor.u32 %v16241_v25, %v14731_v1  ;;  %v14411_v55 = vld [vmem:[%s23671_s3 + $0x1c10] sm:$0xf]  ;;  %9137 = vmatpush.bf16.msrb.mxu3 %v12432_v38  ;;  %9034 = vmatpush.bf16.msra.mxu1 %v14444_v11  ;;  %v15365_v1 = vld [vmem:[%s23671_s3 + $0x354] sm:$0xf]  ;;  %v13328_v38 = vor.u32 %v15885_v19, %v13325_v30  ;;  %v11536_v11 = vor.u32 %v15437_v5, %v11533_v39 }
 0x938   :  { %v16161_v10 = vld [vmem:[%s23671_s3 + $0x1c2c] sm:$0xf0]  ;;  %v11245_v25 = vld [vmem:[%s23671_s3 + $0x370] sm:$0xf0] }
 0x939   :  { %v14699_v56 = vld [vmem:[%s23671_s3 + $0x1e50] sm:$0xf]  ;;  %9046 = vmatpush.bf16.msrb.mxu2 %v14732_v24  ;;  %v14412_v44 = vor.u32 %v16161_v10, %v14411_v55  ;;  %v11248_v49 = vor.u32 %v15365_v1, %v11245_v25  ;;  %v15357_v24 = vld [vmem:[%s23671_s3 + $0x314] sm:$0xf] }
 0x93a   :  { %v16233_v48 = vld [vmem:[%s23671_s3 + $0x1e6c] sm:$0xf0]  ;;  %v11213_v55 = vld [vmem:[%s23671_s3 + $0x330] sm:$0xf0] }
 0x93b   :  { %v14700_v42 = vor.u32 %v16233_v48, %v14699_v56  ;;  %v14667_v47 = vld [vmem:[%s23671_s3 + $0x1e10] sm:$0xf]  ;;  %9138 = vmatpush.bf16.msrb.mxu3 %v12400_v37  ;;  %9035 = vmatpush.bf16.msra.mxu1 %v14412_v44  ;;  %v11501_v10 = vld [vmem:[%s23671_s3 + $0x570] sm:$0xf0]  ;;  %v13296_v56 = vor.u32 %v15877_v54, %v13293_v43  ;;  %v11216_v37 = vor.u32 %v15357_v24, %v11213_v55  ;;  %v8883_v25 = vpop.f32.mrf.mxu1 }
 0x93c   :  { %v16225_v34 = vld [vmem:[%s23671_s3 + $0x1e2c] sm:$0xf0]  ;;  %v15869_v48 = vld [vmem:[%s23671_s3 + $0x1314] sm:$0xf]  ;;  %v11504_v59 = vor.u32 %v15429_v40, %v11501_v10 }
 0x93d   :  { %9047 = vmatpush.bf16.msrb.mxu2 %v14700_v42  ;;  %v14668_v33 = vor.u32 %v16225_v34, %v14667_v47  ;;  %v13261_v52 = vld [vmem:[%s23671_s3 + $0x1330] sm:$0xf0]  ;;  %v8882_v47 = vadd.f32 %v8881_v6, %v8869_v29 }
 0x93e   :  { %9036 = vmatmul.bf16.vlgmr.msra.gmra.mxu1 %v17812_v46  ;;  %v15349_v22 = vld [vmem:[%s23671_s3 + $0x2d4] sm:$0xf]  ;;  %v13264_v42 = vor.u32 %v15869_v48, %v13261_v52 }
 0x93f   :  { %9067 = vmatpush.bf16.msrb.mxu1 %v11312_v20  ;;  %9139 = vmatpush.bf16.msrb.mxu3 %v12368_v60  ;;  %v11181_v14 = vld [vmem:[%s23671_s3 + $0x2f0] sm:$0xf0] }
 0x940   :  { %v15421_v21 = vld [vmem:[%s23671_s3 + $0x514] sm:$0xf]  ;;  %v11184_v34 = vor.u32 %v15349_v22, %v11181_v14 }
 0x941   :  { %9048 = vmatpush.bf16.msrb.mxu2 %v14668_v33  ;;  %v11469_v44 = vld [vmem:[%s23671_s3 + $0x530] sm:$0xf0] }
 0x942   :  { %9140 = vmatmul.bf16.vlgmr.msrb.gmra.mxu3 %v17185_v53  ;;  %v15861_v17 = vld [vmem:[%s23671_s3 + $0x12d4] sm:$0xf]  ;;  %v11472_v41 = vor.u32 %v15421_v21, %v11469_v44 }
 0x943   :  { %9171 = vmatpush.bf16.msra.mxu3 %v13360_v61  ;;  %9068 = vmatpush.bf16.msrb.mxu1 %v11280_v16  ;;  %v13229_v20 = vld [vmem:[%s23671_s3 + $0x12f0] sm:$0xf0] }
 0x944   :  { %9049 = vmatmul.bf16.vlgmr.msrb.gmra.mxu2 %v18101_v57  ;;  %v15341_v60 = vld [vmem:[%s23671_s3 + $0x294] sm:$0xf]  ;;  %v13232_v23 = vor.u32 %v15861_v17, %v13229_v20 }
 0x945   :  { %9080 = vmatpush.bf16.msra.mxu2 %v11568_v9  ;;  %v11149_v0 = vld [vmem:[%s23671_s3 + $0x2b0] sm:$0xf0] }
 0x946   :  { %v15413_v12 = vld [vmem:[%s23671_s3 + $0x4d4] sm:$0xf]  ;;  %v11152_v33 = vor.u32 %v15341_v60, %v11149_v0 }
 0x947   :  { %9172 = vmatpush.bf16.msra.mxu3 %v13328_v38  ;;  %9069 = vmatpush.bf16.msrb.mxu1 %v11248_v49  ;;  %v11437_v29 = vld [vmem:[%s23671_s3 + $0x4f0] sm:$0xf0]  ;;  %v21304_v38 = vpop.f32.mrf.mxu3 }
 0x948   :  { %v15853_v61 = vld [vmem:[%s23671_s3 + $0x1294] sm:$0xf]  ;;  %v11440_v19 = vor.u32 %v15413_v12, %v11437_v29 }
 0x949   :  { %9081 = vmatpush.bf16.msra.mxu2 %v11536_v11  ;;  %v13197_v32 = vld [vmem:[%s23671_s3 + $0x12b0] sm:$0xf0]  ;;  %v8894_v11 = vpop.f32.mrf.mxu2 }
 0x94a   :  { %v15333_v30 = vld [vmem:[%s23671_s3 + $0x254] sm:$0xf]  ;;  %v13200_v1 = vor.u32 %v15853_v61, %v13197_v32  ;;  %v8895_v10 = vadd.f32 %v8894_v11, %v8882_v47 }
 0x94b   :  { %9173 = vmatpush.bf16.msra.mxu3 %v13296_v56  ;;  %9070 = vmatpush.bf16.msrb.mxu1 %v11216_v37  ;;  %v11117_v50 = vld [vmem:[%s23671_s3 + $0x270] sm:$0xf0] }
 0x94c   :  { %v15405_v16 = vld [vmem:[%s23671_s3 + $0x494] sm:$0xf]  ;;  %v11120_v54 = vor.u32 %v15333_v30, %v11117_v50 }
 0x94d   :  { %9082 = vmatpush.bf16.msra.mxu2 %v11504_v59  ;;  %v11405_v9 = vld [vmem:[%s23671_s3 + $0x4b0] sm:$0xf0] }
 0x94e   :  { %v15845_v5 = vld [vmem:[%s23671_s3 + $0x1254] sm:$0xf]  ;;  %v11408_v43 = vor.u32 %v15405_v16, %v11405_v9 }
 0x94f   :  { %9174 = vmatpush.bf16.msra.mxu3 %v13264_v42  ;;  %9071 = vmatpush.bf16.msrb.mxu1 %v11184_v34  ;;  %v13165_v39 = vld [vmem:[%s23671_s3 + $0x1270] sm:$0xf0]  ;;  %v8908_v42 = vadd.f32 %v20999_v58, %v8895_v10  ;;  %v8987_v12 = vpop.f32.mrf.mxu3 }
 0x950   :  { %v15325_v49 = vld [vmem:[%s23671_s3 + $0x214] sm:$0xf]  ;;  %v13168_v56 = vor.u32 %v15845_v5, %v13165_v39 }
 0x951   :  { %9083 = vmatpush.bf16.msra.mxu2 %v11472_v41  ;;  %v11085_v24 = vld [vmem:[%s23671_s3 + $0x230] sm:$0xf0]  ;;  %v8896_v32 = vpop.f32.mrf.mxu2 }
 0x952   :  { %v15397_v55 = vld [vmem:[%s23671_s3 + $0x454] sm:$0xf]  ;;  %v11088_v22 = vor.u32 %v15325_v49, %v11085_v24 }
 0x953   :  { %9175 = vmatpush.bf16.msra.mxu3 %v13232_v23  ;;  %9072 = vmatpush.bf16.msrb.mxu1 %v11152_v33  ;;  %v11373_v40 = vld [vmem:[%s23671_s3 + $0x470] sm:$0xf0] }
 0x954   :  { %v15573_v48 = vld [vmem:[%s23671_s3 + $0x9d4] sm:$0xf]  ;;  %v11376_v14 = vor.u32 %v15397_v55, %v11373_v40 }
 0x955   :  { %9084 = vmatpush.bf16.msra.mxu2 %v11440_v19  ;;  %v12077_v52 = vld [vmem:[%s23671_s3 + $0x9f0] sm:$0xf0] }
 0x956   :  { %v15837_v37 = vld [vmem:[%s23671_s3 + $0x1214] sm:$0xf]  ;;  %v12080_v6 = vor.u32 %v15573_v48, %v12077_v52 }
 0x957   :  { %9176 = vmatpush.bf16.msra.mxu3 %v13200_v1  ;;  %v13133_v59 = vld [vmem:[%s23671_s3 + $0x1230] sm:$0xf0]  ;;  %9073 = vmatpush.bf16.msrb.mxu1 %v11120_v54 }
 0x958   :  { %v16085_v21 = vld [vmem:[%s23671_s3 + $0x19d4] sm:$0xf]  ;;  %v13136_v34 = vor.u32 %v15837_v37, %v13133_v59 }
 0x959   :  { %9085 = vmatpush.bf16.msra.mxu2 %v11408_v43  ;;  %v14125_v44 = vld [vmem:[%s23671_s3 + $0x19f0] sm:$0xf0] }
 0x95a   :  { %v15389_v17 = vld [vmem:[%s23671_s3 + $0x414] sm:$0xf]  ;;  %v14128_v0 = vor.u32 %v16085_v21, %v14125_v44  ;;  %v8920_v21 = vpop.f32.mrf.mxu1 }
 0x95b   :  { %v11341_v20 = vld [vmem:[%s23671_s3 + $0x430] sm:$0xf0]  ;;  %9177 = vmatpush.bf16.msra.mxu3 %v13168_v56  ;;  %9074 = vmatpush.bf16.msrb.mxu1 %v11088_v22 }
 0x95c   :  { %v15565_v47 = vld [vmem:[%s23671_s3 + $0x994] sm:$0xf]  ;;  %v11344_v29 = vor.u32 %v15389_v17, %v11341_v20  ;;  %v8921_v17 = vadd.f32 %v8920_v21, %v8908_v42 }
 0x95d   :  { %v12045_v41 = vld [vmem:[%s23671_s3 + $0x9b0] sm:$0xf0]  ;;  %9086 = vmatpush.bf16.msra.mxu2 %v11376_v14 }
 0x95e   :  { %v15637_v58 = vld [vmem:[%s23671_s3 + $0xbd4] sm:$0xf]  ;;  %v12048_v33 = vor.u32 %v15565_v47, %v12045_v41  ;;  %9075 = vmatmul.bf16.vlgmr.msrb.gmra.mxu1 %v16790_v45 }
 0x95f   :  { %v12333_v60 = vld [vmem:[%s23671_s3 + $0xbf0] sm:$0xf0]  ;;  %9106 = vmatpush.bf16.msra.mxu1 %v12080_v6  ;;  %9178 = vmatpush.bf16.msra.mxu3 %v13136_v34 }
 0x960   :  { %v16077_v23 = vld [vmem:[%s23671_s3 + $0x1994] sm:$0xf]  ;;  %v12336_v19 = vor.u32 %v15637_v58, %v12333_v60 }
 0x961   :  { %v14093_v61 = vld [vmem:[%s23671_s3 + $0x19b0] sm:$0xf0]  ;;  %9087 = vmatpush.bf16.msra.mxu2 %v11344_v29 }
 0x962   :  { %v15557_v30 = vld [vmem:[%s23671_s3 + $0x954] sm:$0xf]  ;;  %v14096_v1 = vor.u32 %v16077_v23, %v14093_v61  ;;  %9179 = vmatmul.bf16.vlgmr.msra.gmra.mxu3 %v17487_v62 }
 0x963   :  { %v12013_v50 = vld [vmem:[%s23671_s3 + $0x970] sm:$0xf0]  ;;  %9210 = vmatpush.bf16.msrb.mxu3 %v14128_v0  ;;  %9107 = vmatpush.bf16.msra.mxu1 %v12048_v33 }
 0x964   :  { %v15629_v16 = vld [vmem:[%s23671_s3 + $0xb94] sm:$0xf]  ;;  %v12016_v39 = vor.u32 %v15557_v30, %v12013_v50  ;;  %9088 = vmatmul.bf16.vlgmr.msra.gmra.mxu2 %v16828_v13  ;;  %v8922_v50 = vpop.f32.mrf.mxu1 }
 0x965   :  { %v12301_v9 = vld [vmem:[%s23671_s3 + $0xbb0] sm:$0xf0]  ;;  %9119 = vmatpush.bf16.msrb.mxu2 %v12336_v19 }
 0x966   :  { %v16069_v25 = vld [vmem:[%s23671_s3 + $0x1954] sm:$0xf]  ;;  %v12304_v54 = vor.u32 %v15629_v16, %v12301_v9 }
 0x967   :  { %v14061_v5 = vld [vmem:[%s23671_s3 + $0x1970] sm:$0xf0]  ;;  %9211 = vmatpush.bf16.msrb.mxu3 %v14096_v1  ;;  %9108 = vmatpush.bf16.msra.mxu1 %v12016_v39  ;;  %v21454_v1 = vpop.f32.mrf.mxu3 }
 0x968   :  { %v15549_v43 = vld [vmem:[%s23671_s3 + $0x914] sm:$0xf]  ;;  %v14064_v55 = vor.u32 %v16069_v25, %v14061_v5 }
 0x969   :  { %v11981_v49 = vld [vmem:[%s23671_s3 + $0x930] sm:$0xf0]  ;;  %9120 = vmatpush.bf16.msrb.mxu2 %v12304_v54  ;;  %v8933_v54 = vpop.f32.mrf.mxu2 }
 0x96a   :  { %v15621_v11 = vld [vmem:[%s23671_s3 + $0xb54] sm:$0xf]  ;;  %v11984_v56 = vor.u32 %v15549_v43, %v11981_v49 }
 0x96b   :  { %v12269_v24 = vld [vmem:[%s23671_s3 + $0xb70] sm:$0xf0]  ;;  %9212 = vmatpush.bf16.msrb.mxu3 %v14064_v55 }
 0x96c   :  { %v16061_v40 = vld [vmem:[%s23671_s3 + $0x1914] sm:$0xf]  ;;  %v12272_v48 = vor.u32 %v15621_v11, %v12269_v24  ;;  %9109 = vmatpush.bf16.msra.mxu1 %v11984_v56  ;;  %v8934_v24 = vadd.f32 %v8933_v54, %v8921_v17 }
 0x96d   :  { %v14029_v10 = vld [vmem:[%s23671_s3 + $0x1930] sm:$0xf0] }
 0x96e   :  { %v15541_v52 = vld [vmem:[%s23671_s3 + $0x8d4] sm:$0xf]  ;;  %v14032_v14 = vor.u32 %v16061_v40, %v14029_v10  ;;  %9121 = vmatpush.bf16.msrb.mxu2 %v12272_v48 }
 0x96f   :  { %v11949_v37 = vld [vmem:[%s23671_s3 + $0x8f0] sm:$0xf0] }
 0x970   :  { %v15613_v59 = vld [vmem:[%s23671_s3 + $0xb14] sm:$0xf]  ;;  %v11952_v20 = vor.u32 %v15541_v52, %v11949_v37  ;;  %9213 = vmatpush.bf16.msrb.mxu3 %v14032_v14  ;;  %v8947_v14 = vadd.f32 %v21154_v31, %v8934_v24 }
 0x971   :  { %v12237_v22 = vld [vmem:[%s23671_s3 + $0xb30] sm:$0xf0] }
 0x972   :  { %v16053_v44 = vld [vmem:[%s23671_s3 + $0x18d4] sm:$0xf]  ;;  %v12240_v47 = vor.u32 %v15613_v59, %v12237_v22  ;;  %9110 = vmatpush.bf16.msra.mxu1 %v11952_v20 }
 0x973   :  { %v13997_v6 = vld [vmem:[%s23671_s3 + $0x18f0] sm:$0xf0] }
 0x974   :  { %v15533_v34 = vld [vmem:[%s23671_s3 + $0x894] sm:$0xf]  ;;  %v14000_v60 = vor.u32 %v16053_v44, %v13997_v6  ;;  %9122 = vmatpush.bf16.msrb.mxu2 %v12240_v47 }
 0x975   :  { %v11917_v41 = vld [vmem:[%s23671_s3 + $0x8b0] sm:$0xf0] }
 0x976   :  { %v15605_v58 = vld [vmem:[%s23671_s3 + $0xad4] sm:$0xf]  ;;  %v11920_v29 = vor.u32 %v15533_v34, %v11917_v41  ;;  %9214 = vmatpush.bf16.msrb.mxu3 %v14000_v60 }
 0x977   :  { %v12205_v42 = vld [vmem:[%s23671_s3 + $0xaf0] sm:$0xf0] }
 0x978   :  { %v16045_v0 = vld [vmem:[%s23671_s3 + $0x1894] sm:$0xf]  ;;  %v12208_v23 = vor.u32 %v15605_v58, %v12205_v42  ;;  %9111 = vmatpush.bf16.msra.mxu1 %v11920_v29  ;;  %v9026_v58 = vpop.f32.mrf.mxu3 }
 0x979   :  { %v13965_v12 = vld [vmem:[%s23671_s3 + $0x18b0] sm:$0xf0] }
 0x97a   :  { %v15525_v61 = vld [vmem:[%s23671_s3 + $0x854] sm:$0xf]  ;;  %v13968_v30 = vor.u32 %v16045_v0, %v13965_v12  ;;  %9123 = vmatpush.bf16.msrb.mxu2 %v12208_v23  ;;  %v8935_v12 = vpop.f32.mrf.mxu2 }
 0x97b   :  { %v11885_v32 = vld [vmem:[%s23671_s3 + $0x870] sm:$0xf0] }
 0x97c   :  { %v15597_v33 = vld [vmem:[%s23671_s3 + $0xa94] sm:$0xf]  ;;  %v11888_v25 = vor.u32 %v15525_v61, %v11885_v32  ;;  %9215 = vmatpush.bf16.msrb.mxu3 %v13968_v30 }
 0x97d   :  { %v12173_v19 = vld [vmem:[%s23671_s3 + $0xab0] sm:$0xf0] }
 0x97e   :  { %v16037_v16 = vld [vmem:[%s23671_s3 + $0x1854] sm:$0xf]  ;;  %v12176_v5 = vor.u32 %v15597_v33, %v12173_v19  ;;  %9112 = vmatpush.bf16.msra.mxu1 %v11888_v25 }
 0x97f   :  { %v13933_v9 = vld [vmem:[%s23671_s3 + $0x1870] sm:$0xf0] }
 0x980   :  { %v15517_v39 = vld [vmem:[%s23671_s3 + $0x814] sm:$0xf]  ;;  %v13936_v55 = vor.u32 %v16037_v16, %v13933_v9  ;;  %9124 = vmatpush.bf16.msrb.mxu2 %v12176_v5 }
 0x981   :  { %v11853_v43 = vld [vmem:[%s23671_s3 + $0x830] sm:$0xf0] }
 0x982   :  { %v15589_v49 = vld [vmem:[%s23671_s3 + $0xa54] sm:$0xf]  ;;  %v11856_v52 = vor.u32 %v15517_v39, %v11853_v43  ;;  %9216 = vmatpush.bf16.msrb.mxu3 %v13936_v55 }
 0x983   :  { %v12141_v11 = vld [vmem:[%s23671_s3 + $0xa70] sm:$0xf0] }
 0x984   :  { %v15765_v40 = vld [vmem:[%s23671_s3 + $0xfd4] sm:$0xf]  ;;  %v12144_v37 = vor.u32 %v15589_v49, %v12141_v11  ;;  %9113 = vmatpush.bf16.msra.mxu1 %v11856_v52 }
 0x985   :  { %v12845_v10 = vld [vmem:[%s23671_s3 + $0xff0] sm:$0xf0] }
 0x986   :  { %v16029_v56 = vld [vmem:[%s23671_s3 + $0x1814] sm:$0xf]  ;;  %v12848_v21 = vor.u32 %v15765_v40, %v12845_v10  ;;  %9125 = vmatpush.bf16.msrb.mxu2 %v12144_v37 }
 0x987   :  { %v13901_v48 = vld [vmem:[%s23671_s3 + $0x1830] sm:$0xf0]  ;;  %9114 = vmatmul.bf16.vlgmr.msra.gmra.mxu1 %v17083_v18 }
 0x988   :  { %v16277_v59 = vld [vmem:[%s23671_s3 + $0x1fd4] sm:$0xf]  ;;  %v13904_v20 = vor.u32 %v16029_v56, %v13901_v48  ;;  %9145 = vmatpush.bf16.msrb.mxu1 %v12848_v21 }
 0x989   :  { %v14893_v22 = vld [vmem:[%s23671_s3 + $0x1ff0] sm:$0xf0] }
 0x98a   :  { %v15581_v44 = vld [vmem:[%s23671_s3 + $0xa14] sm:$0xf]  ;;  %v14896_v41 = vor.u32 %v16277_v59, %v14893_v22  ;;  %9217 = vmatpush.bf16.msrb.mxu3 %v13904_v20  ;;  %v8959_v59 = vpop.f32.mrf.mxu1 }
 0x98b   :  { %v12109_v6 = vld [vmem:[%s23671_s3 + $0xa30] sm:$0xf0] }
 0x98c   :  { %v15757_v17 = vld [vmem:[%s23671_s3 + $0xf94] sm:$0xf]  ;;  %v12112_v42 = vor.u32 %v15581_v44, %v12109_v6  ;;  %v8960_v44 = vadd.f32 %v8959_v59, %v8947_v14 }
 0x98d   :  { %v12813_v47 = vld [vmem:[%s23671_s3 + $0xfb0] sm:$0xf0]  ;;  %9218 = vmatmul.bf16.vlgmr.msrb.gmra.mxu3 %v18017_v28 }
 0x98e   :  { %v15829_v31 = vld [vmem:[%s23671_s3 + $0x11d4] sm:$0xf]  ;;  %v12816_v29 = vor.u32 %v15757_v17, %v12813_v47  ;;  %9249 = vmatpush.bf16.msra.mxu3 %v14896_v41  ;;  %9126 = vmatpush.bf16.msrb.mxu2 %v12112_v42 }
 0x98f   :  { %v13101_v34 = vld [vmem:[%s23671_s3 + $0x11f0] sm:$0xf0] }
 0x990   :  { %v16269_v60 = vld [vmem:[%s23671_s3 + $0x1f94] sm:$0xf]  ;;  %v13104_v23 = vor.u32 %v15829_v31, %v13101_v34  ;;  %9146 = vmatpush.bf16.msrb.mxu1 %v12816_v29 }
 0x991   :  { %v14861_v0 = vld [vmem:[%s23671_s3 + $0x1fb0] sm:$0xf0]  ;;  %9127 = vmatmul.bf16.vlgmr.msrb.gmra.mxu2 %v17147_v15 }
 0x992   :  { %v15749_v61 = vld [vmem:[%s23671_s3 + $0xf54] sm:$0xf]  ;;  %v14864_v30 = vor.u32 %v16269_v60, %v14861_v0  ;;  %9158 = vmatpush.bf16.msra.mxu2 %v13104_v23 }
 0x993   :  { %v12781_v32 = vld [vmem:[%s23671_s3 + $0xf70] sm:$0xf0] }
 0x994   :  { %v15821_v33 = vld [vmem:[%s23671_s3 + $0x1194] sm:$0xf]  ;;  %v12784_v9 = vor.u32 %v15749_v61, %v12781_v32  ;;  %9250 = vmatpush.bf16.msra.mxu3 %v14864_v30  ;;  %v8961_v32 = vpop.f32.mrf.mxu1  ;;  %v21604_v30 = vpop.f32.mrf.mxu3 }
 0x995   :  { %v13069_v19 = vld [vmem:[%s23671_s3 + $0x11b0] sm:$0xf0]  ;;  %v11507_v32 = vld [vmem:[%s23671_s3 + $0x558] sm:$0xf] }
 0x996   :  { %v16261_v50 = vld [vmem:[%s23671_s3 + $0x1f54] sm:$0xf]  ;;  %v13072_v25 = vor.u32 %v15821_v33, %v13069_v19  ;;  %9147 = vmatpush.bf16.msrb.mxu1 %v12784_v9 }
 0x997   :  { %v14829_v16 = vld [vmem:[%s23671_s3 + $0x1f70] sm:$0xf0] }
 0x998   :  { %v15741_v5 = vld [vmem:[%s23671_s3 + $0xf14] sm:$0xf]  ;;  %v14832_v49 = vor.u32 %v16261_v50, %v14829_v16  ;;  %9159 = vmatpush.bf16.msra.mxu2 %v13072_v25  ;;  %v8972_v25 = vpop.f32.mrf.mxu2 }
 0x999   :  { %v12749_v39 = vld [vmem:[%s23671_s3 + $0xf30] sm:$0xf0] }
 0x99a   :  { %v15813_v54 = vld [vmem:[%s23671_s3 + $0x1154] sm:$0xf]  ;;  %v12752_v55 = vor.u32 %v15741_v5, %v12749_v39  ;;  %9251 = vmatpush.bf16.msra.mxu3 %v14832_v49 }
 0x99b   :  { %v13037_v43 = vld [vmem:[%s23671_s3 + $0x1170] sm:$0xf0] }
 0x99c   :  { %v16253_v11 = vld [vmem:[%s23671_s3 + $0x1f14] sm:$0xf]  ;;  %v13040_v40 = vor.u32 %v15813_v54, %v13037_v43  ;;  %9148 = vmatpush.bf16.msrb.mxu1 %v12752_v55  ;;  %v8973_v43 = vadd.f32 %v8972_v25, %v8960_v44 }
 0x99d   :  { %v14797_v24 = vld [vmem:[%s23671_s3 + $0x1f30] sm:$0xf0] }
 0x99e   :  { %v15733_v10 = vld [vmem:[%s23671_s3 + $0xed4] sm:$0xf]  ;;  %v14800_v37 = vor.u32 %v16253_v11, %v14797_v24  ;;  %9160 = vmatpush.bf16.msra.mxu2 %v13040_v40 }
 0x99f   :  { %v12717_v56 = vld [vmem:[%s23671_s3 + $0xef0] sm:$0xf0] }
 0x9a0   :  { %v15805_v48 = vld [vmem:[%s23671_s3 + $0x1114] sm:$0xf]  ;;  %v12720_v6 = vor.u32 %v15733_v10, %v12717_v56  ;;  %9252 = vmatpush.bf16.msra.mxu3 %v14800_v37  ;;  %v8986_v37 = vadd.f32 %v21304_v38, %v8973_v43  ;;  %v15426_v43 = vld [vmem:[%s23671_s3 + $0x534] sm:$0xf0] }
 0x9a1   :  { %v13005_v52 = vld [vmem:[%s23671_s3 + $0x1130] sm:$0xf0] }
 0x9a2   :  { %v16245_v22 = vld [vmem:[%s23671_s3 + $0x1ed4] sm:$0xf]  ;;  %v13008_v17 = vor.u32 %v15805_v48, %v13005_v52  ;;  %9149 = vmatpush.bf16.msrb.mxu1 %v12720_v6  ;;  %v11571_v48 = vld [vmem:[%s23671_s3 + $0x5d8] sm:$0xf] }
 0x9a3   :  { %v14765_v21 = vld [vmem:[%s23671_s3 + $0x1ef0] sm:$0xf0]  ;;  %v15450_v52 = vld [vmem:[%s23671_s3 + $0x5f4] sm:$0xf0] }
 0x9a4   :  { %v15725_v20 = vld [vmem:[%s23671_s3 + $0xe94] sm:$0xf]  ;;  %v14768_v34 = vor.u32 %v16245_v22, %v14765_v21  ;;  %9161 = vmatpush.bf16.msra.mxu2 %v13008_v17 }
 0x9a5   :  { %v12685_v47 = vld [vmem:[%s23671_s3 + $0xeb0] sm:$0xf0] }
 0x9a6   :  { %v15797_v31 = vld [vmem:[%s23671_s3 + $0x10d4] sm:$0xf]  ;;  %v12688_v42 = vor.u32 %v15725_v20, %v12685_v47  ;;  %9253 = vmatpush.bf16.msra.mxu3 %v14768_v34  ;;  %v11572_v47 = vor.u32 %v15450_v52, %v11571_v48  ;;  %v11539_v34 = vld [vmem:[%s23671_s3 + $0x598] sm:$0xf]  ;;  %v8998_v48 = vpop.f32.mrf.mxu1 }
 0x9a7   :  { %v12973_v14 = vld [vmem:[%s23671_s3 + $0x10f0] sm:$0xf0]  ;;  %v11443_v52 = vld [vmem:[%s23671_s3 + $0x4d8] sm:$0xf] }
 0x9a8   :  { %v16237_v41 = vld [vmem:[%s23671_s3 + $0x1e94] sm:$0xf]  ;;  %v12976_v60 = vor.u32 %v15797_v31, %v12973_v14  ;;  %9150 = vmatpush.bf16.msrb.mxu1 %v12688_v42  ;;  %v9065_v31 = vpop.f32.mrf.mxu3 }
 0x9a9   :  { %v14733_v58 = vld [vmem:[%s23671_s3 + $0x1eb0] sm:$0xf0]  ;;  %v15410_v31 = vld [vmem:[%s23671_s3 + $0x4b4] sm:$0xf0] }
 0x9aa   :  { %v15717_v0 = vld [vmem:[%s23671_s3 + $0xe54] sm:$0xf]  ;;  %v14736_v61 = vor.u32 %v16237_v41, %v14733_v58  ;;  %9162 = vmatpush.bf16.msra.mxu2 %v12976_v60  ;;  %v15442_v41 = vld [vmem:[%s23671_s3 + $0x5b4] sm:$0xf0]  ;;  %v8974_v58 = vpop.f32.mrf.mxu2 }
 0x9ab   :  { %v12653_v12 = vld [vmem:[%s23671_s3 + $0xe70] sm:$0xf0] }
 0x9ac   :  { %v15789_v29 = vld [vmem:[%s23671_s3 + $0x1094] sm:$0xf]  ;;  %v12656_v50 = vor.u32 %v15717_v0, %v12653_v12  ;;  %9254 = vmatpush.bf16.msra.mxu3 %v14736_v61  ;;  %v11540_v61 = vor.u32 %v15442_v41, %v11539_v34 }
 0x9ad   :  { %v12941_v23 = vld [vmem:[%s23671_s3 + $0x10b0] sm:$0xf0] }
 0x9ae   :  { %v16229_v33 = vld [vmem:[%s23671_s3 + $0x1e54] sm:$0xf]  ;;  %v12944_v16 = vor.u32 %v15789_v29, %v12941_v23  ;;  %9151 = vmatpush.bf16.msrb.mxu1 %v12656_v50 }
 0x9af   :  { %v14701_v19 = vld [vmem:[%s23671_s3 + $0x1e70] sm:$0xf0] }
 0x9b0   :  { %v15709_v9 = vld [vmem:[%s23671_s3 + $0xe14] sm:$0xf]  ;;  %v14704_v49 = vor.u32 %v16229_v33, %v14701_v19  ;;  %9163 = vmatpush.bf16.msra.mxu2 %v12944_v16  ;;  %v15434_v33 = vld [vmem:[%s23671_s3 + $0x574] sm:$0xf0] }
 0x9b1   :  { %v12621_v5 = vld [vmem:[%s23671_s3 + $0xe30] sm:$0xf0] }
 0x9b2   :  { %v15781_v39 = vld [vmem:[%s23671_s3 + $0x1054] sm:$0xf]  ;;  %v12624_v10 = vor.u32 %v15709_v9, %v12621_v5  ;;  %9255 = vmatpush.bf16.msra.mxu3 %v14704_v49 }
 0x9b3   :  { %v12909_v54 = vld [vmem:[%s23671_s3 + $0x1070] sm:$0xf0] }
 0x9b4   :  { %v15957_v11 = vld [vmem:[%s23671_s3 + $0x15d4] sm:$0xf]  ;;  %v12912_v56 = vor.u32 %v15781_v39, %v12909_v54  ;;  %9152 = vmatpush.bf16.msrb.mxu1 %v12624_v10  ;;  %v11508_v39 = vor.u32 %v15434_v33, %v11507_v32  ;;  %v11475_v54 = vld [vmem:[%s23671_s3 + $0x518] sm:$0xf] }
 0x9b5   :  { %v13613_v24 = vld [vmem:[%s23671_s3 + $0x15f0] sm:$0xf0] }
 0x9b6   :  { %v16221_v55 = vld [vmem:[%s23671_s3 + $0x1e14] sm:$0xf]  ;;  %v13616_v59 = vor.u32 %v15957_v11, %v13613_v24  ;;  %9164 = vmatpush.bf16.msra.mxu2 %v12912_v56  ;;  %v11476_v56 = vor.u32 %v15426_v43, %v11475_v54 }
 0x9b7   :  { %v14669_v40 = vld [vmem:[%s23671_s3 + $0x1e30] sm:$0xf0]  ;;  %9153 = vmatmul.bf16.vlgmr.msrb.gmra.mxu1 %v17198_v8 }
 0x9b8   :  { %v15773_v22 = vld [vmem:[%s23671_s3 + $0x1014] sm:$0xf]  ;;  %v14672_v6 = vor.u32 %v16221_v55, %v14669_v40  ;;  %9184 = vmatpush.bf16.msra.mxu1 %v13616_v59  ;;  %v15418_v59 = vld [vmem:[%s23671_s3 + $0x4f4] sm:$0xf0] }
 0x9b9   :  { %v12877_v21 = vld [vmem:[%s23671_s3 + $0x1030] sm:$0xf0] }
 0x9ba   :  { %v15949_v44 = vld [vmem:[%s23671_s3 + $0x1594] sm:$0xf]  ;;  %v12880_v14 = vor.u32 %v15773_v22, %v12877_v21  ;;  %9256 = vmatpush.bf16.msra.mxu3 %v14672_v6  ;;  %v8999_v22 = vadd.f32 %v8998_v48, %v8986_v37 }
 0x9bb   :  { %v13581_v17 = vld [vmem:[%s23671_s3 + $0x15b0] sm:$0xf0] }
 0x9bc   :  { %v16021_v38 = vld [vmem:[%s23671_s3 + $0x17d4] sm:$0xf]  ;;  %v13584_v42 = vor.u32 %v15949_v44, %v13581_v17  ;;  %9165 = vmatpush.bf16.msra.mxu2 %v12880_v14 }
 0x9bd   :  { %v13869_v20 = vld [vmem:[%s23671_s3 + $0x17f0] sm:$0xf0]  ;;  %9257 = vmatmul.bf16.vlgmr.msra.gmra.mxu3 %v18101_v57 }
 0x9be   :  { %v13872_v60 = vor.u32 %v16021_v38, %v13869_v20  ;;  %v15941_v0 = vld [vmem:[%s23671_s3 + $0x1554] sm:$0xf]  ;;  %9288 = vmatpush.bf16.msrb.mxu3 %v11572_v47  ;;  %9185 = vmatpush.bf16.msra.mxu1 %v13584_v42  ;;  %v11444_v20 = vor.u32 %v15418_v59, %v11443_v52  ;;  %v11411_v47 = vld [vmem:[%s23671_s3 + $0x498] sm:$0xf] }
 0x9bf   :  { %v13549_v12 = vld [vmem:[%s23671_s3 + $0x1570] sm:$0xf0]  ;;  %9166 = vmatmul.bf16.vlgmr.msra.gmra.mxu2 %v17423_v2 }
 0x9c0   :  { %v16013_v29 = vld [vmem:[%s23671_s3 + $0x1794] sm:$0xf]  ;;  %9197 = vmatpush.bf16.msrb.mxu2 %v13872_v60  ;;  %v13552_v19 = vor.u32 %v15941_v0, %v13549_v12  ;;  %v11412_v0 = vor.u32 %v15410_v31, %v11411_v47  ;;  %v9000_v12 = vpop.f32.mrf.mxu1  ;;  %v15634_v47 = vld [vmem:[%s23671_s3 + $0xbb4] sm:$0xf0] }
 0x9c1   :  { %v13837_v23 = vld [vmem:[%s23671_s3 + $0x17b0] sm:$0xf0]  ;;  %v12275_v12 = vld [vmem:[%s23671_s3 + $0xb58] sm:$0xf] }
 0x9c2   :  { %v13840_v50 = vor.u32 %v16013_v29, %v13837_v23  ;;  %v15933_v16 = vld [vmem:[%s23671_s3 + $0x1514] sm:$0xf]  ;;  %9289 = vmatpush.bf16.msrb.mxu3 %v11540_v61  ;;  %9186 = vmatpush.bf16.msra.mxu1 %v13552_v19  ;;  %v11379_v29 = vld [vmem:[%s23671_s3 + $0x458] sm:$0xf]  ;;  %v21754_v61 = vpop.f32.mrf.mxu3 }
 0x9c3   :  { %v13517_v9 = vld [vmem:[%s23671_s3 + $0x1530] sm:$0xf0]  ;;  %v15402_v23 = vld [vmem:[%s23671_s3 + $0x474] sm:$0xf0] }
 0x9c4   :  { %v16005_v25 = vld [vmem:[%s23671_s3 + $0x1754] sm:$0xf]  ;;  %9198 = vmatpush.bf16.msrb.mxu2 %v13840_v50  ;;  %v13520_v49 = vor.u32 %v15933_v16, %v13517_v9  ;;  %v9011_v50 = vpop.f32.mrf.mxu2 }
 0x9c5   :  { %v13805_v5 = vld [vmem:[%s23671_s3 + $0x1770] sm:$0xf0] }
 0x9c6   :  { %v13808_v11 = vor.u32 %v16005_v25, %v13805_v5  ;;  %v15925_v24 = vld [vmem:[%s23671_s3 + $0x14d4] sm:$0xf]  ;;  %9290 = vmatpush.bf16.msrb.mxu3 %v11508_v39  ;;  %9187 = vmatpush.bf16.msra.mxu1 %v13520_v49  ;;  %v9012_v5 = vadd.f32 %v9011_v50, %v8999_v22  ;;  %v11380_v39 = vor.u32 %v15402_v23, %v11379_v29  ;;  %v11347_v49 = vld [vmem:[%s23671_s3 + $0x418] sm:$0xf] }
 0x9c7   :  { %v13485_v55 = vld [vmem:[%s23671_s3 + $0x14f0] sm:$0xf0]  ;;  %v15626_v29 = vld [vmem:[%s23671_s3 + $0xb74] sm:$0xf0] }
 0x9c8   :  { %v15997_v40 = vld [vmem:[%s23671_s3 + $0x1714] sm:$0xf]  ;;  %9199 = vmatpush.bf16.msrb.mxu2 %v13808_v11  ;;  %v13488_v21 = vor.u32 %v15925_v24, %v13485_v55  ;;  %v15394_v11 = vld [vmem:[%s23671_s3 + $0x434] sm:$0xf0] }
 0x9c9   :  { %v13773_v10 = vld [vmem:[%s23671_s3 + $0x1730] sm:$0xf0] }
 0x9ca   :  { %v13776_v44 = vor.u32 %v15997_v40, %v13773_v10  ;;  %v15917_v6 = vld [vmem:[%s23671_s3 + $0x1494] sm:$0xf]  ;;  %9291 = vmatpush.bf16.msrb.mxu3 %v11476_v56  ;;  %9188 = vmatpush.bf16.msra.mxu1 %v13488_v21  ;;  %v12339_v40 = vld [vmem:[%s23671_s3 + $0xbd8] sm:$0xf]  ;;  %v9025_v56 = vadd.f32 %v21454_v1, %v9012_v5  ;;  %v11348_v21 = vor.u32 %v15394_v11, %v11347_v49 }
 0x9cb   :  { %v13453_v17 = vld [vmem:[%s23671_s3 + $0x14b0] sm:$0xf0]  ;;  %v15642_v10 = vld [vmem:[%s23671_s3 + $0xbf4] sm:$0xf0] }
 0x9cc   :  { %v15989_v38 = vld [vmem:[%s23671_s3 + $0x16d4] sm:$0xf]  ;;  %9200 = vmatpush.bf16.msrb.mxu2 %v13776_v44  ;;  %v13456_v14 = vor.u32 %v15917_v6, %v13453_v17  ;;  %v12340_v17 = vor.u32 %v15642_v10, %v12339_v40  ;;  %v9013_v31 = vpop.f32.mrf.mxu2  ;;  %v15618_v5 = vld [vmem:[%s23671_s3 + $0xb34] sm:$0xf0]  ;;  %v9037_v40 = vpop.f32.mrf.mxu1 }
 0x9cd   :  { %v13741_v37 = vld [vmem:[%s23671_s3 + $0x16f0] sm:$0xf0]  ;;  %v12211_v10 = vld [vmem:[%s23671_s3 + $0xad8] sm:$0xf] }
 0x9ce   :  { %v13744_v34 = vor.u32 %v15989_v38, %v13741_v37  ;;  %v15909_v41 = vld [vmem:[%s23671_s3 + $0x1454] sm:$0xf]  ;;  %9292 = vmatpush.bf16.msrb.mxu3 %v11444_v20  ;;  %9189 = vmatpush.bf16.msra.mxu1 %v13456_v14  ;;  %v9104_v38 = vpop.f32.mrf.mxu3  ;;  %v12307_v20 = vld [vmem:[%s23671_s3 + $0xb98] sm:$0xf] }
 0x9cf   :  { %v13421_v58 = vld [vmem:[%s23671_s3 + $0x1470] sm:$0xf0]  ;;  %v15602_v38 = vld [vmem:[%s23671_s3 + $0xab4] sm:$0xf0] }
 0x9d0   :  { %v15981_v42 = vld [vmem:[%s23671_s3 + $0x1694] sm:$0xf]  ;;  %9201 = vmatpush.bf16.msrb.mxu2 %v13744_v34  ;;  %v13424_v32 = vor.u32 %v15909_v41, %v13421_v58 }
 0x9d1   :  { %v13709_v60 = vld [vmem:[%s23671_s3 + $0x16b0] sm:$0xf0] }
 0x9d2   :  { %v13712_v33 = vor.u32 %v15981_v42, %v13709_v60  ;;  %v15901_v19 = vld [vmem:[%s23671_s3 + $0x1414] sm:$0xf]  ;;  %9293 = vmatpush.bf16.msrb.mxu3 %v11412_v0  ;;  %9190 = vmatpush.bf16.msra.mxu1 %v13424_v32  ;;  %v12308_v0 = vor.u32 %v15634_v47, %v12307_v20 }
 0x9d3   :  { %v13389_v16 = vld [vmem:[%s23671_s3 + $0x1430] sm:$0xf0] }
 0x9d4   :  { %v15973_v9 = vld [vmem:[%s23671_s3 + $0x1654] sm:$0xf]  ;;  %9202 = vmatpush.bf16.msrb.mxu2 %v13712_v33  ;;  %v13392_v24 = vor.u32 %v15901_v19, %v13389_v16 }
 0x9d5   :  { %v13677_v25 = vld [vmem:[%s23671_s3 + $0x1670] sm:$0xf0] }
 0x9d6   :  { %v16149_v54 = vld [vmem:[%s23671_s3 + $0x1bd4] sm:$0xf]  ;;  %v13680_v55 = vor.u32 %v15973_v9, %v13677_v25  ;;  %9294 = vmatpush.bf16.msrb.mxu3 %v11380_v39  ;;  %9191 = vmatpush.bf16.msra.mxu1 %v13392_v24  ;;  %v12276_v9 = vor.u32 %v15626_v29, %v12275_v12  ;;  %v12243_v25 = vld [vmem:[%s23671_s3 + $0xb18] sm:$0xf] }
 0x9d7   :  { %v14381_v43 = vld [vmem:[%s23671_s3 + $0x1bf0] sm:$0xf0] }
 0x9d8   :  { %v14384_v48 = vor.u32 %v16149_v54, %v14381_v43  ;;  %v15965_v52 = vld [vmem:[%s23671_s3 + $0x1614] sm:$0xf]  ;;  %9203 = vmatpush.bf16.msrb.mxu2 %v13680_v55  ;;  %v12244_v55 = vor.u32 %v15618_v5, %v12243_v25  ;;  %v11059_v25 = vld [vmem:[%s23671_s3 + $0x1d8] sm:$0xf] }
 0x9d9   :  { %v13645_v59 = vld [vmem:[%s23671_s3 + $0x1630] sm:$0xf0]  ;;  %9192 = vmatmul.bf16.vlgmr.msra.gmra.mxu1 %v17525_v7  ;;  %v15322_v5 = vld [vmem:[%s23671_s3 + $0x1f4] sm:$0xf0] }
 0x9da   :  { %v16141_v22 = vld [vmem:[%s23671_s3 + $0x1b94] sm:$0xf]  ;;  %v13648_v37 = vor.u32 %v15965_v52, %v13645_v59  ;;  %9223 = vmatpush.bf16.msrb.mxu1 %v14384_v48  ;;  %9295 = vmatpush.bf16.msrb.mxu3 %v11348_v21  ;;  %v15610_v48 = vld [vmem:[%s23671_s3 + $0xaf4] sm:$0xf0]  ;;  %v9038_v52 = vadd.f32 %v9037_v40, %v9025_v56 }
 0x9db   :  { %v14349_v44 = vld [vmem:[%s23671_s3 + $0x1bb0] sm:$0xf0] }
 0x9dc   :  { %v16213_v1 = vld [vmem:[%s23671_s3 + $0x1dd4] sm:$0xf]  ;;  %v14352_v14 = vor.u32 %v16141_v22, %v14349_v44  ;;  %9204 = vmatpush.bf16.msrb.mxu2 %v13648_v37 }
 0x9dd   :  { %v14637_v6 = vld [vmem:[%s23671_s3 + $0x1df0] sm:$0xf0]  ;;  %9296 = vmatmul.bf16.vlgmr.msrb.gmra.mxu3 %v16828_v13 }
 0x9de   :  { %v14640_v34 = vor.u32 %v16213_v1, %v14637_v6  ;;  %v16133_v41 = vld [vmem:[%s23671_s3 + $0x1b54] sm:$0xf]  ;;  %9327 = vmatpush.bf16.msra.mxu3 %v12340_v17  ;;  %9224 = vmatpush.bf16.msrb.mxu1 %v14352_v14  ;;  %v12212_v6 = vor.u32 %v15610_v48, %v12211_v10  ;;  %v12179_v17 = vld [vmem:[%s23671_s3 + $0xa98] sm:$0xf] }
 0x9df   :  { %v14317_v58 = vld [vmem:[%s23671_s3 + $0x1b70] sm:$0xf0]  ;;  %9205 = vmatmul.bf16.vlgmr.msrb.gmra.mxu2 %v17538_v63  ;;  %v11027_v48 = vld [vmem:[%s23671_s3 + $0x198] sm:$0xf] }
 0x9e0   :  { %v16205_v42 = vld [vmem:[%s23671_s3 + $0x1d94] sm:$0xf]  ;;  %9236 = vmatpush.bf16.msra.mxu2 %v14640_v34  ;;  %v14320_v23 = vor.u32 %v16133_v41, %v14317_v58  ;;  %v12180_v41 = vor.u32 %v15602_v38, %v12179_v17  ;;  %v9039_v58 = vpop.f32.mrf.mxu1  ;;  %v15826_v17 = vld [vmem:[%s23671_s3 + $0x11b4] sm:$0xf0] }
 0x9e1   :  { %v14605_v60 = vld [vmem:[%s23671_s3 + $0x1db0] sm:$0xf0]  ;;  %v13043_v58 = vld [vmem:[%s23671_s3 + $0x1158] sm:$0xf] }
 0x9e2   :  { %v14608_v32 = vor.u32 %v16205_v42, %v14605_v60  ;;  %v16125_v33 = vld [vmem:[%s23671_s3 + $0x1b14] sm:$0xf]  ;;  %9328 = vmatpush.bf16.msra.mxu3 %v12308_v0  ;;  %9225 = vmatpush.bf16.msrb.mxu1 %v14320_v23  ;;  %v12147_v42 = vld [vmem:[%s23671_s3 + $0xa58] sm:$0xf]  ;;  %v21904_v0 = vpop.f32.mrf.mxu3 }
 0x9e3   :  { %v14285_v19 = vld [vmem:[%s23671_s3 + $0x1b30] sm:$0xf0]  ;;  %v15594_v60 = vld [vmem:[%s23671_s3 + $0xa74] sm:$0xf0] }
 0x9e4   :  { %v16197_v50 = vld [vmem:[%s23671_s3 + $0x1d54] sm:$0xf]  ;;  %9237 = vmatpush.bf16.msra.mxu2 %v14608_v32  ;;  %v14288_v39 = vor.u32 %v16125_v33, %v14285_v19  ;;  %v9050_v32 = vpop.f32.mrf.mxu2 }
 0x9e5   :  { %v14573_v16 = vld [vmem:[%s23671_s3 + $0x1d70] sm:$0xf0] }
 0x9e6   :  { %v14576_v54 = vor.u32 %v16197_v50, %v14573_v16  ;;  %v16117_v43 = vld [vmem:[%s23671_s3 + $0x1ad4] sm:$0xf]  ;;  %9329 = vmatpush.bf16.msra.mxu3 %v12276_v9  ;;  %9226 = vmatpush.bf16.msrb.mxu1 %v14288_v39  ;;  %v21918_v16 = vadd.f32 %v9050_v32, %v9038_v52  ;;  %v12148_v9 = vor.u32 %v15594_v60, %v12147_v42  ;;  %v12115_v39 = vld [vmem:[%s23671_s3 + $0xa18] sm:$0xf] }
 0x9e7   :  { %v14253_v49 = vld [vmem:[%s23671_s3 + $0x1af0] sm:$0xf0]  ;;  %v15818_v42 = vld [vmem:[%s23671_s3 + $0x1174] sm:$0xf0] }
 0x9e8   :  { %v16189_v11 = vld [vmem:[%s23671_s3 + $0x1d14] sm:$0xf]  ;;  %9238 = vmatpush.bf16.msra.mxu2 %v14576_v54  ;;  %v14256_v59 = vor.u32 %v16117_v43, %v14253_v49  ;;  %v15586_v54 = vld [vmem:[%s23671_s3 + $0xa34] sm:$0xf0] }
 0x9e9   :  { %v14541_v24 = vld [vmem:[%s23671_s3 + $0x1d30] sm:$0xf0]  ;;  %v12116_v52 = vor.u32 %v15586_v54, %v12115_v39  ;;  %v11251_v32 = vld [vmem:[%s23671_s3 + $0x358] sm:$0xf] }
 0x9ea   :  { %v14544_v22 = vor.u32 %v16189_v11, %v14541_v24  ;;  %v16109_v21 = vld [vmem:[%s23671_s3 + $0x1a94] sm:$0xf]  ;;  %9330 = vmatpush.bf16.msra.mxu3 %v12244_v55  ;;  %9227 = vmatpush.bf16.msrb.mxu1 %v14256_v59  ;;  %v13107_v11 = vld [vmem:[%s23671_s3 + $0x11d8] sm:$0xf]  ;;  %v11060_v55 = vor.u32 %v15322_v5, %v11059_v25 }
 0x9eb   :  { %v14221_v44 = vld [vmem:[%s23671_s3 + $0x1ab0] sm:$0xf0]  ;;  %v15834_v24 = vld [vmem:[%s23671_s3 + $0x11f4] sm:$0xf0] }
 0x9ec   :  { %v16181_v1 = vld [vmem:[%s23671_s3 + $0x1cd4] sm:$0xf]  ;;  %9239 = vmatpush.bf16.msra.mxu2 %v14544_v22  ;;  %v14224_v37 = vor.u32 %v16109_v21, %v14221_v44  ;;  %v15314_v59 = vld [vmem:[%s23671_s3 + $0x1b4] sm:$0xf0]  ;;  %v13108_v44 = vor.u32 %v15834_v24, %v13107_v11  ;;  %v9052_v38 = vpop.f32.mrf.mxu2 }
 0x9ed   :  { %v14509_v56 = vld [vmem:[%s23671_s3 + $0x1cf0] sm:$0xf0]  ;;  %v11315_v22 = vld [vmem:[%s23671_s3 + $0x3d8] sm:$0xf] }
 0x9ee   :  { %v14512_v20 = vor.u32 %v16181_v1, %v14509_v56  ;;  %v16101_v47 = vld [vmem:[%s23671_s3 + $0x1a54] sm:$0xf]  ;;  %9331 = vmatpush.bf16.msra.mxu3 %v12212_v6  ;;  %9228 = vmatpush.bf16.msrb.mxu1 %v14224_v37  ;;  %v15386_v21 = vld [vmem:[%s23671_s3 + $0x3f4] sm:$0xf0]  ;;  %v9143_v1 = vpop.f32.mrf.mxu3  ;;  %v11028_v37 = vor.u32 %v15314_v59, %v11027_v48 }
 0x9ef   :  { %v14189_v31 = vld [vmem:[%s23671_s3 + $0x1a70] sm:$0xf0]  ;;  %v13075_v6 = vld [vmem:[%s23671_s3 + $0x1198] sm:$0xf] }
 0x9f0   :  { %v16173_v14 = vld [vmem:[%s23671_s3 + $0x1c94] sm:$0xf]  ;;  %9240 = vmatpush.bf16.msra.mxu2 %v14512_v20  ;;  %v14192_v12 = vor.u32 %v16101_v47, %v14189_v31  ;;  %v11316_v20 = vor.u32 %v15386_v21, %v11315_v22  ;;  %v10995_v47 = vld [vmem:[%s23671_s3 + $0x158] sm:$0xf] }
 0x9f1   :  { %v14477_v34 = vld [vmem:[%s23671_s3 + $0x1cb0] sm:$0xf0]  ;;  %v15306_v31 = vld [vmem:[%s23671_s3 + $0x174] sm:$0xf0] }
 0x9f2   :  { %v14480_v29 = vor.u32 %v16173_v14, %v14477_v34  ;;  %v16093_v23 = vld [vmem:[%s23671_s3 + $0x1a14] sm:$0xf]  ;;  %9332 = vmatpush.bf16.msra.mxu3 %v12180_v41  ;;  %9229 = vmatpush.bf16.msrb.mxu1 %v14192_v12  ;;  %v11283_v14 = vld [vmem:[%s23671_s3 + $0x398] sm:$0xf]  ;;  %v13076_v41 = vor.u32 %v15826_v17, %v13075_v6  ;;  %v10996_v60 = vor.u32 %v15306_v31, %v10995_v47 }
 0x9f3   :  { %v14157_v33 = vld [vmem:[%s23671_s3 + $0x1a30] sm:$0xf0]  ;;  %v15378_v34 = vld [vmem:[%s23671_s3 + $0x3b4] sm:$0xf0] }
 0x9f4   :  { %v16165_v19 = vld [vmem:[%s23671_s3 + $0x1c54] sm:$0xf]  ;;  %9241 = vmatpush.bf16.msra.mxu2 %v14480_v29  ;;  %v14160_v43 = vor.u32 %v16093_v23, %v14157_v33  ;;  %v11284_v12 = vor.u32 %v15378_v34, %v11283_v14  ;;  %v10963_v29 = vld [vmem:[%s23671_s3 + $0x118] sm:$0xf] }
 0x9f5   :  { %v14445_v50 = vld [vmem:[%s23671_s3 + $0x1c70] sm:$0xf0]  ;;  %v15298_v23 = vld [vmem:[%s23671_s3 + $0x134] sm:$0xf0] }
 0x9f6   :  { %v14448_v49 = vor.u32 %v16165_v19, %v14445_v50  ;;  %v16157_v40 = vld [vmem:[%s23671_s3 + $0x1c14] sm:$0xf]  ;;  %9333 = vmatpush.bf16.msra.mxu3 %v12148_v9  ;;  %9230 = vmatpush.bf16.msrb.mxu1 %v14160_v43  ;;  %v15370_v33 = vld [vmem:[%s23671_s3 + $0x374] sm:$0xf0]  ;;  %v16357_v19 = vld [vmem:[%s23672_s4] sm:$0xff]  ;;  %v13044_v9 = vor.u32 %v15818_v42, %v13043_v58  ;;  %v10964_v39 = vor.u32 %v15298_v23, %v10963_v29 }
 0x9f7   :  { %v14413_v10 = vld [vmem:[%s23671_s3 + $0x1c30] sm:$0xf0]  ;;  %v2883_v50 = vperm.slane %v16357_v19, 5  ;;  %v13011_v25 = vld [vmem:[%s23671_s3 + $0x1118] sm:$0xf]  ;;  %v11252_v54 = vor.u32 %v15370_v33, %v11251_v32  ;;  %v9089_v33 = vpop.f32.mrf.mxu2 }
 0x9f8   :  { %9242 = vmatpush.bf16.msra.mxu2 %v14448_v49  ;;  %v14416_v56 = vor.u32 %v16157_v40, %v14413_v10  ;;  %v15810_v5 = vld [vmem:[%s23671_s3 + $0x1134] sm:$0xf0]  ;;  %v9076_v10 = vpop.f32.mrf.mxu1 }
 0x9f9   :  { %9231 = vmatmul.bf16.vlgmr.msrb.gmra.mxu1 %v18039_v51  ;;  %v10931_v43 = vld [vmem:[%s23671_s3 + $0xd8] sm:$0xf]  ;;  %v13012_v40 = vor.u32 %v15810_v5, %v13011_v25 }
 0x9fa   :  { %9262 = vmatpush.bf16.msra.mxu1 %v11060_v55  ;;  %9334 = vmatpush.bf16.msra.mxu3 %v12116_v52  ;;  %v15290_v49 = vld [vmem:[%s23671_s3 + $0xf4] sm:$0xf0]  ;;  %v9064_v55 = vadd.f32 %v21604_v30, %v2883_v50 }
 0x9fb   :  { %v11219_v11 = vld [vmem:[%s23671_s3 + $0x318] sm:$0xf]  ;;  %v10932_v22 = vor.u32 %v15290_v49, %v10931_v43 }
 0x9fc   :  { %9243 = vmatpush.bf16.msra.mxu2 %v14416_v56  ;;  %v15362_v24 = vld [vmem:[%s23671_s3 + $0x334] sm:$0xf0]  ;;  %v9077_v59 = vadd.f32 %v9076_v10, %v9064_v55 }
 0x9fd   :  { %9335 = vmatmul.bf16.vlgmr.msra.gmra.mxu3 %v17147_v15  ;;  %v12979_v48 = vld [vmem:[%s23671_s3 + $0x10d8] sm:$0xf]  ;;  %v11220_v21 = vor.u32 %v15362_v24, %v11219_v11 }
 0x9fe   :  { %9366 = vmatpush.bf16.msrb.mxu3 %v13108_v44  ;;  %9263 = vmatpush.bf16.msra.mxu1 %v11028_v37  ;;  %v15802_v52 = vld [vmem:[%s23671_s3 + $0x10f4] sm:$0xf0]  ;;  %v9090_v25 = vadd.f32 %v9089_v33, %v9077_v59 }
 0x9ff   :  { %9244 = vmatmul.bf16.vlgmr.msra.gmra.mxu2 %v17812_v46  ;;  %v10899_v30 = vld [vmem:[%s23671_s3 + $0x98] sm:$0xf]  ;;  %v12980_v6 = vor.u32 %v15802_v52, %v12979_v48 }
 0xa00   :  { %9275 = vmatpush.bf16.msrb.mxu2 %v11316_v20  ;;  %v15282_v44 = vld [vmem:[%s23671_s3 + $0xb4] sm:$0xf0]  ;;  %v9078_v58 = vpop.f32.mrf.mxu1  ;;  %v9103_v10 = vadd.f32 %v21754_v61, %v9090_v25 }
 0xa01   :  { %v11187_v1 = vld [vmem:[%s23671_s3 + $0x2d8] sm:$0xf]  ;;  %v10900_v37 = vor.u32 %v15282_v44, %v10899_v30 }
 0xa02   :  { %9367 = vmatpush.bf16.msrb.mxu3 %v13076_v41  ;;  %9264 = vmatpush.bf16.msra.mxu1 %v10996_v60  ;;  %v15354_v56 = vld [vmem:[%s23671_s3 + $0x2f4] sm:$0xf0] }
 0xa03   :  { %v12947_v17 = vld [vmem:[%s23671_s3 + $0x1098] sm:$0xf]  ;;  %v11188_v20 = vor.u32 %v15354_v56, %v11187_v1 }
 0xa04   :  { %9276 = vmatpush.bf16.msrb.mxu2 %v11284_v12  ;;  %v15794_v38 = vld [vmem:[%s23671_s3 + $0x10b4] sm:$0xf0]  ;;  %v22059_v12 = vpop.f32.mrf.mxu3 }
 0xa05   :  { %v10867_v47 = vld [vmem:[%s23671_s3 + $0x58] sm:$0xf]  ;;  %v12948_v41 = vor.u32 %v15794_v38, %v12947_v17 }
 0xa06   :  { %9368 = vmatpush.bf16.msrb.mxu3 %v13044_v9  ;;  %9265 = vmatpush.bf16.msra.mxu1 %v10964_v39  ;;  %v15274_v31 = vld [vmem:[%s23671_s3 + $0x74] sm:$0xf0] }
 0xa07   :  { %v11155_v14 = vld [vmem:[%s23671_s3 + $0x298] sm:$0xf]  ;;  %v10868_v29 = vor.u32 %v15274_v31, %v10867_v47 }
 0xa08   :  { %9277 = vmatpush.bf16.msrb.mxu2 %v11252_v54  ;;  %v15346_v34 = vld [vmem:[%s23671_s3 + $0x2b4] sm:$0xf0] }
 0xa09   :  { %v12915_v42 = vld [vmem:[%s23671_s3 + $0x1058] sm:$0xf]  ;;  %v11156_v23 = vor.u32 %v15346_v34, %v11155_v14 }
 0xa0a   :  { %9369 = vmatpush.bf16.msrb.mxu3 %v13012_v40  ;;  %9266 = vmatpush.bf16.msra.mxu1 %v10932_v22  ;;  %v15786_v60 = vld [vmem:[%s23671_s3 + $0x1074] sm:$0xf0] }
 0xa0b   :  { %v10835_v32 = vld [vmem:[%s23671_s3 + $0x18] sm:$0xf]  ;;  %v12916_v5 = vor.u32 %v15786_v60, %v12915_v42 }
 0xa0c   :  { %9278 = vmatpush.bf16.msrb.mxu2 %v11220_v21  ;;  %v15266_v19 = vld [vmem:[%s23671_s3 + $0x34] sm:$0xf0]  ;;  %v9182_v56 = vpop.f32.mrf.mxu3 }
 0xa0d   :  { %v11123_v50 = vld [vmem:[%s23671_s3 + $0x258] sm:$0xf]  ;;  %v10836_v11 = vor.u32 %v15266_v19, %v10835_v32 }
 0xa0e   :  { %9370 = vmatpush.bf16.msrb.mxu3 %v12980_v6  ;;  %9267 = vmatpush.bf16.msra.mxu1 %v10900_v37  ;;  %v15338_v9 = vld [vmem:[%s23671_s3 + $0x274] sm:$0xf0]  ;;  %v9091_v37 = vpop.f32.mrf.mxu2 }
 0xa0f   :  { %v11827_v39 = vld [vmem:[%s23671_s3 + $0x7d8] sm:$0xf]  ;;  %v11124_v24 = vor.u32 %v15338_v9, %v11123_v50 }
 0xa10   :  { %9279 = vmatpush.bf16.msrb.mxu2 %v11188_v20  ;;  %v15514_v54 = vld [vmem:[%s23671_s3 + $0x7f4] sm:$0xf0] }
 0xa11   :  { %v12883_v43 = vld [vmem:[%s23671_s3 + $0x1018] sm:$0xf]  ;;  %v11828_v48 = vor.u32 %v15514_v54, %v11827_v39 }
 0xa12   :  { %9371 = vmatpush.bf16.msrb.mxu3 %v12948_v41  ;;  %v15778_v49 = vld [vmem:[%s23671_s3 + $0x1034] sm:$0xf0]  ;;  %9268 = vmatpush.bf16.msra.mxu1 %v10868_v29 }
 0xa13   :  { %v13875_v55 = vld [vmem:[%s23671_s3 + $0x17d8] sm:$0xf]  ;;  %v12884_v21 = vor.u32 %v15778_v49, %v12883_v43 }
 0xa14   :  { %9280 = vmatpush.bf16.msrb.mxu2 %v11156_v23  ;;  %v16026_v40 = vld [vmem:[%s23671_s3 + $0x17f4] sm:$0xf0] }
 0xa15   :  { %v11091_v52 = vld [vmem:[%s23671_s3 + $0x218] sm:$0xf]  ;;  %v13876_v1 = vor.u32 %v16026_v40, %v13875_v55  ;;  %v9115_v40 = vpop.f32.mrf.mxu1 }
 0xa16   :  { %v15330_v59 = vld [vmem:[%s23671_s3 + $0x234] sm:$0xf0]  ;;  %9372 = vmatpush.bf16.msrb.mxu3 %v12916_v5  ;;  %9269 = vmatpush.bf16.msra.mxu1 %v10836_v11 }
 0xa17   :  { %v11795_v22 = vld [vmem:[%s23671_s3 + $0x798] sm:$0xf]  ;;  %v11092_v6 = vor.u32 %v15330_v59, %v11091_v52  ;;  %v9116_v59 = vadd.f32 %v9115_v40, %v9103_v10 }
 0xa18   :  { %v15506_v30 = vld [vmem:[%s23671_s3 + $0x7b4] sm:$0xf0]  ;;  %9281 = vmatpush.bf16.msrb.mxu2 %v11124_v24 }
 0xa19   :  { %v12083_v61 = vld [vmem:[%s23671_s3 + $0x9d8] sm:$0xf]  ;;  %v11796_v20 = vor.u32 %v15506_v30, %v11795_v22  ;;  %9270 = vmatmul.bf16.vlgmr.msra.gmra.mxu1 %v16722_v3 }
 0xa1a   :  { %v15578_v44 = vld [vmem:[%s23671_s3 + $0x9f4] sm:$0xf0]  ;;  %9301 = vmatpush.bf16.msrb.mxu1 %v11828_v48  ;;  %9373 = vmatpush.bf16.msrb.mxu3 %v12884_v21 }
 0xa1b   :  { %v13843_v17 = vld [vmem:[%s23671_s3 + $0x1798] sm:$0xf]  ;;  %v12084_v47 = vor.u32 %v15578_v44, %v12083_v61 }
 0xa1c   :  { %v16018_v38 = vld [vmem:[%s23671_s3 + $0x17b4] sm:$0xf0]  ;;  %9282 = vmatpush.bf16.msrb.mxu2 %v11092_v6 }
 0xa1d   :  { %v11763_v31 = vld [vmem:[%s23671_s3 + $0x758] sm:$0xf]  ;;  %v13844_v58 = vor.u32 %v16018_v38, %v13843_v17  ;;  %9374 = vmatmul.bf16.vlgmr.msrb.gmra.mxu3 %v17423_v2 }
 0xa1e   :  { %v15498_v14 = vld [vmem:[%s23671_s3 + $0x774] sm:$0xf0]  ;;  %9405 = vmatpush.bf16.msra.mxu3 %v13876_v1  ;;  %9302 = vmatpush.bf16.msrb.mxu1 %v11796_v20 }
 0xa1f   :  { %v12051_v34 = vld [vmem:[%s23671_s3 + $0x998] sm:$0xf]  ;;  %v11764_v29 = vor.u32 %v15498_v14, %v11763_v31  ;;  %9283 = vmatmul.bf16.vlgmr.msrb.gmra.mxu2 %v16790_v45 }
 0xa20   :  { %v15570_v41 = vld [vmem:[%s23671_s3 + $0x9b4] sm:$0xf0]  ;;  %9314 = vmatpush.bf16.msra.mxu2 %v12084_v47 }
 0xa21   :  { %v13811_v42 = vld [vmem:[%s23671_s3 + $0x1758] sm:$0xf]  ;;  %v12052_v23 = vor.u32 %v15570_v41, %v12051_v34  ;;  %v9117_v34 = vpop.f32.mrf.mxu1 }
 0xa22   :  { %v16010_v60 = vld [vmem:[%s23671_s3 + $0x1774] sm:$0xf0]  ;;  %9406 = vmatpush.bf16.msra.mxu3 %v13844_v58  ;;  %9303 = vmatpush.bf16.msrb.mxu1 %v11764_v29 }
 0xa23   :  { %v11731_v32 = vld [vmem:[%s23671_s3 + $0x718] sm:$0xf]  ;;  %v13812_v9 = vor.u32 %v16010_v60, %v13811_v42  ;;  %v22209_v42 = vpop.f32.mrf.mxu3 }
 0xa24   :  { %v15490_v33 = vld [vmem:[%s23671_s3 + $0x734] sm:$0xf0]  ;;  %9315 = vmatpush.bf16.msra.mxu2 %v12052_v23 }
 0xa25   :  { %v12019_v19 = vld [vmem:[%s23671_s3 + $0x958] sm:$0xf]  ;;  %v11732_v39 = vor.u32 %v15490_v33, %v11731_v32  ;;  %v9128_v32 = vpop.f32.mrf.mxu2 }
 0xa26   :  { %v15562_v50 = vld [vmem:[%s23671_s3 + $0x974] sm:$0xf0]  ;;  %9407 = vmatpush.bf16.msra.mxu3 %v13812_v9  ;;  %v9129_v9 = vadd.f32 %v9128_v32, %v9116_v59 }
 0xa27   :  { %v13779_v25 = vld [vmem:[%s23671_s3 + $0x1718] sm:$0xf]  ;;  %v12020_v54 = vor.u32 %v15562_v50, %v12019_v19  ;;  %9304 = vmatpush.bf16.msrb.mxu1 %v11732_v39 }
 0xa28   :  { %v16002_v5 = vld [vmem:[%s23671_s3 + $0x1734] sm:$0xf0]  ;;  %v9142_v40 = vadd.f32 %v21904_v0, %v9129_v9 }
 0xa29   :  { %v11699_v43 = vld [vmem:[%s23671_s3 + $0x6d8] sm:$0xf]  ;;  %v13780_v55 = vor.u32 %v16002_v5, %v13779_v25  ;;  %9316 = vmatpush.bf16.msra.mxu2 %v12020_v54 }
 0xa2a   :  { %v15482_v49 = vld [vmem:[%s23671_s3 + $0x6f4] sm:$0xf0] }
 0xa2b   :  { %v11987_v11 = vld [vmem:[%s23671_s3 + $0x918] sm:$0xf]  ;;  %v11700_v22 = vor.u32 %v15482_v49, %v11699_v43  ;;  %9408 = vmatpush.bf16.msra.mxu3 %v13780_v55 }
 0xa2c   :  { %v15554_v24 = vld [vmem:[%s23671_s3 + $0x934] sm:$0xf0] }
 0xa2d   :  { %v13747_v48 = vld [vmem:[%s23671_s3 + $0x16d8] sm:$0xf]  ;;  %v11988_v21 = vor.u32 %v15554_v24, %v11987_v11  ;;  %9305 = vmatpush.bf16.msrb.mxu1 %v11700_v22 }
 0xa2e   :  { %v15994_v52 = vld [vmem:[%s23671_s3 + $0x16f4] sm:$0xf0] }
 0xa2f   :  { %v11667_v30 = vld [vmem:[%s23671_s3 + $0x698] sm:$0xf]  ;;  %v13748_v1 = vor.u32 %v15994_v52, %v13747_v48  ;;  %9317 = vmatpush.bf16.msra.mxu2 %v11988_v21 }
 0xa30   :  { %v15474_v61 = vld [vmem:[%s23671_s3 + $0x6b4] sm:$0xf0] }
 0xa31   :  { %v11955_v44 = vld [vmem:[%s23671_s3 + $0x8d8] sm:$0xf]  ;;  %v11668_v17 = vor.u32 %v15474_v61, %v11667_v30  ;;  %9409 = vmatpush.bf16.msra.mxu3 %v13748_v1 }
 0xa32   :  { %v15546_v10 = vld [vmem:[%s23671_s3 + $0x8f4] sm:$0xf0] }
 0xa33   :  { %v13715_v56 = vld [vmem:[%s23671_s3 + $0x1698] sm:$0xf]  ;;  %v11956_v38 = vor.u32 %v15546_v10, %v11955_v44  ;;  %9306 = vmatpush.bf16.msrb.mxu1 %v11668_v17  ;;  %v9221_v10 = vpop.f32.mrf.mxu3  ;;  %v9130_v17 = vpop.f32.mrf.mxu2 }
 0xa34   :  { %v15986_v6 = vld [vmem:[%s23671_s3 + $0x16b4] sm:$0xf0] }
 0xa35   :  { %v11635_v37 = vld [vmem:[%s23671_s3 + $0x658] sm:$0xf]  ;;  %v13716_v14 = vor.u32 %v15986_v6, %v13715_v56  ;;  %9318 = vmatpush.bf16.msra.mxu2 %v11956_v38 }
 0xa36   :  { %v15466_v20 = vld [vmem:[%s23671_s3 + $0x674] sm:$0xf0] }
 0xa37   :  { %v11923_v47 = vld [vmem:[%s23671_s3 + $0x898] sm:$0xf]  ;;  %v11636_v60 = vor.u32 %v15466_v20, %v11635_v37  ;;  %9410 = vmatpush.bf16.msra.mxu3 %v13716_v14 }
 0xa38   :  { %v15538_v31 = vld [vmem:[%s23671_s3 + $0x8b4] sm:$0xf0] }
 0xa39   :  { %v13683_v41 = vld [vmem:[%s23671_s3 + $0x1658] sm:$0xf]  ;;  %v11924_v29 = vor.u32 %v15538_v31, %v11923_v47  ;;  %9307 = vmatpush.bf16.msrb.mxu1 %v11636_v60 }
 0xa3a   :  { %v15978_v58 = vld [vmem:[%s23671_s3 + $0x1674] sm:$0xf0] }
 0xa3b   :  { %v11603_v23 = vld [vmem:[%s23671_s3 + $0x618] sm:$0xf]  ;;  %v13684_v25 = vor.u32 %v15978_v58, %v13683_v41  ;;  %9319 = vmatpush.bf16.msra.mxu2 %v11924_v29 }
 0xa3c   :  { %v15458_v33 = vld [vmem:[%s23671_s3 + $0x634] sm:$0xf0] }
 0xa3d   :  { %v11891_v19 = vld [vmem:[%s23671_s3 + $0x858] sm:$0xf]  ;;  %v11604_v49 = vor.u32 %v15458_v33, %v11603_v23  ;;  %9411 = vmatpush.bf16.msra.mxu3 %v13684_v25 }
 0xa3e   :  { %v15530_v50 = vld [vmem:[%s23671_s3 + $0x874] sm:$0xf0] }
 0xa3f   :  { %v12595_v5 = vld [vmem:[%s23671_s3 + $0xdd8] sm:$0xf]  ;;  %v11892_v11 = vor.u32 %v15530_v50, %v11891_v19  ;;  %9308 = vmatpush.bf16.msrb.mxu1 %v11604_v49 }
 0xa40   :  { %v15706_v39 = vld [vmem:[%s23671_s3 + $0xdf4] sm:$0xf0] }
 0xa41   :  { %v13651_v54 = vld [vmem:[%s23671_s3 + $0x1618] sm:$0xf]  ;;  %v12596_v48 = vor.u32 %v15706_v39, %v12595_v5  ;;  %9320 = vmatpush.bf16.msra.mxu2 %v11892_v11 }
 0xa42   :  { %v15970_v43 = vld [vmem:[%s23671_s3 + $0x1634] sm:$0xf0]  ;;  %9309 = vmatmul.bf16.vlgmr.msrb.gmra.mxu1 %v16844_v27 }
 0xa43   :  { %v14643_v24 = vld [vmem:[%s23671_s3 + $0x1dd8] sm:$0xf]  ;;  %v13652_v21 = vor.u32 %v15970_v43, %v13651_v54  ;;  %9340 = vmatpush.bf16.msra.mxu1 %v12596_v48 }
 0xa44   :  { %v16218_v55 = vld [vmem:[%s23671_s3 + $0x1df4] sm:$0xf0] }
 0xa45   :  { %v11859_v52 = vld [vmem:[%s23671_s3 + $0x818] sm:$0xf]  ;;  %v14644_v44 = vor.u32 %v16218_v55, %v14643_v24  ;;  %9412 = vmatpush.bf16.msra.mxu3 %v13652_v21  ;;  %v9154_v55 = vpop.f32.mrf.mxu1 }
 0xa46   :  { %v15522_v59 = vld [vmem:[%s23671_s3 + $0x834] sm:$0xf0] }
 0xa47   :  { %v12563_v22 = vld [vmem:[%s23671_s3 + $0xd98] sm:$0xf]  ;;  %v11860_v1 = vor.u32 %v15522_v59, %v11859_v52  ;;  %v9155_v59 = vadd.f32 %v9154_v55, %v9142_v40 }
 0xa48   :  { %v15698_v30 = vld [vmem:[%s23671_s3 + $0xdb4] sm:$0xf0]  ;;  %9413 = vmatmul.bf16.vlgmr.msra.gmra.mxu3 %v17538_v63 }
 0xa49   :  { %v12851_v0 = vld [vmem:[%s23671_s3 + $0xfd8] sm:$0xf]  ;;  %v12564_v38 = vor.u32 %v15698_v30, %v12563_v22  ;;  %9444 = vmatpush.bf16.msrb.mxu3 %v14644_v44  ;;  %9321 = vmatpush.bf16.msra.mxu2 %v11860_v1 }
 0xa4a   :  { %v15770_v61 = vld [vmem:[%s23671_s3 + $0xff4] sm:$0xf0] }
 0xa4b   :  { %v14611_v56 = vld [vmem:[%s23671_s3 + $0x1d98] sm:$0xf]  ;;  %v12852_v37 = vor.u32 %v15770_v61, %v12851_v0  ;;  %9341 = vmatpush.bf16.msra.mxu1 %v12564_v38 }
 0xa4c   :  { %v16210_v6 = vld [vmem:[%s23671_s3 + $0x1db4] sm:$0xf0]  ;;  %9322 = vmatmul.bf16.vlgmr.msra.gmra.mxu2 %v17083_v18 }
 0xa4d   :  { %v12531_v20 = vld [vmem:[%s23671_s3 + $0xd58] sm:$0xf]  ;;  %v14612_v34 = vor.u32 %v16210_v6, %v14611_v56  ;;  %9353 = vmatpush.bf16.msrb.mxu2 %v12852_v37 }
 0xa4e   :  { %v15690_v47 = vld [vmem:[%s23671_s3 + $0xd74] sm:$0xf0] }
 0xa4f   :  { %v12819_v31 = vld [vmem:[%s23671_s3 + $0xf98] sm:$0xf]  ;;  %v12532_v60 = vor.u32 %v15690_v47, %v12531_v20  ;;  %9445 = vmatpush.bf16.msrb.mxu3 %v14612_v34 }
 0xa50   :  { %v15762_v14 = vld [vmem:[%s23671_s3 + $0xfb4] sm:$0xf0] }
 0xa51   :  { %v14579_v41 = vld [vmem:[%s23671_s3 + $0x1d58] sm:$0xf]  ;;  %v12820_v29 = vor.u32 %v15762_v14, %v12819_v31  ;;  %9342 = vmatpush.bf16.msra.mxu1 %v12532_v60  ;;  %v9156_v31 = vpop.f32.mrf.mxu1 }
 0xa52   :  { %v16202_v58 = vld [vmem:[%s23671_s3 + $0x1d74] sm:$0xf0] }
 0xa53   :  { %v12499_v23 = vld [vmem:[%s23671_s3 + $0xd18] sm:$0xf]  ;;  %v14580_v50 = vor.u32 %v16202_v58, %v14579_v41  ;;  %9354 = vmatpush.bf16.msrb.mxu2 %v12820_v29  ;;  %v22359_v41 = vpop.f32.mrf.mxu3 }
 0xa54   :  { %v15682_v32 = vld [vmem:[%s23671_s3 + $0xd34] sm:$0xf0] }
 0xa55   :  { %v12787_v33 = vld [vmem:[%s23671_s3 + $0xf58] sm:$0xf]  ;;  %v12500_v5 = vor.u32 %v15682_v32, %v12499_v23  ;;  %9446 = vmatpush.bf16.msrb.mxu3 %v14580_v50  ;;  %v9167_v23 = vpop.f32.mrf.mxu2 }
 0xa56   :  { %v15754_v19 = vld [vmem:[%s23671_s3 + $0xf74] sm:$0xf0]  ;;  %v9168_v50 = vadd.f32 %v9167_v23, %v9155_v59 }
 0xa57   :  { %v14547_v9 = vld [vmem:[%s23671_s3 + $0x1d18] sm:$0xf]  ;;  %v12788_v39 = vor.u32 %v15754_v19, %v12787_v33  ;;  %9343 = vmatpush.bf16.msra.mxu1 %v12500_v5 }
 0xa58   :  { %v16194_v25 = vld [vmem:[%s23671_s3 + $0x1d34] sm:$0xf0]  ;;  %v9181_v55 = vadd.f32 %v22059_v12, %v9168_v50  ;;  %v15358_v50 = vld [vmem:[%s23671_s3 + $0x31c] sm:$0xf] }
 0xa59   :  { %v12467_v54 = vld [vmem:[%s23671_s3 + $0xcd8] sm:$0xf]  ;;  %v14548_v24 = vor.u32 %v16194_v25, %v14547_v9  ;;  %9355 = vmatpush.bf16.msrb.mxu2 %v12788_v39 }
 0xa5a   :  { %v15674_v43 = vld [vmem:[%s23671_s3 + $0xcf4] sm:$0xf0] }
 0xa5b   :  { %v12755_v49 = vld [vmem:[%s23671_s3 + $0xf18] sm:$0xf]  ;;  %v12468_v22 = vor.u32 %v15674_v43, %v12467_v54  ;;  %9447 = vmatpush.bf16.msrb.mxu3 %v14548_v24  ;;  %v11317_v24 = vld [vmem:[%s23671_s3 + $0x3f8] sm:$0xf0] }
 0xa5c   :  { %v15746_v11 = vld [vmem:[%s23671_s3 + $0xf34] sm:$0xf0] }
 0xa5d   :  { %v14515_v48 = vld [vmem:[%s23671_s3 + $0x1cd8] sm:$0xf]  ;;  %v12756_v21 = vor.u32 %v15746_v11, %v12755_v49  ;;  %9344 = vmatpush.bf16.msra.mxu1 %v12468_v22  ;;  %v15382_v11 = vld [vmem:[%s23671_s3 + $0x3dc] sm:$0xf] }
 0xa5e   :  { %v16186_v52 = vld [vmem:[%s23671_s3 + $0x1cf4] sm:$0xf0] }
 0xa5f   :  { %v12435_v30 = vld [vmem:[%s23671_s3 + $0xc98] sm:$0xf]  ;;  %v14516_v44 = vor.u32 %v16186_v52, %v14515_v48  ;;  %9356 = vmatpush.bf16.msrb.mxu2 %v12756_v21 }
 0xa60   :  { %v15666_v0 = vld [vmem:[%s23671_s3 + $0xcb4] sm:$0xf0] }
 0xa61   :  { %v12723_v61 = vld [vmem:[%s23671_s3 + $0xed8] sm:$0xf]  ;;  %v12436_v56 = vor.u32 %v15666_v0, %v12435_v30  ;;  %9448 = vmatpush.bf16.msrb.mxu3 %v14516_v44 }
 0xa62   :  { %v15738_v40 = vld [vmem:[%s23671_s3 + $0xef4] sm:$0xf0] }
 0xa63   :  { %v14483_v10 = vld [vmem:[%s23671_s3 + $0x1c98] sm:$0xf]  ;;  %v12724_v6 = vor.u32 %v15738_v40, %v12723_v61  ;;  %9345 = vmatpush.bf16.msra.mxu1 %v12436_v56  ;;  %v11320_v61 = vor.u32 %v15382_v11, %v11317_v24  ;;  %v9260_v40 = vpop.f32.mrf.mxu3  ;;  %v9169_v56 = vpop.f32.mrf.mxu2 }
 0xa64   :  { %v16178_v1 = vld [vmem:[%s23671_s3 + $0x1cb4] sm:$0xf0]  ;;  %v9193_v24 = vpop.f32.mrf.mxu1  ;;  %v15342_v40 = vld [vmem:[%s23671_s3 + $0x29c] sm:$0xf] }
 0xa65   :  { %v12403_v17 = vld [vmem:[%s23671_s3 + $0xc58] sm:$0xf]  ;;  %v14484_v47 = vor.u32 %v16178_v1, %v14483_v10  ;;  %9357 = vmatpush.bf16.msrb.mxu2 %v12724_v6  ;;  %v15374_v10 = vld [vmem:[%s23671_s3 + $0x39c] sm:$0xf] }
 0xa66   :  { %v15658_v38 = vld [vmem:[%s23671_s3 + $0xc74] sm:$0xf0]  ;;  %v11285_v1 = vld [vmem:[%s23671_s3 + $0x3b8] sm:$0xf0] }
 0xa67   :  { %v12691_v37 = vld [vmem:[%s23671_s3 + $0xe98] sm:$0xf]  ;;  %v12404_v58 = vor.u32 %v15658_v38, %v12403_v17  ;;  %9449 = vmatpush.bf16.msrb.mxu3 %v14484_v47  ;;  %v11288_v31 = vor.u32 %v15374_v10, %v11285_v1 }
 0xa68   :  { %v15730_v20 = vld [vmem:[%s23671_s3 + $0xeb4] sm:$0xf0] }
 0xa69   :  { %v14451_v14 = vld [vmem:[%s23671_s3 + $0x1c58] sm:$0xf]  ;;  %v12692_v60 = vor.u32 %v15730_v20, %v12691_v37  ;;  %9346 = vmatpush.bf16.msra.mxu1 %v12404_v58 }
 0xa6a   :  { %v16170_v34 = vld [vmem:[%s23671_s3 + $0x1c74] sm:$0xf0] }
 0xa6b   :  { %v12371_v29 = vld [vmem:[%s23671_s3 + $0xc18] sm:$0xf]  ;;  %v14452_v9 = vor.u32 %v16170_v34, %v14451_v14  ;;  %9358 = vmatpush.bf16.msrb.mxu2 %v12692_v60  ;;  %v15366_v14 = vld [vmem:[%s23671_s3 + $0x35c] sm:$0xf] }
 0xa6c   :  { %v15650_v32 = vld [vmem:[%s23671_s3 + $0xc34] sm:$0xf0]  ;;  %v11253_v34 = vld [vmem:[%s23671_s3 + $0x378] sm:$0xf0] }
 0xa6d   :  { %v12659_v33 = vld [vmem:[%s23671_s3 + $0xe58] sm:$0xf]  ;;  %v12372_v43 = vor.u32 %v15650_v32, %v12371_v29  ;;  %9450 = vmatpush.bf16.msrb.mxu3 %v14452_v9  ;;  %v11221_v9 = vld [vmem:[%s23671_s3 + $0x338] sm:$0xf0] }
 0xa6e   :  { %v15722_v19 = vld [vmem:[%s23671_s3 + $0xe74] sm:$0xf0]  ;;  %v11224_v11 = vor.u32 %v15358_v50, %v11221_v9 }
 0xa6f   :  { %v13363_v25 = vld [vmem:[%s23671_s3 + $0x13d8] sm:$0xf]  ;;  %v12660_v49 = vor.u32 %v15722_v19, %v12659_v33  ;;  %9347 = vmatpush.bf16.msra.mxu1 %v12372_v43  ;;  %v11256_v19 = vor.u32 %v15366_v14, %v11253_v34  ;;  %v22509_v14 = vpop.f32.mrf.mxu3 }
 0xa70   :  { %v15898_v5 = vld [vmem:[%s23671_s3 + $0x13f4] sm:$0xf0] }
 0xa71   :  { %v14419_v39 = vld [vmem:[%s23671_s3 + $0x1c18] sm:$0xf]  ;;  %v13364_v48 = vor.u32 %v15898_v5, %v13363_v25  ;;  %9359 = vmatpush.bf16.msrb.mxu2 %v12660_v49 }
 0xa72   :  { %v16162_v54 = vld [vmem:[%s23671_s3 + $0x1c34] sm:$0xf0]  ;;  %9348 = vmatmul.bf16.vlgmr.msra.gmra.mxu1 %v17185_v53 }
 0xa73   :  { %v12627_v52 = vld [vmem:[%s23671_s3 + $0xe18] sm:$0xf]  ;;  %v14420_v21 = vor.u32 %v16162_v54, %v14419_v39  ;;  %9379 = vmatpush.bf16.msrb.mxu1 %v13364_v48  ;;  %v15350_v48 = vld [vmem:[%s23671_s3 + $0x2dc] sm:$0xf] }
 0xa74   :  { %v15714_v59 = vld [vmem:[%s23671_s3 + $0xe34] sm:$0xf0] }
 0xa75   :  { %v13331_v22 = vld [vmem:[%s23671_s3 + $0x1398] sm:$0xf]  ;;  %v12628_v44 = vor.u32 %v15714_v59, %v12627_v52  ;;  %9451 = vmatpush.bf16.msrb.mxu3 %v14420_v21  ;;  %v11189_v52 = vld [vmem:[%s23671_s3 + $0x2f8] sm:$0xf0]  ;;  %v9194_v59 = vadd.f32 %v9193_v24, %v9181_v55 }
 0xa76   :  { %v15890_v30 = vld [vmem:[%s23671_s3 + $0x13b4] sm:$0xf0] }
 0xa77   :  { %v13619_v12 = vld [vmem:[%s23671_s3 + $0x15d8] sm:$0xf]  ;;  %v13332_v6 = vor.u32 %v15890_v30, %v13331_v22  ;;  %9360 = vmatpush.bf16.msrb.mxu2 %v12628_v44  ;;  %v11157_v44 = vld [vmem:[%s23671_s3 + $0x2b8] sm:$0xf0] }
 0xa78   :  { %v15962_v0 = vld [vmem:[%s23671_s3 + $0x15f4] sm:$0xf0]  ;;  %9452 = vmatmul.bf16.vlgmr.msrb.gmra.mxu3 %v17812_v46 }
 0xa79   :  { %v13620_v17 = vor.u32 %v15962_v0, %v13619_v12  ;;  %v13299_v38 = vld [vmem:[%s23671_s3 + $0x1358] sm:$0xf]  ;;  %9483 = vmatpush.bf16.msra.mxu3 %v11320_v61  ;;  %9380 = vmatpush.bf16.msrb.mxu1 %v13332_v6  ;;  %v11192_v61 = vor.u32 %v15350_v48, %v11189_v52 }
 0xa7a   :  { %v15882_v37 = vld [vmem:[%s23671_s3 + $0x1374] sm:$0xf0]  ;;  %9361 = vmatmul.bf16.vlgmr.msrb.gmra.mxu2 %v17198_v8 }
 0xa7b   :  { %v13587_v20 = vld [vmem:[%s23671_s3 + $0x1598] sm:$0xf]  ;;  %9392 = vmatpush.bf16.msra.mxu2 %v13620_v17  ;;  %v13300_v58 = vor.u32 %v15882_v37, %v13299_v38  ;;  %v11160_v37 = vor.u32 %v15342_v40, %v11157_v44  ;;  %v15566_v40 = vld [vmem:[%s23671_s3 + $0x99c] sm:$0xf] }
 0xa7c   :  { %v15954_v47 = vld [vmem:[%s23671_s3 + $0x15b4] sm:$0xf0]  ;;  %v12053_v44 = vld [vmem:[%s23671_s3 + $0x9b8] sm:$0xf0] }
 0xa7d   :  { %v13588_v60 = vor.u32 %v15954_v47, %v13587_v20  ;;  %v13267_v29 = vld [vmem:[%s23671_s3 + $0x1318] sm:$0xf]  ;;  %9484 = vmatpush.bf16.msra.mxu3 %v11288_v31  ;;  %9381 = vmatpush.bf16.msrb.mxu1 %v13300_v58  ;;  %v9195_v20 = vpop.f32.mrf.mxu1  ;;  %v15334_v47 = vld [vmem:[%s23671_s3 + $0x25c] sm:$0xf] }
 0xa7e   :  { %v15874_v23 = vld [vmem:[%s23671_s3 + $0x1334] sm:$0xf0]  ;;  %v11125_v31 = vld [vmem:[%s23671_s3 + $0x278] sm:$0xf0]  ;;  %v12056_v20 = vor.u32 %v15566_v40, %v12053_v44 }
 0xa7f   :  { %v13555_v32 = vld [vmem:[%s23671_s3 + $0x1558] sm:$0xf]  ;;  %9393 = vmatpush.bf16.msra.mxu2 %v13588_v60  ;;  %v13268_v25 = vor.u32 %v15874_v23, %v13267_v29  ;;  %v9206_v29 = vpop.f32.mrf.mxu2  ;;  %v11128_v50 = vor.u32 %v15334_v47, %v11125_v31  ;;  %v15558_v47 = vld [vmem:[%s23671_s3 + $0x95c] sm:$0xf] }
 0xa80   :  { %v15946_v33 = vld [vmem:[%s23671_s3 + $0x1574] sm:$0xf0]  ;;  %v12021_v31 = vld [vmem:[%s23671_s3 + $0x978] sm:$0xf0] }
 0xa81   :  { %v13556_v5 = vor.u32 %v15946_v33, %v13555_v32  ;;  %v13235_v39 = vld [vmem:[%s23671_s3 + $0x12d8] sm:$0xf]  ;;  %9485 = vmatpush.bf16.msra.mxu3 %v11256_v19  ;;  %9382 = vmatpush.bf16.msrb.mxu1 %v13268_v25  ;;  %v9207_v19 = vadd.f32 %v9206_v29, %v9194_v59 }
 0xa82   :  { %v15866_v54 = vld [vmem:[%s23671_s3 + $0x12f4] sm:$0xf0] }
 0xa83   :  { %v13523_v43 = vld [vmem:[%s23671_s3 + $0x1518] sm:$0xf]  ;;  %9394 = vmatpush.bf16.msra.mxu2 %v13556_v5  ;;  %v13236_v22 = vor.u32 %v15866_v54, %v13235_v39  ;;  %v15326_v5 = vld [vmem:[%s23671_s3 + $0x21c] sm:$0xf]  ;;  %v9220_v24 = vadd.f32 %v22209_v42, %v9207_v19 }
 0xa84   :  { %v15938_v49 = vld [vmem:[%s23671_s3 + $0x1534] sm:$0xf0]  ;;  %v11093_v39 = vld [vmem:[%s23671_s3 + $0x238] sm:$0xf0] }
 0xa85   :  { %v13524_v21 = vor.u32 %v15938_v49, %v13523_v43  ;;  %v13203_v30 = vld [vmem:[%s23671_s3 + $0x1298] sm:$0xf]  ;;  %9486 = vmatpush.bf16.msra.mxu3 %v11224_v11  ;;  %9383 = vmatpush.bf16.msrb.mxu1 %v13236_v22  ;;  %v15574_v49 = vld [vmem:[%s23671_s3 + $0x9dc] sm:$0xf] }
 0xa86   :  { %v15858_v12 = vld [vmem:[%s23671_s3 + $0x12b4] sm:$0xf0]  ;;  %v12085_v11 = vld [vmem:[%s23671_s3 + $0x9f8] sm:$0xf0] }
 0xa87   :  { %v13491_v0 = vld [vmem:[%s23671_s3 + $0x14d8] sm:$0xf]  ;;  %9395 = vmatpush.bf16.msra.mxu2 %v13524_v21  ;;  %v13204_v10 = vor.u32 %v15858_v12, %v13203_v30  ;;  %v11096_v21 = vor.u32 %v15326_v5, %v11093_v39  ;;  %v11989_v19 = vld [vmem:[%s23671_s3 + $0x938] sm:$0xf0] }
 0xa88   :  { %v15930_v55 = vld [vmem:[%s23671_s3 + $0x14f4] sm:$0xf0] }
 0xa89   :  { %v13492_v1 = vor.u32 %v15930_v55, %v13491_v0  ;;  %v13171_v56 = vld [vmem:[%s23671_s3 + $0x1258] sm:$0xf]  ;;  %9487 = vmatpush.bf16.msra.mxu3 %v11192_v61  ;;  %9384 = vmatpush.bf16.msrb.mxu1 %v13204_v10  ;;  %v12088_v0 = vor.u32 %v15574_v49, %v12085_v11  ;;  %v9299_v55 = vpop.f32.mrf.mxu3  ;;  %v9208_v10 = vpop.f32.mrf.mxu2  ;;  %v15542_v11 = vld [vmem:[%s23671_s3 + $0x8dc] sm:$0xf] }
 0xa8a   :  { %v15850_v6 = vld [vmem:[%s23671_s3 + $0x1274] sm:$0xf0]  ;;  %v9232_v49 = vpop.f32.mrf.mxu1  ;;  %v11925_v55 = vld [vmem:[%s23671_s3 + $0x8b8] sm:$0xf0] }
 0xa8b   :  { %v13459_v17 = vld [vmem:[%s23671_s3 + $0x1498] sm:$0xf]  ;;  %9396 = vmatpush.bf16.msra.mxu2 %v13492_v1  ;;  %v13172_v34 = vor.u32 %v15850_v6, %v13171_v56 }
 0xa8c   :  { %v15922_v38 = vld [vmem:[%s23671_s3 + $0x14b4] sm:$0xf0] }
 0xa8d   :  { %v13460_v58 = vor.u32 %v15922_v38, %v13459_v17  ;;  %v13139_v60 = vld [vmem:[%s23671_s3 + $0x1218] sm:$0xf]  ;;  %9488 = vmatpush.bf16.msra.mxu3 %v11160_v37  ;;  %9385 = vmatpush.bf16.msrb.mxu1 %v13172_v34 }
 0xa8e   :  { %v15842_v23 = vld [vmem:[%s23671_s3 + $0x1234] sm:$0xf0] }
 0xa8f   :  { %v13427_v32 = vld [vmem:[%s23671_s3 + $0x1458] sm:$0xf]  ;;  %9397 = vmatpush.bf16.msra.mxu2 %v13460_v58  ;;  %v13140_v54 = vor.u32 %v15842_v23, %v13139_v60 }
 0xa90   :  { %v15914_v33 = vld [vmem:[%s23671_s3 + $0x1474] sm:$0xf0] }
 0xa91   :  { %v14131_v9 = vld [vmem:[%s23671_s3 + $0x19d8] sm:$0xf]  ;;  %v13428_v43 = vor.u32 %v15914_v33, %v13427_v32  ;;  %9489 = vmatpush.bf16.msra.mxu3 %v11128_v50  ;;  %9386 = vmatpush.bf16.msrb.mxu1 %v13140_v54  ;;  %v12024_v33 = vor.u32 %v15558_v47, %v12021_v31 }
 0xa92   :  { %v16090_v25 = vld [vmem:[%s23671_s3 + $0x19f4] sm:$0xf0] }
 0xa93   :  { %v14132_v48 = vor.u32 %v16090_v25, %v14131_v9  ;;  %v13395_v52 = vld [vmem:[%s23671_s3 + $0x1418] sm:$0xf]  ;;  %9398 = vmatpush.bf16.msra.mxu2 %v13428_v43 }
 0xa94   :  { %v15906_v59 = vld [vmem:[%s23671_s3 + $0x1434] sm:$0xf0]  ;;  %9387 = vmatmul.bf16.vlgmr.msrb.gmra.mxu1 %v17487_v62 }
 0xa95   :  { %v14099_v22 = vld [vmem:[%s23671_s3 + $0x1998] sm:$0xf]  ;;  %v13396_v61 = vor.u32 %v15906_v59, %v13395_v52  ;;  %9418 = vmatpush.bf16.msra.mxu1 %v14132_v48  ;;  %9490 = vmatpush.bf16.msra.mxu3 %v11096_v21  ;;  %v11957_v48 = vld [vmem:[%s23671_s3 + $0x8f8] sm:$0xf0]  ;;  %v9233_v52 = vadd.f32 %v9232_v49, %v9220_v24 }
 0xa96   :  { %v16082_v30 = vld [vmem:[%s23671_s3 + $0x19b4] sm:$0xf0] }
 0xa97   :  { %v14387_v42 = vld [vmem:[%s23671_s3 + $0x1bd8] sm:$0xf]  ;;  %v14100_v1 = vor.u32 %v16082_v30, %v14099_v22  ;;  %9399 = vmatpush.bf16.msra.mxu2 %v13396_v61 }
 0xa98   :  { %v16154_v12 = vld [vmem:[%s23671_s3 + $0x1bf4] sm:$0xf0]  ;;  %9491 = vmatmul.bf16.vlgmr.msra.gmra.mxu3 %v16790_v45  ;;  %v15550_v45 = vld [vmem:[%s23671_s3 + $0x91c] sm:$0xf] }
 0xa99   :  { %v14388_v56 = vor.u32 %v16154_v12, %v14387_v42  ;;  %v14067_v6 = vld [vmem:[%s23671_s3 + $0x1958] sm:$0xf]  ;;  %9522 = vmatpush.bf16.msrb.mxu3 %v12088_v0  ;;  %9419 = vmatpush.bf16.msra.mxu1 %v14100_v1  ;;  %v11992_v43 = vor.u32 %v15550_v45, %v11989_v19  ;;  %v11960_v12 = vor.u32 %v15542_v11, %v11957_v48  ;;  %v15534_v0 = vld [vmem:[%s23671_s3 + $0x89c] sm:$0xf] }
 0xa9a   :  { %v16074_v17 = vld [vmem:[%s23671_s3 + $0x1974] sm:$0xf0]  ;;  %9400 = vmatmul.bf16.vlgmr.msra.gmra.mxu2 %v17525_v7 }
 0xa9b   :  { %v14355_v38 = vld [vmem:[%s23671_s3 + $0x1b98] sm:$0xf]  ;;  %9431 = vmatpush.bf16.msrb.mxu2 %v14388_v56  ;;  %v14068_v34 = vor.u32 %v16074_v17, %v14067_v6  ;;  %v11928_v6 = vor.u32 %v15534_v0, %v11925_v55  ;;  %v9234_v17 = vpop.f32.mrf.mxu1  ;;  %v12821_v0 = vld [vmem:[%s23671_s3 + $0xfb8] sm:$0xf0] }
 0xa9c   :  { %v16146_v37 = vld [vmem:[%s23671_s3 + $0x1bb4] sm:$0xf0]  ;;  %v15750_v17 = vld [vmem:[%s23671_s3 + $0xf5c] sm:$0xf] }
 0xa9d   :  { %v14356_v58 = vor.u32 %v16146_v37, %v14355_v38  ;;  %v14035_v60 = vld [vmem:[%s23671_s3 + $0x1918] sm:$0xf]  ;;  %9523 = vmatpush.bf16.msrb.mxu3 %v12056_v20  ;;  %9420 = vmatpush.bf16.msra.mxu1 %v14068_v34  ;;  %v15526_v38 = vld [vmem:[%s23671_s3 + $0x85c] sm:$0xf]  ;;  %v22659_v20 = vpop.f32.mrf.mxu3 }
 0xa9e   :  { %v16066_v29 = vld [vmem:[%s23671_s3 + $0x1934] sm:$0xf0]  ;;  %v11893_v37 = vld [vmem:[%s23671_s3 + $0x878] sm:$0xf0] }
 0xa9f   :  { %v14323_v23 = vld [vmem:[%s23671_s3 + $0x1b58] sm:$0xf]  ;;  %9432 = vmatpush.bf16.msrb.mxu2 %v14356_v58  ;;  %v14036_v50 = vor.u32 %v16066_v29, %v14035_v60  ;;  %v9245_v58 = vpop.f32.mrf.mxu2 }
 0xaa0   :  { %v16138_v32 = vld [vmem:[%s23671_s3 + $0x1b74] sm:$0xf0] }
 0xaa1   :  { %v14324_v9 = vor.u32 %v16138_v32, %v14323_v23  ;;  %v14003_v25 = vld [vmem:[%s23671_s3 + $0x18d8] sm:$0xf]  ;;  %9524 = vmatpush.bf16.msrb.mxu3 %v12024_v33  ;;  %9421 = vmatpush.bf16.msra.mxu1 %v14036_v50  ;;  %v9246_v32 = vadd.f32 %v9245_v58, %v9233_v52  ;;  %v11896_v33 = vor.u32 %v15526_v38, %v11893_v37  ;;  %v15518_v50 = vld [vmem:[%s23671_s3 + $0x81c] sm:$0xf] }
 0xaa2   :  { %v16058_v5 = vld [vmem:[%s23671_s3 + $0x18f4] sm:$0xf0]  ;;  %v12789_v38 = vld [vmem:[%s23671_s3 + $0xf78] sm:$0xf0] }
 0xaa3   :  { %v14291_v39 = vld [vmem:[%s23671_s3 + $0x1b18] sm:$0xf]  ;;  %9433 = vmatpush.bf16.msrb.mxu2 %v14324_v9  ;;  %v14004_v59 = vor.u32 %v16058_v5, %v14003_v25  ;;  %v11861_v9 = vld [vmem:[%s23671_s3 + $0x838] sm:$0xf0]  ;;  %v22686_v25 = vadd.f32 %v22359_v41, %v9246_v32 }
 0xaa4   :  { %v16130_v54 = vld [vmem:[%s23671_s3 + $0x1b34] sm:$0xf0]  ;;  %v11864_v52 = vor.u32 %v15518_v50, %v11861_v9  ;;  %v15302_v58 = vld [vmem:[%s23671_s3 + $0x15c] sm:$0xf] }
 0xaa5   :  { %v14292_v22 = vor.u32 %v16130_v54, %v14291_v39  ;;  %v13971_v21 = vld [vmem:[%s23671_s3 + $0x1898] sm:$0xf]  ;;  %9525 = vmatpush.bf16.msrb.mxu3 %v11992_v43  ;;  %9422 = vmatpush.bf16.msra.mxu1 %v14004_v59  ;;  %v15766_v54 = vld [vmem:[%s23671_s3 + $0xfdc] sm:$0xf] }
 0xaa6   :  { %v16050_v30 = vld [vmem:[%s23671_s3 + $0x18b4] sm:$0xf0]  ;;  %v12853_v43 = vld [vmem:[%s23671_s3 + $0xff8] sm:$0xf0] }
 0xaa7   :  { %v14259_v42 = vld [vmem:[%s23671_s3 + $0x1ad8] sm:$0xf]  ;;  %9434 = vmatpush.bf16.msrb.mxu2 %v14292_v22  ;;  %v13972_v61 = vor.u32 %v16050_v30, %v13971_v21  ;;  %v15318_v22 = vld [vmem:[%s23671_s3 + $0x1dc] sm:$0xf]  ;;  %v12856_v30 = vor.u32 %v15766_v54, %v12853_v43  ;;  %v9247_v55 = vpop.f32.mrf.mxu2 }
 0xaa8   :  { %v16122_v24 = vld [vmem:[%s23671_s3 + $0x1af4] sm:$0xf0]  ;;  %v11061_v21 = vld [vmem:[%s23671_s3 + $0x1f8] sm:$0xf0] }
 0xaa9   :  { %v14260_v40 = vor.u32 %v16122_v24, %v14259_v42  ;;  %v13939_v44 = vld [vmem:[%s23671_s3 + $0x1858] sm:$0xf]  ;;  %9526 = vmatpush.bf16.msrb.mxu3 %v11960_v12  ;;  %9423 = vmatpush.bf16.msra.mxu1 %v13972_v61  ;;  %v9338_v42 = vpop.f32.mrf.mxu3  ;;  %v15758_v12 = vld [vmem:[%s23671_s3 + $0xf9c] sm:$0xf] }
 0xaaa   :  { %v16042_v10 = vld [vmem:[%s23671_s3 + $0x1874] sm:$0xf0]  ;;  %v15294_v50 = vld [vmem:[%s23671_s3 + $0x11c] sm:$0xf]  ;;  %v16358_v42 = vld [vmem:[%s23672_s4] sm:$0xff] }
 0xaab   :  { %v14227_v1 = vld [vmem:[%s23671_s3 + $0x1a98] sm:$0xf]  ;;  %9435 = vmatpush.bf16.msrb.mxu2 %v14260_v40  ;;  %v13940_v47 = vor.u32 %v16042_v10, %v13939_v44  ;;  %v11064_v40 = vor.u32 %v15318_v22, %v11061_v21  ;;  %v10965_v9 = vld [vmem:[%s23671_s3 + $0x138] sm:$0xf0] }
 0xaac   :  { %v16114_v56 = vld [vmem:[%s23671_s3 + $0x1ab4] sm:$0xf0]  ;;  %v15734_v54 = vld [vmem:[%s23671_s3 + $0xedc] sm:$0xf] }
 0xaad   :  { %v14228_v31 = vor.u32 %v16114_v56, %v14227_v1  ;;  %v13907_v34 = vld [vmem:[%s23671_s3 + $0x1818] sm:$0xf]  ;;  %9527 = vmatpush.bf16.msrb.mxu3 %v11928_v6  ;;  %9424 = vmatpush.bf16.msra.mxu1 %v13940_v47  ;;  %v15310_v1 = vld [vmem:[%s23671_s3 + $0x19c] sm:$0xf]  ;;  %v12824_v6 = vor.u32 %v15758_v12, %v12821_v0 }
 0xaae   :  { %v16034_v60 = vld [vmem:[%s23671_s3 + $0x1834] sm:$0xf0]  ;;  %v11029_v56 = vld [vmem:[%s23671_s3 + $0x1b8] sm:$0xf0] }
 0xaaf   :  { %v14195_v29 = vld [vmem:[%s23671_s3 + $0x1a58] sm:$0xf]  ;;  %9436 = vmatpush.bf16.msrb.mxu2 %v14228_v31  ;;  %v13908_v5 = vor.u32 %v16034_v60, %v13907_v34  ;;  %v11032_v47 = vor.u32 %v15310_v1, %v11029_v56  ;;  %v10997_v60 = vld [vmem:[%s23671_s3 + $0x178] sm:$0xf0] }
 0xab0   :  { %v16106_v23 = vld [vmem:[%s23671_s3 + $0x1a74] sm:$0xf0]  ;;  %v12725_v43 = vld [vmem:[%s23671_s3 + $0xef8] sm:$0xf0] }
 0xab1   :  { %v14899_v45 = vld [vmem:[%s23671_s3 + $0x1fd8] sm:$0xf]  ;;  %v14196_v39 = vor.u32 %v16106_v23, %v14195_v29  ;;  %9528 = vmatpush.bf16.msrb.mxu3 %v11896_v33  ;;  %9425 = vmatpush.bf16.msra.mxu1 %v13908_v5  ;;  %v12792_v29 = vor.u32 %v15750_v17, %v12789_v38  ;;  %v12757_v23 = vld [vmem:[%s23671_s3 + $0xf38] sm:$0xf0]  ;;  %v11000_v33 = vor.u32 %v15302_v58, %v10997_v60  ;;  %v22814_v38 = vpop.f32.mrf.mxu3 }
 0xab2   :  { %v16282_v19 = vld [vmem:[%s23671_s3 + $0x1ff4] sm:$0xf0]  ;;  %v12728_v22 = vor.u32 %v15734_v54, %v12725_v43  ;;  %v15726_v21 = vld [vmem:[%s23671_s3 + $0xe9c] sm:$0xf] }
 0xab3   :  { %v14900_v49 = vor.u32 %v16282_v19, %v14899_v45  ;;  %v14163_v11 = vld [vmem:[%s23671_s3 + $0x1a18] sm:$0xf]  ;;  %9437 = vmatpush.bf16.msrb.mxu2 %v14196_v39  ;;  %v9271_v39 = vpop.f32.mrf.mxu1  ;;  %v15718_v56 = vld [vmem:[%s23671_s3 + $0xe5c] sm:$0xf] }
 0xab4   :  { %v16098_v41 = vld [vmem:[%s23671_s3 + $0x1a34] sm:$0xf0]  ;;  %9426 = vmatmul.bf16.vlgmr.msra.gmra.mxu1 %v18017_v28  ;;  %v15270_v60 = vld [vmem:[%s23671_s3 + $0x5c] sm:$0xf] }
 0xab5   :  { %v14867_v48 = vld [vmem:[%s23671_s3 + $0x1f98] sm:$0xf]  ;;  %v14164_v24 = vor.u32 %v16098_v41, %v14163_v11  ;;  %9457 = vmatpush.bf16.msrb.mxu1 %v14900_v49  ;;  %9529 = vmatpush.bf16.msrb.mxu3 %v11864_v52  ;;  %v10968_v11 = vor.u32 %v15294_v50, %v10965_v9  ;;  %v15286_v52 = vld [vmem:[%s23671_s3 + $0xdc] sm:$0xf] }
 0xab6   :  { %v16274_v59 = vld [vmem:[%s23671_s3 + $0x1fb4] sm:$0xf0] }
 0xab7   :  { %v14868_v61 = vor.u32 %v16274_v59, %v14867_v48  ;;  %v14835_v44 = vld [vmem:[%s23671_s3 + $0x1f58] sm:$0xf]  ;;  %9438 = vmatpush.bf16.msrb.mxu2 %v14164_v24  ;;  %v10933_v59 = vld [vmem:[%s23671_s3 + $0xf8] sm:$0xf0]  ;;  %v2884_v24 = vperm.slane %v16358_v42, 6 }
 0xab8   :  { %v16266_v10 = vld [vmem:[%s23671_s3 + $0x1f74] sm:$0xf0]  ;;  %9530 = vmatmul.bf16.vlgmr.msrb.gmra.mxu3 %v17083_v18  ;;  %v15742_v18 = vld [vmem:[%s23671_s3 + $0xf1c] sm:$0xf]  ;;  %v10936_v0 = vor.u32 %v15286_v52, %v10933_v59 }
 0xab9   :  { %9561 = vmatpush.bf16.msra.mxu3 %v12856_v30  ;;  %9458 = vmatpush.bf16.msrb.mxu1 %v14868_v61  ;;  %v14836_v37 = vor.u32 %v16266_v10, %v14835_v44  ;;  %v14803_v31 = vld [vmem:[%s23671_s3 + $0x1f18] sm:$0xf]  ;;  %v12760_v5 = vor.u32 %v15742_v18, %v12757_v23  ;;  %v12693_v30 = vld [vmem:[%s23671_s3 + $0xeb8] sm:$0xf0]  ;;  %v9272_v17 = vadd.f32 %v9271_v39, %v2884_v24 }
 0xaba   :  { %v16258_v34 = vld [vmem:[%s23671_s3 + $0x1f34] sm:$0xf0]  ;;  %9439 = vmatmul.bf16.vlgmr.msrb.gmra.mxu2 %v18039_v51  ;;  %v10901_v44 = vld [vmem:[%s23671_s3 + $0xb8] sm:$0xf0]  ;;  %v12696_v10 = vor.u32 %v15726_v21, %v12693_v30  ;;  %v9377_v21 = vpop.f32.mrf.mxu3 }
 0xabb   :  { %9470 = vmatpush.bf16.msra.mxu2 %v11064_v40  ;;  %v14804_v32 = vor.u32 %v16258_v34, %v14803_v31  ;;  %v14771_v45 = vld [vmem:[%s23671_s3 + $0x1ed8] sm:$0xf]  ;;  %v15278_v40 = vld [vmem:[%s23671_s3 + $0x9c] sm:$0xf]  ;;  %v9273_v1 = vpop.f32.mrf.mxu1  ;;  %v9284_v34 = vpop.f32.mrf.mxu2 }
 0xabc   :  { %v16250_v19 = vld [vmem:[%s23671_s3 + $0x1ef4] sm:$0xf0]  ;;  %v9285_v18 = vadd.f32 %v9284_v34, %v9272_v17  ;;  %v13621_v39 = vld [vmem:[%s23671_s3 + $0x15f8] sm:$0xf0] }
 0xabd   :  { %9562 = vmatpush.bf16.msra.mxu3 %v12824_v6  ;;  %9459 = vmatpush.bf16.msrb.mxu1 %v14836_v37  ;;  %v14772_v49 = vor.u32 %v16250_v19, %v14771_v45  ;;  %v14739_v41 = vld [vmem:[%s23671_s3 + $0x1e98] sm:$0xf]  ;;  %v12661_v6 = vld [vmem:[%s23671_s3 + $0xe78] sm:$0xf0] }
 0xabe   :  { %v16242_v48 = vld [vmem:[%s23671_s3 + $0x1eb4] sm:$0xf0]  ;;  %v12664_v23 = vor.u32 %v15718_v56, %v12661_v6  ;;  %v15710_v45 = vld [vmem:[%s23671_s3 + $0xe1c] sm:$0xf]  ;;  %v9298_v54 = vadd.f32 %v22509_v14, %v9285_v18 }
 0xabf   :  { %9471 = vmatpush.bf16.msra.mxu2 %v11032_v47  ;;  %v14740_v12 = vor.u32 %v16242_v48, %v14739_v41  ;;  %v14707_v55 = vld [vmem:[%s23671_s3 + $0x1e58] sm:$0xf]  ;;  %v10904_v47 = vor.u32 %v15278_v40, %v10901_v44  ;;  %v12629_v19 = vld [vmem:[%s23671_s3 + $0xe38] sm:$0xf0] }
 0xac0   :  { %v16234_v61 = vld [vmem:[%s23671_s3 + $0x1e74] sm:$0xf0]  ;;  %v15438_v41 = vld [vmem:[%s23671_s3 + $0x59c] sm:$0xf]  ;;  %v12632_v48 = vor.u32 %v15710_v45, %v12629_v19 }
 0xac1   :  { %9563 = vmatpush.bf16.msra.mxu3 %v12792_v29  ;;  %9460 = vmatpush.bf16.msrb.mxu1 %v14804_v32  ;;  %v14708_v37 = vor.u32 %v16234_v61, %v14707_v55  ;;  %v14675_v31 = vld [vmem:[%s23671_s3 + $0x1e18] sm:$0xf]  ;;  %v10869_v29 = vld [vmem:[%s23671_s3 + $0x78] sm:$0xf0] }
 0xac2   :  { %v16226_v58 = vld [vmem:[%s23671_s3 + $0x1e34] sm:$0xf0]  ;;  %v15446_v32 = vld [vmem:[%s23671_s3 + $0x5dc] sm:$0xf]  ;;  %v10872_v9 = vor.u32 %v15270_v60, %v10869_v29 }
 0xac3   :  { %9472 = vmatpush.bf16.msra.mxu2 %v11000_v33  ;;  %v11573_v33 = vld [vmem:[%s23671_s3 + $0x5f8] sm:$0xf0]  ;;  %v14676_v50 = vor.u32 %v16226_v58, %v14675_v31 }
 0xac4   :  { %v11576_v43 = vor.u32 %v15446_v32, %v11573_v33  ;;  %v11541_v52 = vld [vmem:[%s23671_s3 + $0x5b8] sm:$0xf0] }
 0xac5   :  { %9564 = vmatpush.bf16.msra.mxu3 %v12760_v5  ;;  %9461 = vmatpush.bf16.msrb.mxu1 %v14772_v49  ;;  %v15958_v5 = vld [vmem:[%s23671_s3 + $0x15dc] sm:$0xf] }
 0xac6   :  { %v15262_v49 = vld [vmem:[%s23671_s3 + $0x1c] sm:$0xf] }
 0xac7   :  { %9473 = vmatpush.bf16.msra.mxu2 %v10968_v11  ;;  %v10837_v11 = vld [vmem:[%s23671_s3 + $0x38] sm:$0xf0] }
 0xac8   :  { %v15510_v14 = vld [vmem:[%s23671_s3 + $0x7dc] sm:$0xf]  ;;  %v10840_v30 = vor.u32 %v15262_v49, %v10837_v11 }
 0xac9   :  { %9565 = vmatpush.bf16.msra.mxu3 %v12728_v22  ;;  %9462 = vmatpush.bf16.msrb.mxu1 %v14740_v12  ;;  %v11829_v59 = vld [vmem:[%s23671_s3 + $0x7f8] sm:$0xf0]  ;;  %v13624_v22 = vor.u32 %v15958_v5, %v13621_v39  ;;  %v9286_v12 = vpop.f32.mrf.mxu2 }
 0xaca   :  { %v15950_v42 = vld [vmem:[%s23671_s3 + $0x159c] sm:$0xf]  ;;  %v11832_v55 = vor.u32 %v15510_v14, %v11829_v59 }
 0xacb   :  { %9474 = vmatpush.bf16.msra.mxu2 %v10936_v0  ;;  %v13589_v24 = vld [vmem:[%s23671_s3 + $0x15b8] sm:$0xf0]  ;;  %v11544_v0 = vor.u32 %v15438_v41, %v11541_v52 }
 0xacc   :  { %v15430_v61 = vld [vmem:[%s23671_s3 + $0x55c] sm:$0xf]  ;;  %v13592_v1 = vor.u32 %v15950_v42, %v13589_v24 }
 0xacd   :  { %9566 = vmatpush.bf16.msra.mxu3 %v12696_v10  ;;  %9463 = vmatpush.bf16.msrb.mxu1 %v14708_v37  ;;  %v11509_v40 = vld [vmem:[%s23671_s3 + $0x578] sm:$0xf0] }
 0xace   :  { %v15502_v44 = vld [vmem:[%s23671_s3 + $0x79c] sm:$0xf]  ;;  %v11512_v17 = vor.u32 %v15430_v61, %v11509_v40 }
 0xacf   :  { %9475 = vmatpush.bf16.msra.mxu2 %v10904_v47  ;;  %v11797_v10 = vld [vmem:[%s23671_s3 + $0x7b8] sm:$0xf0] }
 0xad0   :  { %v15942_v56 = vld [vmem:[%s23671_s3 + $0x155c] sm:$0xf]  ;;  %v11800_v37 = vor.u32 %v15502_v44, %v11797_v10  ;;  %v22964_v44 = vpop.f32.mrf.mxu3 }
 0xad1   :  { %9567 = vmatpush.bf16.msra.mxu3 %v12664_v23  ;;  %9464 = vmatpush.bf16.msrb.mxu1 %v14676_v50  ;;  %v13557_v6 = vld [vmem:[%s23671_s3 + $0x1578] sm:$0xf0]  ;;  %v9310_v50 = vpop.f32.mrf.mxu1 }
 0xad2   :  { %v15422_v47 = vld [vmem:[%s23671_s3 + $0x51c] sm:$0xf]  ;;  %v13560_v60 = vor.u32 %v15942_v56, %v13557_v6  ;;  %v9311_v39 = vadd.f32 %v9310_v50, %v9298_v54  ;;  %v9323_v6 = vpop.f32.mrf.mxu2 }
 0xad3   :  { %9476 = vmatpush.bf16.msra.mxu2 %v10872_v9  ;;  %v11477_v31 = vld [vmem:[%s23671_s3 + $0x538] sm:$0xf0] }
 0xad4   :  { %9465 = vmatmul.bf16.vlgmr.msrb.gmra.mxu1 %v18101_v57  ;;  %v15494_v34 = vld [vmem:[%s23671_s3 + $0x75c] sm:$0xf]  ;;  %v11480_v18 = vor.u32 %v15422_v47, %v11477_v31  ;;  %v9324_v31 = vadd.f32 %v9323_v6, %v9311_v39 }
 0xad5   :  { %9496 = vmatpush.bf16.msra.mxu1 %v11576_v43  ;;  %9568 = vmatpush.bf16.msra.mxu3 %v12632_v48  ;;  %v11765_v58 = vld [vmem:[%s23671_s3 + $0x778] sm:$0xf0] }
 0xad6   :  { %v13525_v29 = vld [vmem:[%s23671_s3 + $0x1538] sm:$0xf0]  ;;  %v11768_v23 = vor.u32 %v15494_v34, %v11765_v58 }
 0xad7   :  { %9477 = vmatpush.bf16.msra.mxu2 %v10840_v30  ;;  %v15414_v32 = vld [vmem:[%s23671_s3 + $0x4dc] sm:$0xf] }
 0xad8   :  { %9569 = vmatmul.bf16.vlgmr.msra.gmra.mxu3 %v17198_v8  ;;  %v15934_v8 = vld [vmem:[%s23671_s3 + $0x151c] sm:$0xf] }
 0xad9   :  { %9600 = vmatpush.bf16.msrb.mxu3 %v13624_v22  ;;  %9497 = vmatpush.bf16.msra.mxu1 %v11544_v0  ;;  %v15486_v33 = vld [vmem:[%s23671_s3 + $0x71c] sm:$0xf]  ;;  %v13528_v19 = vor.u32 %v15934_v8, %v13525_v29 }
 0xada   :  { %9478 = vmatmul.bf16.vlgmr.msra.gmra.mxu2 %v16722_v3  ;;  %v11445_v3 = vld [vmem:[%s23671_s3 + $0x4f8] sm:$0xf0] }
 0xadb   :  { %9509 = vmatpush.bf16.msrb.mxu2 %v11832_v55  ;;  %v11733_v45 = vld [vmem:[%s23671_s3 + $0x738] sm:$0xf0]  ;;  %v11448_v43 = vor.u32 %v15414_v32, %v11445_v3  ;;  %v9312_v55 = vpop.f32.mrf.mxu1 }
 0xadc   :  { %v15926_v9 = vld [vmem:[%s23671_s3 + $0x14dc] sm:$0xf]  ;;  %v11736_v49 = vor.u32 %v15486_v33, %v11733_v45  ;;  %v9337_v33 = vadd.f32 %v22659_v20, %v9324_v31 }
 0xadd   :  { %9601 = vmatpush.bf16.msrb.mxu3 %v13592_v1  ;;  %9498 = vmatpush.bf16.msra.mxu1 %v11512_v17  ;;  %v13493_v5 = vld [vmem:[%s23671_s3 + $0x14f8] sm:$0xf0] }
 0xade   :  { %v15406_v11 = vld [vmem:[%s23671_s3 + $0x49c] sm:$0xf]  ;;  %v13496_v52 = vor.u32 %v15926_v9, %v13493_v5 }
 0xadf   :  { %9510 = vmatpush.bf16.msrb.mxu2 %v11800_v37  ;;  %v11413_v41 = vld [vmem:[%s23671_s3 + $0x4b8] sm:$0xf0] }
 0xae0   :  { %v15478_v48 = vld [vmem:[%s23671_s3 + $0x6dc] sm:$0xf]  ;;  %v11416_v22 = vor.u32 %v15406_v11, %v11413_v41  ;;  %v9416_v11 = vpop.f32.mrf.mxu3 }
 0xae1   :  { %9602 = vmatpush.bf16.msrb.mxu3 %v13560_v60  ;;  %9499 = vmatpush.bf16.msra.mxu1 %v11480_v18  ;;  %v11701_v54 = vld [vmem:[%s23671_s3 + $0x6f8] sm:$0xf0] }
 0xae2   :  { %v15918_v14 = vld [vmem:[%s23671_s3 + $0x149c] sm:$0xf]  ;;  %v11704_v21 = vor.u32 %v15478_v48, %v11701_v54 }
 0xae3   :  { %9511 = vmatpush.bf16.msrb.mxu2 %v11768_v23  ;;  %v13461_v59 = vld [vmem:[%s23671_s3 + $0x14b8] sm:$0xf0] }
 0xae4   :  { %v15398_v30 = vld [vmem:[%s23671_s3 + $0x45c] sm:$0xf]  ;;  %v13464_v0 = vor.u32 %v15918_v14, %v13461_v59 }
 0xae5   :  { %9603 = vmatpush.bf16.msrb.mxu3 %v13528_v19  ;;  %9500 = vmatpush.bf16.msra.mxu1 %v11448_v43  ;;  %v11381_v42 = vld [vmem:[%s23671_s3 + $0x478] sm:$0xf0] }
 0xae6   :  { %v15470_v24 = vld [vmem:[%s23671_s3 + $0x69c] sm:$0xf]  ;;  %v11384_v10 = vor.u32 %v15398_v30, %v11381_v42 }
 0xae7   :  { %9512 = vmatpush.bf16.msrb.mxu2 %v11736_v49  ;;  %v11669_v12 = vld [vmem:[%s23671_s3 + $0x6b8] sm:$0xf0] }
 0xae8   :  { %v15910_v61 = vld [vmem:[%s23671_s3 + $0x145c] sm:$0xf]  ;;  %v11672_v1 = vor.u32 %v15470_v24, %v11669_v12 }
 0xae9   :  { %9604 = vmatpush.bf16.msrb.mxu3 %v13496_v52  ;;  %v13429_v40 = vld [vmem:[%s23671_s3 + $0x1478] sm:$0xf0]  ;;  %9501 = vmatpush.bf16.msra.mxu1 %v11416_v22  ;;  %v9325_v52 = vpop.f32.mrf.mxu2 }
 0xaea   :  { %v15390_v56 = vld [vmem:[%s23671_s3 + $0x41c] sm:$0xf]  ;;  %v13432_v34 = vor.u32 %v15910_v61, %v13429_v40 }
 0xaeb   :  { %9513 = vmatpush.bf16.msrb.mxu2 %v11704_v21  ;;  %v11349_v17 = vld [vmem:[%s23671_s3 + $0x438] sm:$0xf0] }
 0xaec   :  { %v15462_v37 = vld [vmem:[%s23671_s3 + $0x65c] sm:$0xf]  ;;  %v11352_v18 = vor.u32 %v15390_v56, %v11349_v17 }
 0xaed   :  { %v11637_v47 = vld [vmem:[%s23671_s3 + $0x678] sm:$0xf0]  ;;  %9605 = vmatpush.bf16.msrb.mxu3 %v13464_v0  ;;  %9502 = vmatpush.bf16.msra.mxu1 %v11384_v10 }
 0xaee   :  { %v15638_v58 = vld [vmem:[%s23671_s3 + $0xbdc] sm:$0xf]  ;;  %v11640_v23 = vor.u32 %v15462_v37, %v11637_v47 }
 0xaef   :  { %v12341_v60 = vld [vmem:[%s23671_s3 + $0xbf8] sm:$0xf0]  ;;  %9514 = vmatpush.bf16.msrb.mxu2 %v11672_v1 }
 0xaf0   :  { %v15902_v8 = vld [vmem:[%s23671_s3 + $0x141c] sm:$0xf]  ;;  %v12344_v45 = vor.u32 %v15638_v58, %v12341_v60  ;;  %v9349_v60 = vpop.f32.mrf.mxu1 }
 0xaf1   :  { %v13397_v29 = vld [vmem:[%s23671_s3 + $0x1438] sm:$0xf0]  ;;  %9606 = vmatpush.bf16.msrb.mxu3 %v13432_v34  ;;  %9503 = vmatpush.bf16.msra.mxu1 %v11352_v18  ;;  %v9350_v18 = vadd.f32 %v9349_v60, %v9337_v33 }
 0xaf2   :  { %v16150_v32 = vld [vmem:[%s23671_s3 + $0x1bdc] sm:$0xf]  ;;  %v13400_v5 = vor.u32 %v15902_v8, %v13397_v29 }
 0xaf3   :  { %v14389_v3 = vld [vmem:[%s23671_s3 + $0x1bf8] sm:$0xf0]  ;;  %9515 = vmatpush.bf16.msrb.mxu2 %v11640_v23 }
 0xaf4   :  { %v15454_v19 = vld [vmem:[%s23671_s3 + $0x61c] sm:$0xf]  ;;  %v14392_v49 = vor.u32 %v16150_v32, %v14389_v3  ;;  %9504 = vmatmul.bf16.vlgmr.msra.gmra.mxu1 %v16828_v13 }
 0xaf5   :  { %v11605_v50 = vld [vmem:[%s23671_s3 + $0x638] sm:$0xf0]  ;;  %9535 = vmatpush.bf16.msrb.mxu1 %v12344_v45  ;;  %9607 = vmatpush.bf16.msrb.mxu3 %v13400_v5 }
 0xaf6   :  { %v15630_v9 = vld [vmem:[%s23671_s3 + $0xb9c] sm:$0xf]  ;;  %v11608_v41 = vor.u32 %v15454_v19, %v11605_v50 }
 0xaf7   :  { %v12309_v39 = vld [vmem:[%s23671_s3 + $0xbb8] sm:$0xf0] }
 0xaf8   :  { %v15702_v20 = vld [vmem:[%s23671_s3 + $0xddc] sm:$0xf]  ;;  %v12312_v14 = vor.u32 %v15630_v9, %v12309_v39  ;;  %9516 = vmatpush.bf16.msrb.mxu2 %v11608_v41  ;;  %9608 = vmatmul.bf16.vlgmr.msrb.gmra.mxu3 %v17525_v7 }
 0xaf9   :  { %v12597_v43 = vld [vmem:[%s23671_s3 + $0xdf8] sm:$0xf0]  ;;  %9639 = vmatpush.bf16.msra.mxu3 %v14392_v49 }
 0xafa   :  { %v16142_v48 = vld [vmem:[%s23671_s3 + $0x1b9c] sm:$0xf]  ;;  %v12600_v59 = vor.u32 %v15702_v20, %v12597_v43  ;;  %9536 = vmatpush.bf16.msrb.mxu1 %v12312_v14 }
 0xafb   :  { %v14357_v54 = vld [vmem:[%s23671_s3 + $0x1bb8] sm:$0xf0]  ;;  %9517 = vmatmul.bf16.vlgmr.msrb.gmra.mxu2 %v16844_v27 }
 0xafc   :  { %v15622_v22 = vld [vmem:[%s23671_s3 + $0xb5c] sm:$0xf]  ;;  %v14360_v24 = vor.u32 %v16142_v48, %v14357_v54  ;;  %9548 = vmatpush.bf16.msra.mxu2 %v12600_v59  ;;  %v9351_v54 = vpop.f32.mrf.mxu1  ;;  %v23114_v59 = vpop.f32.mrf.mxu3 }
 0xafd   :  { %v12277_v21 = vld [vmem:[%s23671_s3 + $0xb78] sm:$0xf0] }
 0xafe   :  { %v15694_v30 = vld [vmem:[%s23671_s3 + $0xd9c] sm:$0xf]  ;;  %v12280_v55 = vor.u32 %v15622_v22, %v12277_v21  ;;  %9640 = vmatpush.bf16.msra.mxu3 %v14360_v24 }
 0xaff   :  { %v12565_v42 = vld [vmem:[%s23671_s3 + $0xdb8] sm:$0xf0] }
 0xb00   :  { %v16134_v12 = vld [vmem:[%s23671_s3 + $0x1b5c] sm:$0xf]  ;;  %v12568_v61 = vor.u32 %v15694_v30, %v12565_v42  ;;  %9537 = vmatpush.bf16.msrb.mxu1 %v12280_v55  ;;  %v9362_v42 = vpop.f32.mrf.mxu2 }
 0xb01   :  { %v14325_v0 = vld [vmem:[%s23671_s3 + $0x1b78] sm:$0xf0]  ;;  %v9363_v55 = vadd.f32 %v9362_v42, %v9350_v18 }
 0xb02   :  { %v15614_v40 = vld [vmem:[%s23671_s3 + $0xb1c] sm:$0xf]  ;;  %v14328_v56 = vor.u32 %v16134_v12, %v14325_v0  ;;  %9549 = vmatpush.bf16.msra.mxu2 %v12568_v61 }
 0xb03   :  { %v12245_v13 = vld [vmem:[%s23671_s3 + $0xb38] sm:$0xf0] }
 0xb04   :  { %v15686_v10 = vld [vmem:[%s23671_s3 + $0xd5c] sm:$0xf]  ;;  %v12248_v17 = vor.u32 %v15614_v40, %v12245_v13  ;;  %9641 = vmatpush.bf16.msra.mxu3 %v14328_v56 }
 0xb05   :  { %v12533_v1 = vld [vmem:[%s23671_s3 + $0xd78] sm:$0xf0] }
 0xb06   :  { %v16126_v7 = vld [vmem:[%s23671_s3 + $0x1b1c] sm:$0xf]  ;;  %v12536_v37 = vor.u32 %v15686_v10, %v12533_v1  ;;  %9538 = vmatpush.bf16.msrb.mxu1 %v12248_v17 }
 0xb07   :  { %v14293_v6 = vld [vmem:[%s23671_s3 + $0x1b38] sm:$0xf0] }
 0xb08   :  { %v15606_v47 = vld [vmem:[%s23671_s3 + $0xadc] sm:$0xf]  ;;  %v14296_v58 = vor.u32 %v16126_v7, %v14293_v6  ;;  %9550 = vmatpush.bf16.msra.mxu2 %v12536_v37  ;;  %v23141_v6 = vadd.f32 %v22814_v38, %v9363_v55  ;;  %v9364_v18 = vpop.f32.mrf.mxu2 }
 0xb09   :  { %v12213_v27 = vld [vmem:[%s23671_s3 + $0xaf8] sm:$0xf0] }
 0xb0a   :  { %v15678_v31 = vld [vmem:[%s23671_s3 + $0xd1c] sm:$0xf]  ;;  %v12216_v23 = vor.u32 %v15606_v47, %v12213_v27  ;;  %9642 = vmatpush.bf16.msra.mxu3 %v14296_v58 }
 0xb0b   :  { %v12501_v34 = vld [vmem:[%s23671_s3 + $0xd38] sm:$0xf0] }
 0xb0c   :  { %v16118_v8 = vld [vmem:[%s23671_s3 + $0x1adc] sm:$0xf]  ;;  %v12504_v32 = vor.u32 %v15678_v31, %v12501_v34  ;;  %9539 = vmatpush.bf16.msrb.mxu1 %v12216_v23 }
 0xb0d   :  { %v14261_v29 = vld [vmem:[%s23671_s3 + $0x1af8] sm:$0xf0] }
 0xb0e   :  { %v15598_v3 = vld [vmem:[%s23671_s3 + $0xa9c] sm:$0xf]  ;;  %v14264_v50 = vor.u32 %v16118_v8, %v14261_v29  ;;  %9551 = vmatpush.bf16.msra.mxu2 %v12504_v32  ;;  %v9455_v8 = vpop.f32.mrf.mxu3 }
 0xb0f   :  { %v12181_v45 = vld [vmem:[%s23671_s3 + $0xab8] sm:$0xf0]  ;;  %v16284_v8 = vld [vmem:[%s23673_s5 + $0x8] sm:$0xff] }
 0xb10   :  { %v15670_v19 = vld [vmem:[%s23671_s3 + $0xcdc] sm:$0xf]  ;;  %v12184_v39 = vor.u32 %v15598_v3, %v12181_v45  ;;  %9643 = vmatpush.bf16.msra.mxu3 %v14264_v50  ;;  %v16289_v50 = vld [vmem:[%s23673_s5 + $0x30] sm:$0xff] }
 0xb11   :  { %v12469_v33 = vld [vmem:[%s23671_s3 + $0xcf8] sm:$0xf0] }
 0xb12   :  { %v16110_v9 = vld [vmem:[%s23671_s3 + $0x1a9c] sm:$0xf]  ;;  %v12472_v20 = vor.u32 %v15670_v19, %v12469_v33  ;;  %9540 = vmatpush.bf16.msrb.mxu1 %v12184_v39 }
 0xb13   :  { %v14229_v5 = vld [vmem:[%s23671_s3 + $0x1ab8] sm:$0xf0] }
 0xb14   :  { %v15590_v43 = vld [vmem:[%s23671_s3 + $0xa5c] sm:$0xf]  ;;  %v14232_v48 = vor.u32 %v16110_v9, %v14229_v5  ;;  %9552 = vmatpush.bf16.msra.mxu2 %v12472_v20 }
 0xb15   :  { %v12149_v49 = vld [vmem:[%s23671_s3 + $0xa78] sm:$0xf0] }
 0xb16   :  { %v15662_v11 = vld [vmem:[%s23671_s3 + $0xc9c] sm:$0xf]  ;;  %v12152_v22 = vor.u32 %v15590_v43, %v12149_v49  ;;  %9644 = vmatpush.bf16.msra.mxu3 %v14232_v48  ;;  %v16288_v49 = vld [vmem:[%s23673_s5 + $0x28] sm:$0xff] }
 0xb17   :  { %v12437_v41 = vld [vmem:[%s23671_s3 + $0xcb8] sm:$0xf0] }
 0xb18   :  { %v16102_v52 = vld [vmem:[%s23671_s3 + $0x1a5c] sm:$0xf]  ;;  %v12440_v21 = vor.u32 %v15662_v11, %v12437_v41  ;;  %9541 = vmatpush.bf16.msrb.mxu1 %v12152_v22 }
 0xb19   :  { %v14197_v14 = vld [vmem:[%s23671_s3 + $0x1a78] sm:$0xf0] }
 0xb1a   :  { %v15582_v30 = vld [vmem:[%s23671_s3 + $0xa1c] sm:$0xf]  ;;  %v14200_v61 = vor.u32 %v16102_v52, %v14197_v14  ;;  %9553 = vmatpush.bf16.msra.mxu2 %v12440_v21  ;;  %v16287_v52 = vld [vmem:[%s23673_s5 + $0x20] sm:$0xff]  ;;  %v9388_v14 = vpop.f32.mrf.mxu1 }
 0xb1b   :  { %v12117_v24 = vld [vmem:[%s23671_s3 + $0xa38] sm:$0xf0] }
 0xb1c   :  { %v15654_v12 = vld [vmem:[%s23671_s3 + $0xc5c] sm:$0xf]  ;;  %v12120_v56 = vor.u32 %v15582_v30, %v12117_v24  ;;  %9645 = vmatpush.bf16.msra.mxu3 %v14200_v61 }
 0xb1d   :  { %v12405_v0 = vld [vmem:[%s23671_s3 + $0xc78] sm:$0xf0] }
 0xb1e   :  { %v15830_v40 = vld [vmem:[%s23671_s3 + $0x11dc] sm:$0xf]  ;;  %v12408_v7 = vor.u32 %v15654_v12, %v12405_v0  ;;  %9542 = vmatpush.bf16.msrb.mxu1 %v12120_v56  ;;  %v16285_v56 = vld [vmem:[%s23673_s5 + $0x10] sm:$0xff] }
 0xb1f   :  { %v13109_v13 = vld [vmem:[%s23671_s3 + $0x11f8] sm:$0xf0] }
 0xb20   :  { %v16094_v10 = vld [vmem:[%s23671_s3 + $0x1a1c] sm:$0xf]  ;;  %v13112_v17 = vor.u32 %v15830_v40, %v13109_v13  ;;  %9554 = vmatpush.bf16.msra.mxu2 %v12408_v7 }
 0xb21   :  { %v14165_v1 = vld [vmem:[%s23671_s3 + $0x1a38] sm:$0xf0]  ;;  %9543 = vmatmul.bf16.vlgmr.msrb.gmra.mxu1 %v17147_v15 }
 0xb22   :  { %v15646_v37 = vld [vmem:[%s23671_s3 + $0xc1c] sm:$0xf]  ;;  %v14168_v31 = vor.u32 %v16094_v10, %v14165_v1  ;;  %9574 = vmatpush.bf16.msra.mxu1 %v13112_v17  ;;  %v9390_v7 = vpop.f32.mrf.mxu1  ;;  %v9389_v17 = vadd.f32 %v9388_v14, %v23141_v6 }
 0xb23   :  { %v12373_v47 = vld [vmem:[%s23671_s3 + $0xc38] sm:$0xf0] }
 0xb24   :  { %v15822_v27 = vld [vmem:[%s23671_s3 + $0x119c] sm:$0xf]  ;;  %v12376_v29 = vor.u32 %v15646_v37, %v12373_v47  ;;  %9646 = vmatpush.bf16.msra.mxu3 %v14168_v31  ;;  %v23243_v37 = vpop.f32.mrf.mxu3 }
 0xb25   :  { %v13077_v38 = vld [vmem:[%s23671_s3 + $0x11b8] sm:$0xf0] }
 0xb26   :  { %v15894_v34 = vld [vmem:[%s23671_s3 + $0x13dc] sm:$0xf]  ;;  %v13080_v23 = vor.u32 %v15822_v27, %v13077_v38  ;;  %9555 = vmatpush.bf16.msra.mxu2 %v12376_v29  ;;  %v9401_v38 = vpop.f32.mrf.mxu2 }
 0xb27   :  { %v13365_v58 = vld [vmem:[%s23671_s3 + $0x13f8] sm:$0xf0]  ;;  %9647 = vmatmul.bf16.vlgmr.msra.gmra.mxu3 %v18039_v51 }
 0xb28   :  { %v16290_v60 = vld [vmem:[%s23673_s5 + $0x38] sm:$0xff]  ;;  %v13368_v32 = vor.u32 %v15894_v34, %v13365_v58  ;;  %9575 = vmatpush.bf16.msra.mxu1 %v13080_v23 }
 0xb29   :  { %v15814_v3 = vld [vmem:[%s23671_s3 + $0x115c] sm:$0xf]  ;;  %10210 = vmatpush.bf16.msrb.mxu3 %v16290_v60  ;;  %9556 = vmatmul.bf16.vlgmr.msra.gmra.mxu2 %v17185_v53  ;;  %v9402_v60 = vadd.f32 %v9401_v38, %v9389_v17 }
 0xb2a   :  { %v13045_v45 = vld [vmem:[%s23671_s3 + $0x1178] sm:$0xf0]  ;;  %9587 = vmatpush.bf16.msrb.mxu2 %v13368_v32 }
 0xb2b   :  { %v15886_v19 = vld [vmem:[%s23671_s3 + $0x139c] sm:$0xf]  ;;  %v13048_v9 = vor.u32 %v15814_v3, %v13045_v45  ;;  %v16283_v3 = vld [vmem:[%s23673_s5] sm:$0xff]  ;;  %v23270_v45 = vadd.f32 %v22964_v44, %v9402_v60 }
 0xb2c   :  { %v13333_v33 = vld [vmem:[%s23671_s3 + $0x13b8] sm:$0xf0] }
 0xb2d   :  { %v13336_v5 = vor.u32 %v15886_v19, %v13333_v33  ;;  %v15806_v39 = vld [vmem:[%s23671_s3 + $0x111c] sm:$0xf]  ;;  %10211 = vmatpush.bf16.msrb.mxu3 %v16289_v50  ;;  %9576 = vmatpush.bf16.msra.mxu1 %v13048_v9 }
 0xb2e   :  { %v13013_v15 = vld [vmem:[%s23671_s3 + $0x1138] sm:$0xf0] }
 0xb2f   :  { %v15878_v20 = vld [vmem:[%s23671_s3 + $0x135c] sm:$0xf]  ;;  %9588 = vmatpush.bf16.msrb.mxu2 %v13336_v5  ;;  %v13016_v51 = vor.u32 %v15806_v39, %v13013_v15 }
 0xb30   :  { %v13301_v43 = vld [vmem:[%s23671_s3 + $0x1378] sm:$0xf0] }
 0xb31   :  { %v13304_v11 = vor.u32 %v15878_v20, %v13301_v43  ;;  %v15798_v41 = vld [vmem:[%s23671_s3 + $0x10dc] sm:$0xf]  ;;  %10212 = vmatpush.bf16.msrb.mxu3 %v16288_v49  ;;  %9577 = vmatpush.bf16.msra.mxu1 %v13016_v51  ;;  %v9678_v20 = vmax.f32 %v18766_v35, 0.0  ;;  %v9494_v43 = vpop.f32.mrf.mxu3  ;;  %v9403_v51 = vpop.f32.mrf.mxu2 }
 0xb32   :  { %v12981_v48 = vld [vmem:[%s23671_s3 + $0x10f8] sm:$0xf0] }
 0xb33   :  { %v15870_v53 = vld [vmem:[%s23671_s3 + $0x131c] sm:$0xf]  ;;  %9589 = vmatpush.bf16.msrb.mxu2 %v13304_v11  ;;  %v12984_v22 = vor.u32 %v15798_v41, %v12981_v48  ;;  %v9686_v14 = vpack.c.bf16 %v9678_v20, %v9678_v20 }
 0xb34   :  { %v13269_v54 = vld [vmem:[%s23671_s3 + $0x1338] sm:$0xf0] }
 0xb35   :  { %v13272_v21 = vor.u32 %v15870_v53, %v13269_v54  ;;  %v15790_v30 = vld [vmem:[%s23671_s3 + $0x109c] sm:$0xf]  ;;  %10213 = vmatpush.bf16.msrb.mxu3 %v16287_v52  ;;  %9578 = vmatpush.bf16.msra.mxu1 %v12984_v22  ;;  %v16313_v52 = vld [vmem:[%s23673_s5 + $0xf0] sm:$0xff] }
 0xb36   :  { %v12949_v42 = vld [vmem:[%s23671_s3 + $0x10b8] sm:$0xf0] }
 0xb37   :  { %v15862_v24 = vld [vmem:[%s23671_s3 + $0x12dc] sm:$0xf]  ;;  %9590 = vmatpush.bf16.msrb.mxu2 %v13272_v21  ;;  %v12952_v55 = vor.u32 %v15790_v30, %v12949_v42 }
 0xb38   :  { %v13237_v12 = vld [vmem:[%s23671_s3 + $0x12f8] sm:$0xf0] }
 0xb39   :  { %v16286_v0 = vld [vmem:[%s23673_s5 + $0x18] sm:$0xff]  ;;  %v13240_v61 = vor.u32 %v15862_v24, %v13237_v12  ;;  %9579 = vmatpush.bf16.msra.mxu1 %v12952_v55  ;;  %v16312_v12 = vld [vmem:[%s23673_s5 + $0xe8] sm:$0xff] }
 0xb3a   :  { %v15782_v40 = vld [vmem:[%s23671_s3 + $0x105c] sm:$0xf]  ;;  %10214 = vmatpush.bf16.msrb.mxu3 %v16286_v0 }
 0xb3b   :  { %v12917_v13 = vld [vmem:[%s23671_s3 + $0x1078] sm:$0xf0]  ;;  %9591 = vmatpush.bf16.msrb.mxu2 %v13240_v61 }
 0xb3c   :  { %v15854_v10 = vld [vmem:[%s23671_s3 + $0x129c] sm:$0xf]  ;;  %v12920_v47 = vor.u32 %v15782_v40, %v12917_v13 }
 0xb3d   :  { %v13205_v1 = vld [vmem:[%s23671_s3 + $0x12b8] sm:$0xf0] }
 0xb3e   :  { %v13208_v27 = vor.u32 %v15854_v10, %v13205_v1  ;;  %v15774_v31 = vld [vmem:[%s23671_s3 + $0x101c] sm:$0xf]  ;;  %10215 = vmatpush.bf16.msrb.mxu3 %v16285_v56  ;;  %9580 = vmatpush.bf16.msra.mxu1 %v12920_v47  ;;  %v16311_v10 = vld [vmem:[%s23673_s5 + $0xe0] sm:$0xff]  ;;  %v9427_v1 = vpop.f32.mrf.mxu1 }
 0xb3f   :  { %v12885_v34 = vld [vmem:[%s23671_s3 + $0x1038] sm:$0xf0] }
 0xb40   :  { %v15846_v58 = vld [vmem:[%s23671_s3 + $0x125c] sm:$0xf]  ;;  %9592 = vmatpush.bf16.msrb.mxu2 %v13208_v27  ;;  %v12888_v23 = vor.u32 %v15774_v31, %v12885_v34 }
 0xb41   :  { %v13173_v6 = vld [vmem:[%s23671_s3 + $0x1278] sm:$0xf0] }
 0xb42   :  { %v16022_v29 = vld [vmem:[%s23671_s3 + $0x17dc] sm:$0xf]  ;;  %v13176_v32 = vor.u32 %v15846_v58, %v13173_v6  ;;  %10216 = vmatpush.bf16.msrb.mxu3 %v16284_v8  ;;  %9581 = vmatpush.bf16.msra.mxu1 %v12888_v23 }
 0xb43   :  { %v13877_v18 = vld [vmem:[%s23671_s3 + $0x17f8] sm:$0xf0] }
 0xb44   :  { %v13880_v19 = vor.u32 %v16022_v29, %v13877_v18  ;;  %v15838_v33 = vld [vmem:[%s23671_s3 + $0x121c] sm:$0xf]  ;;  %9593 = vmatpush.bf16.msrb.mxu2 %v13176_v32  ;;  %v16309_v18 = vld [vmem:[%s23673_s5 + $0xd0] sm:$0xff]  ;;  %v9428_v32 = vadd.f32 %v9427_v1, %v23270_v45 }
 0xb45   :  { %v13141_v50 = vld [vmem:[%s23671_s3 + $0x1238] sm:$0xf0]  ;;  %9582 = vmatmul.bf16.vlgmr.msra.gmra.mxu1 %v17423_v2 }
 0xb46   :  { %v16014_v9 = vld [vmem:[%s23671_s3 + $0x179c] sm:$0xf]  ;;  %v13144_v49 = vor.u32 %v15838_v33, %v13141_v50  ;;  %9613 = vmatpush.bf16.msrb.mxu1 %v13880_v19  ;;  %10217 = vmatpush.bf16.msrb.mxu3 %v16283_v3  ;;  %v9429_v23 = vpop.f32.mrf.mxu1  ;;  %v23372_v3 = vpop.f32.mrf.mxu3 }
 0xb47   :  { %v13845_v5 = vld [vmem:[%s23671_s3 + $0x17b8] sm:$0xf0] }
 0xb48   :  { %v16086_v44 = vld [vmem:[%s23671_s3 + $0x19dc] sm:$0xf]  ;;  %v13848_v11 = vor.u32 %v16014_v9, %v13845_v5  ;;  %9594 = vmatpush.bf16.msrb.mxu2 %v13144_v49  ;;  %v9440_v9 = vpop.f32.mrf.mxu2 }
 0xb49   :  { %v14133_v39 = vld [vmem:[%s23671_s3 + $0x19f8] sm:$0xf0]  ;;  %10218 = vmatmul.bf16.vlgmr.msrb.gmra.mxu3 %v9686_v14 }
 0xb4a   :  { %v16314_v15 = vld [vmem:[%s23673_s5 + $0xf8] sm:$0xff]  ;;  %v14136_v41 = vor.u32 %v16086_v44, %v14133_v39  ;;  %9614 = vmatpush.bf16.msrb.mxu1 %v13848_v11  ;;  %v9441_v39 = vadd.f32 %v9440_v9, %v9428_v32  ;;  %v16307_v11 = vld [vmem:[%s23673_s5 + $0xc0] sm:$0xff] }
 0xb4b   :  { %v16006_v48 = vld [vmem:[%s23671_s3 + $0x175c] sm:$0xf]  ;;  %10249 = vmatpush.bf16.msra.mxu3 %v16314_v15  ;;  %9595 = vmatmul.bf16.vlgmr.msrb.gmra.mxu2 %v17487_v62  ;;  %v16308_v15 = vld [vmem:[%s23673_s5 + $0xc8] sm:$0xff] }
 0xb4c   :  { %v13813_v53 = vld [vmem:[%s23671_s3 + $0x1778] sm:$0xf0]  ;;  %9626 = vmatpush.bf16.msra.mxu2 %v14136_v41  ;;  %v23399_v41 = vadd.f32 %v23114_v59, %v9441_v39  ;;  %v16359_v39 = vld [vmem:[%s23672_s4] sm:$0xff] }
 0xb4d   :  { %v16078_v35 = vld [vmem:[%s23671_s3 + $0x199c] sm:$0xf]  ;;  %v13816_v22 = vor.u32 %v16006_v48, %v13813_v53 }
 0xb4e   :  { %v14101_v54 = vld [vmem:[%s23671_s3 + $0x19b8] sm:$0xf0] }
 0xb4f   :  { %v14104_v21 = vor.u32 %v16078_v35, %v14101_v54  ;;  %v15998_v30 = vld [vmem:[%s23671_s3 + $0x171c] sm:$0xf]  ;;  %10250 = vmatpush.bf16.msra.mxu3 %v16313_v52  ;;  %9615 = vmatpush.bf16.msrb.mxu1 %v13816_v22 }
 0xb50   :  { %v13781_v2 = vld [vmem:[%s23671_s3 + $0x1738] sm:$0xf0] }
 0xb51   :  { %v16070_v42 = vld [vmem:[%s23671_s3 + $0x195c] sm:$0xf]  ;;  %9627 = vmatpush.bf16.msra.mxu2 %v14104_v21  ;;  %v13784_v0 = vor.u32 %v15998_v30, %v13781_v2  ;;  %v9681_v21 = vmax.f32 %v21113_v4, 0.0  ;;  %v9533_v30 = vpop.f32.mrf.mxu3 }
 0xb52   :  { %v14069_v24 = vld [vmem:[%s23671_s3 + $0x1978] sm:$0xf0] }
 0xb53   :  { %v14072_v55 = vor.u32 %v16070_v42, %v14069_v24  ;;  %v15990_v61 = vld [vmem:[%s23671_s3 + $0x16dc] sm:$0xf]  ;;  %10251 = vmatpush.bf16.msra.mxu3 %v16312_v12  ;;  %9616 = vmatpush.bf16.msrb.mxu1 %v13784_v0  ;;  %v9442_v42 = vpop.f32.mrf.mxu2 }
 0xb54   :  { %v13749_v40 = vld [vmem:[%s23671_s3 + $0x16f8] sm:$0xf0] }
 0xb55   :  { %v16062_v62 = vld [vmem:[%s23671_s3 + $0x191c] sm:$0xf]  ;;  %9628 = vmatpush.bf16.msra.mxu2 %v14072_v55  ;;  %v13752_v56 = vor.u32 %v15990_v61, %v13749_v40  ;;  %v16337_v40 = vld [vmem:[%s23673_s5 + $0x1b0] sm:$0xff] }
 0xb56   :  { %v14037_v13 = vld [vmem:[%s23671_s3 + $0x1938] sm:$0xf0] }
 0xb57   :  { %v14040_v7 = vor.u32 %v16062_v62, %v14037_v13  ;;  %v15982_v17 = vld [vmem:[%s23671_s3 + $0x169c] sm:$0xf]  ;;  %10252 = vmatpush.bf16.msra.mxu3 %v16311_v10  ;;  %9617 = vmatpush.bf16.msrb.mxu1 %v13752_v56  ;;  %v9689_v62 = vpack.c.bf16 %v9681_v21, %v9681_v21 }
 0xb58   :  { %v13717_v47 = vld [vmem:[%s23671_s3 + $0x16b8] sm:$0xf0] }
 0xb59   :  { %v16054_v27 = vld [vmem:[%s23671_s3 + $0x18dc] sm:$0xf]  ;;  %9629 = vmatpush.bf16.msra.mxu2 %v14040_v7  ;;  %v13720_v34 = vor.u32 %v15982_v17, %v13717_v47  ;;  %v16336_v17 = vld [vmem:[%s23673_s5 + $0x1a8] sm:$0xff] }
 0xb5a   :  { %v14005_v31 = vld [vmem:[%s23671_s3 + $0x18f8] sm:$0xf0] }
 0xb5b   :  { %v16310_v38 = vld [vmem:[%s23673_s5 + $0xd8] sm:$0xff]  ;;  %v14008_v58 = vor.u32 %v16054_v27, %v14005_v31  ;;  %9618 = vmatpush.bf16.msrb.mxu1 %v13720_v34 }
 0xb5c   :  { %v15974_v6 = vld [vmem:[%s23671_s3 + $0x165c] sm:$0xf]  ;;  %10253 = vmatpush.bf16.msra.mxu3 %v16310_v38 }
 0xb5d   :  { %v13685_v60 = vld [vmem:[%s23671_s3 + $0x1678] sm:$0xf0]  ;;  %9630 = vmatpush.bf16.msra.mxu2 %v14008_v58  ;;  %v16335_v58 = vld [vmem:[%s23673_s5 + $0x1a0] sm:$0xff] }
 0xb5e   :  { %v16046_v8 = vld [vmem:[%s23671_s3 + $0x189c] sm:$0xf]  ;;  %v13688_v19 = vor.u32 %v15974_v6, %v13685_v60  ;;  %v9466_v6 = vpop.f32.mrf.mxu1 }
 0xb5f   :  { %v13973_v29 = vld [vmem:[%s23671_s3 + $0x18b8] sm:$0xf0]  ;;  %v9467_v21 = vadd.f32 %v9466_v6, %v23399_v41  ;;  %v16331_v41 = vld [vmem:[%s23673_s5 + $0x180] sm:$0xff] }
 0xb60   :  { %v13976_v33 = vor.u32 %v16046_v8, %v13973_v29  ;;  %v15966_v50 = vld [vmem:[%s23671_s3 + $0x161c] sm:$0xf]  ;;  %10254 = vmatpush.bf16.msra.mxu3 %v16309_v18  ;;  %9619 = vmatpush.bf16.msrb.mxu1 %v13688_v19  ;;  %v16291_v6 = vld [vmem:[%s23673_s5 + $0x40] sm:$0xff] }
 0xb61   :  { %v13653_v5 = vld [vmem:[%s23671_s3 + $0x1638] sm:$0xf0] }
 0xb62   :  { %v16038_v44 = vld [vmem:[%s23671_s3 + $0x185c] sm:$0xf]  ;;  %9631 = vmatpush.bf16.msra.mxu2 %v13976_v33  ;;  %v13656_v49 = vor.u32 %v15966_v50, %v13653_v5 }
 0xb63   :  { %v13941_v45 = vld [vmem:[%s23671_s3 + $0x1878] sm:$0xf0] }
 0xb64   :  { %v16214_v20 = vld [vmem:[%s23671_s3 + $0x1ddc] sm:$0xf]  ;;  %v13944_v51 = vor.u32 %v16038_v44, %v13941_v45  ;;  %10255 = vmatpush.bf16.msra.mxu3 %v16308_v15  ;;  %9620 = vmatpush.bf16.msrb.mxu1 %v13656_v49  ;;  %v2885_v15 = vperm.slane %v16359_v39, 7  ;;  %v23503_v49 = vpop.f32.mrf.mxu3 }
 0xb65   :  { %v14645_v43 = vld [vmem:[%s23671_s3 + $0x1df8] sm:$0xf0] }
 0xb66   :  { %v14648_v48 = vor.u32 %v16214_v20, %v14645_v43  ;;  %v16030_v53 = vld [vmem:[%s23671_s3 + $0x181c] sm:$0xf]  ;;  %9632 = vmatpush.bf16.msra.mxu2 %v13944_v51  ;;  %v16333_v20 = vld [vmem:[%s23673_s5 + $0x190] sm:$0xff]  ;;  %v9468_v43 = vpop.f32.mrf.mxu1 }
 0xb67   :  { %v13909_v35 = vld [vmem:[%s23671_s3 + $0x1838] sm:$0xf0]  ;;  %9621 = vmatmul.bf16.vlgmr.msrb.gmra.mxu1 %v17538_v63  ;;  %v16327_v43 = vld [vmem:[%s23673_s5 + $0x160] sm:$0xff] }
 0xb68   :  { %v16206_v54 = vld [vmem:[%s23671_s3 + $0x1d9c] sm:$0xf]  ;;  %v13912_v2 = vor.u32 %v16030_v53, %v13909_v35  ;;  %9652 = vmatpush.bf16.msra.mxu1 %v14648_v48  ;;  %10256 = vmatpush.bf16.msra.mxu3 %v16307_v11  ;;  %v9479_v35 = vpop.f32.mrf.mxu2 }
 0xb69   :  { %v14613_v52 = vld [vmem:[%s23671_s3 + $0x1db8] sm:$0xf0] }
 0xb6a   :  { %v16278_v59 = vld [vmem:[%s23671_s3 + $0x1fdc] sm:$0xf]  ;;  %v14616_v24 = vor.u32 %v16206_v54, %v14613_v52  ;;  %9633 = vmatpush.bf16.msra.mxu2 %v13912_v2 }
 0xb6b   :  { %v14901_v14 = vld [vmem:[%s23671_s3 + $0x1ff8] sm:$0xf0]  ;;  %10257 = vmatmul.bf16.vlgmr.msra.gmra.mxu3 %v9689_v62 }
 0xb6c   :  { %v16338_v22 = vld [vmem:[%s23673_s5 + $0x1b8] sm:$0xff]  ;;  %v14904_v12 = vor.u32 %v16278_v59, %v14901_v14  ;;  %9653 = vmatpush.bf16.msra.mxu1 %v14616_v24  ;;  %v9480_v59 = vadd.f32 %v9479_v35, %v2885_v15  ;;  %v16332_v14 = vld [vmem:[%s23673_s5 + $0x188] sm:$0xff] }
 0xb6d   :  { %v16198_v0 = vld [vmem:[%s23671_s3 + $0x1d5c] sm:$0xf]  ;;  %10288 = vmatpush.bf16.msrb.mxu3 %v16338_v22  ;;  %9634 = vmatmul.bf16.vlgmr.msra.gmra.mxu2 %v18017_v28  ;;  %v16316_v35 = vld [vmem:[%s23673_s5 + $0x108] sm:$0xff] }
 0xb6e   :  { %v14581_v55 = vld [vmem:[%s23671_s3 + $0x1d78] sm:$0xf0]  ;;  %9665 = vmatpush.bf16.msrb.mxu2 %v14904_v12  ;;  %v9493_v2 = vadd.f32 %v23243_v37, %v9480_v59 }
 0xb6f   :  { %v16270_v4 = vld [vmem:[%s23671_s3 + $0x1f9c] sm:$0xf]  ;;  %v14584_v13 = vor.u32 %v16198_v0, %v14581_v55  ;;  %v9684_v0 = vmax.f32 %v9467_v21, 0.0  ;;  %v9572_v55 = vpop.f32.mrf.mxu3 }
 0xb70   :  { %v14869_v61 = vld [vmem:[%s23671_s3 + $0x1fb8] sm:$0xf0] }
 0xb71   :  { %v14872_v10 = vor.u32 %v16270_v4, %v14869_v61  ;;  %v16190_v1 = vld [vmem:[%s23671_s3 + $0x1d1c] sm:$0xf]  ;;  %10289 = vmatpush.bf16.msrb.mxu3 %v16337_v40  ;;  %9654 = vmatpush.bf16.msra.mxu1 %v14584_v13  ;;  %v9481_v4 = vpop.f32.mrf.mxu2  ;;  %v16297_v61 = vld [vmem:[%s23673_s5 + $0x70] sm:$0xff]  ;;  %v9692_v62 = vpack.c.bf16 %v9684_v0, %v9684_v0  ;;  %v16296_v13 = vld [vmem:[%s23673_s5 + $0x68] sm:$0xff] }
 0xb72   :  { %v14549_v63 = vld [vmem:[%s23671_s3 + $0x1d38] sm:$0xf0] }
 0xb73   :  { %v16262_v56 = vld [vmem:[%s23671_s3 + $0x1f5c] sm:$0xf]  ;;  %9666 = vmatpush.bf16.msrb.mxu2 %v14872_v10  ;;  %v14552_v47 = vor.u32 %v16190_v1, %v14549_v63  ;;  %v16305_v10 = vld [vmem:[%s23673_s5 + $0xb0] sm:$0xff]  ;;  %v16304_v1 = vld [vmem:[%s23673_s5 + $0xa8] sm:$0xff]  ;;  %v9505_v63 = vpop.f32.mrf.mxu1 }
 0xb74   :  { %v14837_v7 = vld [vmem:[%s23671_s3 + $0x1f78] sm:$0xf0] }
 0xb75   :  { %v14840_v27 = vor.u32 %v16262_v56, %v14837_v7  ;;  %v16182_v31 = vld [vmem:[%s23671_s3 + $0x1cdc] sm:$0xf]  ;;  %10290 = vmatpush.bf16.msrb.mxu3 %v16336_v17  ;;  %9655 = vmatpush.bf16.msra.mxu1 %v14552_v47  ;;  %v9506_v56 = vadd.f32 %v9505_v63, %v9493_v2  ;;  %v16293_v17 = vld [vmem:[%s23673_s5 + $0x50] sm:$0xff] }
 0xb76   :  { %v14517_v38 = vld [vmem:[%s23671_s3 + $0x1cf8] sm:$0xf0] }
 0xb77   :  { %v16254_v28 = vld [vmem:[%s23671_s3 + $0x1f1c] sm:$0xf]  ;;  %9667 = vmatpush.bf16.msrb.mxu2 %v14840_v27  ;;  %v14520_v60 = vor.u32 %v16182_v31, %v14517_v38  ;;  %v16292_v38 = vld [vmem:[%s23673_s5 + $0x48] sm:$0xff] }
 0xb78   :  { %v14805_v34 = vld [vmem:[%s23671_s3 + $0x1f38] sm:$0xf0] }
 0xb79   :  { %v14808_v8 = vor.u32 %v16254_v28, %v14805_v34  ;;  %v16174_v29 = vld [vmem:[%s23671_s3 + $0x1c9c] sm:$0xf]  ;;  %10291 = vmatpush.bf16.msrb.mxu3 %v16335_v58  ;;  %9656 = vmatpush.bf16.msra.mxu1 %v14520_v60  ;;  %v16301_v28 = vld [vmem:[%s23673_s5 + $0x90] sm:$0xff]  ;;  %v16300_v60 = vld [vmem:[%s23673_s5 + $0x88] sm:$0xff] }
 0xb7a   :  { %v14485_v18 = vld [vmem:[%s23671_s3 + $0x1cb8] sm:$0xf0] }
 0xb7b   :  { %v16246_v23 = vld [vmem:[%s23671_s3 + $0x1edc] sm:$0xf]  ;;  %9668 = vmatpush.bf16.msrb.mxu2 %v14808_v8  ;;  %v14488_v33 = vor.u32 %v16174_v29, %v14485_v18  ;;  %v9507_v27 = vpop.f32.mrf.mxu1  ;;  %v23566_v31 = vpop.f32.mrf.mxu3  ;;  %v9679_v29 = vmax.f32 %v19503_v26, 0.0  ;;  %v16321_v26 = vld [vmem:[%s23673_s5 + $0x130] sm:$0xff] }
 0xb7c   :  { %v14773_v32 = vld [vmem:[%s23671_s3 + $0x1ef8] sm:$0xf0] }
 0xb7d   :  { %v16334_v19 = vld [vmem:[%s23673_s5 + $0x198] sm:$0xff]  ;;  %v14776_v50 = vor.u32 %v16246_v23, %v14773_v32  ;;  %9657 = vmatpush.bf16.msra.mxu1 %v14488_v33  ;;  %v16299_v32 = vld [vmem:[%s23673_s5 + $0x80] sm:$0xff]  ;;  %v9680_v33 = vmax.f32 %v20271_v36, 0.0  ;;  %v16329_v36 = vld [vmem:[%s23673_s5 + $0x170] sm:$0xff] }
 0xb7e   :  { %v16166_v9 = vld [vmem:[%s23671_s3 + $0x1c5c] sm:$0xf]  ;;  %10292 = vmatpush.bf16.msrb.mxu3 %v16334_v19  ;;  %v9518_v34 = vpop.f32.mrf.mxu2  ;;  %v9687_v19 = vpack.c.bf16 %v9679_v29, %v9679_v29 }
 0xb7f   :  { %v14453_v5 = vld [vmem:[%s23671_s3 + $0x1c78] sm:$0xf0]  ;;  %9669 = vmatpush.bf16.msrb.mxu2 %v14776_v50  ;;  %v9519_v58 = vadd.f32 %v9518_v34, %v9506_v56 }
 0xb80   :  { %v16238_v44 = vld [vmem:[%s23671_s3 + $0x1e9c] sm:$0xf]  ;;  %v14456_v51 = vor.u32 %v16166_v9, %v14453_v5  ;;  %v9688_v9 = vpack.c.bf16 %v9680_v33, %v9680_v33  ;;  %v16320_v5 = vld [vmem:[%s23673_s5 + $0x128] sm:$0xff] }
 0xb81   :  { %v14741_v45 = vld [vmem:[%s23671_s3 + $0x1eb8] sm:$0xf0]  ;;  %v9532_v8 = vadd.f32 %v23372_v3, %v9519_v58 }
 0xb82   :  { %v14744_v11 = vor.u32 %v16238_v44, %v14741_v45  ;;  %v16158_v48 = vld [vmem:[%s23671_s3 + $0x1c1c] sm:$0xf]  ;;  %10293 = vmatpush.bf16.msrb.mxu3 %v16333_v20  ;;  %9658 = vmatpush.bf16.msra.mxu1 %v14456_v51  ;;  %v16319_v44 = vld [vmem:[%s23673_s5 + $0x120] sm:$0xff]  ;;  %v16328_v45 = vld [vmem:[%s23673_s5 + $0x168] sm:$0xff] }
 0xb83   :  { %v14421_v53 = vld [vmem:[%s23671_s3 + $0x1c38] sm:$0xf0]  ;;  %v9611_v23 = vpop.f32.mrf.mxu3  ;;  %v16317_v51 = vld [vmem:[%s23673_s5 + $0x110] sm:$0xff] }
 0xb84   :  { %v16230_v54 = vld [vmem:[%s23671_s3 + $0x1e5c] sm:$0xf]  ;;  %v14424_v22 = vor.u32 %v16158_v48, %v14421_v53  ;;  %9670 = vmatpush.bf16.msrb.mxu2 %v14744_v11 }
 0xb85   :  { %v14709_v52 = vld [vmem:[%s23671_s3 + $0x1e78] sm:$0xf0] }
 0xb86   :  { %v14712_v30 = vor.u32 %v16230_v54, %v14709_v52  ;;  %v16298_v42 = vld [vmem:[%s23673_s5 + $0x78] sm:$0xff]  ;;  %10294 = vmatpush.bf16.msrb.mxu3 %v16332_v14  ;;  %9659 = vmatpush.bf16.msra.mxu1 %v14424_v22  ;;  %v9520_v50 = vpop.f32.mrf.mxu2  ;;  %v16325_v54 = vld [vmem:[%s23673_s5 + $0x150] sm:$0xff]  ;;  %v16315_v14 = vld [vmem:[%s23673_s5 + $0x100] sm:$0xff] }
 0xb87   :  { %v16222_v24 = vld [vmem:[%s23671_s3 + $0x1e1c] sm:$0xf]  ;;  %v16324_v22 = vld [vmem:[%s23673_s5 + $0x148] sm:$0xff] }
 0xb88   :  { %v14677_v12 = vld [vmem:[%s23671_s3 + $0x1e38] sm:$0xf0]  ;;  %9671 = vmatpush.bf16.msrb.mxu2 %v14712_v30  ;;  %v9682_v30 = vmax.f32 %v21918_v16, 0.0 }
 0xb89   :  { %v14680_v37 = vor.u32 %v16222_v24, %v14677_v12  ;;  %v16306_v40 = vld [vmem:[%s23673_s5 + $0xb8] sm:$0xff]  ;;  %9660 = vmatmul.bf16.vlgmr.msra.gmra.mxu1 %v17812_v46  ;;  %v16295_v46 = vld [vmem:[%s23673_s5 + $0x60] sm:$0xff]  ;;  %v9683_v12 = vmax.f32 %v22686_v25, 0.0  ;;  %v16345_v25 = vld [vmem:[%s23673_s5 + $0x1f0] sm:$0xff] }
 0xb8a   :  { %10223 = vmatpush.bf16.msrb.mxu1 %v16298_v42  ;;  %10295 = vmatpush.bf16.msrb.mxu3 %v16331_v41  ;;  %v16294_v7 = vld [vmem:[%s23673_s5 + $0x58] sm:$0xff]  ;;  %v16323_v42 = vld [vmem:[%s23673_s5 + $0x140] sm:$0xff]  ;;  %v9690_v24 = vpack.c.bf16 %v9682_v30, %v9682_v30 }
 0xb8b   :  { %v16302_v47 = vld [vmem:[%s23673_s5 + $0x98] sm:$0xff]  ;;  %v9691_v0 = vpack.c.bf16 %v9683_v12, %v9683_v12 }
 0xb8c   :  { %9672 = vmatpush.bf16.msrb.mxu2 %v14680_v37  ;;  %v16322_v18 = vld [vmem:[%s23673_s5 + $0x138] sm:$0xff] }
 0xb8d   :  { %10296 = vmatmul.bf16.vlgmr.msrb.gmra.mxu3 %v9692_v62  ;;  %v16330_v3 = vld [vmem:[%s23673_s5 + $0x178] sm:$0xff] }
 0xb8e   :  { %10224 = vmatpush.bf16.msrb.mxu1 %v16297_v61  ;;  %v16318_v20 = vld [vmem:[%s23673_s5 + $0x118] sm:$0xff] }
 0xb8f   :  { %9673 = vmatmul.bf16.vlgmr.msrb.gmra.mxu2 %v18101_v57  ;;  %v16303_v57 = vld [vmem:[%s23673_s5 + $0xa0] sm:$0xff]  ;;  %v16326_v11 = vld [vmem:[%s23673_s5 + $0x158] sm:$0xff] }
 0xb90   :  { %10236 = vmatpush.bf16.msra.mxu2 %v16306_v40  ;;  %v16346_v16 = vld [vmem:[%s23673_s5 + $0x1f8] sm:$0xff] }
 0xb91   :  { %v16342_v63 = vld [vmem:[%s23673_s5 + $0x1d8] sm:$0xff] }
 0xb92   :  { %10225 = vmatpush.bf16.msrb.mxu1 %v16296_v13 }
 0xb94   :  { %10237 = vmatpush.bf16.msra.mxu2 %v16305_v10  ;;  %v16344_v10 = vld [vmem:[%s23673_s5 + $0x1e8] sm:$0xff] }
 0xb96   :  { %10226 = vmatpush.bf16.msrb.mxu1 %v16295_v46 }
 0xb98   :  { %10238 = vmatpush.bf16.msra.mxu2 %v16304_v1  ;;  %v16343_v1 = vld [vmem:[%s23673_s5 + $0x1e0] sm:$0xff] }
 0xb9a   :  { %10227 = vmatpush.bf16.msrb.mxu1 %v16294_v7  ;;  %v16341_v7 = vld [vmem:[%s23673_s5 + $0x1d0] sm:$0xff] }
 0xb9c   :  { %10239 = vmatpush.bf16.msra.mxu2 %v16303_v57  ;;  %v16340_v57 = vld [vmem:[%s23673_s5 + $0x1c8] sm:$0xff] }
 0xb9e   :  { %10228 = vmatpush.bf16.msrb.mxu1 %v16293_v17  ;;  %v9544_v39 = vpop.f32.mrf.mxu1 }
 0xb9f   :  { %v9545_v15 = vadd.f32 %v9544_v39, %v9532_v8 }
 0xba0   :  { %10240 = vmatpush.bf16.msra.mxu2 %v16302_v47 }
 0xba2   :  { %10229 = vmatpush.bf16.msrb.mxu1 %v16292_v38  ;;  %v16339_v38 = vld [vmem:[%s23673_s5 + $0x1c0] sm:$0xff] }
 0xba4   :  { %10241 = vmatpush.bf16.msra.mxu2 %v16301_v28 }
 0xba6   :  { %10230 = vmatpush.bf16.msrb.mxu1 %v16291_v6  ;;  %v9546_v48 = vpop.f32.mrf.mxu1 }
 0xba8   :  { %10242 = vmatpush.bf16.msra.mxu2 %v16300_v60 }
 0xba9   :  { %10231 = vmatmul.bf16.vlgmr.msrb.gmra.mxu1 %v9687_v19 }
 0xbaa   :  { %10262 = vmatpush.bf16.msra.mxu1 %v16322_v18  ;;  %v9648_v53 = vpop.f32.mrf.mxu3 }
 0xbac   :  { %10243 = vmatpush.bf16.msra.mxu2 %v16299_v32  ;;  %v9557_v52 = vpop.f32.mrf.mxu2 }
 0xbad   :  { %v9558_v59 = vadd.f32 %v9557_v52, %v9545_v15 }
 0xbae   :  { %10263 = vmatpush.bf16.msra.mxu1 %v16321_v26 }
 0xbaf   :  { %10244 = vmatmul.bf16.vlgmr.msra.gmra.mxu2 %v9688_v9  ;;  %v9571_v21 = vadd.f32 %v23503_v49, %v9558_v59 }
 0xbb0   :  { %10275 = vmatpush.bf16.msrb.mxu2 %v16330_v3  ;;  %v16350_v3 = vld [vmem:[%s23674_s6] ss:$0 sm:$0xff] }
 0xbb2   :  { %10264 = vmatpush.bf16.msra.mxu1 %v16320_v5  ;;  %v9650_v2 = vpop.f32.mrf.mxu3 }
 0xbb4   :  { %10276 = vmatpush.bf16.msrb.mxu2 %v16329_v36  ;;  %v9559_v41 = vpop.f32.mrf.mxu2 }
 0xbb6   :  { %10265 = vmatpush.bf16.msra.mxu1 %v16319_v44 }
 0xbb8   :  { %10277 = vmatpush.bf16.msrb.mxu2 %v16328_v45 }
 0xbba   :  { %10266 = vmatpush.bf16.msra.mxu1 %v16318_v20 }
 0xbbc   :  { %10278 = vmatpush.bf16.msrb.mxu2 %v16327_v43 }
 0xbbe   :  { %10267 = vmatpush.bf16.msra.mxu1 %v16317_v51 }
 0xbc0   :  { %10279 = vmatpush.bf16.msrb.mxu2 %v16326_v11 }
 0xbc2   :  { %10268 = vmatpush.bf16.msra.mxu1 %v16316_v35  ;;  %v9583_v55 = vpop.f32.mrf.mxu1 }
 0xbc3   :  { %v9584_v49 = vadd.f32 %v9583_v55, %v9571_v21 }
 0xbc4   :  { %10280 = vmatpush.bf16.msrb.mxu2 %v16325_v54 }
 0xbc6   :  { %10269 = vmatpush.bf16.msra.mxu1 %v16315_v14 }
 0xbc8   :  { %10281 = vmatpush.bf16.msrb.mxu2 %v16324_v22 }
 0xbc9   :  { %10270 = vmatmul.bf16.vlgmr.msra.gmra.mxu1 %v9690_v24 }
 0xbca   :  { %v9585_v37 = vpop.f32.mrf.mxu1  ;;  %10301 = vmatpush.bf16.msrb.mxu1 %v16346_v16 }
 0xbcc   :  { %10282 = vmatpush.bf16.msrb.mxu2 %v16323_v42  ;;  %v10219_v4 = vpop.f32.mrf.mxu3 }
 0xbcd   :  { %v10220_v9 = vadd.f32 %v16350_v3, %v10219_v4 }
 0xbce   :  { %v9596_v61 = vpop.f32.mrf.mxu2  ;;  %10302 = vmatpush.bf16.msrb.mxu1 %v16345_v25 }
 0xbcf   :  { %10283 = vmatmul.bf16.vlgmr.msrb.gmra.mxu2 %v9691_v0  ;;  %v9597_v40 = vadd.f32 %v9596_v61, %v9584_v49 }
 0xbd1   :  { %v9610_v62 = vadd.f32 %v23566_v31, %v9597_v40 }
 0xbd2   :  { %10303 = vmatpush.bf16.msrb.mxu1 %v16344_v10 }
 0xbd4   :  { %v10221_v13 = vpop.f32.mrf.mxu3 }
 0xbd6   :  { %v9598_v46 = vpop.f32.mrf.mxu2  ;;  %10304 = vmatpush.bf16.msrb.mxu1 %v16343_v1 }
 0xbda   :  { %10305 = vmatpush.bf16.msrb.mxu1 %v16342_v63 }
 0xbde   :  { %10306 = vmatpush.bf16.msrb.mxu1 %v16341_v7 }
 0xbe2   :  { %10307 = vmatpush.bf16.msrb.mxu1 %v16340_v57 }
 0xbe4   :  { %v9622_v56 = vpop.f32.mrf.mxu1 }
 0xbe5   :  { %v9623_v47 = vadd.f32 %v9622_v56, %v9610_v62 }
 0xbe6   :  { %10308 = vmatpush.bf16.msrb.mxu1 %v16339_v38 }
 0xbec   :  { %v9624_v17 = vpop.f32.mrf.mxu1 }
 0xbee   :  { %v10258_v27 = vpop.f32.mrf.mxu3 }
 0xbf0   :  { %v9635_v31 = vpop.f32.mrf.mxu2 }
 0xbf1   :  { %v9636_v28 = vadd.f32 %v9635_v31, %v9623_v47 }
 0xbf3   :  { %v9649_v34 = vadd.f32 %v9648_v53, %v9636_v28 }
 0xbf6   :  { %v10260_v58 = vpop.f32.mrf.mxu3 }
 0xbf8   :  { %v9637_v6 = vpop.f32.mrf.mxu2 }
 0xc06   :  { %v9661_v60 = vpop.f32.mrf.mxu1 }
 0xc07   :  { %v9662_v29 = vadd.f32 %v9661_v60, %v9649_v34 }
 0xc0e   :  { %v9663_v8 = vpop.f32.mrf.mxu1 }
 0xc10   :  { %v10297_v18 = vpop.f32.mrf.mxu3 }
 0xc12   :  { %v9674_v23 = vpop.f32.mrf.mxu2 }
 0xc13   :  { %v9675_v32 = vadd.f32 %v9674_v23, %v9662_v29 }
 0xc15   :  { %v9685_v19 = vmax.f32 %v9675_v32, 0.0 }
 0xc17   :  { %v9693_v33 = vpack.c.bf16 %v9685_v19, %v9685_v19 }
 0xc18   :  { %v10299_v50 = vpop.f32.mrf.mxu3 }
 0xc19   :  { %10309 = vmatmul.bf16.vlgmr.msrb.gmra.mxu1 %v9693_v33 }
 0xc1a   :  { %v9676_v26 = vpop.f32.mrf.mxu2 }
 0xc26   :  { %v10232_v5 = vpop.f32.mrf.mxu1 }
 0xc27   :  { %v10233_v36 = vadd.f32 %v10232_v5, %v10220_v9 }
 0xc2e   :  { %v10234_v44 = vpop.f32.mrf.mxu1 }
 0xc32   :  { %v10245_v45 = vpop.f32.mrf.mxu2 }
 0xc33   :  { %v10246_v39 = vadd.f32 %v10245_v45, %v10233_v36 }
 0xc35   :  { %v10259_v15 = vadd.f32 %v10258_v27, %v10246_v39 }
 0xc3a   :  { %v10247_v20 = vpop.f32.mrf.mxu2 }
 0xc46   :  { %v10271_v43 = vpop.f32.mrf.mxu1 }
 0xc47   :  { %v10272_v51 = vadd.f32 %v10271_v43, %v10259_v15 }
 0xc4e   :  { %v10273_v11 = vpop.f32.mrf.mxu1 }
 0xc52   :  { %v10284_v48 = vpop.f32.mrf.mxu2 }
 0xc53   :  { %v10285_v53 = vadd.f32 %v10284_v48, %v10272_v51 }
 0xc55   :  { %v10298_v35 = vadd.f32 %v10297_v18, %v10285_v53 }
 0xc5a   :  { %v10286_v54 = vpop.f32.mrf.mxu2 }
 0xc96   :  { %v10310_v52 = vpop.f32.mrf.mxu1 }
 0xc97   :  { %v10311_v59 = vadd.f32 %v10310_v52, %v10298_v35 }
 0xc99   :  { %10314 = vst [vmem:[%s23675_s7] sm:$0xff] %v10311_v59 }
 0xc9e   :  { %v10312_v14 = vpop.f32.mrf.mxu1 }

</bundles_post_ra>
